<compile_context>
chip_gen: v7x
topology: tpu7x:2x2x1
jax: 0.10.0
libtpu: 0.0.40
codegen_flags: <defaults>
</compile_context>

<pallas_src>
import functools

import jax
import jax.numpy as jnp
from jax.experimental import pallas as pl
from jax.experimental.pallas import tpu as pltpu

EPS = 1e-5
LANE = 128


def _round_up(x, m):
    return ((x + m - 1) // m) * m


def _vmem_capacity_bytes():
    """Best-effort physical-VMEM query; conservative (v7x, 64 MiB) fallback."""
    try:
        info = pltpu.get_tpu_info()
        for attr in ("vmem_capacity_bytes", "vmem_size_bytes", "vmem_bytes"):
            v = getattr(info, attr, None)
            if v:
                return int(v)
    except Exception:
        pass
    return 64 * 1024 * 1024


def _vmem_bytes_estimate(tile, halo_pad, cin, kd, cpad, in_bpe):
    """Rough per-kernel VMEM footprint: double-buffered streams + scratch + values."""
    return (2 * tile * cin * in_bpe              # body input blocks
            + 2 * halo_pad * cin * in_bpe        # halo input blocks
            + 2 * kd * cpad * in_bpe             # resident conv weight
            + 2 * tile * cpad * 4                # pass-2 output blocks (f32)
            + (tile + halo_pad) * cin * in_bpe   # stitched window scratch
            + tile * (kd + cpad) * 4)            # im2col value + f32 accumulator


def _conv_tile(xwin_ref, w_ref, tap_offsets, cin, tile, fuse_taps):
    """3x3 conv of one flattened tile against the (K*K*Cin, CPAD) weight."""
    if fuse_taps:
        # In-VMEM im2col: lane-concatenate the 9 shifted window views so a single
        # matmul runs with contraction depth K*K*Cin instead of 9 shallow matmuls
        # followed by 8 full-tile VPU accumulate adds.
        col = jnp.concatenate(
            [xwin_ref[off:off + tile, :] for off in tap_offsets], axis=1)
        return jnp.dot(col, w_ref[...], preferred_element_type=jnp.float32)
    # Per-tap fallback: accumulator initialised from the first dot (no zeros + add).
    acc = None
    for tap, off in enumerate(tap_offsets):
        part = jnp.dot(xwin_ref[off:off + tile, :],
                       w_ref[tap * cin:(tap + 1) * cin, :],
                       preferred_element_type=jnp.float32)
        acc = part if acc is None else acc + part
    return acc


def _make_stats_kernel(tap_offsets, cin, tile, wp, w_valid, m_ext, fuse_taps):
    """Pass 1: conv tile + masked per-channel sum / sum-of-squares (shape (1, CPAD))."""

    def kernel(body_ref, halo_ref, w_ref, sum_ref, sq_ref, xwin_ref):
        # Stitch the contiguous (tile + halo_pad, Cin) window from the two streams.
        xwin_ref[:tile, :] = body_ref[...]
        xwin_ref[tile:, :] = halo_ref[...]
        acc = _conv_tile(xwin_ref, w_ref, tap_offsets, cin, tile, fuse_taps)
        # In-kernel validity mask: a flattened row is a real output iff it lies inside
        # the image and is not one of the extended/alignment columns.
        g = (pl.program_id(1) * tile
             + jax.lax.broadcasted_iota(jnp.int32, (tile, 1), 0))
        valid = jnp.logical_and(g % wp < w_valid, g < m_ext)
        masked = jnp.where(valid, acc, 0.0)
        sum_ref[...] = jnp.sum(masked, axis=0, keepdims=True)        # (1, CPAD)
        sq_ref[...] = jnp.sum(masked * acc, axis=0, keepdims=True)   # sum x^2 (valid)

    return kernel


def _make_norm_kernel(tap_offsets, cin, tile, fuse_taps):
    """Pass 2: conv with BN-scale-folded weights + shift + ReLU, lane-dense store."""

    def kernel(body_ref, halo_ref, w_ref, shift_ref, o_ref, xwin_ref):
        xwin_ref[:tile, :] = body_ref[...]
        xwin_ref[tile:, :] = halo_ref[...]
        acc = _conv_tile(xwin_ref, w_ref, tap_offsets, cin, tile, fuse_taps)
        # TODO(synk): optionally store bf16 here to halve output HBM traffic when the
        # downstream consumer tolerates it.
        o_ref[...] = jnp.maximum(acc + shift_ref[...], 0.0).astype(o_ref.dtype)

    return kernel


@functools.partial(jax.jit, static_argnames=("stride", "padding", "tile_m",
                                              "compute_dtype", "fuse_taps"))
def cbr2d(x, weight, bias, gamma, beta, *, stride=1, padding=1, tile_m=None,
          compute_dtype=jnp.float32, fuse_taps=True):
    # x: (N, Cin, H, W); weight: (Cout, Cin, K, K); bias/gamma/beta: (Cout,)
    n, cin, h, w = x.shape
    cout, cin_w, k, k2 = weight.shape
    assert cin_w == cin and k == k2
    # TODO(synk): general stride / padding needs a different flattening; the module's
    # defaults (k=3, stride=1, padding=1 -> 'same' conv) are what is supported here.
    assert stride == 1 and k % 2 == 1 and padding == k // 2, \
        "only stride=1 'same' conv (padding = kernel_size // 2) supported"
    # Conv bias is unused on purpose: training-mode BatchNorm subtracts the per-channel
    # batch mean, which exactly cancels a constant per-channel bias.  (If this kernel
    # is ever reused with eval-mode BN running stats, the bias must be re-added.)
    del bias

    in_bpe = jnp.dtype(compute_dtype).itemsize

    wp = _round_up(w + 2 * padding, 8)    # extended width; sublane-aligned ky offsets
    cpad = _round_up(cout, LANE)          # lane-dense output channels
    m_ext = h * wp                        # extended output rows per image
    kd = k * k * cin
    halo = (k - 1) * (wp + 1)             # max flat shift of any conv tap
    halo_pad = _round_up(halo, 8)         # halo-stream block size (= tile granule)

    # ---- per-generation tile / VMEM budgeting ----
    cap = _vmem_capacity_bytes()
    if tile_m is None:                    # bigger default tiles on 128 MiB v5e/v6e
        tile_m = 2048 if cap >= 96 * 1024 * 1024 else 1024
    tile = _round_up(max(min(tile_m, m_ext), 1), halo_pad)
    # v7x megacore: keep at least 2 parallel grid units when there is enough work.
    if n * pl.cdiv(m_ext, tile) < 2 and m_ext > halo_pad:
        tile = _round_up(pl.cdiv(m_ext, 2), halo_pad)
    budget = int(cap * 0.6)
    while tile > halo_pad and _vmem_bytes_estimate(
            tile, halo_pad, cin, kd, cpad, in_bpe) > budget:
        tile -= halo_pad
    n_sub = tile // halo_pad
    t_m = pl.cdiv(m_ext, tile)
    flat_len = t_m * tile + halo_pad
    est = _vmem_bytes_estimate(tile, halo_pad, cin, kd, cpad, in_bpe)
    vmem_limit = int(min(max(est * 3 // 2, 32 * 1024 * 1024),
                         max(cap - 4 * 1024 * 1024, 32 * 1024 * 1024),
                         128 * 1024 * 1024))

    # ---- wrapper-side layout prep (one cheap pass over the small input) ----
    # TODO(synk): accept/produce NHWC (or the flattened (M, C) layout) directly when
    # chaining CBR blocks to drop these NCHW<->NHWC transposes and the final slice.
    x_nhwc = jnp.transpose(x, (0, 2, 3, 1))
    xpad = jnp.pad(x_nhwc, ((0, 0), (padding, padding),
                            (padding, wp - w - padding), (0, 0)))
    x_flat = xpad.reshape(n, (h + 2 * padding) * wp, cin)
    x_flat = jnp.pad(x_flat, ((0, 0), (0, flat_len - x_flat.shape[1]), (0, 0)))
    x_flat = x_flat.astype(compute_dtype)

    # Conv weight -> (K*K*Cin, CPAD), rows ordered (ky, kx, ci) to match the im2col
    # column order; kept in f32 so the BN scale fold happens at full precision.
    w_mat = jnp.transpose(weight, (2, 3, 1, 0)).reshape(kd, cout).astype(jnp.float32)
    w_mat = jnp.pad(w_mat, ((0, 0), (0, cpad - cout)))
    g_pad = jnp.pad(gamma.astype(jnp.float32), (0, cpad - cout))
    b_pad = jnp.pad(beta.astype(jnp.float32), (0, cpad - cout))

    tap_offsets = tuple(ky * wp + kx for ky in range(k) for kx in range(k))

    compiler_params = pltpu.CompilerParams(
        dimension_semantics=("parallel", "parallel"),   # megacore-shardable grid
        vmem_limit_bytes=vmem_limit)

    # Body block of the flattened slab + the head of the next block (the halo).
    body_spec = pl.BlockSpec((None, tile, cin), lambda i, t: (i, t, 0))
    halo_spec = pl.BlockSpec((None, halo_pad, cin),
                             lambda i, t: (i, (t + 1) * n_sub, 0))
    # TODO(synk): single-buffer this constant-index weight stream
    # (pipeline_mode=pl.Buffered(1)) to halve its VMEM footprint on v7x's 64 MiB.
    w_spec = pl.BlockSpec((kd, cpad), lambda i, t: (0, 0))
    stat_spec = pl.BlockSpec((None, None, 1, cpad), lambda i, t: (i, t, 0, 0))
    window_scratch = pltpu.VMEM((tile + halo_pad, cin), compute_dtype)

    # ---- pass 1: conv + masked per-channel sum / sum-of-squares ----
    psum, psq = pl.pallas_call(
        _make_stats_kernel(tap_offsets, cin, tile, wp, w, m_ext, fuse_taps),
        out_shape=(jax.ShapeDtypeStruct((n, t_m, 1, cpad), jnp.float32),
                   jax.ShapeDtypeStruct((n, t_m, 1, cpad), jnp.float32)),
        grid=(n, t_m),
        in_specs=[body_spec, halo_spec, w_spec],
        out_specs=(stat_spec, stat_spec),
        scratch_shapes=[window_scratch],
        compiler_params=compiler_params,
    )(x_flat, x_flat, w_mat.astype(compute_dtype))

    # ---- finalize BN stats -> per-channel scale / shift (tiny XLA ops) ----
    count = jnp.float32(n * h * w)
    total = jnp.sum(psum, axis=(0, 1, 2))
    total_sq = jnp.sum(psq, axis=(0, 1, 2))
    mean = total / count
    # TODO(synk): switch to per-tile-centered (Welford) accumulation for extreme
    # activation magnitudes; f32 sum/sumsq matches the reference at these scales.
    var = jnp.maximum(total_sq / count - mean * mean, 0.0)
    # Padded channels have var == 0, so inv_std = 1/sqrt(eps) (~316); their gamma is
    # zero-padded so scale == 0 keeps them finite and they are sliced off below.
    inv_std = jax.lax.rsqrt(var + EPS)
    scale = g_pad * inv_std
    shift = (b_pad - mean * scale).reshape(1, cpad)
    w_scaled = (w_mat * scale[None, :]).astype(compute_dtype)   # fold scale into W

    # ---- pass 2: recompute conv with scaled weights, add shift, ReLU ----
    # TODO(synk): for large Cin (>=128-256) store the pass-1 conv output (bf16) and
    # make this pass a pure VPU scale+shift+ReLU instead of recomputing the conv.
    shift_spec = pl.BlockSpec((1, cpad), lambda i, t: (0, 0))
    out_spec = pl.BlockSpec((None, None, tile, cpad), lambda i, t: (i, t, 0, 0))
    y_ext = pl.pallas_call(
        _make_norm_kernel(tap_offsets, cin, tile, fuse_taps),
        out_shape=jax.ShapeDtypeStruct((n, t_m, tile, cpad), jnp.float32),
        grid=(n, t_m),
        in_specs=[body_spec, halo_spec, w_spec, shift_spec],
        out_specs=out_spec,
        scratch_shapes=[window_scratch],
        compiler_params=compiler_params,
    )(x_flat, x_flat, w_scaled, shift)

    # ---- drop extended/alignment columns & padded channels, back to NCHW ----
    y = y_ext.reshape(n, t_m * tile, cpad)[:, :m_ext, :]
    y = y.reshape(n, h, wp, cpad)[:, :, :w, :cout]
    return jnp.transpose(y, (0, 3, 1, 2))


def cbr2d_reference(x, weight, bias, gamma, beta, padding=1, eps=EPS):
    """Pure-JAX reference: Conv2d(+bias) -> BatchNorm2d(train) -> ReLU."""
    y = jax.lax.conv_general_dilated(
        x, weight, window_strides=(1, 1),
        padding=((padding, padding), (padding, padding)),
        dimension_numbers=("NCHW", "OIHW", "NCHW"))
    y = y + bias[None, :, None, None]
    mean = jnp.mean(y, axis=(0, 2, 3), keepdims=True)
    var = jnp.mean((y - mean) ** 2, axis=(0, 2, 3), keepdims=True)
    y = (y - mean) * jax.lax.rsqrt(var + eps)
    y = y * gamma[None, :, None, None] + beta[None, :, None, None]
    return jnp.maximum(y, 0.0)


if __name__ == "__main__":
    key = jax.random.PRNGKey(0)
    kx, kw, kb, kg, kbe = jax.random.split(key, 5)

    N, Cin, H, W = 2, 4, 16, 16
    Cout, K = 8, 3

    x = jax.random.normal(kx, (N, Cin, H, W), dtype=jnp.float32)
    weight = jax.random.normal(kw, (Cout, Cin, K, K), dtype=jnp.float32) * 0.1
    bias = jax.random.normal(kb, (Cout,), dtype=jnp.float32) * 0.1
    gamma = 1.0 + 0.1 * jax.random.normal(kg, (Cout,), dtype=jnp.float32)
    beta = 0.1 * jax.random.normal(kbe, (Cout,), dtype=jnp.float32)

    def run(fuse_taps):
        # tile_m=128 -> several M-tiles per image, exercising the halo'd pipeline.
        out = cbr2d(x, weight, bias, gamma, beta, stride=1, padding=1,
                    tile_m=128, fuse_taps=fuse_taps)
        return jax.block_until_ready(out)

    try:
        y = run(True)     # fused im2col contraction (9x deeper MXU dot) -- preferred
    except Exception:
        y = run(False)    # per-tap fallback if this Mosaic build rejects lane concat

    assert y.shape == (N, Cout, H, W)
    y_ref = cbr2d_reference(x, weight, bias, gamma, beta, padding=1)
    err = float(jnp.max(jnp.abs(y - y_ref)))
    assert err < 1e-3, f"max abs error vs reference: {err}"
    print("KERNEL_OK")
</pallas_src>

<mosaic_0001>
module attributes {stable_mosaic.version = 11 : i64} {
  func.func @kernel(%arg0: i32, %arg1: i32, %arg2: memref<1x168x4xf32, #tpu.memory_space<vmem>>, %arg3: memref<1x56x4xf32, #tpu.memory_space<vmem>>, %arg4: memref<36x128xf32, #tpu.memory_space<vmem>>, %arg5: memref<1x1x1x128xf32, #tpu.memory_space<vmem>>, %arg6: memref<1x1x1x128xf32, #tpu.memory_space<vmem>>, %arg7: memref<224x4xf32, #tpu.memory_space<vmem>>) attributes {dimension_semantics = [#tpu.dimension_semantics<parallel>, #tpu.dimension_semantics<parallel>], iteration_bounds = array<i64: 2, 3>, scalar_prefetch = 0 : i64, scratch_operands = 1 : i64, tpu.core_type = #tpu.core_type<tc>, window_params = [{transform_indices = @transform_0, window_bounds = array<i64: 1, 168, 4>}, {transform_indices = @transform_1, window_bounds = array<i64: 1, 56, 4>}, {pipeline_mode = #tpu.pipeline_mode<synchronous>, transform_indices = @transform_2, window_bounds = array<i64: 36, 128>}, {transform_indices = @transform_3, window_bounds = array<i64: 1, 1, 1, 128>}, {transform_indices = @transform_4, window_bounds = array<i64: 1, 1, 1, 128>}]} {
    %c0 = arith.constant 0 : index
    %c0_0 = arith.constant 0 : index
    %c0_1 = arith.constant 0 : index
    %0 = vector.load %arg2[%c0, %c0_0, %c0_1] : memref<1x168x4xf32, #tpu.memory_space<vmem>>, vector<1x168x4xf32>
    %1 = vector.shape_cast %0 : vector<1x168x4xf32> to vector<168x4xf32>
    %c0_2 = arith.constant 0 : index
    %c0_3 = arith.constant 0 : index
    %2 = vector.load %arg7[%c0_2, %c0_3] : memref<224x4xf32, #tpu.memory_space<vmem>>, vector<168x4xf32>
    tpu.vector_store %arg7[%c0_2, %c0_3], %1 {strides = array<i32>} : memref<224x4xf32, #tpu.memory_space<vmem>>, vector<168x4xf32>,
    %c0_4 = arith.constant 0 : index
    %c0_5 = arith.constant 0 : index
    %c0_6 = arith.constant 0 : index
    %3 = vector.load %arg3[%c0_4, %c0_5, %c0_6] : memref<1x56x4xf32, #tpu.memory_space<vmem>>, vector<1x56x4xf32>
    %4 = vector.shape_cast %3 : vector<1x56x4xf32> to vector<56x4xf32>
    %c168 = arith.constant 168 : index
    %c0_7 = arith.constant 0 : index
    %5 = vector.load %arg7[%c168, %c0_7] : memref<224x4xf32, #tpu.memory_space<vmem>>, vector<56x4xf32>
    tpu.vector_store %arg7[%c168, %c0_7], %4 {strides = array<i32>} : memref<224x4xf32, #tpu.memory_space<vmem>>, vector<56x4xf32>,
    %c0_8 = arith.constant 0 : index
    %c0_9 = arith.constant 0 : index
    %6 = vector.load %arg7[%c0_8, %c0_9] : memref<224x4xf32, #tpu.memory_space<vmem>>, vector<168x4xf32>
    %c1 = arith.constant 1 : index
    %c0_10 = arith.constant 0 : index
    %7 = vector.load %arg7[%c1, %c0_10] : memref<224x4xf32, #tpu.memory_space<vmem>>, vector<168x4xf32>
    %c2 = arith.constant 2 : index
    %c0_11 = arith.constant 0 : index
    %8 = vector.load %arg7[%c2, %c0_11] : memref<224x4xf32, #tpu.memory_space<vmem>>, vector<168x4xf32>
    %c24 = arith.constant 24 : index
    %c0_12 = arith.constant 0 : index
    %9 = vector.load %arg7[%c24, %c0_12] : memref<224x4xf32, #tpu.memory_space<vmem>>, vector<168x4xf32>
    %c25 = arith.constant 25 : index
    %c0_13 = arith.constant 0 : index
    %10 = vector.load %arg7[%c25, %c0_13] : memref<224x4xf32, #tpu.memory_space<vmem>>, vector<168x4xf32>
    %c26 = arith.constant 26 : index
    %c0_14 = arith.constant 0 : index
    %11 = vector.load %arg7[%c26, %c0_14] : memref<224x4xf32, #tpu.memory_space<vmem>>, vector<168x4xf32>
    %c48 = arith.constant 48 : index
    %c0_15 = arith.constant 0 : index
    %12 = vector.load %arg7[%c48, %c0_15] : memref<224x4xf32, #tpu.memory_space<vmem>>, vector<168x4xf32>
    %c49 = arith.constant 49 : index
    %c0_16 = arith.constant 0 : index
    %13 = vector.load %arg7[%c49, %c0_16] : memref<224x4xf32, #tpu.memory_space<vmem>>, vector<168x4xf32>
    %c50 = arith.constant 50 : index
    %c0_17 = arith.constant 0 : index
    %14 = vector.load %arg7[%c50, %c0_17] : memref<224x4xf32, #tpu.memory_space<vmem>>, vector<168x4xf32>
    %15 = tpu.concatenate %6, %7, %8, %9, %10, %11, %12, %13, %14 in 1 : vector<168x4xf32>, vector<168x4xf32>, vector<168x4xf32>, vector<168x4xf32>, vector<168x4xf32>, vector<168x4xf32>, vector<168x4xf32>, vector<168x4xf32>, vector<168x4xf32> -> vector<168x36xf32>
    %c0_18 = arith.constant 0 : index
    %c0_19 = arith.constant 0 : index
    %16 = vector.load %arg4[%c0_18, %c0_19] : memref<36x128xf32, #tpu.memory_space<vmem>>, vector<36x128xf32>
    %cst = arith.constant dense<0.000000e+00> : vector<168x128xf32>
    %17 = tpu.matmul %15, %16, %cst {dimension_numbers = #tpu.dot_dimension_numbers<[1], [0], [0], [1], [0, 0, 1, 1], [], []>} : vector<168x36xf32>, vector<36x128xf32>, vector<168x128xf32> -> vector<168x128xf32>
    %c168_i32 = arith.constant 168 : i32
    %18 = arith.muli %arg1, %c168_i32 : i32
    %19 = tpu.iota {dimensions = array<i32: 0>} : vector<168x1xi32>
    %20 = vector.broadcast %18 : i32 to vector<168x1xi32>
    %21 = arith.addi %20, %19 : vector<168x1xi32>
    %c24_i32 = arith.constant 24 : i32
    %c0_i32 = arith.constant 0 : i32
    %22 = arith.cmpi eq, %c24_i32, %c0_i32 : i32
    %c1_i32 = arith.constant 1 : i32
    %23 = arith.select %22, %c1_i32, %c24_i32 : i32
    %24 = vector.broadcast %23 : i32 to vector<168x1xi32>
    %25 = arith.remsi %21, %24 : vector<168x1xi32>
    %c0_i32_20 = arith.constant 0 : i32
    %26 = vector.broadcast %c0_i32_20 : i32 to vector<168x1xi32>
    %27 = arith.cmpi ne, %25, %26 : vector<168x1xi32>
    %c0_i32_21 = arith.constant 0 : i32
    %28 = vector.broadcast %c0_i32_21 : i32 to vector<168x1xi32>
    %29 = arith.cmpi slt, %25, %28 : vector<168x1xi32>
    %c0_i32_22 = arith.constant 0 : i32
    %30 = arith.cmpi slt, %23, %c0_i32_22 : i32
    %31 = vector.broadcast %30 : i1 to vector<168x1xi1>
    %32 = vector.broadcast %31 : vector<168x1xi1> to vector<168x1xi1>
    %33 = arith.xori %29, %32 : vector<168x1xi1>
    %34 = arith.andi %33, %27 : vector<168x1xi1>
    %35 = vector.broadcast %23 : i32 to vector<168x1xi32>
    %36 = arith.addi %25, %35 : vector<168x1xi32>
    %37 = arith.select %34, %36, %25 : vector<168x1xi1>, vector<168x1xi32>
    %c16_i32 = arith.constant 16 : i32
    %38 = vector.broadcast %c16_i32 : i32 to vector<168x1xi32>
    %39 = arith.cmpi slt, %37, %38 : vector<168x1xi32>
    %c384_i32 = arith.constant 384 : i32
    %40 = vector.broadcast %c384_i32 : i32 to vector<168x1xi32>
    %41 = arith.cmpi slt, %21, %40 : vector<168x1xi32>
    %42 = arith.andi %39, %41 : vector<168x1xi1>
    %cst_23 = arith.constant 0.000000e+00 : f32
    %43 = vector.shape_cast %42 : vector<168x1xi1> to vector<168x1xi1>
    %44 = vector.broadcast %43 : vector<168x1xi1> to vector<168x128xi1>
    %45 = vector.broadcast %cst_23 : f32 to vector<168x128xf32>
    %46 = arith.select %44, %17, %45 : vector<168x128xi1>, vector<168x128xf32>
    %cst_24 = arith.constant dense<0.000000e+00> : vector<128xf32>
    %47 = vector.multi_reduction <add>, %46, %cst_24 [0] : vector<168x128xf32> to vector<128xf32>
    %48 = vector.shape_cast %47 : vector<128xf32> to vector<1x128xf32>
    %c0_25 = arith.constant 0 : index
    %c0_26 = arith.constant 0 : index
    %c0_27 = arith.constant 0 : index
    %c0_28 = arith.constant 0 : index
    %49 = vector.load %arg5[%c0_25, %c0_26, %c0_27, %c0_28] : memref<1x1x1x128xf32, #tpu.memory_space<vmem>>, vector<1x1x1x128xf32>
    %50 = vector.shape_cast %49 : vector<1x1x1x128xf32> to vector<1x128xf32>
    %51 = vector.shape_cast %48 : vector<1x128xf32> to vector<1x1x1x128xf32>
    tpu.vector_store %arg5[%c0_25, %c0_26, %c0_27, %c0_28], %51 {strides = array<i32>} : memref<1x1x1x128xf32, #tpu.memory_space<vmem>>, vector<1x1x1x128xf32>,
    %52 = arith.mulf %46, %17 : vector<168x128xf32>
    %cst_29 = arith.constant dense<0.000000e+00> : vector<128xf32>
    %53 = vector.multi_reduction <add>, %52, %cst_29 [0] : vector<168x128xf32> to vector<128xf32>
    %54 = vector.shape_cast %53 : vector<128xf32> to vector<1x128xf32>
    %c0_30 = arith.constant 0 : index
    %c0_31 = arith.constant 0 : index
    %c0_32 = arith.constant 0 : index
    %c0_33 = arith.constant 0 : index
    %55 = vector.load %arg6[%c0_30, %c0_31, %c0_32, %c0_33] : memref<1x1x1x128xf32, #tpu.memory_space<vmem>>, vector<1x1x1x128xf32>
    %56 = vector.shape_cast %55 : vector<1x1x1x128xf32> to vector<1x128xf32>
    %57 = vector.shape_cast %54 : vector<1x128xf32> to vector<1x1x1x128xf32>
    tpu.vector_store %arg6[%c0_30, %c0_31, %c0_32, %c0_33], %57 {strides = array<i32>} : memref<1x1x1x128xf32, #tpu.memory_space<vmem>>, vector<1x1x1x128xf32>,
    return
  }
  func.func @transform_0(%arg0: i32, %arg1: i32) -> (i32, i32, i32) {
    %c0_i32 = arith.constant 0 : i32
    %c0_i32_0 = arith.constant 0 : i32
    return %arg0, %arg1, %c0_i32 : i32, i32, i32
  }
  func.func @transform_1(%arg0: i32, %arg1: i32) -> (i32, i32, i32) {
    %c1_i32 = arith.constant 1 : i32
    %0 = arith.addi %arg1, %c1_i32 : i32
    %c3_i32 = arith.constant 3 : i32
    %1 = arith.muli %0, %c3_i32 : i32
    %c0_i32 = arith.constant 0 : i32
    %c0_i32_0 = arith.constant 0 : i32
    return %arg0, %1, %c0_i32 : i32, i32, i32
  }
  func.func @transform_2(%arg0: i32, %arg1: i32) -> (i32, i32) {
    %c0_i32 = arith.constant 0 : i32
    %c0_i32_0 = arith.constant 0 : i32
    %c0_i32_1 = arith.constant 0 : i32
    return %c0_i32, %c0_i32_0 : i32, i32
  }
  func.func @transform_3(%arg0: i32, %arg1: i32) -> (i32, i32, i32, i32) {
    %c0_i32 = arith.constant 0 : i32
    %c0_i32_0 = arith.constant 0 : i32
    %c0_i32_1 = arith.constant 0 : i32
    return %arg0, %arg1, %c0_i32, %c0_i32_0 : i32, i32, i32, i32
  }
  func.func @transform_4(%arg0: i32, %arg1: i32) -> (i32, i32, i32, i32) {
    %c0_i32 = arith.constant 0 : i32
    %c0_i32_0 = arith.constant 0 : i32
    %c0_i32_1 = arith.constant 0 : i32
    return %arg0, %arg1, %c0_i32, %c0_i32_0 : i32, i32, i32, i32
  }
}

module attributes {stable_mosaic.version = 11 : i64} {
  func.func @kernel(%arg0: i32, %arg1: i32, %arg2: memref<1x168x4xf32, #tpu.memory_space<vmem>>, %arg3: memref<1x56x4xf32, #tpu.memory_space<vmem>>, %arg4: memref<36x128xf32, #tpu.memory_space<vmem>>, %arg5: memref<1x128xf32, #tpu.memory_space<vmem>>, %arg6: memref<1x1x168x128xf32, #tpu.memory_space<vmem>>, %arg7: memref<224x4xf32, #tpu.memory_space<vmem>>) attributes {dimension_semantics = [#tpu.dimension_semantics<parallel>, #tpu.dimension_semantics<parallel>], iteration_bounds = array<i64: 2, 3>, scalar_prefetch = 0 : i64, scratch_operands = 1 : i64, tpu.core_type = #tpu.core_type<tc>, window_params = [{transform_indices = @transform_0, window_bounds = array<i64: 1, 168, 4>}, {transform_indices = @transform_1, window_bounds = array<i64: 1, 56, 4>}, {pipeline_mode = #tpu.pipeline_mode<synchronous>, transform_indices = @transform_2, window_bounds = array<i64: 36, 128>}, {pipeline_mode = #tpu.pipeline_mode<synchronous>, transform_indices = @transform_3, window_bounds = array<i64: 1, 128>}, {transform_indices = @transform_4, window_bounds = array<i64: 1, 1, 168, 128>}]} {
    %c0 = arith.constant 0 : index
    %c0_0 = arith.constant 0 : index
    %c0_1 = arith.constant 0 : index
    %0 = vector.load %arg2[%c0, %c0_0, %c0_1] : memref<1x168x4xf32, #tpu.memory_space<vmem>>, vector<1x168x4xf32>
    %1 = vector.shape_cast %0 : vector<1x168x4xf32> to vector<168x4xf32>
    %c0_2 = arith.constant 0 : index
    %c0_3 = arith.constant 0 : index
    %2 = vector.load %arg7[%c0_2, %c0_3] : memref<224x4xf32, #tpu.memory_space<vmem>>, vector<168x4xf32>
    tpu.vector_store %arg7[%c0_2, %c0_3], %1 {strides = array<i32>} : memref<224x4xf32, #tpu.memory_space<vmem>>, vector<168x4xf32>,
    %c0_4 = arith.constant 0 : index
    %c0_5 = arith.constant 0 : index
    %c0_6 = arith.constant 0 : index
    %3 = vector.load %arg3[%c0_4, %c0_5, %c0_6] : memref<1x56x4xf32, #tpu.memory_space<vmem>>, vector<1x56x4xf32>
    %4 = vector.shape_cast %3 : vector<1x56x4xf32> to vector<56x4xf32>
    %c168 = arith.constant 168 : index
    %c0_7 = arith.constant 0 : index
    %5 = vector.load %arg7[%c168, %c0_7] : memref<224x4xf32, #tpu.memory_space<vmem>>, vector<56x4xf32>
    tpu.vector_store %arg7[%c168, %c0_7], %4 {strides = array<i32>} : memref<224x4xf32, #tpu.memory_space<vmem>>, vector<56x4xf32>,
    %c0_8 = arith.constant 0 : index
    %c0_9 = arith.constant 0 : index
    %6 = vector.load %arg7[%c0_8, %c0_9] : memref<224x4xf32, #tpu.memory_space<vmem>>, vector<168x4xf32>
    %c1 = arith.constant 1 : index
    %c0_10 = arith.constant 0 : index
    %7 = vector.load %arg7[%c1, %c0_10] : memref<224x4xf32, #tpu.memory_space<vmem>>, vector<168x4xf32>
    %c2 = arith.constant 2 : index
    %c0_11 = arith.constant 0 : index
    %8 = vector.load %arg7[%c2, %c0_11] : memref<224x4xf32, #tpu.memory_space<vmem>>, vector<168x4xf32>
    %c24 = arith.constant 24 : index
    %c0_12 = arith.constant 0 : index
    %9 = vector.load %arg7[%c24, %c0_12] : memref<224x4xf32, #tpu.memory_space<vmem>>, vector<168x4xf32>
    %c25 = arith.constant 25 : index
    %c0_13 = arith.constant 0 : index
    %10 = vector.load %arg7[%c25, %c0_13] : memref<224x4xf32, #tpu.memory_space<vmem>>, vector<168x4xf32>
    %c26 = arith.constant 26 : index
    %c0_14 = arith.constant 0 : index
    %11 = vector.load %arg7[%c26, %c0_14] : memref<224x4xf32, #tpu.memory_space<vmem>>, vector<168x4xf32>
    %c48 = arith.constant 48 : index
    %c0_15 = arith.constant 0 : index
    %12 = vector.load %arg7[%c48, %c0_15] : memref<224x4xf32, #tpu.memory_space<vmem>>, vector<168x4xf32>
    %c49 = arith.constant 49 : index
    %c0_16 = arith.constant 0 : index
    %13 = vector.load %arg7[%c49, %c0_16] : memref<224x4xf32, #tpu.memory_space<vmem>>, vector<168x4xf32>
    %c50 = arith.constant 50 : index
    %c0_17 = arith.constant 0 : index
    %14 = vector.load %arg7[%c50, %c0_17] : memref<224x4xf32, #tpu.memory_space<vmem>>, vector<168x4xf32>
    %15 = tpu.concatenate %6, %7, %8, %9, %10, %11, %12, %13, %14 in 1 : vector<168x4xf32>, vector<168x4xf32>, vector<168x4xf32>, vector<168x4xf32>, vector<168x4xf32>, vector<168x4xf32>, vector<168x4xf32>, vector<168x4xf32>, vector<168x4xf32> -> vector<168x36xf32>
    %c0_18 = arith.constant 0 : index
    %c0_19 = arith.constant 0 : index
    %16 = vector.load %arg4[%c0_18, %c0_19] : memref<36x128xf32, #tpu.memory_space<vmem>>, vector<36x128xf32>
    %cst = arith.constant dense<0.000000e+00> : vector<168x128xf32>
    %17 = tpu.matmul %15, %16, %cst {dimension_numbers = #tpu.dot_dimension_numbers<[1], [0], [0], [1], [0, 0, 1, 1], [], []>} : vector<168x36xf32>, vector<36x128xf32>, vector<168x128xf32> -> vector<168x128xf32>
    %c0_20 = arith.constant 0 : index
    %c0_21 = arith.constant 0 : index
    %18 = vector.load %arg5[%c0_20, %c0_21] : memref<1x128xf32, #tpu.memory_space<vmem>>, vector<1x128xf32>
    %19 = vector.broadcast %18 : vector<1x128xf32> to vector<168x128xf32>
    %20 = arith.addf %17, %19 : vector<168x128xf32>
    %cst_22 = arith.constant 0.000000e+00 : f32
    %21 = vector.broadcast %cst_22 : f32 to vector<168x128xf32>
    %22 = arith.maximumf %20, %21 : vector<168x128xf32>
    %c0_23 = arith.constant 0 : index
    %c0_24 = arith.constant 0 : index
    %c0_25 = arith.constant 0 : index
    %c0_26 = arith.constant 0 : index
    %23 = vector.load %arg6[%c0_23, %c0_24, %c0_25, %c0_26] : memref<1x1x168x128xf32, #tpu.memory_space<vmem>>, vector<1x1x168x128xf32>
    %24 = vector.shape_cast %23 : vector<1x1x168x128xf32> to vector<168x128xf32>
    %25 = vector.shape_cast %22 : vector<168x128xf32> to vector<1x1x168x128xf32>
    tpu.vector_store %arg6[%c0_23, %c0_24, %c0_25, %c0_26], %25 {strides = array<i32>} : memref<1x1x168x128xf32, #tpu.memory_space<vmem>>, vector<1x1x168x128xf32>,
    return
  }
  func.func @transform_0(%arg0: i32, %arg1: i32) -> (i32, i32, i32) {
    %c0_i32 = arith.constant 0 : i32
    %c0_i32_0 = arith.constant 0 : i32
    return %arg0, %arg1, %c0_i32 : i32, i32, i32
  }
  func.func @transform_1(%arg0: i32, %arg1: i32) -> (i32, i32, i32) {
    %c1_i32 = arith.constant 1 : i32
    %0 = arith.addi %arg1, %c1_i32 : i32
    %c3_i32 = arith.constant 3 : i32
    %1 = arith.muli %0, %c3_i32 : i32
    %c0_i32 = arith.constant 0 : i32
    %c0_i32_0 = arith.constant 0 : i32
    return %arg0, %1, %c0_i32 : i32, i32, i32
  }
  func.func @transform_2(%arg0: i32, %arg1: i32) -> (i32, i32) {
    %c0_i32 = arith.constant 0 : i32
    %c0_i32_0 = arith.constant 0 : i32
    %c0_i32_1 = arith.constant 0 : i32
    return %c0_i32, %c0_i32_0 : i32, i32
  }
  func.func @transform_3(%arg0: i32, %arg1: i32) -> (i32, i32) {
    %c0_i32 = arith.constant 0 : i32
    %c0_i32_0 = arith.constant 0 : i32
    %c0_i32_1 = arith.constant 0 : i32
    return %c0_i32, %c0_i32_0 : i32, i32
  }
  func.func @transform_4(%arg0: i32, %arg1: i32) -> (i32, i32, i32, i32) {
    %c0_i32 = arith.constant 0 : i32
    %c0_i32_0 = arith.constant 0 : i32
    %c0_i32_1 = arith.constant 0 : i32
    return %arg0, %arg1, %c0_i32, %c0_i32_0 : i32, i32, i32, i32
  }
}

module attributes {stable_mosaic.version = 11 : i64} {
  func.func @kernel(%arg0: i32, %arg1: i32, %arg2: memref<1x168x4xf32, #tpu.memory_space<vmem>>, %arg3: memref<1x56x4xf32, #tpu.memory_space<vmem>>, %arg4: memref<36x128xf32, #tpu.memory_space<vmem>>, %arg5: memref<1x1x1x128xf32, #tpu.memory_space<vmem>>, %arg6: memref<1x1x1x128xf32, #tpu.memory_space<vmem>>, %arg7: memref<224x4xf32, #tpu.memory_space<vmem>>) attributes {dimension_semantics = [#tpu.dimension_semantics<parallel>, #tpu.dimension_semantics<parallel>], iteration_bounds = array<i64: 2, 3>, scalar_prefetch = 0 : i64, scratch_operands = 1 : i64, tpu.core_type = #tpu.core_type<tc>, window_params = [{transform_indices = @transform_0, window_bounds = array<i64: 1, 168, 4>}, {transform_indices = @transform_1, window_bounds = array<i64: 1, 56, 4>}, {pipeline_mode = #tpu.pipeline_mode<synchronous>, transform_indices = @transform_2, window_bounds = array<i64: 36, 128>}, {transform_indices = @transform_3, window_bounds = array<i64: 1, 1, 1, 128>}, {transform_indices = @transform_4, window_bounds = array<i64: 1, 1, 1, 128>}]} {
    %c0 = arith.constant 0 : index
    %c0_0 = arith.constant 0 : index
    %c0_1 = arith.constant 0 : index
    %0 = vector.load %arg2[%c0, %c0_0, %c0_1] : memref<1x168x4xf32, #tpu.memory_space<vmem>>, vector<1x168x4xf32>
    %1 = vector.shape_cast %0 : vector<1x168x4xf32> to vector<168x4xf32>
    %c0_2 = arith.constant 0 : index
    %c0_3 = arith.constant 0 : index
    %2 = vector.load %arg7[%c0_2, %c0_3] : memref<224x4xf32, #tpu.memory_space<vmem>>, vector<168x4xf32>
    tpu.vector_store %arg7[%c0_2, %c0_3], %1 {strides = array<i32>} : memref<224x4xf32, #tpu.memory_space<vmem>>, vector<168x4xf32>,
    %c0_4 = arith.constant 0 : index
    %c0_5 = arith.constant 0 : index
    %c0_6 = arith.constant 0 : index
    %3 = vector.load %arg3[%c0_4, %c0_5, %c0_6] : memref<1x56x4xf32, #tpu.memory_space<vmem>>, vector<1x56x4xf32>
    %4 = vector.shape_cast %3 : vector<1x56x4xf32> to vector<56x4xf32>
    %c168 = arith.constant 168 : index
    %c0_7 = arith.constant 0 : index
    %5 = vector.load %arg7[%c168, %c0_7] : memref<224x4xf32, #tpu.memory_space<vmem>>, vector<56x4xf32>
    tpu.vector_store %arg7[%c168, %c0_7], %4 {strides = array<i32>} : memref<224x4xf32, #tpu.memory_space<vmem>>, vector<56x4xf32>,
    %c0_8 = arith.constant 0 : index
    %c0_9 = arith.constant 0 : index
    %6 = vector.load %arg7[%c0_8, %c0_9] : memref<224x4xf32, #tpu.memory_space<vmem>>, vector<168x4xf32>
    %c0_10 = arith.constant 0 : index
    %c0_11 = arith.constant 0 : index
    %7 = vector.load %arg4[%c0_10, %c0_11] : memref<36x128xf32, #tpu.memory_space<vmem>>, vector<4x128xf32>
    %cst = arith.constant dense<0.000000e+00> : vector<168x128xf32>
    %8 = tpu.matmul %6, %7, %cst {dimension_numbers = #tpu.dot_dimension_numbers<[1], [0], [0], [1], [0, 0, 1, 1], [], []>} : vector<168x4xf32>, vector<4x128xf32>, vector<168x128xf32> -> vector<168x128xf32>
    %c1 = arith.constant 1 : index
    %c0_12 = arith.constant 0 : index
    %9 = vector.load %arg7[%c1, %c0_12] : memref<224x4xf32, #tpu.memory_space<vmem>>, vector<168x4xf32>
    %c4 = arith.constant 4 : index
    %c0_13 = arith.constant 0 : index
    %10 = vector.load %arg4[%c4, %c0_13] : memref<36x128xf32, #tpu.memory_space<vmem>>, vector<4x128xf32>
    %cst_14 = arith.constant dense<0.000000e+00> : vector<168x128xf32>
    %11 = tpu.matmul %9, %10, %cst_14 {dimension_numbers = #tpu.dot_dimension_numbers<[1], [0], [0], [1], [0, 0, 1, 1], [], []>} : vector<168x4xf32>, vector<4x128xf32>, vector<168x128xf32> -> vector<168x128xf32>
    %12 = arith.addf %8, %11 : vector<168x128xf32>
    %c2 = arith.constant 2 : index
    %c0_15 = arith.constant 0 : index
    %13 = vector.load %arg7[%c2, %c0_15] : memref<224x4xf32, #tpu.memory_space<vmem>>, vector<168x4xf32>
    %c8 = arith.constant 8 : index
    %c0_16 = arith.constant 0 : index
    %14 = vector.load %arg4[%c8, %c0_16] : memref<36x128xf32, #tpu.memory_space<vmem>>, vector<4x128xf32>
    %cst_17 = arith.constant dense<0.000000e+00> : vector<168x128xf32>
    %15 = tpu.matmul %13, %14, %cst_17 {dimension_numbers = #tpu.dot_dimension_numbers<[1], [0], [0], [1], [0, 0, 1, 1], [], []>} : vector<168x4xf32>, vector<4x128xf32>, vector<168x128xf32> -> vector<168x128xf32>
    %16 = arith.addf %12, %15 : vector<168x128xf32>
    %c24 = arith.constant 24 : index
    %c0_18 = arith.constant 0 : index
    %17 = vector.load %arg7[%c24, %c0_18] : memref<224x4xf32, #tpu.memory_space<vmem>>, vector<168x4xf32>
    %c12 = arith.constant 12 : index
    %c0_19 = arith.constant 0 : index
    %18 = vector.load %arg4[%c12, %c0_19] : memref<36x128xf32, #tpu.memory_space<vmem>>, vector<4x128xf32>
    %cst_20 = arith.constant dense<0.000000e+00> : vector<168x128xf32>
    %19 = tpu.matmul %17, %18, %cst_20 {dimension_numbers = #tpu.dot_dimension_numbers<[1], [0], [0], [1], [0, 0, 1, 1], [], []>} : vector<168x4xf32>, vector<4x128xf32>, vector<168x128xf32> -> vector<168x128xf32>
    %20 = arith.addf %16, %19 : vector<168x128xf32>
    %c25 = arith.constant 25 : index
    %c0_21 = arith.constant 0 : index
    %21 = vector.load %arg7[%c25, %c0_21] : memref<224x4xf32, #tpu.memory_space<vmem>>, vector<168x4xf32>
    %c16 = arith.constant 16 : index
    %c0_22 = arith.constant 0 : index
    %22 = vector.load %arg4[%c16, %c0_22] : memref<36x128xf32, #tpu.memory_space<vmem>>, vector<4x128xf32>
    %cst_23 = arith.constant dense<0.000000e+00> : vector<168x128xf32>
    %23 = tpu.matmul %21, %22, %cst_23 {dimension_numbers = #tpu.dot_dimension_numbers<[1], [0], [0], [1], [0, 0, 1, 1], [], []>} : vector<168x4xf32>, vector<4x128xf32>, vector<168x128xf32> -> vector<168x128xf32>
    %24 = arith.addf %20, %23 : vector<168x128xf32>
    %c26 = arith.constant 26 : index
    %c0_24 = arith.constant 0 : index
    %25 = vector.load %arg7[%c26, %c0_24] : memref<224x4xf32, #tpu.memory_space<vmem>>, vector<168x4xf32>
    %c20 = arith.constant 20 : index
    %c0_25 = arith.constant 0 : index
    %26 = vector.load %arg4[%c20, %c0_25] : memref<36x128xf32, #tpu.memory_space<vmem>>, vector<4x128xf32>
    %cst_26 = arith.constant dense<0.000000e+00> : vector<168x128xf32>
    %27 = tpu.matmul %25, %26, %cst_26 {dimension_numbers = #tpu.dot_dimension_numbers<[1], [0], [0], [1], [0, 0, 1, 1], [], []>} : vector<168x4xf32>, vector<4x128xf32>, vector<168x128xf32> -> vector<168x128xf32>
    %28 = arith.addf %24, %27 : vector<168x128xf32>
    %c48 = arith.constant 48 : index
    %c0_27 = arith.constant 0 : index
    %29 = vector.load %arg7[%c48, %c0_27] : memref<224x4xf32, #tpu.memory_space<vmem>>, vector<168x4xf32>
    %c24_28 = arith.constant 24 : index
    %c0_29 = arith.constant 0 : index
    %30 = vector.load %arg4[%c24_28, %c0_29] : memref<36x128xf32, #tpu.memory_space<vmem>>, vector<4x128xf32>
    %cst_30 = arith.constant dense<0.000000e+00> : vector<168x128xf32>
    %31 = tpu.matmul %29, %30, %cst_30 {dimension_numbers = #tpu.dot_dimension_numbers<[1], [0], [0], [1], [0, 0, 1, 1], [], []>} : vector<168x4xf32>, vector<4x128xf32>, vector<168x128xf32> -> vector<168x128xf32>
    %32 = arith.addf %28, %31 : vector<168x128xf32>
    %c49 = arith.constant 49 : index
    %c0_31 = arith.constant 0 : index
    %33 = vector.load %arg7[%c49, %c0_31] : memref<224x4xf32, #tpu.memory_space<vmem>>, vector<168x4xf32>
    %c28 = arith.constant 28 : index
    %c0_32 = arith.constant 0 : index
    %34 = vector.load %arg4[%c28, %c0_32] : memref<36x128xf32, #tpu.memory_space<vmem>>, vector<4x128xf32>
    %cst_33 = arith.constant dense<0.000000e+00> : vector<168x128xf32>
    %35 = tpu.matmul %33, %34, %cst_33 {dimension_numbers = #tpu.dot_dimension_numbers<[1], [0], [0], [1], [0, 0, 1, 1], [], []>} : vector<168x4xf32>, vector<4x128xf32>, vector<168x128xf32> -> vector<168x128xf32>
    %36 = arith.addf %32, %35 : vector<168x128xf32>
    %c50 = arith.constant 50 : index
    %c0_34 = arith.constant 0 : index
    %37 = vector.load %arg7[%c50, %c0_34] : memref<224x4xf32, #tpu.memory_space<vmem>>, vector<168x4xf32>
    %c32 = arith.constant 32 : index
    %c0_35 = arith.constant 0 : index
    %38 = vector.load %arg4[%c32, %c0_35] : memref<36x128xf32, #tpu.memory_space<vmem>>, vector<4x128xf32>
    %cst_36 = arith.constant dense<0.000000e+00> : vector<168x128xf32>
    %39 = tpu.matmul %37, %38, %cst_36 {dimension_numbers = #tpu.dot_dimension_numbers<[1], [0], [0], [1], [0, 0, 1, 1], [], []>} : vector<168x4xf32>, vector<4x128xf32>, vector<168x128xf32> -> vector<168x128xf32>
    %40 = arith.addf %36, %39 : vector<168x128xf32>
    %c168_i32 = arith.constant 168 : i32
    %41 = arith.muli %arg1, %c168_i32 : i32
    %42 = tpu.iota {dimensions = array<i32: 0>} : vector<168x1xi32>
    %43 = vector.broadcast %41 : i32 to vector<168x1xi32>
    %44 = arith.addi %43, %42 : vector<168x1xi32>
    %c24_i32 = arith.constant 24 : i32
    %c0_i32 = arith.constant 0 : i32
    %45 = arith.cmpi eq, %c24_i32, %c0_i32 : i32
    %c1_i32 = arith.constant 1 : i32
    %46 = arith.select %45, %c1_i32, %c24_i32 : i32
    %47 = vector.broadcast %46 : i32 to vector<168x1xi32>
    %48 = arith.remsi %44, %47 : vector<168x1xi32>
    %c0_i32_37 = arith.constant 0 : i32
    %49 = vector.broadcast %c0_i32_37 : i32 to vector<168x1xi32>
    %50 = arith.cmpi ne, %48, %49 : vector<168x1xi32>
    %c0_i32_38 = arith.constant 0 : i32
    %51 = vector.broadcast %c0_i32_38 : i32 to vector<168x1xi32>
    %52 = arith.cmpi slt, %48, %51 : vector<168x1xi32>
    %c0_i32_39 = arith.constant 0 : i32
    %53 = arith.cmpi slt, %46, %c0_i32_39 : i32
    %54 = vector.broadcast %53 : i1 to vector<168x1xi1>
    %55 = vector.broadcast %54 : vector<168x1xi1> to vector<168x1xi1>
    %56 = arith.xori %52, %55 : vector<168x1xi1>
    %57 = arith.andi %56, %50 : vector<168x1xi1>
    %58 = vector.broadcast %46 : i32 to vector<168x1xi32>
    %59 = arith.addi %48, %58 : vector<168x1xi32>
    %60 = arith.select %57, %59, %48 : vector<168x1xi1>, vector<168x1xi32>
    %c16_i32 = arith.constant 16 : i32
    %61 = vector.broadcast %c16_i32 : i32 to vector<168x1xi32>
    %62 = arith.cmpi slt, %60, %61 : vector<168x1xi32>
    %c384_i32 = arith.constant 384 : i32
    %63 = vector.broadcast %c384_i32 : i32 to vector<168x1xi32>
    %64 = arith.cmpi slt, %44, %63 : vector<168x1xi32>
    %65 = arith.andi %62, %64 : vector<168x1xi1>
    %cst_40 = arith.constant 0.000000e+00 : f32
    %66 = vector.shape_cast %65 : vector<168x1xi1> to vector<168x1xi1>
    %67 = vector.broadcast %66 : vector<168x1xi1> to vector<168x128xi1>
    %68 = vector.broadcast %cst_40 : f32 to vector<168x128xf32>
    %69 = arith.select %67, %40, %68 : vector<168x128xi1>, vector<168x128xf32>
    %cst_41 = arith.constant dense<0.000000e+00> : vector<128xf32>
    %70 = vector.multi_reduction <add>, %69, %cst_41 [0] : vector<168x128xf32> to vector<128xf32>
    %71 = vector.shape_cast %70 : vector<128xf32> to vector<1x128xf32>
    %c0_42 = arith.constant 0 : index
    %c0_43 = arith.constant 0 : index
    %c0_44 = arith.constant 0 : index
    %c0_45 = arith.constant 0 : index
    %72 = vector.load %arg5[%c0_42, %c0_43, %c0_44, %c0_45] : memref<1x1x1x128xf32, #tpu.memory_space<vmem>>, vector<1x1x1x128xf32>
    %73 = vector.shape_cast %72 : vector<1x1x1x128xf32> to vector<1x128xf32>
    %74 = vector.shape_cast %71 : vector<1x128xf32> to vector<1x1x1x128xf32>
    tpu.vector_store %arg5[%c0_42, %c0_43, %c0_44, %c0_45], %74 {strides = array<i32>} : memref<1x1x1x128xf32, #tpu.memory_space<vmem>>, vector<1x1x1x128xf32>,
    %75 = arith.mulf %69, %40 : vector<168x128xf32>
    %cst_46 = arith.constant dense<0.000000e+00> : vector<128xf32>
    %76 = vector.multi_reduction <add>, %75, %cst_46 [0] : vector<168x128xf32> to vector<128xf32>
    %77 = vector.shape_cast %76 : vector<128xf32> to vector<1x128xf32>
    %c0_47 = arith.constant 0 : index
    %c0_48 = arith.constant 0 : index
    %c0_49 = arith.constant 0 : index
    %c0_50 = arith.constant 0 : index
    %78 = vector.load %arg6[%c0_47, %c0_48, %c0_49, %c0_50] : memref<1x1x1x128xf32, #tpu.memory_space<vmem>>, vector<1x1x1x128xf32>
    %79 = vector.shape_cast %78 : vector<1x1x1x128xf32> to vector<1x128xf32>
    %80 = vector.shape_cast %77 : vector<1x128xf32> to vector<1x1x1x128xf32>
    tpu.vector_store %arg6[%c0_47, %c0_48, %c0_49, %c0_50], %80 {strides = array<i32>} : memref<1x1x1x128xf32, #tpu.memory_space<vmem>>, vector<1x1x1x128xf32>,
    return
  }
  func.func @transform_0(%arg0: i32, %arg1: i32) -> (i32, i32, i32) {
    %c0_i32 = arith.constant 0 : i32
    %c0_i32_0 = arith.constant 0 : i32
    return %arg0, %arg1, %c0_i32 : i32, i32, i32
  }
  func.func @transform_1(%arg0: i32, %arg1: i32) -> (i32, i32, i32) {
    %c1_i32 = arith.constant 1 : i32
    %0 = arith.addi %arg1, %c1_i32 : i32
    %c3_i32 = arith.constant 3 : i32
    %1 = arith.muli %0, %c3_i32 : i32
    %c0_i32 = arith.constant 0 : i32
    %c0_i32_0 = arith.constant 0 : i32
    return %arg0, %1, %c0_i32 : i32, i32, i32
  }
  func.func @transform_2(%arg0: i32, %arg1: i32) -> (i32, i32) {
    %c0_i32 = arith.constant 0 : i32
    %c0_i32_0 = arith.constant 0 : i32
    %c0_i32_1 = arith.constant 0 : i32
    return %c0_i32, %c0_i32_0 : i32, i32
  }
  func.func @transform_3(%arg0: i32, %arg1: i32) -> (i32, i32, i32, i32) {
    %c0_i32 = arith.constant 0 : i32
    %c0_i32_0 = arith.constant 0 : i32
    %c0_i32_1 = arith.constant 0 : i32
    return %arg0, %arg1, %c0_i32, %c0_i32_0 : i32, i32, i32, i32
  }
  func.func @transform_4(%arg0: i32, %arg1: i32) -> (i32, i32, i32, i32) {
    %c0_i32 = arith.constant 0 : i32
    %c0_i32_0 = arith.constant 0 : i32
    %c0_i32_1 = arith.constant 0 : i32
    return %arg0, %arg1, %c0_i32, %c0_i32_0 : i32, i32, i32, i32
  }
}

module attributes {stable_mosaic.version = 11 : i64} {
  func.func @kernel(%arg0: i32, %arg1: i32, %arg2: memref<1x168x4xf32, #tpu.memory_space<vmem>>, %arg3: memref<1x56x4xf32, #tpu.memory_space<vmem>>, %arg4: memref<36x128xf32, #tpu.memory_space<vmem>>, %arg5: memref<1x128xf32, #tpu.memory_space<vmem>>, %arg6: memref<1x1x168x128xf32, #tpu.memory_space<vmem>>, %arg7: memref<224x4xf32, #tpu.memory_space<vmem>>) attributes {dimension_semantics = [#tpu.dimension_semantics<parallel>, #tpu.dimension_semantics<parallel>], iteration_bounds = array<i64: 2, 3>, scalar_prefetch = 0 : i64, scratch_operands = 1 : i64, tpu.core_type = #tpu.core_type<tc>, window_params = [{transform_indices = @transform_0, window_bounds = array<i64: 1, 168, 4>}, {transform_indices = @transform_1, window_bounds = array<i64: 1, 56, 4>}, {pipeline_mode = #tpu.pipeline_mode<synchronous>, transform_indices = @transform_2, window_bounds = array<i64: 36, 128>}, {pipeline_mode = #tpu.pipeline_mode<synchronous>, transform_indices = @transform_3, window_bounds = array<i64: 1, 128>}, {transform_indices = @transform_4, window_bounds = array<i64: 1, 1, 168, 128>}]} {
    %c0 = arith.constant 0 : index
    %c0_0 = arith.constant 0 : index
    %c0_1 = arith.constant 0 : index
    %0 = vector.load %arg2[%c0, %c0_0, %c0_1] : memref<1x168x4xf32, #tpu.memory_space<vmem>>, vector<1x168x4xf32>
    %1 = vector.shape_cast %0 : vector<1x168x4xf32> to vector<168x4xf32>
    %c0_2 = arith.constant 0 : index
    %c0_3 = arith.constant 0 : index
    %2 = vector.load %arg7[%c0_2, %c0_3] : memref<224x4xf32, #tpu.memory_space<vmem>>, vector<168x4xf32>
    tpu.vector_store %arg7[%c0_2, %c0_3], %1 {strides = array<i32>} : memref<224x4xf32, #tpu.memory_space<vmem>>, vector<168x4xf32>,
    %c0_4 = arith.constant 0 : index
    %c0_5 = arith.constant 0 : index
    %c0_6 = arith.constant 0 : index
    %3 = vector.load %arg3[%c0_4, %c0_5, %c0_6] : memref<1x56x4xf32, #tpu.memory_space<vmem>>, vector<1x56x4xf32>
    %4 = vector.shape_cast %3 : vector<1x56x4xf32> to vector<56x4xf32>
    %c168 = arith.constant 168 : index
    %c0_7 = arith.constant 0 : index
    %5 = vector.load %arg7[%c168, %c0_7] : memref<224x4xf32, #tpu.memory_space<vmem>>, vector<56x4xf32>
    tpu.vector_store %arg7[%c168, %c0_7], %4 {strides = array<i32>} : memref<224x4xf32, #tpu.memory_space<vmem>>, vector<56x4xf32>,
    %c0_8 = arith.constant 0 : index
    %c0_9 = arith.constant 0 : index
    %6 = vector.load %arg7[%c0_8, %c0_9] : memref<224x4xf32, #tpu.memory_space<vmem>>, vector<168x4xf32>
    %c0_10 = arith.constant 0 : index
    %c0_11 = arith.constant 0 : index
    %7 = vector.load %arg4[%c0_10, %c0_11] : memref<36x128xf32, #tpu.memory_space<vmem>>, vector<4x128xf32>
    %cst = arith.constant dense<0.000000e+00> : vector<168x128xf32>
    %8 = tpu.matmul %6, %7, %cst {dimension_numbers = #tpu.dot_dimension_numbers<[1], [0], [0], [1], [0, 0, 1, 1], [], []>} : vector<168x4xf32>, vector<4x128xf32>, vector<168x128xf32> -> vector<168x128xf32>
    %c1 = arith.constant 1 : index
    %c0_12 = arith.constant 0 : index
    %9 = vector.load %arg7[%c1, %c0_12] : memref<224x4xf32, #tpu.memory_space<vmem>>, vector<168x4xf32>
    %c4 = arith.constant 4 : index
    %c0_13 = arith.constant 0 : index
    %10 = vector.load %arg4[%c4, %c0_13] : memref<36x128xf32, #tpu.memory_space<vmem>>, vector<4x128xf32>
    %cst_14 = arith.constant dense<0.000000e+00> : vector<168x128xf32>
    %11 = tpu.matmul %9, %10, %cst_14 {dimension_numbers = #tpu.dot_dimension_numbers<[1], [0], [0], [1], [0, 0, 1, 1], [], []>} : vector<168x4xf32>, vector<4x128xf32>, vector<168x128xf32> -> vector<168x128xf32>
    %12 = arith.addf %8, %11 : vector<168x128xf32>
    %c2 = arith.constant 2 : index
    %c0_15 = arith.constant 0 : index
    %13 = vector.load %arg7[%c2, %c0_15] : memref<224x4xf32, #tpu.memory_space<vmem>>, vector<168x4xf32>
    %c8 = arith.constant 8 : index
    %c0_16 = arith.constant 0 : index
    %14 = vector.load %arg4[%c8, %c0_16] : memref<36x128xf32, #tpu.memory_space<vmem>>, vector<4x128xf32>
    %cst_17 = arith.constant dense<0.000000e+00> : vector<168x128xf32>
    %15 = tpu.matmul %13, %14, %cst_17 {dimension_numbers = #tpu.dot_dimension_numbers<[1], [0], [0], [1], [0, 0, 1, 1], [], []>} : vector<168x4xf32>, vector<4x128xf32>, vector<168x128xf32> -> vector<168x128xf32>
    %16 = arith.addf %12, %15 : vector<168x128xf32>
    %c24 = arith.constant 24 : index
    %c0_18 = arith.constant 0 : index
    %17 = vector.load %arg7[%c24, %c0_18] : memref<224x4xf32, #tpu.memory_space<vmem>>, vector<168x4xf32>
    %c12 = arith.constant 12 : index
    %c0_19 = arith.constant 0 : index
    %18 = vector.load %arg4[%c12, %c0_19] : memref<36x128xf32, #tpu.memory_space<vmem>>, vector<4x128xf32>
    %cst_20 = arith.constant dense<0.000000e+00> : vector<168x128xf32>
    %19 = tpu.matmul %17, %18, %cst_20 {dimension_numbers = #tpu.dot_dimension_numbers<[1], [0], [0], [1], [0, 0, 1, 1], [], []>} : vector<168x4xf32>, vector<4x128xf32>, vector<168x128xf32> -> vector<168x128xf32>
    %20 = arith.addf %16, %19 : vector<168x128xf32>
    %c25 = arith.constant 25 : index
    %c0_21 = arith.constant 0 : index
    %21 = vector.load %arg7[%c25, %c0_21] : memref<224x4xf32, #tpu.memory_space<vmem>>, vector<168x4xf32>
    %c16 = arith.constant 16 : index
    %c0_22 = arith.constant 0 : index
    %22 = vector.load %arg4[%c16, %c0_22] : memref<36x128xf32, #tpu.memory_space<vmem>>, vector<4x128xf32>
    %cst_23 = arith.constant dense<0.000000e+00> : vector<168x128xf32>
    %23 = tpu.matmul %21, %22, %cst_23 {dimension_numbers = #tpu.dot_dimension_numbers<[1], [0], [0], [1], [0, 0, 1, 1], [], []>} : vector<168x4xf32>, vector<4x128xf32>, vector<168x128xf32> -> vector<168x128xf32>
    %24 = arith.addf %20, %23 : vector<168x128xf32>
    %c26 = arith.constant 26 : index
    %c0_24 = arith.constant 0 : index
    %25 = vector.load %arg7[%c26, %c0_24] : memref<224x4xf32, #tpu.memory_space<vmem>>, vector<168x4xf32>
    %c20 = arith.constant 20 : index
    %c0_25 = arith.constant 0 : index
    %26 = vector.load %arg4[%c20, %c0_25] : memref<36x128xf32, #tpu.memory_space<vmem>>, vector<4x128xf32>
    %cst_26 = arith.constant dense<0.000000e+00> : vector<168x128xf32>
    %27 = tpu.matmul %25, %26, %cst_26 {dimension_numbers = #tpu.dot_dimension_numbers<[1], [0], [0], [1], [0, 0, 1, 1], [], []>} : vector<168x4xf32>, vector<4x128xf32>, vector<168x128xf32> -> vector<168x128xf32>
    %28 = arith.addf %24, %27 : vector<168x128xf32>
    %c48 = arith.constant 48 : index
    %c0_27 = arith.constant 0 : index
    %29 = vector.load %arg7[%c48, %c0_27] : memref<224x4xf32, #tpu.memory_space<vmem>>, vector<168x4xf32>
    %c24_28 = arith.constant 24 : index
    %c0_29 = arith.constant 0 : index
    %30 = vector.load %arg4[%c24_28, %c0_29] : memref<36x128xf32, #tpu.memory_space<vmem>>, vector<4x128xf32>
    %cst_30 = arith.constant dense<0.000000e+00> : vector<168x128xf32>
    %31 = tpu.matmul %29, %30, %cst_30 {dimension_numbers = #tpu.dot_dimension_numbers<[1], [0], [0], [1], [0, 0, 1, 1], [], []>} : vector<168x4xf32>, vector<4x128xf32>, vector<168x128xf32> -> vector<168x128xf32>
    %32 = arith.addf %28, %31 : vector<168x128xf32>
    %c49 = arith.constant 49 : index
    %c0_31 = arith.constant 0 : index
    %33 = vector.load %arg7[%c49, %c0_31] : memref<224x4xf32, #tpu.memory_space<vmem>>, vector<168x4xf32>
    %c28 = arith.constant 28 : index
    %c0_32 = arith.constant 0 : index
    %34 = vector.load %arg4[%c28, %c0_32] : memref<36x128xf32, #tpu.memory_space<vmem>>, vector<4x128xf32>
    %cst_33 = arith.constant dense<0.000000e+00> : vector<168x128xf32>
    %35 = tpu.matmul %33, %34, %cst_33 {dimension_numbers = #tpu.dot_dimension_numbers<[1], [0], [0], [1], [0, 0, 1, 1], [], []>} : vector<168x4xf32>, vector<4x128xf32>, vector<168x128xf32> -> vector<168x128xf32>
    %36 = arith.addf %32, %35 : vector<168x128xf32>
    %c50 = arith.constant 50 : index
    %c0_34 = arith.constant 0 : index
    %37 = vector.load %arg7[%c50, %c0_34] : memref<224x4xf32, #tpu.memory_space<vmem>>, vector<168x4xf32>
    %c32 = arith.constant 32 : index
    %c0_35 = arith.constant 0 : index
    %38 = vector.load %arg4[%c32, %c0_35] : memref<36x128xf32, #tpu.memory_space<vmem>>, vector<4x128xf32>
    %cst_36 = arith.constant dense<0.000000e+00> : vector<168x128xf32>
    %39 = tpu.matmul %37, %38, %cst_36 {dimension_numbers = #tpu.dot_dimension_numbers<[1], [0], [0], [1], [0, 0, 1, 1], [], []>} : vector<168x4xf32>, vector<4x128xf32>, vector<168x128xf32> -> vector<168x128xf32>
    %40 = arith.addf %36, %39 : vector<168x128xf32>
    %c0_37 = arith.constant 0 : index
    %c0_38 = arith.constant 0 : index
    %41 = vector.load %arg5[%c0_37, %c0_38] : memref<1x128xf32, #tpu.memory_space<vmem>>, vector<1x128xf32>
    %42 = vector.broadcast %41 : vector<1x128xf32> to vector<168x128xf32>
    %43 = arith.addf %40, %42 : vector<168x128xf32>
    %cst_39 = arith.constant 0.000000e+00 : f32
    %44 = vector.broadcast %cst_39 : f32 to vector<168x128xf32>
    %45 = arith.maximumf %43, %44 : vector<168x128xf32>
    %c0_40 = arith.constant 0 : index
    %c0_41 = arith.constant 0 : index
    %c0_42 = arith.constant 0 : index
    %c0_43 = arith.constant 0 : index
    %46 = vector.load %arg6[%c0_40, %c0_41, %c0_42, %c0_43] : memref<1x1x168x128xf32, #tpu.memory_space<vmem>>, vector<1x1x168x128xf32>
    %47 = vector.shape_cast %46 : vector<1x1x168x128xf32> to vector<168x128xf32>
    %48 = vector.shape_cast %45 : vector<168x128xf32> to vector<1x1x168x128xf32>
    tpu.vector_store %arg6[%c0_40, %c0_41, %c0_42, %c0_43], %48 {strides = array<i32>} : memref<1x1x168x128xf32, #tpu.memory_space<vmem>>, vector<1x1x168x128xf32>,
    return
  }
  func.func @transform_0(%arg0: i32, %arg1: i32) -> (i32, i32, i32) {
    %c0_i32 = arith.constant 0 : i32
    %c0_i32_0 = arith.constant 0 : i32
    return %arg0, %arg1, %c0_i32 : i32, i32, i32
  }
  func.func @transform_1(%arg0: i32, %arg1: i32) -> (i32, i32, i32) {
    %c1_i32 = arith.constant 1 : i32
    %0 = arith.addi %arg1, %c1_i32 : i32
    %c3_i32 = arith.constant 3 : i32
    %1 = arith.muli %0, %c3_i32 : i32
    %c0_i32 = arith.constant 0 : i32
    %c0_i32_0 = arith.constant 0 : i32
    return %arg0, %1, %c0_i32 : i32, i32, i32
  }
  func.func @transform_2(%arg0: i32, %arg1: i32) -> (i32, i32) {
    %c0_i32 = arith.constant 0 : i32
    %c0_i32_0 = arith.constant 0 : i32
    %c0_i32_1 = arith.constant 0 : i32
    return %c0_i32, %c0_i32_0 : i32, i32
  }
  func.func @transform_3(%arg0: i32, %arg1: i32) -> (i32, i32) {
    %c0_i32 = arith.constant 0 : i32
    %c0_i32_0 = arith.constant 0 : i32
    %c0_i32_1 = arith.constant 0 : i32
    return %c0_i32, %c0_i32_0 : i32, i32
  }
  func.func @transform_4(%arg0: i32, %arg1: i32) -> (i32, i32, i32, i32) {
    %c0_i32 = arith.constant 0 : i32
    %c0_i32_0 = arith.constant 0 : i32
    %c0_i32_1 = arith.constant 0 : i32
    return %arg0, %arg1, %c0_i32, %c0_i32_0 : i32, i32, i32, i32
  }
}

</mosaic_0001>

<bundles_post_ra>
// kernel: cbr2d.3
= control target key start
LH: loop header
LB: loop body
LE: loop exit
PB: predicated region body
PF: predicated region fallthrough
CT: control target
= control target key end

     0   :  { %s1880_s15 = smov 0   ;;  %s1882_s16 = smov 0   ;;  %s2889_s0 = inlined_call_operand.vmem [shape: f32[2,560,4], index: 0, kind: input, shape index: {}, may-alias: {0,1}]   ;;  %s2890_s1 = inlined_call_operand.vmem [shape: f32[2,560,4], index: 1, kind: input, shape index: {}, may-alias: {0,1}]   ;;  %s2891_s2 = inlined_call_operand.vmem [shape: f32[36,128], index: 2, kind: input, shape index: {}]   ;;  %s2892_s3 = inlined_call_operand.vmem [shape: f32[1,128], index: 3, kind: input, shape index: {}]   ;;  %s2893_s4 = inlined_call_operand.vmem [shape: f32[2,3,168,128], index: 4, kind: output, shape index: {}]  }
   0x1   :  { %s1884_s17 = smov 0   ;;  %s1886_s18 = smov 0  }
   0x2   :  { %s1888_s19 = smov 0  }
   0x3 LB: > { %s23_s20 = sadd.s32 1, %s1834_s17  ;;  %s26_s21 = sadd.s32 1, %s1838_s18  ;;  %s1842_s19 = sphi %s1888_s19, %s14_s19   ;;  %s1838_s18 = sphi %s1886_s18, %s2939_s18   ;;  %s1834_s17 = sphi %s1884_s17, %s2938_s17   ;;  %s1830_s16 = sphi %s1882_s16, %s2937_s16   ;;  %s1826_s15 = sphi %s1880_s15, %s2936_s15  }
   0x4   : > { %p24_p0 = scmp.ge.s32.totalorder %s23_s20, 3  ;;  %p1607_p1 = scmp.ge.s32.totalorder %s1842_s19, 1 }
   0x5   : > { %p216_p2 = scmp.lt.s32.totalorder %s1842_s19, 7 }
   0x6   : > { %s2941_s20 = smov (%p24_p0, %s23_s20), 0  ;;  %s2943_s21 = smov (!%p24_p0, %s26_s21), %s1838_s18 }
   0x7   : > { %p217_p3 = pnand %p1607_p1, %p216_p2  ;;  %p28_p4 = scmp.ge.s32.totalorder %s2943_s21, 2 }
   0x9   : > { %s2945_s21 = smov (%p28_p4, %s2943_s21), 0  ;;  %220 = sbr.rel (%p217_p3) target bundleno = 701 (0x2bd), region = 36 }
  0x10   : > { %s265_s22 = smul.u32 21, %s1826_s15  ;;  %p270_p5 = scmp.lt.s32.totalorder %s1830_s16, 1  ;;  %vm327_vm0 = vcmask 31744   ;;  %v1847_v32 = vmov 0.0|0.0   ;;  %v1201_v33 = vld [vmem:[%s2891_s2] sm:$0xff]  ;;  %v1202_v34 = vld [vmem:[%s2891_s2 + $0x8] sm:$0xff] }
  0x11   : > { %s1844_s29 = smov 4   ;;  %s283_s30 = sadd.s32 1, %s1826_s15  ;;  %1736 = vmatprep.subr.bf16.mxu0 %v1847_v32  ;;  %1742 = vmatprep.subr.bf16.mxu1 %v1847_v32  ;;  %v1737_v36 = vpack.c.bf16 %v1202_v34, %v1201_v33  ;;  %v1203_v38 = vld [vmem:[%s2891_s2 + $0x10] sm:$0xff]  ;;  %v1204_v39 = vld [vmem:[%s2891_s2 + $0x18] sm:$0xff]  ;;  %v2894_v44 = vmov 0.0   ;;  %vm1277_vm1 = vcmask 1043456  }
  0x12   : > { %s2947_s16 = smov (!%p270_p5, %s1830_s16), 1  ;;  %p272_p6 = scmp.lt.s32.totalorder %s265_s22, 69  ;;  %v1740_v41 = vpack.c.bf16 %v1204_v39, %v1203_v38  ;;  %v1205_v45 = vld [vmem:[%s2891_s2 + $0x20] sm:$0xf]  ;;  %vm1852_vm2 = vmmov 0   ;;  %vm1047_vm3 = vcmask 64512  }
  0x13   : > { %s1748_s23 = smul.u32 70, %s2947_s16  ;;  %s1845_s11 = smov 12   ;;  %1738 = vmatpush3.bf16.msra.mxu0 %v1737_v36  ;;  %1745 = vmatpush3.bf16.msra.mxu1 %v1737_v36  ;;  %vm1069_vm4 = vcmask 97280   ;;  %vm1091_vm5 = vcmask 130048   ;;  %vm1113_vm6 = vcmask 162816   ;;  %vm1135_vm7 = vcmask 195584  }
  0x14   : > { %s2949_s22 = smov (!%p272_p6, %s265_s22), 69  ;;  %s1609_s5 = smul.u32 21, %s283_s30  ;;  %1739 = vmatprep.subr.bf16.mxu0 %v1847_v32  ;;  %1743 = vmatprep.subr.bf16.mxu1 %v1847_v32  ;;  %vm1157_vm8 = vcmask 228352   ;;  %vm1179_vm9 = vcmask 261120   ;;  %vm1213_vm10 = vcmask 293888  }
  0x15   : > { %s275_s24 = sadd.s32 %s1748_s23, %s2949_s22  ;;  %s1846_s12 = smov 8   ;;  %1673 = vmatprep.mubr.msk.f32.mxu0 %vm1852_vm2, %v2894_v44  ;;  %1706 = vmatprep.mubr.msk.f32.mxu1 %vm1852_vm2, %v2894_v44 }
  0x16   : > { %s1608_s25 = sshll.u32 %s275_s24, 3  ;;  %p288_p7 = scmp.lt.s32.totalorder %s1609_s5, 69 }
  0x17   : > { %s1921_s28 = scalar_lea.vmem %s2889_s0, %s1608_s25  ;;  %s1848_s24 = smov 16   ;;  %1741 = vmatpush3.bf16.msra.mxu0 %v1740_v41  ;;  %1746 = vmatpush3.bf16.msra.mxu1 %v1740_v41 }
  0x18   : > { %v308_v0 = vld [vmem:[%s1921_s28 + $0x10] sm:$0xff]  ;;  %v309_v1 = vld [vmem:[%s1921_s28 + $0x18] sm:$0xff]  ;;  %v306_v2 = vld [vmem:[%s1921_s28] sm:$0xff]  ;;  %s2951_s5 = smov (!%p288_p7, %s1609_s5), 69  ;;  %s1849_s30 = smov 20   ;;  %1671 = vmatprep.subr.mxu0 %v2894_v44  ;;  %1744 = vmatprep.subr.mxu1 %v2894_v44 }
  0x19   : > { %330 = vst.msk [vmem:[#allocation2 + $0x10] sm:$0xff] %vm327_vm0, %v308_v0  ;;  %331 = vst.msk [vmem:[#allocation2 + $0x18] sm:$0xff] %vm327_vm0, %v309_v1  ;;  %v307_v3 = vld [vmem:[%s1921_s28 + $0x8] sm:$0xff]  ;;  %v310_v4 = vld [vmem:[%s1921_s28 + $0x20] sm:$0xff]  ;;  %s291_s6 = sadd.s32 %s1748_s23, %s2951_s5  ;;  %s1853_s8 = smov 28  }
  0x1a   : > { %328 = vst.msk [vmem:[#allocation2] sm:$0xff] %vm327_vm0, %v306_v2  ;;  %v311_v5 = vld [vmem:[%s1921_s28 + $0x28] sm:$0xff]  ;;  %329 = vst.msk [vmem:[#allocation2 + $0x8] sm:$0xff] %vm327_vm0, %v307_v3  ;;  %v312_v6 = vld [vmem:[%s1921_s28 + $0x30] sm:$0xff]  ;;  %s1610_s7 = sshll.u32 %s291_s6, 3  ;;  %s1854_s9 = smov 32  }
  0x1b   : > { %332 = vst.msk [vmem:[#allocation2 + $0x20] sm:$0xff] %vm327_vm0, %v310_v4  ;;  %333 = vst.msk [vmem:[#allocation2 + $0x28] sm:$0xff] %vm327_vm0, %v311_v5  ;;  %v313_v7 = vld [vmem:[%s1921_s28 + $0x38] sm:$0xff]  ;;  %v314_v8 = vld [vmem:[%s1921_s28 + $0x40] sm:$0xff]  ;;  %s1993_s10 = scalar_lea.vmem %s2890_s1, %s1610_s7  ;;  %s1851_s7 = smov 24   ;;  %1672 = vmatpush3.msk.msra.mxu0 %vm1277_vm1, %v1205_v45  ;;  %1747 = vmatpush3.msk.msra.mxu1 %vm1277_vm1, %v1205_v45 }
  0x1c   : > { %334 = vst.msk [vmem:[#allocation2 + $0x30] sm:$0xff] %vm327_vm0, %v312_v6  ;;  %335 = vst.msk [vmem:[#allocation2 + $0x38] sm:$0xff] %vm327_vm0, %v313_v7  ;;  %v317_v9 = vld [vmem:[%s1921_s28 + $0x58] sm:$0xff]  ;;  %v318_v10 = vld [vmem:[%s1921_s28 + $0x60] sm:$0xff]  ;;  %p299_p8 = scmp.lt.s32.totalorder %s1826_s15, 2 }
  0x1d   : > { %336 = vst.msk [vmem:[#allocation2 + $0x40] sm:$0xff] %vm327_vm0, %v314_v8  ;;  %v320_v11 = vld [vmem:[%s1921_s28 + $0x70] sm:$0xff]  ;;  %339 = vst.msk [vmem:[#allocation2 + $0x58] sm:$0xff] %vm327_vm0, %v317_v9  ;;  %v321_v12 = vld [vmem:[%s1921_s28 + $0x78] sm:$0xff] }
  0x1e   : > { %340 = vst.msk [vmem:[#allocation2 + $0x60] sm:$0xff] %vm327_vm0, %v318_v10  ;;  %342 = vst.msk [vmem:[#allocation2 + $0x70] sm:$0xff] %vm327_vm0, %v320_v11  ;;  %v319_v13 = vld [vmem:[%s1921_s28 + $0x68] sm:$0xff]  ;;  %v324_v15 = vld [vmem:[%s1921_s28 + $0x90] sm:$0xff]  ;;  %s2953_s15 = smov (!%p299_p8, %s1826_s15), 2 }
  0x1f   : > { %v323_v14 = vld [vmem:[%s1921_s28 + $0x88] sm:$0xff]  ;;  %343 = vst.msk [vmem:[#allocation2 + $0x78] sm:$0xff] %vm327_vm0, %v321_v12  ;;  %341 = vst.msk [vmem:[#allocation2 + $0x68] sm:$0xff] %vm327_vm0, %v319_v13  ;;  %v322_v16 = vld [vmem:[%s1921_s28 + $0x80] sm:$0xff] }
  0x20   : > { %345 = vst.msk [vmem:[#allocation2 + $0x88] sm:$0xff] %vm327_vm0, %v323_v14  ;;  %v325_v17 = vld [vmem:[%s1921_s28 + $0x98] sm:$0xff]  ;;  %346 = vst.msk [vmem:[#allocation2 + $0x90] sm:$0xff] %vm327_vm0, %v324_v15  ;;  %v315_v18 = vld [vmem:[%s1921_s28 + $0x48] sm:$0xff] }
  0x21   : > { %344 = vst.msk [vmem:[#allocation2 + $0x80] sm:$0xff] %vm327_vm0, %v322_v16  ;;  %347 = vst.msk [vmem:[#allocation2 + $0x98] sm:$0xff] %vm327_vm0, %v325_v17  ;;  %v316_v19 = vld [vmem:[%s1921_s28 + $0x50] sm:$0xff]  ;;  %v326_v20 = vld [vmem:[%s1921_s28 + $0xa0] sm:$0xff] }
  0x22   : > { %337 = vst.msk [vmem:[#allocation2 + $0x48] sm:$0xff] %vm327_vm0, %v315_v18  ;;  %338 = vst.msk [vmem:[#allocation2 + $0x50] sm:$0xff] %vm327_vm0, %v316_v19  ;;  %v386_v21 = vld [vmem:[#allocation2 + $0x11] sm:$0xff]  ;;  %v384_v22 = vld [vmem:[#allocation2 + $0x1] sm:$0xff] }
  0x23   : > { %348 = vst.msk [vmem:[#allocation2 + $0xa0] sm:$0xff] %vm327_vm0, %v326_v20  ;;  %469 = vrot.lane.b32.xlu1 %v386_v21, %s1844_s29  ;;  %465 = vrot.lane.b32.xlu0 %v384_v22, %s1844_s29  ;;  %v387_v23 = vld [vmem:[#allocation2 + $0x19] sm:$0xff]  ;;  %v385_v24 = vld [vmem:[#allocation2 + $0x9] sm:$0xff]  ;;  %v1971_v26 = vld [vmem:[#allocation2 + $0x21] sm:$0xff] }
  0x24   : > { %v1969_v25 = vld [vmem:[#allocation2 + $0x29] sm:$0xff]  ;;  %v1978_v27 = vld [vmem:[#allocation2 + $0x39] sm:$0xff]  ;;  %v1980_v28 = vld [vmem:[#allocation2 + $0x31] sm:$0xff] }
  0x25   : > { %v1986_v29 = vld [vmem:[#allocation2 + $0x18] sm:$0xff]  ;;  %v405_v30 = vld [vmem:[#allocation2 + $0x2] sm:$0xff]  ;;  %v406_v37 = vld [vmem:[#allocation2 + $0xa] sm:$0xff] }
  0x26   : > { %v1998_v31 = vld [vmem:[#allocation2 + $0x59] sm:$0xff]  ;;  %v2022_v42 = vld [vmem:[#allocation2 + $0x30] sm:$0xff]  ;;  %v409_v50 = vld [vmem:[#allocation2 + $0x22] sm:$0xff] }
  0x27   : > { %471 = vrot.lane.b32.xlu1 %v387_v23, %s1844_s29  ;;  %467 = vrot.lane.b32.xlu0 %v385_v24, %s1844_s29  ;;  %v349_v35 = vld [vmem:[%s1993_s10] sm:$0xff]  ;;  %2909 = vst [vmem:[#allocation3_spill] sm:$0xff] %v2022_v42  ;;  %v2037_v46 = vld [vmem:[#allocation2 + $0x70] sm:$0xff]  ;;  %v350_v54 = vld [vmem:[%s1993_s10 + $0x8] sm:$0xff] }
  0x28   : > { %356 = vst.msk [vmem:[#allocation2 + $0xa8] sm:$0xff] %vm327_vm0, %v349_v35  ;;  %v2017_v40 = vld [vmem:[#allocation2 + $0x1a] sm:$0xff]  ;;  %v2051_v48 = vld [vmem:[#allocation2 + $0x32] sm:$0xff]  ;;  %357 = vst.msk [vmem:[#allocation2 + $0xb0] sm:$0xff] %vm327_vm0, %v350_v54 }
  0x29   : > { %v2024_v43 = vld [vmem:[#allocation2 + $0x5a] sm:$0xff]  ;;  %v2053_v49 = vld [vmem:[#allocation2 + $0x71] sm:$0xff]  ;;  %v2073_v56 = vld [vmem:[#allocation2 + $0x62] sm:$0xff] }
  0x2a   : > { %v2039_v47 = vld [vmem:[#allocation2 + $0x20] sm:$0xff]  ;;  %v407_v52 = vld [vmem:[#allocation2 + $0x12] sm:$0xff]  ;;  %v2079_v57 = vld [vmem:[#allocation2 + $0x28] sm:$0xff] }
  0x2b   : > { %475 = vrot.lane.b32.xlu1 %v1969_v25, %s1844_s29  ;;  %473 = vrot.lane.b32.xlu0 %v1971_v26, %s1844_s29  ;;  %v2059_v51 = vld [vmem:[#allocation2 + $0x61] sm:$0xff]  ;;  %v2064_v53 = vld [vmem:[#allocation2 + $0x72] sm:$0xff]  ;;  %v2093_v60 = vld [vmem:[#allocation2 + $0x89] sm:$0xff] }
  0x2c   : > { %v2070_v55 = vld [vmem:[#allocation2 + $0x38] sm:$0xff]  ;;  %v2081_v58 = vld [vmem:[#allocation2 + $0x88] sm:$0xff]  ;;  %v351_v3 = vld [vmem:[%s1993_s10 + $0x10] sm:$0xff] }
  0x2d   : > { %2910 = vst [vmem:[#allocation4_spill] sm:$0xff] %v2070_v55  ;;  %2911 = vst [vmem:[#allocation5_spill] sm:$0xff] %v2081_v58  ;;  %v2087_v59 = vld [vmem:[#allocation2 + $0x78] sm:$0xff]  ;;  %v2107_v63 = vld [vmem:[#allocation2 + $0x69] sm:$0xff] }
  0x2e   : > { %2912 = vst [vmem:[#allocation6_spill] sm:$0xff] %v2087_v59  ;;  %v2099_v61 = vld [vmem:[#allocation2 + $0x3a] sm:$0xff]  ;;  %v2109_v0 = vld [vmem:[#allocation2 + $0x8a] sm:$0xff]  ;;  %358 = vst.msk [vmem:[#allocation2 + $0xb8] sm:$0xff] %vm327_vm0, %v351_v3 }
  0x2f   : > { %479 = vrot.lane.b32.xlu1 %v1978_v27, %s1844_s29  ;;  %477 = vrot.lane.b32.xlu0 %v1980_v28, %s1844_s29  ;;  %v2101_v62 = vld [vmem:[#allocation2 + $0x79] sm:$0xff]  ;;  %v2117_v2 = vld [vmem:[#allocation2 + $0x2a] sm:$0xff]  ;;  %v2147_v9 = vld [vmem:[#allocation2 + $0x41] sm:$0xff] }
  0x30   : > { %2913 = vst [vmem:[#allocation7_spill] sm:$0xff] %v2101_v62  ;;  %v2115_v1 = vld [vmem:[#allocation2 + $0x7a] sm:$0xff]  ;;  %v2124_v4 = vld [vmem:[#allocation2 + $0x6a] sm:$0xff]  ;;  %v2159_v11 = vld [vmem:[#allocation2 + $0x92] sm:$0xff] }
  0x31   : > { %2914 = vst [vmem:[#allocation8_spill] sm:$0xff] %v2115_v1  ;;  %v2131_v5 = vld [vmem:[#allocation2 + $0x90] sm:$0xff]  ;;  %v2133_v6 = vld [vmem:[#allocation2 + $0x40] sm:$0xff]  ;;  %v352_v14 = vld [vmem:[%s1993_s10 + $0x18] sm:$0xff] }
  0x32   : > { %2915 = vst [vmem:[#allocation9_spill] sm:$0xff] %v2131_v5  ;;  %2916 = vst [vmem:[#allocation10_spill] sm:$0xff] %v2133_v6  ;;  %v2139_v7 = vld [vmem:[#allocation2 + $0x80] sm:$0xff]  ;;  %v2145_v8 = vld [vmem:[#allocation2 + $0x91] sm:$0xff] }
  0x33   : > { %633 = vrot.lane.b32.xlu1 %v1986_v29, %s1845_s11  ;;  %549 = vrot.lane.b32.xlu0 %v405_v30, %s1846_s12  ;;  %2917 = vst [vmem:[#allocation11_spill] sm:$0xff] %v2139_v7  ;;  %v2153_v10 = vld [vmem:[#allocation2 + $0x81] sm:$0xff]  ;;  %359 = vst.msk [vmem:[#allocation2 + $0xc0] sm:$0xff] %vm327_vm0, %v352_v14  ;;  %v2186_v17 = vld [vmem:[#allocation2 + $0x98] sm:$0xff] }
  0x34   : > { %2918 = vst [vmem:[#allocation12_spill] sm:$0xff] %v2153_v10  ;;  %v2161_v12 = vld [vmem:[#allocation2 + $0x42] sm:$0xff]  ;;  %v2222_v32 = vld [vmem:[#allocation2 + $0x9a] sm:$0xff] }
  0x35   : > { %v2171_v13 = vld [vmem:[#allocation2 + $0x82] sm:$0xff] }
  0x36   : > { %2919 = vst [vmem:[#allocation13_spill] sm:$0xff] %v2171_v13  ;;  %v2177_v15 = vld [vmem:[#allocation2 + $0x48] sm:$0xff]  ;;  %v2241_v38 = vld [vmem:[#allocation2 + $0xa0] sm:$0xff] }
  0x37   : > { %487 = vrot.lane.b32.xlu1 %v1998_v31, %s1844_s29  ;;  %699 = vrot.lane.b32.xlu0 %v387_v23, %s1848_s24  ;;  %v2192_v19 = vld [vmem:[#allocation2 + $0x49] sm:$0xff]  ;;  %v2204_v23 = vld [vmem:[#allocation2 + $0x99] sm:$0xff]  ;;  %v2260_v3 = vld [vmem:[#allocation2 + $0xa1] sm:$0xff] }
  0x38   : > { %v363_v41 = vld [vmem:[#allocation2] sm:$0xff] }
  0x3b   : > { %551 = vrot.lane.b32.xlu1 %v406_v37, %s1846_s12  ;;  %765 = vrot.lane.b32.xlu0 %v2017_v40, %s1849_s30  ;;  %v353_v37 = vld [vmem:[%s1993_s10 + $0x20] sm:$0xff] }
  0x3c   : > { %360 = vst.msk [vmem:[#allocation2 + $0xc8] sm:$0xff] %vm327_vm0, %v353_v37  ;;  %v2263_v37 = vld [vmem:[#allocation2 + $0x51] sm:$0xff] }
  0x3f   : > { %831 = vrot.lane.b32.xlu1 %v2022_v42, %s1851_s7  ;;  %571 = vrot.lane.b32.xlu0 %v2024_v43, %s1846_s12 }
  0x43   : > { %655 = vrot.lane.b32.xlu1 %v2037_v46, %s1845_s11  ;;  %635 = vrot.lane.b32.xlu0 %v2039_v47, %s1845_s11 }
  0x47   : > { %701 = vrot.lane.b32.xlu1 %v1971_v26, %s1848_s24  ;;  %897 = vrot.lane.b32.xlu0 %v1980_v28, %s1853_s8 }
  0x4b   : > { %963 = vrot.lane.b32.xlu1 %v2051_v48, %s1854_s9  ;;  %721 = vrot.lane.b32.xlu0 %v2053_v49, %s1848_s24 }
  0x4f   : > { %767 = vrot.lane.b32.xlu1 %v409_v50, %s1849_s30  ;;  %489 = vrot.lane.b32.xlu0 %v2059_v51, %s1844_s29 }
  0x53   : > { %553 = vrot.lane.b32.xlu1 %v407_v52, %s1846_s12  ;;  %787 = vrot.lane.b32.xlu0 %v2064_v53, %s1849_s30 }
  0x57   : > { %833 = vrot.lane.b32.xlu1 %v2070_v55, %s1851_s7  ;;  %573 = vrot.lane.b32.xlu0 %v2073_v56, %s1846_s12 }
  0x5b   : > { %637 = vrot.lane.b32.xlu1 %v2079_v57, %s1845_s11  ;;  %853 = vrot.lane.b32.xlu0 %v2081_v58, %s1851_s7 }
  0x5f   : > { %899 = vrot.lane.b32.xlu1 %v1978_v27, %s1853_s8  ;;  %657 = vrot.lane.b32.xlu0 %v2087_v59, %s1845_s11 }
  0x63   : > { %703 = vrot.lane.b32.xlu1 %v1969_v25, %s1848_s24  ;;  %919 = vrot.lane.b32.xlu0 %v2093_v60, %s1853_s8  ;;  %v2212_v25 = vld [vmem:[#allocation2 + $0x4a] sm:$0xff] }
  0x67   : > { %965 = vrot.lane.b32.xlu1 %v2099_v61, %s1854_s9  ;;  %723 = vrot.lane.b32.xlu0 %v2101_v62, %s1848_s24 }
  0x6b   : > { %491 = vrot.lane.b32.xlu1 %v2107_v63, %s1844_s29  ;;  %985 = vrot.lane.b32.xlu0 %v2109_v0, %s1854_s9 }
  0x6f   : > { %789 = vrot.lane.b32.xlu1 %v2115_v1, %s1849_s30  ;;  %769 = vrot.lane.b32.xlu0 %v2117_v2, %s1849_s30 }
  0x73   : > { %575 = vrot.lane.b32.xlu1 %v2124_v4, %s1846_s12  ;;  %555 = vrot.lane.b32.xlu0 %v2017_v40, %s1846_s12  ;;  %v2244_v40 = vld [vmem:[#allocation2 + $0x50] sm:$0xff] }
  0x77   : > { %855 = vrot.lane.b32.xlu1 %v2131_v5, %s1851_s7  ;;  %835 = vrot.lane.b32.xlu0 %v2133_v6, %s1851_s7 }
  0x7b   : > { %659 = vrot.lane.b32.xlu1 %v2139_v7, %s1845_s11  ;;  %639 = vrot.lane.b32.xlu0 %v2022_v42, %s1845_s11 }
  0x7f   : > { %921 = vrot.lane.b32.xlu1 %v2145_v8, %s1853_s8  ;;  %901 = vrot.lane.b32.xlu0 %v2147_v9, %s1853_s8 }
  0x83   : > { %725 = vrot.lane.b32.xlu1 %v2153_v10, %s1848_s24  ;;  %705 = vrot.lane.b32.xlu0 %v1980_v28, %s1848_s24 }
  0x87   : > { %987 = vrot.lane.b32.xlu1 %v2159_v11, %s1854_s9  ;;  %967 = vrot.lane.b32.xlu0 %v2161_v12, %s1854_s9 }
  0x8b   : > { %771 = vrot.lane.b32.xlu1 %v2051_v48, %s1849_s30  ;;  %493 = vrot.lane.b32.xlu0 %v2053_v49, %s1844_s29 }
  0x8f   : > { %557 = vrot.lane.b32.xlu1 %v409_v50, %s1846_s12  ;;  %791 = vrot.lane.b32.xlu0 %v2171_v13, %s1849_s30 }
  0x93   : > { %837 = vrot.lane.b32.xlu1 %v2177_v15, %s1851_s7  ;;  %577 = vrot.lane.b32.xlu0 %v2064_v53, %s1846_s12 }
  0x95   : > { %v2184_v16 = vpop.permute.xlu1 %469  ;;  %v466_v18 = vpop.permute.xlu0 %465 }
  0x96   : > { %v1026_v50 = vsel %vm327_vm0, %v363_v41, %v466_v18 }
  0x97   : > { %641 = vrot.lane.b32.xlu1 %v2070_v55, %s1845_s11  ;;  %857 = vrot.lane.b32.xlu0 %v2186_v17, %s1851_s7 }
  0x99   : > { %v2194_v20 = vpop.permute.xlu1 %471  ;;  %v2196_v21 = vpop.permute.xlu0 %467 }
  0x9b   : > { %903 = vrot.lane.b32.xlu1 %v2192_v19, %s1853_s8  ;;  %661 = vrot.lane.b32.xlu0 %v2081_v58, %s1845_s11  ;;  %v364_v58 = vld [vmem:[#allocation2 + $0x8] sm:$0xff] }
  0x9d   : > { %v2202_v22 = vpop.permute.xlu1 %475  ;;  %v2206_v24 = vpop.permute.xlu0 %473 }
  0x9f   : > { %707 = vrot.lane.b32.xlu1 %v1978_v27, %s1848_s24  ;;  %923 = vrot.lane.b32.xlu0 %v2204_v23, %s1853_s8 }
  0xa1   : > { %v2214_v26 = vpop.permute.xlu1 %479  ;;  %v2216_v28 = vpop.permute.xlu0 %477 }
  0xa2   : > { %2920 = vst [vmem:[#allocation14_spill] sm:$0xff] %v2214_v26  ;;  %2921 = vst [vmem:[#allocation15_spill] sm:$0xff] %v2216_v28  ;;  %v354_v26 = vld [vmem:[%s1993_s10 + $0x28] sm:$0xff]  ;;  %v1027_v28 = vsel %vm327_vm0, %v364_v58, %v2196_v21 }
  0xa3   : > { %969 = vrot.lane.b32.xlu1 %v2212_v25, %s1854_s9  ;;  %727 = vrot.lane.b32.xlu0 %v2093_v60, %s1848_s24  ;;  %361 = vst.msk [vmem:[#allocation2 + $0xd0] sm:$0xff] %vm327_vm0, %v354_v26 }
  0xa5   : > { %v634_v30 = vpop.permute.xlu1 %633  ;;  %v550_v27 = vpop.permute.xlu0 %549 }
  0xa6   : > { %v1048_v54 = vsel %vm1047_vm3, %v1026_v50, %v550_v27 }
  0xa7   : > { %495 = vrot.lane.b32.xlu1 %v2101_v62, %s1844_s29  ;;  %989 = vrot.lane.b32.xlu0 %v2222_v32, %s1854_s9  ;;  %v1070_v14 = vsel %vm1069_vm4, %v1048_v54, %v634_v30 }
  0xa9   : > { %v2228_v33 = vpop.permute.xlu1 %487  ;;  %v700_v34 = vpop.permute.xlu0 %699 }
  0xaa   : > { %v1092_v27 = vsel %vm1091_vm5, %v1070_v14, %v700_v34 }
  0xab   : > { %793 = vrot.lane.b32.xlu1 %v2109_v0, %s1849_s30  ;;  %773 = vrot.lane.b32.xlu0 %v2099_v61, %s1849_s30 }
  0xad   : > { %v2234_v35 = vpop.permute.xlu1 %551  ;;  %v766_v36 = vpop.permute.xlu0 %765 }
  0xae   : > { %v1114_v50 = vsel %vm1113_vm6, %v1092_v27, %v766_v36  ;;  %v2279_v36 = vld [vmem:[#allocation2 + $0xa2] sm:$0xff]  ;;  %v2283_v27 = vld [vmem:[#allocation2 + $0x52] sm:$0xff]  ;;  %v1049_v7 = vsel %vm1047_vm3, %v1027_v28, %v2234_v35 }
  0xaf   : > { %579 = vrot.lane.b32.xlu1 %v2115_v1, %s1846_s12  ;;  %559 = vrot.lane.b32.xlu0 %v2117_v2, %s1846_s12  ;;  %v2341_v28 = vld [vmem:[#allocation2 + $0xa9] sm:$0xff] }
  0xb1   : > { %v832_v39 = vpop.permute.xlu1 %831  ;;  %v2246_v45 = vpop.permute.xlu0 %571 }
  0xb2   : > { %v1136_v44 = vsel %vm1135_vm7, %v1114_v50, %v832_v39  ;;  %v2922_v39 = vmov 0.0  }
  0xb3   : > { %859 = vrot.lane.b32.xlu1 %v2241_v38, %s1851_s7  ;;  %839 = vrot.lane.b32.xlu0 %v2244_v40, %s1851_s7 }
  0xb5   : > { %v2253_v52 = vpop.permute.xlu1 %655  ;;  %v636_v2 = vpop.permute.xlu0 %635 }
  0xb7   : > { %663 = vrot.lane.b32.xlu1 %v2131_v5, %s1845_s11  ;;  %643 = vrot.lane.b32.xlu0 %v2133_v6, %s1845_s11  ;;  %v2305_v5 = vld [vmem:[#allocation2 + $0x58] sm:$0xff] }
  0xb8   : > { %v1037_v58 = vsel %vm327_vm0, %v2305_v5, %v2228_v33 }
  0xb9   : > { %v702_v18 = vpop.permute.xlu1 %701  ;;  %v898_v41 = vpop.permute.xlu0 %897 }
  0xba   : > { %v1158_v30 = vsel %vm1157_vm8, %v1136_v44, %v898_v41 }
  0xbb   : > { %925 = vrot.lane.b32.xlu1 %v2260_v3, %s1853_s8  ;;  %905 = vrot.lane.b32.xlu0 %v2263_v37, %s1853_s8 }
  0xbd   : > { %v964_v54 = vpop.permute.xlu1 %963  ;;  %v722_v34 = vpop.permute.xlu0 %721 }
  0xbe   : > { %v1180_v6 = vsel %vm1179_vm9, %v1158_v30, %v964_v54 }
  0xbf   : > { %729 = vrot.lane.b32.xlu1 %v2145_v8, %s1848_s24  ;;  %1674 = vmatmul.mubr.msk.f32.vlgmr.msra.gmra.mrb[0].mxu0 %vm1213_vm10, %v1180_v6 }
  0xc0   : > { %709 = vrot.lane.b32.xlu0 %v2147_v9, %s1848_s24  ;;  %1676 = vmatprep.mubr.msk.f32.mxu0 %vm1852_vm2, %v2922_v39 }
  0xc1   : > { %v768_v14 = vpop.permute.xlu1 %767  ;;  %v2285_v44 = vpop.permute.xlu0 %489 }
  0xc3   : > { %991 = vrot.lane.b32.xlu1 %v2279_v36, %s1854_s9 }
  0xc4   : > { %971 = vrot.lane.b32.xlu0 %v2283_v27, %s1854_s9 }
  0xc5   : > { %v2291_v6 = vpop.permute.xlu1 %553  ;;  %v788_v41 = vpop.permute.xlu0 %787 }
  0xc7   : > { %775 = vrot.lane.b32.xlu1 %v2161_v12, %s1849_s30 }
  0xc8   : > { %497 = vrot.lane.b32.xlu0 %v2153_v10, %s1844_s29 }
  0xc9   : > { %v834_v50 = vpop.permute.xlu1 %833  ;;  %v2297_v30 = vpop.permute.xlu0 %573 }
  0xcb   : > { %561 = vrot.lane.b32.xlu1 %v2051_v48, %s1846_s12  ;;  %v2313_v48 = vld [vmem:[#allocation2 + $0xa8] sm:$0xff] }
  0xcc   : > { %795 = vrot.lane.b32.xlu0 %v2159_v11, %s1849_s30 }
  0xcd   : > { %v2303_v54 = vpop.permute.xlu1 %637  ;;  %v854_v55 = vpop.permute.xlu0 %853 }
  0xcf   : > { %841 = vrot.lane.b32.xlu1 %v2305_v5, %s1851_s7 }
  0xd0   : > { %581 = vrot.lane.b32.xlu0 %v2171_v13, %s1846_s12  ;;  %v1071_v13 = vsel %vm1069_vm4, %v1049_v7, %v636_v2  ;;  %v1059_v7 = vsel %vm1047_vm3, %v1037_v58, %v2246_v45 }
  0xd1   : > { %v900_v10 = vpop.permute.xlu1 %899  ;;  %v2315_v42 = vpop.permute.xlu0 %657  ;;  %v1093_v1 = vsel %vm1091_vm5, %v1071_v13, %v702_v18 }
  0xd2   : > { %v1115_v59 = vsel %vm1113_vm6, %v1093_v1, %v768_v14  ;;  %v1081_v1 = vsel %vm1069_vm4, %v1059_v7, %v2253_v52 }
  0xd3   : > { %645 = vrot.lane.b32.xlu1 %v2177_v15, %s1845_s11  ;;  %v1137_v15 = vsel %vm1135_vm7, %v1115_v59, %v834_v50  ;;  %v1103_v33 = vsel %vm1091_vm5, %v1081_v1, %v722_v34  ;;  %v2393_v1 = vld [vmem:[#allocation2 + $0x60] sm:$0xff] }
  0xd4   : > { %861 = vrot.lane.b32.xlu0 %v2313_v48, %s1851_s7  ;;  %v1159_v13 = vsel %vm1157_vm8, %v1137_v15, %v900_v10  ;;  %v1125_v59 = vsel %vm1113_vm6, %v1103_v33, %v788_v41  ;;  %v2365_v41 = vld [vmem:[#allocation2 + $0xaa] sm:$0xff] }
  0xd5   : > { %v2326_v26 = vpop.permute.xlu1 %703  ;;  %v920_v62 = vpop.permute.xlu0 %919  ;;  %v1147_v10 = vsel %vm1135_vm7, %v1125_v59, %v854_v55 }
  0xd6   : > { %v1169_v52 = vsel %vm1157_vm8, %v1147_v10, %v920_v62  ;;  %v355_v62 = vld [vmem:[%s1993_s10 + $0x30] sm:$0xff]  ;;  %s1750_s10 = smul.u32 63, %s2947_s16 }
  0xd7   : > { %907 = vrot.lane.b32.xlu1 %v1998_v31, %s1853_s8  ;;  %362 = vst.msk [vmem:[#allocation2 + $0xd8] sm:$0xff] %vm327_vm0, %v355_v62 }
  0xd8   : > { %665 = vrot.lane.b32.xlu0 %v2186_v17, %s1845_s11 }
  0xd9   : > { %v966_v21 = vpop.permute.xlu1 %965  ;;  %v724_v2 = vpop.permute.xlu0 %723 }
  0xda   : > { %v1181_v35 = vsel %vm1179_vm9, %v1159_v13, %v966_v21 }
  0xdb   : > { %711 = vrot.lane.b32.xlu1 %v2192_v19, %s1848_s24  ;;  %1677 = vmatmul.mubr.msk.f32.gmra.mrb[2].mxu0 %vm1213_vm10, %v1181_v35  ;;  %v365_v35 = vld [vmem:[#allocation2 + $0x10] sm:$0xff] }
  0xdc   : > { %927 = vrot.lane.b32.xlu0 %v2341_v28, %s1853_s8  ;;  %1679 = vmatprep.mubr.msk.f32.mxu0 %vm1852_vm2, %v2922_v39  ;;  %v1028_v59 = vsel %vm327_vm0, %v365_v35, %v2184_v16 }
  0xdd   : > { %v2356_v45 = vpop.permute.xlu1 %491  ;;  %v986_v18 = vpop.permute.xlu0 %985 }
  0xde   : > { %v1191_v34 = vsel %vm1179_vm9, %v1169_v52, %v986_v18  ;;  %v2410_v52 = vld [vmem:[#allocation2 + $0xb1] sm:$0xff]  ;;  %v1050_v18 = vsel %vm1047_vm3, %v1028_v59, %v2291_v6 }
  0xdf   : > { %973 = vrot.lane.b32.xlu1 %v2024_v43, %s1854_s9  ;;  %1707 = vmatmul.mubr.msk.f32.vlgmr.msra.gmra.mrb[0].mxu1 %vm1213_vm10, %v1191_v34 }
  0xe0   : > { %731 = vrot.lane.b32.xlu0 %v2204_v23, %s1848_s24  ;;  %1709 = vmatprep.mubr.msk.f32.mxu1 %vm1852_vm2, %v2922_v39 }
  0xe1   : > { %v790_v14 = vpop.permute.xlu1 %789  ;;  %v770_v55 = vpop.permute.xlu0 %769 }
  0xe3   : > { %499 = vrot.lane.b32.xlu1 %v2093_v60, %s1844_s29  ;;  %v2387_v60 = vld [vmem:[#allocation2 + $0xb0] sm:$0xff] }
  0xe4   : > { %993 = vrot.lane.b32.xlu0 %v2365_v41, %s1854_s9 }
  0xe5   : > { %v2375_v50 = vpop.permute.xlu1 %575  ;;  %v2377_v58 = vpop.permute.xlu0 %555 }
  0xe7   : > { %797 = vrot.lane.b32.xlu1 %v2222_v32, %s1849_s30 }
  0xe8   : > { %777 = vrot.lane.b32.xlu0 %v2212_v25, %s1849_s30 }
  0xe9   : > { %v856_v15 = vpop.permute.xlu1 %855  ;;  %v836_v7 = vpop.permute.xlu0 %835 }
  0xeb   : > { %583 = vrot.lane.b32.xlu1 %v2109_v0, %s1846_s12 }
  0xec   : > { %563 = vrot.lane.b32.xlu0 %v2099_v61, %s1846_s12  ;;  %v1038_v61 = vsel %vm327_vm0, %v2393_v1, %v2285_v44 }
  0xed   : > { %v2389_v13 = vpop.permute.xlu1 %659  ;;  %v2391_v21 = vpop.permute.xlu0 %639  ;;  %v1060_v10 = vsel %vm1047_vm3, %v1038_v61, %v2297_v30 }
  0xee   : > { %v1082_v44 = vsel %vm1069_vm4, %v1060_v10, %v2315_v42 }
  0xef   : > { %863 = vrot.lane.b32.xlu1 %v2387_v60, %s1851_s7  ;;  %v1104_v16 = vsel %vm1091_vm5, %v1082_v44, %v724_v2 }
  0xf0   : > { %843 = vrot.lane.b32.xlu0 %v2393_v1, %s1851_s7  ;;  %v1126_v35 = vsel %vm1113_vm6, %v1104_v16, %v790_v14 }
  0xf1   : > { %v922_v33 = vpop.permute.xlu1 %921  ;;  %v902_v0 = vpop.permute.xlu0 %901  ;;  %v1148_v42 = vsel %vm1135_vm7, %v1126_v35, %v856_v15  ;;  %v1029_v35 = vsel %vm327_vm0, %v1986_v29, %v2194_v20 }
  0xf2   : > { %v1170_v2 = vsel %vm1157_vm8, %v1148_v42, %v922_v33 }
  0xf3   : > { %667 = vrot.lane.b32.xlu1 %v2241_v38, %s1845_s11  ;;  %v1072_v38 = vsel %vm1069_vm4, %v1050_v18, %v2303_v54 }
  0xf4   : > { %647 = vrot.lane.b32.xlu0 %v2244_v40, %s1845_s11  ;;  %v1094_v30 = vsel %vm1091_vm5, %v1072_v38, %v2326_v26 }
  0xf5   : > { %v2416_v34 = vpop.permute.xlu1 %725  ;;  %v706_v62 = vpop.permute.xlu0 %705  ;;  %v1116_v6 = vsel %vm1113_vm6, %v1094_v30, %v770_v55  ;;  %v2441_v55 = vld [vmem:[#allocation2 + $0xb2] sm:$0xff] }
  0xf6   : > { %v1138_v54 = vsel %vm1135_vm7, %v1116_v6, %v836_v7  ;;  %v2478_v6 = vld [vmem:[#allocation2 + $0x68] sm:$0xff] }
  0xf7   : > { %929 = vrot.lane.b32.xlu1 %v2410_v52, %s1853_s8  ;;  %v1160_v59 = vsel %vm1157_vm8, %v1138_v54, %v902_v0  ;;  %v1039_v20 = vsel %vm327_vm0, %v2478_v6, %v2356_v45 }
  0xf8   : > { %909 = vrot.lane.b32.xlu0 %v2059_v51, %s1853_s8 }
  0xf9   : > { %v988_v61 = vpop.permute.xlu1 %987  ;;  %v968_v14 = vpop.permute.xlu0 %967 }
  0xfa   : > { %v1192_v26 = vsel %vm1179_vm9, %v1170_v2, %v988_v61  ;;  %v1182_v10 = vsel %vm1179_vm9, %v1160_v59, %v968_v14  ;;  %v2498_v61 = vld [vmem:[#allocation2 + $0xb9] sm:$0xff] }
  0xfb   : > { %733 = vrot.lane.b32.xlu1 %v2260_v3, %s1848_s24  ;;  %1710 = vmatmul.mubr.msk.f32.gmra.mrb[2].mxu1 %vm1213_vm10, %v1192_v26 }
  0xfc   : > { %713 = vrot.lane.b32.xlu0 %v2263_v37, %s1848_s24  ;;  %1680 = vmatmul.mubr.msk.f32.gmra.mrb[4].mxu0 %vm1213_vm10, %v1182_v10 }
  0xfd   : > { %v772_v15 = vpop.permute.xlu1 %771  ;;  %1682 = vmatprep.mubr.msk.f32.mxu0 %vm1852_vm2, %v2922_v39  ;;  %1712 = vmatprep.mubr.msk.f32.mxu1 %vm1852_vm2, %v2922_v39  ;;  %v2447_v7 = vpop.permute.xlu0 %493 }
  0xff   : > { %995 = vrot.lane.b32.xlu1 %v2441_v55, %s1854_s9 }
 0x100   : > { %975 = vrot.lane.b32.xlu0 %v2073_v56, %s1854_s9 }
 0x101   : > { %v2453_v33 = vpop.permute.xlu1 %557  ;;  %v792_v0 = vpop.permute.xlu0 %791 }
 0x103   : > { %501 = vrot.lane.b32.xlu1 %v2145_v8, %s1844_s29  ;;  %v2471_v8 = vld [vmem:[#allocation2 + $0xb8] sm:$0xff] }
 0x104   : > { %481 = vrot.lane.b32.xlu0 %v2147_v9, %s1844_s29 }
 0x105   : > { %v838_v18 = vpop.permute.xlu1 %837  ;;  %v2459_v44 = vpop.permute.xlu0 %577 }
 0x107   : > { %799 = vrot.lane.b32.xlu1 %v2279_v36, %s1849_s30 }
 0x108   : > { %779 = vrot.lane.b32.xlu0 %v2283_v27, %s1849_s30 }
 0x109   : > { %v2465_v38 = vpop.permute.xlu1 %641  ;;  %v858_v16 = vpop.permute.xlu0 %857 }
 0x10b   : > { %585 = vrot.lane.b32.xlu1 %v2159_v11, %s1846_s12  ;;  %v1051_v11 = vsel %vm1047_vm3, %v1029_v35, %v2377_v58 }
 0x10c   : > { %565 = vrot.lane.b32.xlu0 %v2161_v12, %s1846_s12  ;;  %v1073_v12 = vsel %vm1069_vm4, %v1051_v11, %v2391_v21  ;;  %v1061_v21 = vsel %vm1047_vm3, %v1039_v20, %v2375_v50 }
 0x10d   : > { %v904_v9 = vpop.permute.xlu1 %903  ;;  %v2473_v30 = vpop.permute.xlu0 %661  ;;  %v1095_v54 = vsel %vm1091_vm5, %v1073_v12, %v706_v62 }
 0x10e   : > { %v1117_v29 = vsel %vm1113_vm6, %v1095_v54, %v772_v15 }
 0x10f   : > { %865 = vrot.lane.b32.xlu1 %v2471_v8, %s1851_s7  ;;  %v1139_v58 = vsel %vm1135_vm7, %v1117_v29, %v838_v18 }
 0x110   : > { %845 = vrot.lane.b32.xlu0 %v2478_v6, %s1851_s7  ;;  %v1161_v62 = vsel %vm1157_vm8, %v1139_v58, %v904_v9 }
 0x111   : > { %v708_v42 = vpop.permute.xlu1 %707  ;;  %v924_v2 = vpop.permute.xlu0 %923 }
 0x113   : > { %669 = vrot.lane.b32.xlu1 %v2313_v48, %s1845_s11  ;;  %v1083_v48 = vsel %vm1069_vm4, %v1061_v21, %v2389_v13 }
 0x114   : > { %649 = vrot.lane.b32.xlu0 %v2305_v5, %s1845_s11  ;;  %v1105_v45 = vsel %vm1091_vm5, %v1083_v48, %v2416_v34 }
 0x115   : > { %v970_v59 = vpop.permute.xlu1 %969  ;;  %v728_v14 = vpop.permute.xlu0 %727  ;;  %v1127_v5 = vsel %vm1113_vm6, %v1105_v45, %v792_v0  ;;  %v2526_v0 = vld [vmem:[#allocation2 + $0xba] sm:$0xff] }
 0x116   : > { %v1183_v26 = vsel %vm1179_vm9, %v1161_v62, %v970_v59  ;;  %v1149_v50 = vsel %vm1135_vm7, %v1127_v5, %v858_v16 }
 0x117   : > { %931 = vrot.lane.b32.xlu1 %v2498_v61, %s1853_s8  ;;  %1683 = vmatmul.mubr.msk.f32.gmra.mrb[6].mxu0 %vm1213_vm10, %v1183_v26  ;;  %v1171_v10 = vsel %vm1157_vm8, %v1149_v50, %v924_v2  ;;  %v1040_v2 = vsel %vm327_vm0, %v2037_v46, %v2447_v7  ;;  %v441_v26 = vld [vmem:[#allocation2 + $0xc2] sm:$0xff] }
 0x118   : > { %911 = vrot.lane.b32.xlu0 %v2107_v63, %s1853_s8  ;;  %1685 = vmatprep.mubr.msk.f32.mxu0 %vm1852_vm2, %v2922_v39 }
 0x119   : > { %v2517_v13 = vpop.permute.xlu1 %495  ;;  %v990_v34 = vpop.permute.xlu0 %989 }
 0x11a   : > { %v1193_v15 = vsel %vm1179_vm9, %v1171_v10, %v990_v34  ;;  %v1031_v10 = vsel %vm327_vm0, %v2079_v57, %v2202_v22  ;;  %v2923_v57 = vld [vmem:[#allocation6_spill] sm:$0xff] }
 0x11b   : > { %735 = vrot.lane.b32.xlu1 %v2341_v28, %s1848_s24  ;;  %1713 = vmatmul.mubr.msk.f32.gmra.mrb[4].mxu1 %vm1213_vm10, %v1193_v15  ;;  %v1041_v22 = vsel %vm327_vm0, %v2923_v57, %v2517_v13 }
 0x11c   : > { %715 = vrot.lane.b32.xlu0 %v1998_v31, %s1848_s24  ;;  %1715 = vmatprep.mubr.msk.f32.mxu1 %vm1852_vm2, %v2922_v39 }
 0x11d   : > { %v794_v18 = vpop.permute.xlu1 %793  ;;  %v774_v16 = vpop.permute.xlu0 %773 }
 0x11f   : > { %997 = vrot.lane.b32.xlu1 %v2526_v0, %s1854_s9 }
 0x120   : > { %977 = vrot.lane.b32.xlu0 %v2124_v4, %s1854_s9 }
 0x121   : > { %v2534_v9 = vpop.permute.xlu1 %579  ;;  %v2536_v28 = vpop.permute.xlu0 %559 }
 0x123   : > { %503 = vrot.lane.b32.xlu1 %v2204_v23, %s1844_s29  ;;  %v435_v23 = vld [vmem:[#allocation2 + $0xc0] sm:$0xff] }
 0x124   : > { %483 = vrot.lane.b32.xlu0 %v2192_v19, %s1844_s29 }
 0x125   : > { %v860_v31 = vpop.permute.xlu1 %859  ;;  %v840_v35 = vpop.permute.xlu0 %839 }
 0x127   : > { %801 = vrot.lane.b32.xlu1 %v2365_v41, %s1849_s30  ;;  %v1062_v41 = vsel %vm1047_vm3, %v1040_v2, %v2459_v44 }
 0x128   : > { %781 = vrot.lane.b32.xlu0 %v2024_v43, %s1849_s30  ;;  %v1030_v43 = vsel %vm327_vm0, %v2039_v47, %v2206_v24 }
 0x129   : > { %v2546_v11 = vpop.permute.xlu1 %663  ;;  %v644_v12 = vpop.permute.xlu0 %643 }
 0x12b   : > { %587 = vrot.lane.b32.xlu1 %v2222_v32, %s1846_s12  ;;  %v1084_v32 = vsel %vm1069_vm4, %v1062_v41, %v2473_v30  ;;  %v438_v30 = vld [vmem:[#allocation2 + $0xc1] sm:$0xff] }
 0x12c   : > { %567 = vrot.lane.b32.xlu0 %v2212_v25, %s1846_s12  ;;  %v1052_v25 = vsel %vm1047_vm3, %v1030_v43, %v2453_v33  ;;  %v1106_v20 = vsel %vm1091_vm5, %v1084_v32, %v728_v14  ;;  %v2924_v43 = vld [vmem:[#allocation7_spill] sm:$0xff] }
 0x12d   : > { %v926_v54 = vpop.permute.xlu1 %925  ;;  %v906_v19 = vpop.permute.xlu0 %905  ;;  %v1074_v7 = vsel %vm1069_vm4, %v1052_v25, %v2465_v38  ;;  %v1128_v44 = vsel %vm1113_vm6, %v1106_v20, %v794_v18  ;;  %v442_v25 = vld [vmem:[#allocation2 + $0xca] sm:$0xff] }
 0x12e   : > { %v1096_v24 = vsel %vm1091_vm5, %v1074_v7, %v708_v42  ;;  %v1150_v33 = vsel %vm1135_vm7, %v1128_v44, %v860_v31  ;;  %v2925_v7 = vld [vmem:[#allocation8_spill] sm:$0xff]  ;;  %v2926_v44 = vld [vmem:[#allocation11_spill] sm:$0xff] }
 0x12f   : > { %867 = vrot.lane.b32.xlu1 %v435_v23, %s1851_s7  ;;  %v1172_v58 = vsel %vm1157_vm8, %v1150_v33, %v926_v54 }
 0x130   : > { %847 = vrot.lane.b32.xlu0 %v2037_v46, %s1851_s7  ;;  %v1118_v46 = vsel %vm1113_vm6, %v1096_v24, %v774_v16 }
 0x131   : > { %v2567_v29 = vpop.permute.xlu1 %729  ;;  %v1140_v38 = vsel %vm1135_vm7, %v1118_v46, %v840_v35  ;;  %v440_v46 = vld [vmem:[#allocation2 + $0xd1] sm:$0xff] }
 0x132   : > { %v710_v47 = vpop.permute.xlu0 %709  ;;  %v1162_v42 = vsel %vm1157_vm8, %v1140_v38, %v906_v19 }
 0x133   : > { %671 = vrot.lane.b32.xlu1 %v2387_v60, %s1845_s11 }
 0x134   : > { %651 = vrot.lane.b32.xlu0 %v2393_v1, %s1845_s11 }
 0x135   : > { %v992_v21 = vpop.permute.xlu1 %991 }
 0x136   : > { %v1194_v62 = vsel %vm1179_vm9, %v1172_v58, %v992_v21  ;;  %v972_v59 = vpop.permute.xlu0 %971  ;;  %v2928_v58 = vld [vmem:[#allocation3_spill] sm:$0xff] }
 0x137   : > { %v1184_v60 = vsel %vm1179_vm9, %v1162_v42, %v972_v59  ;;  %933 = vrot.lane.b32.xlu1 %v438_v30, %s1853_s8  ;;  %1716 = vmatmul.mubr.msk.f32.gmra.mrb[6].mxu1 %vm1213_vm10, %v1194_v62  ;;  %v2929_v42 = vld [vmem:[#allocation12_spill] sm:$0xff]  ;;  %v443_v62 = vld [vmem:[#allocation2 + $0xd2] sm:$0xff] }
 0x138   : > { %913 = vrot.lane.b32.xlu0 %v2053_v49, %s1853_s8  ;;  %1686 = vmatmul.mubr.msk.f32.gmra.mrb[8].mxu0 %vm1213_vm10, %v1184_v60 }
 0x139   : > { %v776_v1 = vpop.permute.xlu1 %775  ;;  %1688 = vmatprep.mubr.msk.f32.mxu0 %vm1852_vm2, %v2922_v39  ;;  %1718 = vmatprep.mubr.msk.f32.mxu1 %vm1852_vm2, %v2922_v39 }
 0x13a   : > { %v2594_v48 = vpop.permute.xlu0 %497 }
 0x13b   : > { %737 = vrot.lane.b32.xlu1 %v2410_v52, %s1848_s24  ;;  %v1042_v38 = vsel %vm327_vm0, %v2926_v44, %v2594_v48 }
 0x13c   : > { %717 = vrot.lane.b32.xlu0 %v2059_v51, %s1848_s24 }
 0x13d   : > { %v2600_v14 = vpop.permute.xlu1 %561 }
 0x13e   : > { %v796_v49 = vpop.permute.xlu0 %795 }
 0x13f   : > { %999 = vrot.lane.b32.xlu1 %v441_v26, %s1854_s9 }
 0x140   : > { %979 = vrot.lane.b32.xlu0 %v2064_v53, %s1854_s9 }
 0x141   : > { %v842_v45 = vpop.permute.xlu1 %841 }
 0x142   : > { %v2605_v5 = vpop.permute.xlu0 %581 }
 0x143   : > { %505 = vrot.lane.b32.xlu1 %v2260_v3, %s1844_s29  ;;  %v1053_v3 = vsel %vm1047_vm3, %v1031_v10, %v2536_v28  ;;  %v1064_v21 = vsel %vm1047_vm3, %v1042_v38, %v2605_v5 }
 0x144   : > { %485 = vrot.lane.b32.xlu0 %v2263_v37, %s1844_s29  ;;  %v436_v37 = vld [vmem:[#allocation2 + $0xc8] sm:$0xff]  ;;  %s1749_s29 = smul.u32 21, %s2953_s15 }
 0x145   : > { %v2611_v52 = vpop.permute.xlu1 %645 }
 0x146   : > { %v862_v51 = vpop.permute.xlu0 %861  ;;  %s303_s15 = sadd.s32 %s1750_s10, %s1749_s29 }
 0x147   : > { %803 = vrot.lane.b32.xlu1 %v2441_v55, %s1849_s30  ;;  %v1075_v55 = vsel %vm1069_vm4, %v1053_v3, %v644_v12 }
 0x148   : > { %783 = vrot.lane.b32.xlu0 %v2073_v56, %s1849_s30  ;;  %v1097_v34 = vsel %vm1091_vm5, %v1075_v55, %v710_v47 }
 0x149   : > { %v908_v50 = vpop.permute.xlu1 %907  ;;  %v1119_v18 = vsel %vm1113_vm6, %v1097_v34, %v776_v1 }
 0x14a   : > { %v2617_v53 = vpop.permute.xlu0 %665 }
 0x14b   : > { %589 = vrot.lane.b32.xlu1 %v2279_v36, %s1846_s12  ;;  %v1141_v36 = vsel %vm1135_vm7, %v1119_v18, %v842_v45  ;;  %v1086_v60 = vsel %vm1069_vm4, %v1064_v21, %v2617_v53 }
 0x14c   : > { %569 = vrot.lane.b32.xlu0 %v2283_v27, %s1846_s12  ;;  %v1063_v27 = vsel %vm1047_vm3, %v1041_v22, %v2534_v9  ;;  %v1163_v16 = vsel %vm1157_vm8, %v1141_v36, %v908_v50  ;;  %v439_v9 = vld [vmem:[#allocation2 + $0xc9] sm:$0xff]  ;;  %s1611_s12 = sshll.u32 %s303_s15, 3 }
 0x14d   : > { %v2629_v56 = vpop.permute.xlu1 %711  ;;  %v1085_v31 = vsel %vm1069_vm4, %v1063_v27, %v2546_v11  ;;  %v2930_v50 = vld [vmem:[#allocation13_spill] sm:$0xff]  ;;  %s2759_s22 = scalar_lea.vmem %s2893_s4, %s1611_s12 }
 0x14e   : > { %v928_v15 = vpop.permute.xlu0 %927  ;;  %v1107_v13 = vsel %vm1091_vm5, %v1085_v31, %v2567_v29 }
 0x14f   : > { %869 = vrot.lane.b32.xlu1 %v436_v37, %s1851_s7  ;;  %v1129_v23 = vsel %vm1113_vm6, %v1107_v13, %v796_v49  ;;  %v2931_v13 = vld [vmem:[#allocation5_spill] sm:$0xff] }
 0x150   : > { %849 = vrot.lane.b32.xlu0 %v2923_v57, %s1851_s7  ;;  %v1151_v11 = vsel %vm1135_vm7, %v1129_v23, %v862_v51 }
 0x151   : > { %v974_v28 = vpop.permute.xlu1 %973  ;;  %v1173_v19 = vsel %vm1157_vm8, %v1151_v11, %v928_v15  ;;  %v2933_v11 = vld [vmem:[#allocation4_spill] sm:$0xff] }
 0x152   : > { %v1185_v35 = vsel %vm1179_vm9, %v1163_v16, %v974_v28  ;;  %v732_v12 = vpop.permute.xlu0 %731 }
 0x153   : > { %673 = vrot.lane.b32.xlu1 %v2471_v8, %s1845_s11  ;;  %1689 = vmatmul.mubr.msk.f32.gmra.mrb[10].mxu0 %vm1213_vm10, %v1185_v35  ;;  %v1108_v26 = vsel %vm1091_vm5, %v1086_v60, %v732_v12 }
 0x154   : > { %653 = vrot.lane.b32.xlu0 %v2478_v6, %s1845_s11  ;;  %1691 = vmatprep.mubr.msk.f32.mxu0 %vm1852_vm2, %v2922_v39 }
 0x155   : > { %v2657_v54 = vpop.permute.xlu1 %499 }
 0x156   : > { %v994_v2 = vpop.permute.xlu0 %993  ;;  %v1043_v23 = vsel %vm327_vm0, %v2931_v13, %v2657_v54 }
 0x157   : > { %v1195_v8 = vsel %vm1179_vm9, %v1173_v19, %v994_v2  ;;  %935 = vrot.lane.b32.xlu1 %v439_v9, %s1853_s8  ;;  %v2932_v9 = vld [vmem:[#allocation14_spill] sm:$0xff] }
 0x158   : > { %915 = vrot.lane.b32.xlu0 %v2924_v43, %s1853_s8  ;;  %1719 = vmatmul.mubr.msk.f32.gmra.mrb[8].mxu1 %vm1213_vm10, %v1195_v8  ;;  %v1033_v19 = vsel %vm327_vm0, %v2933_v11, %v2932_v9 }
 0x159   : > { %v798_v6 = vpop.permute.xlu1 %797  ;;  %1721 = vmatprep.mubr.msk.f32.mxu1 %vm1852_vm2, %v2922_v39 }
 0x15a   : > { %v778_v41 = vpop.permute.xlu0 %777  ;;  %v1130_v5 = vsel %vm1113_vm6, %v1108_v26, %v798_v6 }
 0x15b   : > { %739 = vrot.lane.b32.xlu1 %v2498_v61, %s1848_s24  ;;  %v437_v61 = vld [vmem:[#allocation2 + $0xd0] sm:$0xff] }
 0x15c   : > { %719 = vrot.lane.b32.xlu0 %v2107_v63, %s1848_s24 }
 0x15d   : > { %v2671_v32 = vpop.permute.xlu1 %583 }
 0x15e   : > { %v2673_v29 = vpop.permute.xlu0 %563  ;;  %v1065_v2 = vsel %vm1047_vm3, %v1043_v23, %v2671_v32 }
 0x15f   : > { %1001 = vrot.lane.b32.xlu1 %v442_v25, %s1854_s9  ;;  %v1055_v8 = vsel %vm1047_vm3, %v1033_v19, %v2673_v29  ;;  %v2747_v29 = vld [vmem:[%s2892_s3] ss:$0 sm:$0xff] }
 0x160   : > { %981 = vrot.lane.b32.xlu0 %v2925_v7, %s1854_s9 }
 0x161   : > { %v864_v20 = vpop.permute.xlu1 %863 }
 0x162   : > { %v844_v47 = vpop.permute.xlu0 %843 }
 0x163   : > { %805 = vrot.lane.b32.xlu1 %v2526_v0, %s1849_s30  ;;  %v2927_v0 = vld [vmem:[#allocation15_spill] sm:$0xff] }
 0x164   : > { %785 = vrot.lane.b32.xlu0 %v2124_v4, %s1849_s30  ;;  %v1032_v4 = vsel %vm327_vm0, %v2928_v58, %v2927_v0 }
 0x165   : > { %v668_v63 = vpop.permute.xlu1 %667  ;;  %v1054_v59 = vsel %vm1047_vm3, %v1032_v4, %v2600_v14  ;;  %v1152_v14 = vsel %vm1135_vm7, %v1130_v5, %v864_v20 }
 0x166   : > { %v648_v24 = vpop.permute.xlu0 %647  ;;  %v1076_v48 = vsel %vm1069_vm4, %v1054_v59, %v2611_v52  ;;  %v1087_v43 = vsel %vm1069_vm4, %v1065_v2, %v668_v63 }
 0x167   : > { %871 = vrot.lane.b32.xlu1 %v437_v61, %s1851_s7  ;;  %v1098_v45 = vsel %vm1091_vm5, %v1076_v48, %v2629_v56 }
 0x168   : > { %851 = vrot.lane.b32.xlu0 %v2926_v44, %s1851_s7  ;;  %v1120_v51 = vsel %vm1113_vm6, %v1098_v45, %v778_v41  ;;  %v1077_v41 = vsel %vm1069_vm4, %v1055_v8, %v648_v24 }
 0x169   : > { %v930_v33 = vpop.permute.xlu1 %929  ;;  %v1142_v53 = vsel %vm1135_vm7, %v1120_v51, %v844_v47 }
 0x16a   : > { %v910_v30 = vpop.permute.xlu0 %909  ;;  %v1174_v52 = vsel %vm1157_vm8, %v1152_v14, %v930_v33  ;;  %v2934_v14 = vld [vmem:[#allocation9_spill] sm:$0xff] }
 0x16b   : > { %937 = vrot.lane.b32.xlu1 %v440_v46, %s1853_s8  ;;  %v1164_v3 = vsel %vm1157_vm8, %v1142_v53, %v910_v30  ;;  %v2935_v53 = vld [vmem:[#allocation10_spill] sm:$0xff] }
 0x16c   : > { %917 = vrot.lane.b32.xlu0 %v2929_v42, %s1853_s8 }
 0x16d   : > { %v734_v1 = vpop.permute.xlu1 %733 }
 0x16e   : > { %v714_v49 = vpop.permute.xlu0 %713  ;;  %v1109_v25 = vsel %vm1091_vm5, %v1087_v43, %v734_v1 }
 0x16f   : > { %1003 = vrot.lane.b32.xlu1 %v443_v62, %s1854_s9  ;;  %v1099_v54 = vsel %vm1091_vm5, %v1077_v41, %v714_v49 }
 0x170   : > { %983 = vrot.lane.b32.xlu0 %v2930_v50, %s1854_s9 }
 0x171   : > { %v996_v10 = vpop.permute.xlu1 %995 }
 0x172   : > { %v1196_v37 = vsel %vm1179_vm9, %v1174_v52, %v996_v10  ;;  %v976_v55 = vpop.permute.xlu0 %975 }
 0x173   : > { %v1186_v56 = vsel %vm1179_vm9, %v1164_v3, %v976_v55  ;;  %1722 = vmatmul.mubr.msk.f32.gmra.mrb[10].mxu1 %vm1213_vm10, %v1196_v37 }
 0x174   : > { %1692 = vmatmul.mubr.msk.f32.gmra.mrb[12].mxu0 %vm1213_vm10, %v1186_v56  ;;  %1724 = vmatprep.mubr.msk.f32.mxu1 %vm1852_vm2, %v2922_v39 }
 0x175   : > { %v2720_v34 = vpop.permute.xlu1 %501  ;;  %1694 = vmatprep.mubr.msk.f32.mxu0 %vm1852_vm2, %v2922_v39 }
 0x176   : > { %v482_v15 = vpop.permute.xlu0 %481  ;;  %v1044_v50 = vsel %vm327_vm0, %v2934_v14, %v2720_v34 }
 0x177   : > { %v1034_v52 = vsel %vm327_vm0, %v2935_v53, %v482_v15 }
 0x179   : > { %v800_v18 = vpop.permute.xlu1 %799 }
 0x17a   : > { %v780_v57 = vpop.permute.xlu0 %779  ;;  %v1131_v20 = vsel %vm1113_vm6, %v1109_v25, %v800_v18 }
 0x17b   : > { %v1121_v47 = vsel %vm1113_vm6, %v1099_v54, %v780_v57 }
 0x17d   : > { %v586_v22 = vpop.permute.xlu1 %585 }
 0x17e   : > { %v566_v36 = vpop.permute.xlu0 %565  ;;  %v1066_v10 = vsel %vm1047_vm3, %v1044_v50, %v586_v22 }
 0x17f   : > { %v1056_v3 = vsel %vm1047_vm3, %v1034_v52, %v566_v36 }
 0x181   : > { %v866_v27 = vpop.permute.xlu1 %865 }
 0x182   : > { %v846_v16 = vpop.permute.xlu0 %845  ;;  %v1153_v32 = vsel %vm1135_vm7, %v1131_v20, %v866_v27 }
 0x183   : > { %v1143_v61 = vsel %vm1135_vm7, %v1121_v47, %v846_v16 }
 0x185   : > { %v670_v28 = vpop.permute.xlu1 %669 }
 0x186   : > { %v650_v31 = vpop.permute.xlu0 %649  ;;  %v1088_v37 = vsel %vm1069_vm4, %v1066_v10, %v670_v28 }
 0x187   : > { %v1078_v56 = vsel %vm1069_vm4, %v1056_v3, %v650_v31 }
 0x189   : > { %v932_v35 = vpop.permute.xlu1 %931 }
 0x18a   : > { %v912_v12 = vpop.permute.xlu0 %911  ;;  %v1175_v63 = vsel %vm1157_vm8, %v1153_v32, %v932_v35 }
 0x18b   : > { %v1165_v44 = vsel %vm1157_vm8, %v1143_v61, %v912_v12 }
 0x18d   : > { %v736_v6 = vpop.permute.xlu1 %735 }
 0x18e   : > { %v716_v7 = vpop.permute.xlu0 %715  ;;  %v1110_v18 = vsel %vm1091_vm5, %v1088_v37, %v736_v6 }
 0x18f   : > { %v1100_v16 = vsel %vm1091_vm5, %v1078_v56, %v716_v7 }
 0x191   : > { %v998_v24 = vpop.permute.xlu1 %997 }
 0x192   : > { %v1197_v46 = vsel %vm1179_vm9, %v1175_v63, %v998_v24  ;;  %v978_v33 = vpop.permute.xlu0 %977  ;;  %v1347_v30 = vpop.f32.mrb[0].mxu0 }
 0x193   : > { %v1187_v38 = vsel %vm1179_vm9, %v1165_v44, %v978_v33  ;;  %v1348_v0 = vadd.f32 %v2747_v29, %v1347_v30  ;;  %v1675_v58 = vpop.f32.mrb[1].mxu0  ;;  %1725 = vmatmul.mubr.msk.f32.gmra.mrb[12].mxu1 %vm1213_vm10, %v1197_v46  ;;  %v1802_v30 = vld [vmem:[#allocation2 + $0x48] sm:$0xff] }
 0x194   : > { %1695 = vmatmul.mubr.msk.f32.gmra.mrb[14].mxu0 %vm1213_vm10, %v1187_v38  ;;  %1727 = vmatprep.mubr.msk.f32.mxu1 %vm1852_vm2, %v2922_v39 }
 0x195   : > { %v1451_v4 = vmax.f32 %v1348_v0, 0.0  ;;  %v504_v21 = vpop.permute.xlu1 %503  ;;  %1697 = vmatprep.mubr.msk.f32.mxu0 %vm1852_vm2, %v2922_v39 }
 0x196   : > { %v484_v42 = vpop.permute.xlu0 %483  ;;  %v1045_v33 = vsel %vm327_vm0, %v2186_v17, %v504_v21 }
 0x197   : > { %1472 = vst [vmem:[%s2759_s22] sm:$0xff] %v1451_v4  ;;  %v1035_v38 = vsel %vm327_vm0, %v1802_v30, %v484_v42 }
 0x199   : > { %v802_v62 = vpop.permute.xlu1 %801 }
 0x19a   : > { %v782_v59 = vpop.permute.xlu0 %781  ;;  %v1132_v34 = vsel %vm1113_vm6, %v1110_v18, %v802_v62 }
 0x19b   : > { %v1122_v22 = vsel %vm1113_vm6, %v1100_v16, %v782_v59 }
 0x19d   : > { %v588_v60 = vpop.permute.xlu1 %587 }
 0x19e   : > { %v568_v1 = vpop.permute.xlu0 %567  ;;  %v1067_v0 = vsel %vm1047_vm3, %v1045_v33, %v588_v60 }
 0x19f   : > { %v1057_v58 = vsel %vm1047_vm3, %v1035_v38, %v568_v1 }
 0x1a1   : > { %v868_v48 = vpop.permute.xlu1 %867 }
 0x1a2   : > { %v848_v26 = vpop.permute.xlu0 %847  ;;  %v1154_v36 = vsel %vm1135_vm7, %v1132_v34, %v868_v48 }
 0x1a3   : > { %v1144_v28 = vsel %vm1135_vm7, %v1122_v22, %v848_v26 }
 0x1a5   : > { %v672_v49 = vpop.permute.xlu1 %671 }
 0x1a6   : > { %v652_v45 = vpop.permute.xlu0 %651  ;;  %v1089_v4 = vsel %vm1069_vm4, %v1067_v0, %v672_v49 }
 0x1a7   : > { %v1079_v59 = vsel %vm1069_vm4, %v1057_v58, %v652_v45 }
 0x1a9   : > { %v934_v5 = vpop.permute.xlu1 %933 }
 0x1aa   : > { %v914_v51 = vpop.permute.xlu0 %913  ;;  %v1176_v31 = vsel %vm1157_vm8, %v1154_v36, %v934_v5 }
 0x1ab   : > { %v1166_v23 = vsel %vm1157_vm8, %v1144_v28, %v914_v51 }
 0x1ad   : > { %v738_v55 = vpop.permute.xlu1 %737 }
 0x1ae   : > { %v718_v57 = vpop.permute.xlu0 %717  ;;  %v1352_v27 = vpop.f32.mrb[2].mxu0  ;;  %v1111_v48 = vsel %vm1091_vm5, %v1089_v4, %v738_v55 }
 0x1af   : > { %v1353_v15 = vadd.f32 %v2747_v29, %v1352_v27  ;;  %v1678_v35 = vpop.f32.mrb[3].mxu0  ;;  %v1101_v51 = vsel %vm1091_vm5, %v1079_v59, %v718_v57 }
 0x1b1   : > { %v1452_v12 = vmax.f32 %v1353_v15, 0.0  ;;  %v1000_v13 = vpop.permute.xlu1 %999  ;;  %v1803_v15 = vld [vmem:[#allocation2 + $0xa0] sm:$0xff] }
 0x1b2   : > { %v1198_v9 = vsel %vm1179_vm9, %v1176_v31, %v1000_v13  ;;  %v980_v11 = vpop.permute.xlu0 %979  ;;  %v1402_v2 = vpop.f32.mrb[0].mxu1 }
 0x1b3   : > { %1473 = vst [vmem:[%s2759_s22 + $0x8] sm:$0xff] %v1452_v12  ;;  %v1188_v19 = vsel %vm1179_vm9, %v1166_v23, %v980_v11  ;;  %1728 = vmatmul.mubr.msk.f32.gmra.mrb[14].mxu1 %vm1213_vm10, %v1198_v9  ;;  %v1403_v8 = vadd.f32 %v2747_v29, %v1402_v2  ;;  %v1708_v43 = vpop.f32.mrb[1].mxu1 }
 0x1b4   : > { %1698 = vmatmul.mubr.msk.f32.gmra.mrb[16].mxu0 %vm1213_vm10, %v1188_v19  ;;  %1730 = vmatprep.mubr.msk.f32.mxu1 %vm1852_vm2, %v2922_v39 }
 0x1b5   : > { %v506_v6 = vpop.permute.xlu1 %505  ;;  %1700 = vmatprep.mubr.msk.f32.mxu0 %vm1852_vm2, %v2922_v39  ;;  %v1462_v41 = vmax.f32 %v1403_v8, 0.0 }
 0x1b6   : > { %v486_v25 = vpop.permute.xlu0 %485  ;;  %v1046_v35 = vsel %vm327_vm0, %v1803_v15, %v506_v6 }
 0x1b7   : > { %1483 = vst [vmem:[%s2759_s22 + $0x58] sm:$0xff] %v1462_v41  ;;  %v1036_v22 = vsel %vm327_vm0, %v2244_v40, %v486_v25 }
 0x1b9   : > { %v804_v7 = vpop.permute.xlu1 %803 }
 0x1ba   : > { %v784_v54 = vpop.permute.xlu0 %783  ;;  %v1133_v17 = vsel %vm1113_vm6, %v1111_v48, %v804_v7 }
 0x1bb   : > { %v1123_v1 = vsel %vm1113_vm6, %v1101_v51, %v784_v54 }
 0x1bd   : > { %v590_v20 = vpop.permute.xlu1 %589 }
 0x1be   : > { %v570_v47 = vpop.permute.xlu0 %569  ;;  %v1068_v36 = vsel %vm1047_vm3, %v1046_v35, %v590_v20 }
 0x1bf   : > { %v1058_v28 = vsel %vm1047_vm3, %v1036_v22, %v570_v47 }
 0x1c1   : > { %v870_v32 = vpop.permute.xlu1 %869 }
 0x1c2   : > { %v850_v61 = vpop.permute.xlu0 %849  ;;  %v1155_v49 = vsel %vm1135_vm7, %v1133_v17, %v870_v32 }
 0x1c3   : > { %v1145_v50 = vsel %vm1135_vm7, %v1123_v1, %v850_v61 }
 0x1c5   : > { %v674_v63 = vpop.permute.xlu1 %673 }
 0x1c6   : > { %v654_v24 = vpop.permute.xlu0 %653  ;;  %v1090_v31 = vsel %vm1069_vm4, %v1068_v36, %v674_v63 }
 0x1c7   : > { %v1080_v13 = vsel %vm1069_vm4, %v1058_v28, %v654_v24 }
 0x1c9   : > { %v936_v44 = vpop.permute.xlu1 %935 }
 0x1ca   : > { %v916_v46 = vpop.permute.xlu0 %915  ;;  %v1177_v53 = vsel %vm1157_vm8, %v1155_v49, %v936_v44 }
 0x1cb   : > { %v1167_v3 = vsel %vm1157_vm8, %v1145_v50, %v916_v46 }
 0x1cd   : > { %v740_v62 = vpop.permute.xlu1 %739 }
 0x1ce   : > { %v720_v26 = vpop.permute.xlu0 %719  ;;  %v1407_v5 = vpop.f32.mrb[2].mxu1 }
 0x1cf   : > { %v1357_v21 = vpop.f32.mrb[4].mxu0  ;;  %v1408_v42 = vadd.f32 %v2747_v29, %v1407_v5  ;;  %v1711_v60 = vpop.f32.mrb[3].mxu1  ;;  %v1102_v9 = vsel %vm1091_vm5, %v1080_v13, %v720_v26 }
 0x1d0   : > { %v1358_v45 = vadd.f32 %v2747_v29, %v1357_v21  ;;  %v1681_v14 = vpop.f32.mrb[5].mxu0 }
 0x1d1   : > { %v1463_v52 = vmax.f32 %v1408_v42, 0.0  ;;  %v1002_v10 = vpop.permute.xlu1 %1001 }
 0x1d2   : > { %v1453_v37 = vmax.f32 %v1358_v45, 0.0  ;;  %v1199_v55 = vsel %vm1179_vm9, %v1177_v53, %v1002_v10  ;;  %v982_v56 = vpop.permute.xlu0 %981 }
 0x1d3   : > { %1484 = vst [vmem:[%s2759_s22 + $0x60] sm:$0xff] %v1463_v52  ;;  %v1189_v18 = vsel %vm1179_vm9, %v1167_v3, %v982_v56  ;;  %1731 = vmatmul.mubr.msk.f32.gmra.mrb[16].mxu1 %vm1213_vm10, %v1199_v55 }
 0x1d4   : > { %1474 = vst [vmem:[%s2759_s22 + $0x10] sm:$0xff] %v1453_v37  ;;  %1701 = vmatmul.mubr.msk.f32.gmra.mrb[18].mxu0 %vm1213_vm10, %v1189_v18  ;;  %1733 = vmatprep.mubr.msk.f32.mxu1 %vm1852_vm2, %v2922_v39 }
 0x1d5   : > { %v806_v57 = vpop.permute.xlu1 %805  ;;  %1703 = vmatprep.mubr.msk.f32.mxu0 %vm1852_vm2, %v2922_v39  ;;  %v1112_v39 = vsel %vm1091_vm5, %v1090_v31, %v740_v62 }
 0x1d6   : > { %v786_v27 = vpop.permute.xlu0 %785  ;;  %v1134_v11 = vsel %vm1113_vm6, %v1112_v39, %v806_v57 }
 0x1d7   : > { %v1124_v19 = vsel %vm1113_vm6, %v1102_v9, %v786_v27 }
 0x1d9   : > { %v872_v16 = vpop.permute.xlu1 %871 }
 0x1da   : > { %v852_v34 = vpop.permute.xlu0 %851  ;;  %v1156_v40 = vsel %vm1135_vm7, %v1134_v11, %v872_v16 }
 0x1db   : > { %v1146_v2 = vsel %vm1135_vm7, %v1124_v19, %v852_v34 }
 0x1dd   : > { %v938_v12 = vpop.permute.xlu1 %937 }
 0x1de   : > { %v918_v23 = vpop.permute.xlu0 %917  ;;  %v1178_v8 = vsel %vm1157_vm8, %v1156_v40, %v938_v12 }
 0x1df   : > { %v1168_v6 = vsel %vm1157_vm8, %v1146_v2, %v918_v23 }
 0x1e1   : > { %v1004_v43 = vpop.permute.xlu1 %1003 }
 0x1e2   : > { %v1200_v41 = vsel %vm1179_vm9, %v1178_v8, %v1004_v43  ;;  %v984_v25 = vpop.permute.xlu0 %983 }
 0x1e3   : > { %v1190_v7 = vsel %vm1179_vm9, %v1168_v6, %v984_v25  ;;  %1734 = vmatmul.mubr.msk.f32.gmra.mrb[18].mxu1 %vm1213_vm10, %v1200_v41 }
 0x1e4   : > { %1704 = vmatmul.mubr.msk.f32.gmra.mrb[20].mxu0 %vm1213_vm10, %v1190_v7 }
 0x1ea   : > { %v1362_v54 = vpop.f32.mrb[6].mxu0 }
 0x1eb   : > { %v1363_v20 = vadd.f32 %v2747_v29, %v1362_v54  ;;  %v1684_v47 = vpop.f32.mrb[7].mxu0 }
 0x1ed   : > { %v1454_v32 = vmax.f32 %v1363_v20, 0.0 }
 0x1ee   : > { %v1412_v61 = vpop.f32.mrb[4].mxu1 }
 0x1ef   : > { %1475 = vst [vmem:[%s2759_s22 + $0x18] sm:$0xff] %v1454_v32  ;;  %v1413_v63 = vadd.f32 %v2747_v29, %v1412_v61  ;;  %v1714_v24 = vpop.f32.mrb[5].mxu1 }
 0x1f1   : > { %v1464_v44 = vmax.f32 %v1413_v63, 0.0 }
 0x1f3   : > { %1485 = vst [vmem:[%s2759_s22 + $0x68] sm:$0xff] %v1464_v44 }
 0x20a   : > { %v1417_v46 = vpop.f32.mrb[6].mxu1 }
 0x20b   : > { %v1367_v33 = vpop.f32.mrb[8].mxu0  ;;  %v1418_v30 = vadd.f32 %v2747_v29, %v1417_v46  ;;  %v1717_v38 = vpop.f32.mrb[7].mxu1 }
 0x20c   : > { %v1368_v0 = vadd.f32 %v2747_v29, %v1367_v33  ;;  %v1687_v58 = vpop.f32.mrb[9].mxu0 }
 0x20d   : > { %v1465_v4 = vmax.f32 %v1418_v30, 0.0 }
 0x20e   : > { %v1455_v62 = vmax.f32 %v1368_v0, 0.0 }
 0x20f   : > { %1486 = vst [vmem:[%s2759_s22 + $0x70] sm:$0xff] %v1465_v4 }
 0x210   : > { %1476 = vst [vmem:[%s2759_s22 + $0x20] sm:$0xff] %v1455_v62 }
 0x226   : > { %v1372_v59 = vpop.f32.mrb[10].mxu0 }
 0x227   : > { %v1373_v48 = vadd.f32 %v2747_v29, %v1372_v59  ;;  %v1690_v26 = vpop.f32.mrb[11].mxu0 }
 0x229   : > { %v1456_v5 = vmax.f32 %v1373_v48, 0.0 }
 0x22b   : > { %1477 = vst [vmem:[%s2759_s22 + $0x28] sm:$0xff] %v1456_v5  ;;  %v1422_v51 = vpop.f32.mrb[8].mxu1 }
 0x22c   : > { %v1423_v17 = vadd.f32 %v2747_v29, %v1422_v51  ;;  %v1720_v21 = vpop.f32.mrb[9].mxu1 }
 0x22e   : > { %v1466_v42 = vmax.f32 %v1423_v17, 0.0 }
 0x230   : > { %1487 = vst [vmem:[%s2759_s22 + $0x78] sm:$0xff] %v1466_v42 }
 0x246   : > { %v1427_v60 = vpop.f32.mrb[10].mxu1 }
 0x247   : > { %v1377_v1 = vpop.f32.mrb[12].mxu0  ;;  %v1428_v49 = vadd.f32 %v2747_v29, %v1427_v60  ;;  %v1723_v45 = vpop.f32.mrb[11].mxu1 }
 0x248   : > { %v1378_v14 = vadd.f32 %v2747_v29, %v1377_v1  ;;  %v1693_v50 = vpop.f32.mrb[13].mxu0 }
 0x249   : > { %v1467_v53 = vmax.f32 %v1428_v49, 0.0 }
 0x24a   : > { %v1457_v52 = vmax.f32 %v1378_v14, 0.0 }
 0x24b   : > { %1488 = vst [vmem:[%s2759_s22 + $0x80] sm:$0xff] %v1467_v53 }
 0x24c   : > { %1478 = vst [vmem:[%s2759_s22 + $0x30] sm:$0xff] %v1457_v52 }
 0x266   : > { %v1432_v10 = vpop.f32.mrb[12].mxu1 }
 0x267   : > { %v1382_v3 = vpop.f32.mrb[14].mxu0  ;;  %v1433_v37 = vadd.f32 %v2747_v29, %v1432_v10  ;;  %v1726_v55 = vpop.f32.mrb[13].mxu1 }
 0x268   : > { %v1383_v56 = vadd.f32 %v2747_v29, %v1382_v3  ;;  %v1696_v18 = vpop.f32.mrb[15].mxu0 }
 0x269   : > { %v1468_v57 = vmax.f32 %v1433_v37, 0.0 }
 0x26a   : > { %v1458_v27 = vmax.f32 %v1383_v56, 0.0 }
 0x26b   : > { %1489 = vst [vmem:[%s2759_s22 + $0x88] sm:$0xff] %v1468_v57 }
 0x26c   : > { %1479 = vst [vmem:[%s2759_s22 + $0x38] sm:$0xff] %v1458_v27 }
 0x286   : > { %v1437_v16 = vpop.f32.mrb[14].mxu1 }
 0x287   : > { %v1387_v34 = vpop.f32.mrb[16].mxu0  ;;  %v1438_v15 = vadd.f32 %v2747_v29, %v1437_v16  ;;  %v1729_v35 = vpop.f32.mrb[15].mxu1 }
 0x288   : > { %v1388_v22 = vadd.f32 %v2747_v29, %v1387_v34  ;;  %v1699_v36 = vpop.f32.mrb[17].mxu0 }
 0x289   : > { %v1469_v28 = vmax.f32 %v1438_v15, 0.0 }
 0x28a   : > { %v1459_v31 = vmax.f32 %v1388_v22, 0.0 }
 0x28b   : > { %1490 = vst [vmem:[%s2759_s22 + $0x90] sm:$0xff] %v1469_v28 }
 0x28c   : > { %1480 = vst [vmem:[%s2759_s22 + $0x40] sm:$0xff] %v1459_v31 }
 0x2a6   : > { %v1442_v12 = vpop.f32.mrb[16].mxu1 }
 0x2a7   : > { %v1392_v13 = vpop.f32.mrb[18].mxu0  ;;  %v1443_v39 = vadd.f32 %v2747_v29, %v1442_v12  ;;  %v1732_v23 = vpop.f32.mrb[17].mxu1 }
 0x2a8   : > { %v1393_v9 = vadd.f32 %v2747_v29, %v1392_v13  ;;  %v1702_v11 = vpop.f32.mrb[19].mxu0 }
 0x2a9   : > { %v1470_v19 = vmax.f32 %v1443_v39, 0.0 }
 0x2aa   : > { %v1460_v40 = vmax.f32 %v1393_v9, 0.0 }
 0x2ab   : > { %1491 = vst [vmem:[%s2759_s22 + $0x98] sm:$0xff] %v1470_v19 }
 0x2ac   : > { %1481 = vst [vmem:[%s2759_s22 + $0x48] sm:$0xff] %v1460_v40 }
 0x2b6   : > { %v1447_v2 = vpop.f32.mrb[18].mxu1 }
 0x2b7   : > { %v1397_v8 = vpop.f32.mrb[20].mxu0  ;;  %v1448_v43 = vadd.f32 %v2747_v29, %v1447_v2  ;;  %v1735_v6 = vpop.f32.mrb[19].mxu1 }
 0x2b8   : > { %v1398_v41 = vadd.f32 %v2747_v29, %v1397_v8  ;;  %v1705_v25 = vpop.f32.mrb[21].mxu0 }
 0x2b9   : > { %v1471_v7 = vmax.f32 %v1448_v43, 0.0 }
 0x2ba   : > { %v1461_v54 = vmax.f32 %v1398_v41, 0.0 }
 0x2bb   : > { %1492 = vst [vmem:[%s2759_s22 + $0xa0] sm:$0xff] %v1471_v7 }
 0x2bc   : > { %1482 = vst [vmem:[%s2759_s22 + $0x50] sm:$0xff] %v1461_v54 }
 0x2bd PF: > { %s14_s19 = sadd.s32 1, %s1842_s19   ;;  %s2936_s15 = smov %s1834_s17 }
 0x2be   : > { %p11_p9 = scmp.ge.s32.totalorder %s14_s19, 8   ;;  %s2937_s16 = smov %s1838_s18 }
 0x2bf   : > { %s2938_s17 = smov %s2941_s20  ;;  %s2939_s18 = smov %s2945_s21 }
 0x2c0   :  { %13 = sbr.rel (!%p11_p9) target bundleno = 3 (0x3), region = 69 }

// kernel: cbr2d.2
= control target key start
LH: loop header
LB: loop body
LE: loop exit
PB: predicated region body
PF: predicated region fallthrough
CT: control target
= control target key end

     0   :  { %s2519_s15 = smov 0   ;;  %s2521_s16 = smov 0   ;;  %s3804_s0 = inlined_call_operand.vmem [shape: f32[2,560,4], index: 0, kind: input, shape index: {}, may-alias: {0,1}]   ;;  %s3805_s1 = inlined_call_operand.vmem [shape: f32[2,560,4], index: 1, kind: input, shape index: {}, may-alias: {0,1}]   ;;  %s3806_s2 = inlined_call_operand.vmem [shape: f32[36,128], index: 2, kind: input, shape index: {}]   ;;  %s3807_s3 = inlined_call_operand.vmem [shape: f32[2,3,1,128], index: 3, kind: output, shape index: {0}]   ;;  %s3808_s4 = inlined_call_operand.vmem [shape: f32[2,3,1,128], index: 4, kind: output, shape index: {1}]  }
   0x1   :  { %s2523_s17 = smov 0   ;;  %s2525_s18 = smov 0  }
   0x2   :  { %s2527_s19 = smov 0  }
   0x3 LB: > { %s24_s20 = sadd.s32 1, %s2473_s17  ;;  %s27_s21 = sadd.s32 1, %s2477_s18  ;;  %s2481_s19 = sphi %s2527_s19, %s15_s19   ;;  %s2477_s18 = sphi %s2525_s18, %s3855_s18   ;;  %s2473_s17 = sphi %s2523_s17, %s3854_s17   ;;  %s2469_s16 = sphi %s2521_s16, %s3853_s16   ;;  %s2465_s15 = sphi %s2519_s15, %s3852_s15  }
   0x4   : > { %p25_p0 = scmp.ge.s32.totalorder %s24_s20, 3  ;;  %p2184_p1 = scmp.ge.s32.totalorder %s2481_s19, 1 }
   0x5   : > { %p221_p2 = scmp.lt.s32.totalorder %s2481_s19, 7 }
   0x6   : > { %s3857_s20 = smov (%p25_p0, %s24_s20), 0  ;;  %s3859_s21 = smov (!%p25_p0, %s27_s21), %s2477_s18 }
   0x7   : > { %p222_p3 = pnand %p2184_p1, %p221_p2  ;;  %p29_p4 = scmp.ge.s32.totalorder %s3859_s21, 2 }
   0x8   : > { %s275_s22 = smul.u32 (!%p222_p3), 21, %s2465_s15  ;;  %p280_p5 = scmp.lt.s32.totalorder (!%p222_p3), %s2469_s16, 1  ;;  %vm342_vm0 = vcmask (!%p222_p3), 31744   ;;  %v1216_v17 = vld [vmem:[%s3806_s2] sm:$0xff] (!%p222_p3)  ;;  %v2483_v18 = vmov (!%p222_p3), 0.0|0.0   ;;  %v1217_v19 = vld [vmem:[%s3806_s2 + $0x8] sm:$0xff] (!%p222_p3) }
   0x9   : > { %s3861_s21 = smov (%p29_p4, %s3859_s21), 0  ;;  %225 = sbr.rel (%p222_p3) target bundleno = 711 (0x2c7), region = 32 }
   0xa   : > { %p282_p6 = scmp.lt.s32.totalorder (!%p222_p3), %s275_s22, 69  ;;  %2332 = vmatprep.subr.bf16.mxu0 (!%p222_p3), %v2483_v18  ;;  %2338 = vmatprep.subr.bf16.mxu1 (!%p222_p3), %v2483_v18  ;;  %v2333_v21 = vpack.c.bf16 (!%p222_p3), %v1217_v19, %v1216_v17  ;;  %s2484_s7 = smov (!%p222_p3), 12   ;;  %vm3809_vm1 = vmmov (!%p222_p3), 0   ;;  %v2489_v28 = vmov (!%p222_p3), 0.0   ;;  %v1218_v33 = vld [vmem:[%s3806_s2 + $0x10] sm:$0xff] (!%p222_p3)  ;;  %v1219_v34 = vld [vmem:[%s3806_s2 + $0x18] sm:$0xff] (!%p222_p3) }
   0xb   : > { %s2485_s8 = smov (!%p222_p3), 4   ;;  %s2486_s9 = smov (!%p222_p3), 16   ;;  %2269 = vmatprep.mubr.msk.f32.mxu0 (!%p222_p3), %vm3809_vm1, %v2489_v28  ;;  %2302 = vmatprep.mubr.msk.f32.mxu1 (!%p222_p3), %vm3809_vm1, %v2489_v28  ;;  %v2336_v35 = vpack.c.bf16 (!%p222_p3), %v1219_v34, %v1218_v33  ;;  %v1220_v39 = vld [vmem:[%s3806_s2 + $0x20] sm:$0xf] (!%p222_p3)  ;;  %vm1285_vm2 = vcmask (!%p222_p3), 1043456   ;;  %vm1062_vm3 = vcmask (!%p222_p3), 64512  }
   0xc   : > { %2334 = vmatpush3.bf16.msra.mxu0 (!%p222_p3), %v2333_v21  ;;  %2341 = vmatpush3.bf16.msra.mxu1 (!%p222_p3), %v2333_v21  ;;  %s2487_s10 = smov (!%p222_p3), 8   ;;  %s2490_s11 = smov (!%p222_p3), 20   ;;  %vm1084_vm4 = vcmask (!%p222_p3), 97280   ;;  %vm1106_vm5 = vcmask (!%p222_p3), 130048   ;;  %vm1128_vm6 = vcmask (!%p222_p3), 162816   ;;  %vm1150_vm7 = vcmask (!%p222_p3), 195584  }
   0xd   : > { %2335 = vmatprep.subr.bf16.mxu0 (!%p222_p3), %v2483_v18  ;;  %2339 = vmatprep.subr.bf16.mxu1 (!%p222_p3), %v2483_v18  ;;  %s2491_s12 = smov (!%p222_p3), 24   ;;  %s2493_s29 = smov (!%p222_p3), 32   ;;  %vm1172_vm8 = vcmask (!%p222_p3), 228352   ;;  %vm3812_vm9 = vcmask (!%p222_p3), 261120   ;;  %vm3811_vm10 = vcmask (!%p222_p3), 293888  }
   0xe   : > { %p309_p8 = scmp.lt.s32.totalorder (!%p222_p3), %s2465_s15, 2 }
  0x10   : > { %s3863_s16 = smov (!%p280_p5, %s2469_s16), 1  ;;  %s3865_s22 = smov (!%p282_p6, %s275_s22), 69  ;;  %2337 = vmatpush3.bf16.msra.mxu0 %v2336_v35  ;;  %2342 = vmatpush3.bf16.msra.mxu1 %v2336_v35 }
  0x11   : > { %s2344_s23 = smul.u32 70, %s3863_s16  ;;  %2267 = vmatprep.subr.mxu0 %v2489_v28  ;;  %2340 = vmatprep.subr.mxu1 %v2489_v28 }
  0x13   : > { %s285_s24 = sadd.s32 %s2344_s23, %s3865_s22 }
  0x14   : > { %s2185_s25 = sshll.u32 %s285_s24, 3  ;;  %2268 = vmatpush3.msk.msra.mxu0 %vm1285_vm2, %v1220_v39  ;;  %2343 = vmatpush3.msk.msra.mxu1 %vm1285_vm2, %v1220_v39 }
  0x15   : > { %s2560_s28 = scalar_lea.vmem %s3804_s0, %s2185_s25  ;;  %s2492_s25 = smov 28  }
  0x16   : > { %v324_v0 = vld [vmem:[%s2560_s28 + $0x18] sm:$0xff]  ;;  %v321_v1 = vld [vmem:[%s2560_s28] sm:$0xff]  ;;  %v322_v2 = vld [vmem:[%s2560_s28 + $0x8] sm:$0xff] }
  0x17   : > { %346 = vst.msk [vmem:[#allocation2 + $0x18] sm:$0xff] %vm342_vm0, %v324_v0  ;;  %343 = vst.msk [vmem:[#allocation2] sm:$0xff] %vm342_vm0, %v321_v1  ;;  %v325_v3 = vld [vmem:[%s2560_s28 + $0x20] sm:$0xff]  ;;  %v323_v4 = vld [vmem:[%s2560_s28 + $0x10] sm:$0xff] }
  0x18   : > { %344 = vst.msk [vmem:[#allocation2 + $0x8] sm:$0xff] %vm342_vm0, %v322_v2  ;;  %v327_v5 = vld [vmem:[%s2560_s28 + $0x30] sm:$0xff]  ;;  %347 = vst.msk [vmem:[#allocation2 + $0x20] sm:$0xff] %vm342_vm0, %v325_v3  ;;  %v328_v6 = vld [vmem:[%s2560_s28 + $0x38] sm:$0xff] }
  0x19   : > { %345 = vst.msk [vmem:[#allocation2 + $0x10] sm:$0xff] %vm342_vm0, %v323_v4  ;;  %349 = vst.msk [vmem:[#allocation2 + $0x30] sm:$0xff] %vm342_vm0, %v327_v5  ;;  %v326_v7 = vld [vmem:[%s2560_s28 + $0x28] sm:$0xff]  ;;  %v329_v8 = vld [vmem:[%s2560_s28 + $0x40] sm:$0xff] }
  0x1a   : > { %350 = vst.msk [vmem:[#allocation2 + $0x38] sm:$0xff] %vm342_vm0, %v328_v6  ;;  %348 = vst.msk [vmem:[#allocation2 + $0x28] sm:$0xff] %vm342_vm0, %v326_v7  ;;  %v330_v9 = vld [vmem:[%s2560_s28 + $0x48] sm:$0xff]  ;;  %v331_v10 = vld [vmem:[%s2560_s28 + $0x50] sm:$0xff] }
  0x1b   : > { %351 = vst.msk [vmem:[#allocation2 + $0x40] sm:$0xff] %vm342_vm0, %v329_v8  ;;  %v332_v11 = vld [vmem:[%s2560_s28 + $0x58] sm:$0xff]  ;;  %352 = vst.msk [vmem:[#allocation2 + $0x48] sm:$0xff] %vm342_vm0, %v330_v9  ;;  %v333_v12 = vld [vmem:[%s2560_s28 + $0x60] sm:$0xff] }
  0x1c   : > { %353 = vst.msk [vmem:[#allocation2 + $0x50] sm:$0xff] %vm342_vm0, %v331_v10  ;;  %354 = vst.msk [vmem:[#allocation2 + $0x58] sm:$0xff] %vm342_vm0, %v332_v11  ;;  %v335_v13 = vld [vmem:[%s2560_s28 + $0x70] sm:$0xff]  ;;  %v336_v14 = vld [vmem:[%s2560_s28 + $0x78] sm:$0xff] }
  0x1d   : > { %355 = vst.msk [vmem:[#allocation2 + $0x60] sm:$0xff] %vm342_vm0, %v333_v12  ;;  %357 = vst.msk [vmem:[#allocation2 + $0x70] sm:$0xff] %vm342_vm0, %v335_v13  ;;  %v334_v15 = vld [vmem:[%s2560_s28 + $0x68] sm:$0xff]  ;;  %v339_v20 = vld [vmem:[%s2560_s28 + $0x90] sm:$0xff] }
  0x1e   : > { %358 = vst.msk [vmem:[#allocation2 + $0x78] sm:$0xff] %vm342_vm0, %v336_v14  ;;  %v338_v16 = vld [vmem:[%s2560_s28 + $0x88] sm:$0xff]  ;;  %356 = vst.msk [vmem:[#allocation2 + $0x68] sm:$0xff] %vm342_vm0, %v334_v15  ;;  %v2604_v22 = vld [vmem:[#allocation2 + $0x18] sm:$0xff] }
  0x1f   : > { %360 = vst.msk [vmem:[#allocation2 + $0x88] sm:$0xff] %vm342_vm0, %v338_v16  ;;  %361 = vst.msk [vmem:[#allocation2 + $0x90] sm:$0xff] %vm342_vm0, %v339_v20  ;;  %v399_v23 = vld [vmem:[#allocation2 + $0x1] sm:$0xff]  ;;  %648 = vrot.lane.b32.xlu1 %v2604_v22, %s2484_s7  ;;  %v2609_v24 = vld [vmem:[#allocation2 + $0x19] sm:$0xff] }
  0x20   : > { %480 = vrot.lane.b32.xlu0 %v399_v23, %s2485_s8  ;;  %v420_v25 = vld [vmem:[#allocation2 + $0x2] sm:$0xff]  ;;  %v423_v26 = vld [vmem:[#allocation2 + $0x1a] sm:$0xff]  ;;  %v2620_v29 = vld [vmem:[#allocation2 + $0x30] sm:$0xff] }
  0x21   : > { %v400_v27 = vld [vmem:[#allocation2 + $0x9] sm:$0xff]  ;;  %v2625_v31 = vld [vmem:[#allocation2 + $0x31] sm:$0xff]  ;;  %v2627_v32 = vld [vmem:[#allocation2 + $0x20] sm:$0xff] }
  0x22   : > { %v421_v30 = vld [vmem:[#allocation2 + $0xa] sm:$0xff]  ;;  %v337_v36 = vld [vmem:[%s2560_s28 + $0x80] sm:$0xff]  ;;  %v2641_v37 = vld [vmem:[#allocation2 + $0x32] sm:$0xff] }
  0x23   : > { %714 = vrot.lane.b32.xlu1 %v2609_v24, %s2486_s9  ;;  %359 = vst.msk [vmem:[#allocation2 + $0x80] sm:$0xff] %vm342_vm0, %v337_v36  ;;  %v403_v38 = vld [vmem:[#allocation2 + $0x21] sm:$0xff]  ;;  %v401_v41 = vld [vmem:[#allocation2 + $0x11] sm:$0xff]  ;;  %v2659_v45 = vld [vmem:[#allocation2 + $0x39] sm:$0xff] }
  0x24   : > { %564 = vrot.lane.b32.xlu0 %v420_v25, %s2487_s10  ;;  %v424_v40 = vld [vmem:[#allocation2 + $0x22] sm:$0xff]  ;;  %v2653_v42 = vld [vmem:[#allocation2 + $0x38] sm:$0xff]  ;;  %v425_v49 = vld [vmem:[#allocation2 + $0x2a] sm:$0xff] }
  0x25   : > { %v422_v43 = vld [vmem:[#allocation2 + $0x12] sm:$0xff]  ;;  %v2661_v46 = vld [vmem:[#allocation2 + $0x28] sm:$0xff]  ;;  %v2668_v47 = vld [vmem:[#allocation2 + $0x3a] sm:$0xff] }
  0x26   : > { %v340_v44 = vld [vmem:[%s2560_s28 + $0x98] sm:$0xff]  ;;  %v404_v48 = vld [vmem:[#allocation2 + $0x29] sm:$0xff]  ;;  %v2676_v50 = vld [vmem:[#allocation2 + $0x40] sm:$0xff] }
  0x27   : > { %780 = vrot.lane.b32.xlu1 %v423_v26, %s2490_s11  ;;  %362 = vst.msk [vmem:[#allocation2 + $0x98] sm:$0xff] %vm342_vm0, %v340_v44  ;;  %v2681_v51 = vld [vmem:[#allocation2 + $0x41] sm:$0xff]  ;;  %v2702_v55 = vld [vmem:[#allocation2 + $0x49] sm:$0xff]  ;;  %v2723_v58 = vld [vmem:[#allocation2 + $0x51] sm:$0xff] }
  0x28   : > { %482 = vrot.lane.b32.xlu0 %v400_v27, %s2485_s8  ;;  %v2687_v52 = vld [vmem:[#allocation2 + $0x42] sm:$0xff]  ;;  %v2709_v56 = vld [vmem:[#allocation2 + $0x4a] sm:$0xff]  ;;  %v2729_v59 = vld [vmem:[#allocation2 + $0x52] sm:$0xff] }
  0x29   : > { %v2696_v53 = vld [vmem:[#allocation2 + $0x48] sm:$0xff]  ;;  %v341_v54 = vld [vmem:[%s2560_s28 + $0xa0] sm:$0xff]  ;;  %v2718_v57 = vld [vmem:[#allocation2 + $0x50] sm:$0xff]  ;;  %s293_s28 = sadd.s32 1, %s2465_s15 }
  0x2a   : > { %363 = vst.msk [vmem:[#allocation2 + $0xa0] sm:$0xff] %vm342_vm0, %v341_v54  ;;  %s2186_s30 = smul.u32 21, %s293_s28  ;;  %v2736_v60 = vld [vmem:[#allocation2 + $0x59] sm:$0xff]  ;;  %v2763_v0 = vld [vmem:[#allocation2 + $0x70] sm:$0xff]  ;;  %v2779_v2 = vld [vmem:[#allocation2 + $0x61] sm:$0xff] }
  0x2b   : > { %846 = vrot.lane.b32.xlu1 %v2620_v29, %s2491_s12  ;;  %v2754_v62 = vld [vmem:[#allocation2 + $0x58] sm:$0xff]  ;;  %v2791_v6 = vld [vmem:[#allocation2 + $0x62] sm:$0xff] }
  0x2c   : > { %566 = vrot.lane.b32.xlu0 %v421_v30, %s2487_s10  ;;  %p298_p7 = scmp.lt.s32.totalorder %s2186_s30, 69  ;;  %v2756_v63 = vld [vmem:[#allocation2 + $0x5a] sm:$0xff]  ;;  %v2773_v1 = vld [vmem:[#allocation2 + $0x71] sm:$0xff]  ;;  %v2798_v11 = vld [vmem:[#allocation2 + $0x88] sm:$0xff] }
  0x2d   : > { %v2785_v3 = vld [vmem:[#allocation2 + $0x72] sm:$0xff]  ;;  %v378_v9 = vld [vmem:[#allocation2] sm:$0xff]  ;;  %v2817_v23 = vld [vmem:[#allocation2 + $0x89] sm:$0xff] }
  0x2e   : > { %s3867_s30 = smov (!%p298_p7, %s2186_s30), 69  ;;  %v2800_v12 = vld [vmem:[#allocation2 + $0x60] sm:$0xff]  ;;  %v2809_v17 = vld [vmem:[#allocation2 + $0x78] sm:$0xff] }
  0x2f   : > { %912 = vrot.lane.b32.xlu1 %v2625_v31, %s2492_s25  ;;  %s301_s5 = sadd.s32 %s2344_s23, %s3867_s30  ;;  %v2825_v30 = vld [vmem:[#allocation2 + $0x79] sm:$0xff]  ;;  %s1459_s23 = smul.u32 168, %s2465_s15 }
  0x30   : > { %650 = vrot.lane.b32.xlu0 %v2627_v32, %s2484_s7  ;;  %s2187_s6 = sshll.u32 %s301_s5, 3  ;;  %s3869_s15 = smov (!%p309_p8, %s2465_s15), 2 }
  0x31   : > { %s2747_s22 = scalar_lea.vmem %s3805_s1, %s2187_s6 }
  0x32   : > { %v364_v61 = vld [vmem:[%s2747_s22] sm:$0xff]  ;;  %v365_v10 = vld [vmem:[%s2747_s22 + $0x8] sm:$0xff]  ;;  %v366_v36 = vld [vmem:[%s2747_s22 + $0x10] sm:$0xff] }
  0x33   : > { %978 = vrot.lane.b32.xlu1 %v2641_v37, %s2493_s29  ;;  %371 = vst.msk [vmem:[#allocation2 + $0xa8] sm:$0xff] %vm342_vm0, %v364_v61  ;;  %372 = vst.msk [vmem:[#allocation2 + $0xb0] sm:$0xff] %vm342_vm0, %v365_v10 }
  0x34   : > { %716 = vrot.lane.b32.xlu0 %v403_v38, %s2486_s9  ;;  %373 = vst.msk [vmem:[#allocation2 + $0xb8] sm:$0xff] %vm342_vm0, %v366_v36 }
  0x37   : > { %782 = vrot.lane.b32.xlu1 %v424_v40, %s2490_s11 }
  0x38   : > { %484 = vrot.lane.b32.xlu0 %v401_v41, %s2485_s8  ;;  %v2844_v41 = vld [vmem:[#allocation2 + $0x69] sm:$0xff] }
  0x3b   : > { %848 = vrot.lane.b32.xlu1 %v2653_v42, %s2491_s12 }
  0x3c   : > { %568 = vrot.lane.b32.xlu0 %v422_v43, %s2487_s10 }
  0x3f   : > { %914 = vrot.lane.b32.xlu1 %v2659_v45, %s2492_s25 }
  0x40   : > { %652 = vrot.lane.b32.xlu0 %v2661_v46, %s2484_s7 }
  0x43   : > { %980 = vrot.lane.b32.xlu1 %v2668_v47, %s2493_s29 }
  0x44   : > { %718 = vrot.lane.b32.xlu0 %v404_v48, %s2486_s9 }
  0x47   : > { %784 = vrot.lane.b32.xlu1 %v425_v49, %s2490_s11 }
  0x48   : > { %486 = vrot.lane.b32.xlu0 %v2609_v24, %s2485_s8 }
  0x4b   : > { %850 = vrot.lane.b32.xlu1 %v2676_v50, %s2491_s12 }
  0x4c   : > { %570 = vrot.lane.b32.xlu0 %v423_v26, %s2487_s10 }
  0x4f   : > { %916 = vrot.lane.b32.xlu1 %v2681_v51, %s2492_s25 }
  0x50   : > { %654 = vrot.lane.b32.xlu0 %v2620_v29, %s2484_s7 }
  0x53   : > { %982 = vrot.lane.b32.xlu1 %v2687_v52, %s2493_s29 }
  0x54   : > { %720 = vrot.lane.b32.xlu0 %v2625_v31, %s2486_s9 }
  0x57   : > { %786 = vrot.lane.b32.xlu1 %v2641_v37, %s2490_s11 }
  0x58   : > { %488 = vrot.lane.b32.xlu0 %v403_v38, %s2485_s8 }
  0x5b   : > { %852 = vrot.lane.b32.xlu1 %v2696_v53, %s2491_s12 }
  0x5c   : > { %572 = vrot.lane.b32.xlu0 %v424_v40, %s2487_s10  ;;  %v379_v40 = vld [vmem:[#allocation2 + $0x8] sm:$0xff] }
  0x5f   : > { %918 = vrot.lane.b32.xlu1 %v2702_v55, %s2492_s25 }
  0x60   : > { %656 = vrot.lane.b32.xlu0 %v2653_v42, %s2484_s7 }
  0x63   : > { %984 = vrot.lane.b32.xlu1 %v2709_v56, %s2493_s29 }
  0x64   : > { %722 = vrot.lane.b32.xlu0 %v2659_v45, %s2486_s9 }
  0x67   : > { %788 = vrot.lane.b32.xlu1 %v2668_v47, %s2490_s11 }
  0x68   : > { %490 = vrot.lane.b32.xlu0 %v404_v48, %s2485_s8  ;;  %v2852_v48 = vld [vmem:[#allocation2 + $0x7a] sm:$0xff] }
  0x6b   : > { %854 = vrot.lane.b32.xlu1 %v2718_v57, %s2491_s12 }
  0x6c   : > { %574 = vrot.lane.b32.xlu0 %v425_v49, %s2487_s10 }
  0x6f   : > { %920 = vrot.lane.b32.xlu1 %v2723_v58, %s2492_s25 }
  0x70   : > { %658 = vrot.lane.b32.xlu0 %v2676_v50, %s2484_s7 }
  0x73   : > { %986 = vrot.lane.b32.xlu1 %v2729_v59, %s2493_s29 }
  0x74   : > { %724 = vrot.lane.b32.xlu0 %v2681_v51, %s2486_s9 }
  0x77   : > { %502 = vrot.lane.b32.xlu1 %v2736_v60, %s2485_s8 }
  0x78   : > { %492 = vrot.lane.b32.xlu0 %v2625_v31, %s2485_s8 }
  0x7b   : > { %576 = vrot.lane.b32.xlu1 %v2641_v37, %s2487_s10  ;;  %v2835_v37 = vld [vmem:[#allocation2 + $0x8a] sm:$0xff] }
  0x7c   : > { %790 = vrot.lane.b32.xlu0 %v2687_v52, %s2490_s11 }
  0x7f   : > { %856 = vrot.lane.b32.xlu1 %v2754_v62, %s2491_s12 }
  0x80   : > { %586 = vrot.lane.b32.xlu0 %v2756_v63, %s2487_s10 }
  0x83   : > { %670 = vrot.lane.b32.xlu1 %v2763_v0, %s2484_s7 }
  0x84   : > { %660 = vrot.lane.b32.xlu0 %v2696_v53, %s2484_s7 }
  0x87   : > { %726 = vrot.lane.b32.xlu1 %v2702_v55, %s2486_s9 }
  0x88   : > { %922 = vrot.lane.b32.xlu0 %v2736_v60, %s2492_s25 }
  0x8b   : > { %988 = vrot.lane.b32.xlu1 %v2756_v63, %s2493_s29 }
  0x8c   : > { %736 = vrot.lane.b32.xlu0 %v2773_v1, %s2486_s9 }
  0x8f   : > { %504 = vrot.lane.b32.xlu1 %v2779_v2, %s2485_s8 }
  0x90   : > { %494 = vrot.lane.b32.xlu0 %v2659_v45, %s2485_s8 }
  0x91   : > { %v649_v4 = vpop.permute.xlu1 %648 }
  0x92   : > { %v481_v5 = vpop.permute.xlu0 %480 }
  0x93   : > { %802 = vrot.lane.b32.xlu1 %v2785_v3, %s2490_s11  ;;  %v1041_v13 = vsel %vm342_vm0, %v378_v9, %v481_v5  ;;  %v2862_v5 = vld [vmem:[#allocation2 + $0x6a] sm:$0xff] }
  0x94   : > { %792 = vrot.lane.b32.xlu0 %v2709_v56, %s2490_s11 }
  0x95   : > { %v715_v7 = vpop.permute.xlu1 %714 }
  0x96   : > { %v565_v8 = vpop.permute.xlu0 %564 }
  0x97   : > { %588 = vrot.lane.b32.xlu1 %v2791_v6, %s2487_s10  ;;  %v1063_v16 = vsel %vm1062_vm3, %v1041_v13, %v565_v8  ;;  %v367_v13 = vld [vmem:[%s2747_s22 + $0x18] sm:$0xff] }
  0x98   : > { %578 = vrot.lane.b32.xlu0 %v2668_v47, %s2487_s10  ;;  %v1085_v18 = vsel %vm1084_vm4, %v1063_v16, %v649_v4  ;;  %374 = vst.msk [vmem:[#allocation2 + $0xc0] sm:$0xff] %vm342_vm0, %v367_v13 }
  0x99   : > { %v781_v14 = vpop.permute.xlu1 %780  ;;  %v1107_v21 = vsel %vm1106_vm5, %v1085_v18, %v715_v7 }
  0x9a   : > { %v483_v15 = vpop.permute.xlu0 %482  ;;  %v1129_v26 = vsel %vm1128_vm6, %v1107_v21, %v781_v14  ;;  %v2872_v14 = vld [vmem:[#allocation2 + $0x90] sm:$0xff] }
  0x9b   : > { %868 = vrot.lane.b32.xlu1 %v2798_v11, %s2491_s12  ;;  %v1042_v45 = vsel %vm342_vm0, %v379_v40, %v483_v15  ;;  %v2874_v15 = vld [vmem:[#allocation2 + $0x68] sm:$0xff] }
  0x9c   : > { %858 = vrot.lane.b32.xlu0 %v2800_v12, %s2491_s12 }
  0x9d   : > { %v847_v19 = vpop.permute.xlu1 %846 }
  0x9e   : > { %v567_v20 = vpop.permute.xlu0 %566  ;;  %v1151_v27 = vsel %vm1150_vm7, %v1129_v26, %v847_v19  ;;  %v2883_v19 = vld [vmem:[#allocation2 + $0x80] sm:$0xff]  ;;  %v2891_v26 = vld [vmem:[#allocation2 + $0x91] sm:$0xff] }
  0x9f   : > { %672 = vrot.lane.b32.xlu1 %v2809_v17, %s2484_s7  ;;  %v1064_v47 = vsel %vm1062_vm3, %v1042_v45, %v567_v20  ;;  %v368_v45 = vld [vmem:[%s2747_s22 + $0x20] sm:$0xff] }
  0xa0   : > { %662 = vrot.lane.b32.xlu0 %v2718_v57, %s2484_s7  ;;  %375 = vst.msk [vmem:[#allocation2 + $0xc8] sm:$0xff] %vm342_vm0, %v368_v45 }
  0xa1   : > { %v913_v24 = vpop.permute.xlu1 %912 }
  0xa2   : > { %v651_v25 = vpop.permute.xlu0 %650  ;;  %v1173_v31 = vsel %vm1172_vm8, %v1151_v27, %v913_v24 }
  0xa3   : > { %934 = vrot.lane.b32.xlu1 %v2817_v23, %s2492_s25  ;;  %v1086_v49 = vsel %vm1084_vm4, %v1064_v47, %v651_v25  ;;  %v2911_v47 = vld [vmem:[#allocation2 + $0x92] sm:$0xff] }
  0xa4   : > { %924 = vrot.lane.b32.xlu0 %v2779_v2, %s2492_s25 }
  0xa5   : > { %v979_v33 = vpop.permute.xlu1 %978 }
  0xa6   : > { %v717_v34 = vpop.permute.xlu0 %716  ;;  %v1195_v35 = vsel %vm3812_vm9, %v1173_v31, %v979_v33 }
  0xa7   : > { %738 = vrot.lane.b32.xlu1 %v2825_v30, %s2486_s9  ;;  %2270 = vmatmul.mubr.msk.f32.vlgmr.msra.gmra.mrb[0].mxu0 %vm3811_vm10, %v1195_v35  ;;  %v1108_v61 = vsel %vm1106_vm5, %v1086_v49, %v717_v34 }
  0xa8   : > { %728 = vrot.lane.b32.xlu0 %v2723_v58, %s2486_s9  ;;  %2272 = vmatprep.mubr.msk.f32.mxu0 %vm3809_vm1, %v2489_v28 }
  0xa9   : > { %v783_v38 = vpop.permute.xlu1 %782 }
  0xaa   : > { %v485_v39 = vpop.permute.xlu0 %484  ;;  %v1130_v4 = vsel %vm1128_vm6, %v1108_v61, %v783_v38  ;;  %v2901_v38 = vld [vmem:[#allocation2 + $0x81] sm:$0xff] }
  0xab   : > { %1000 = vrot.lane.b32.xlu1 %v2835_v37, %s2493_s29 }
  0xac   : > { %990 = vrot.lane.b32.xlu0 %v2791_v6, %s2493_s29 }
  0xad   : > { %v849_v43 = vpop.permute.xlu1 %848 }
  0xae   : > { %v569_v44 = vpop.permute.xlu0 %568 }
  0xaf   : > { %506 = vrot.lane.b32.xlu1 %v2844_v41, %s2485_s8 }
  0xb0   : > { %496 = vrot.lane.b32.xlu0 %v2681_v51, %s2485_s8  ;;  %v1152_v51 = vsel %vm1150_vm7, %v1130_v4, %v849_v43 }
  0xb1   : > { %v915_v54 = vpop.permute.xlu1 %914 }
  0xb2   : > { %v653_v57 = vpop.permute.xlu0 %652  ;;  %v1174_v7 = vsel %vm1172_vm8, %v1152_v51, %v915_v54  ;;  %v2927_v51 = vld [vmem:[#allocation2 + $0x82] sm:$0xff] }
  0xb3   : > { %804 = vrot.lane.b32.xlu1 %v2852_v48, %s2490_s11 }
  0xb4   : > { %794 = vrot.lane.b32.xlu0 %v2729_v59, %s2490_s11 }
  0xb5   : > { %v981_v8 = vpop.permute.xlu1 %980 }
  0xb6   : > { %v719_v9 = vpop.permute.xlu0 %718  ;;  %v1196_v10 = vsel %vm3812_vm9, %v1174_v7, %v981_v8 }
  0xb7   : > { %590 = vrot.lane.b32.xlu1 %v2862_v5, %s2487_s10  ;;  %2273 = vmatmul.mubr.msk.f32.gmra.mrb[2].mxu0 %vm3811_vm10, %v1196_v10 }
  0xb8   : > { %580 = vrot.lane.b32.xlu0 %v2687_v52, %s2487_s10  ;;  %2275 = vmatprep.mubr.msk.f32.mxu0 %vm3809_vm1, %v2489_v28  ;;  %v380_v52 = vld [vmem:[#allocation2 + $0x10] sm:$0xff] }
  0xb9   : > { %v785_v16 = vpop.permute.xlu1 %784  ;;  %v1043_v24 = vsel %vm342_vm0, %v380_v52, %v485_v39 }
  0xba   : > { %v487_v18 = vpop.permute.xlu0 %486  ;;  %v1065_v25 = vsel %vm1062_vm3, %v1043_v24, %v569_v44 }
  0xbb   : > { %870 = vrot.lane.b32.xlu1 %v2872_v14, %s2491_s12  ;;  %v1087_v27 = vsel %vm1084_vm4, %v1065_v25, %v653_v57  ;;  %v1044_v61 = vsel %vm342_vm0, %v2604_v22, %v487_v18 }
  0xbc   : > { %860 = vrot.lane.b32.xlu0 %v2874_v15, %s2491_s12  ;;  %v1109_v34 = vsel %vm1106_vm5, %v1087_v27, %v719_v9 }
  0xbd   : > { %v851_v20 = vpop.permute.xlu1 %850  ;;  %v1131_v35 = vsel %vm1128_vm6, %v1109_v34, %v785_v16 }
  0xbe   : > { %v571_v21 = vpop.permute.xlu0 %570  ;;  %v1153_v36 = vsel %vm1150_vm7, %v1131_v35, %v851_v20  ;;  %v369_v20 = vld [vmem:[%s2747_s22 + $0x28] sm:$0xff] }
  0xbf   : > { %674 = vrot.lane.b32.xlu1 %v2883_v19, %s2484_s7  ;;  %v1066_v4 = vsel %vm1062_vm3, %v1044_v61, %v571_v21  ;;  %v2945_v21 = vld [vmem:[#allocation2 + $0x98] sm:$0xff]  ;;  %376 = vst.msk [vmem:[#allocation2 + $0xd0] sm:$0xff] %vm342_vm0, %v369_v20  ;;  %v3020_v20 = vld [vmem:[#allocation2 + $0xa1] sm:$0xff] }
  0xc0   : > { %664 = vrot.lane.b32.xlu0 %v2754_v62, %s2484_s7 }
  0xc1   : > { %v917_v31 = vpop.permute.xlu1 %916 }
  0xc2   : > { %v655_v33 = vpop.permute.xlu0 %654  ;;  %v1175_v39 = vsel %vm1172_vm8, %v1153_v36, %v917_v31 }
  0xc3   : > { %936 = vrot.lane.b32.xlu1 %v2891_v26, %s2492_s25  ;;  %v1088_v7 = vsel %vm1084_vm4, %v1066_v4, %v655_v33  ;;  %v2961_v33 = vld [vmem:[#allocation2 + $0x99] sm:$0xff] }
  0xc4   : > { %926 = vrot.lane.b32.xlu0 %v2844_v41, %s2492_s25 }
  0xc5   : > { %v983_v40 = vpop.permute.xlu1 %982 }
  0xc6   : > { %v721_v43 = vpop.permute.xlu0 %720  ;;  %v1197_v44 = vsel %vm3812_vm9, %v1175_v39, %v983_v40 }
  0xc7   : > { %740 = vrot.lane.b32.xlu1 %v2901_v38, %s2486_s9  ;;  %2276 = vmatmul.mubr.msk.f32.gmra.mrb[4].mxu0 %vm3811_vm10, %v1197_v44  ;;  %v1110_v10 = vsel %vm1106_vm5, %v1088_v7, %v721_v43 }
  0xc8   : > { %730 = vrot.lane.b32.xlu0 %v2736_v60, %s2486_s9  ;;  %2278 = vmatprep.mubr.msk.f32.mxu0 %vm3809_vm1, %v2489_v28 }
  0xc9   : > { %v787_v49 = vpop.permute.xlu1 %786 }
  0xca   : > { %v489_v54 = vpop.permute.xlu0 %488  ;;  %v1132_v13 = vsel %vm1128_vm6, %v1110_v10, %v787_v49 }
  0xcb   : > { %1002 = vrot.lane.b32.xlu1 %v2911_v47, %s2493_s29  ;;  %v1045_v27 = vsel %vm342_vm0, %v2627_v32, %v489_v54  ;;  %v370_v32 = vld [vmem:[%s2747_s22 + $0x30] sm:$0xff] }
  0xcc   : > { %992 = vrot.lane.b32.xlu0 %v2862_v5, %s2493_s29  ;;  %377 = vst.msk [vmem:[#allocation2 + $0xd8] sm:$0xff] %vm342_vm0, %v370_v32 }
  0xcd   : > { %v853_v57 = vpop.permute.xlu1 %852 }
  0xce   : > { %v573_v60 = vpop.permute.xlu0 %572  ;;  %v1154_v22 = vsel %vm1150_vm7, %v1132_v13, %v853_v57 }
  0xcf   : > { %508 = vrot.lane.b32.xlu1 %v2773_v1, %s2485_s8  ;;  %v1067_v31 = vsel %vm1062_vm3, %v1045_v27, %v573_v60 }
  0xd0   : > { %498 = vrot.lane.b32.xlu0 %v2702_v55, %s2485_s8 }
  0xd1   : > { %v919_v8 = vpop.permute.xlu1 %918 }
  0xd2   : > { %v657_v9 = vpop.permute.xlu0 %656  ;;  %v1176_v55 = vsel %vm1172_vm8, %v1154_v22, %v919_v8 }
  0xd3   : > { %806 = vrot.lane.b32.xlu1 %v2927_v51, %s2490_s11  ;;  %v1089_v34 = vsel %vm1084_vm4, %v1067_v31, %v657_v9  ;;  %v3003_v9 = vld [vmem:[#allocation2 + $0xa0] sm:$0xff] }
  0xd4   : > { %796 = vrot.lane.b32.xlu0 %v2756_v63, %s2490_s11 }
  0xd5   : > { %v985_v16 = vpop.permute.xlu1 %984 }
  0xd6   : > { %v723_v18 = vpop.permute.xlu0 %722  ;;  %v1198_v52 = vsel %vm3812_vm9, %v1176_v55, %v985_v16 }
  0xd7   : > { %592 = vrot.lane.b32.xlu1 %v2785_v3, %s2487_s10  ;;  %2279 = vmatmul.mubr.msk.f32.gmra.mrb[6].mxu0 %vm3811_vm10, %v1198_v52  ;;  %v1111_v39 = vsel %vm1106_vm5, %v1089_v34, %v723_v18 }
  0xd8   : > { %582 = vrot.lane.b32.xlu0 %v2709_v56, %s2487_s10  ;;  %2281 = vmatprep.mubr.msk.f32.mxu0 %vm3809_vm1, %v2489_v28 }
  0xd9   : > { %v789_v63 = vpop.permute.xlu1 %788 }
  0xda   : > { %v491_v24 = vpop.permute.xlu0 %490  ;;  %v1133_v40 = vsel %vm1128_vm6, %v1111_v39, %v789_v63 }
  0xdb   : > { %872 = vrot.lane.b32.xlu1 %v2945_v21, %s2491_s12 }
  0xdc   : > { %862 = vrot.lane.b32.xlu0 %v2763_v0, %s2491_s12 }
  0xdd   : > { %v855_v56 = vpop.permute.xlu1 %854 }
  0xde   : > { %v575_v25 = vpop.permute.xlu0 %574 }
  0xdf   : > { %676 = vrot.lane.b32.xlu1 %v2798_v11, %s2484_s7  ;;  %v1155_v11 = vsel %vm1150_vm7, %v1133_v40, %v855_v56 }
  0xe0   : > { %666 = vrot.lane.b32.xlu0 %v2800_v12, %s2484_s7 }
  0xe1   : > { %v921_v35 = vpop.permute.xlu1 %920 }
  0xe2   : > { %v659_v36 = vpop.permute.xlu0 %658  ;;  %v1177_v43 = vsel %vm1172_vm8, %v1155_v11, %v921_v35 }
  0xe3   : > { %938 = vrot.lane.b32.xlu1 %v2961_v33, %s2492_s25 }
  0xe4   : > { %928 = vrot.lane.b32.xlu0 %v2773_v1, %s2492_s25  ;;  %v2980_v1 = vld [vmem:[#allocation2 + $0x9a] sm:$0xff] }
  0xe5   : > { %v987_v44 = vpop.permute.xlu1 %986 }
  0xe6   : > { %v725_v45 = vpop.permute.xlu0 %724  ;;  %v1199_v49 = vsel %vm3812_vm9, %v1177_v43, %v987_v44 }
  0xe7   : > { %742 = vrot.lane.b32.xlu1 %v2817_v23, %s2486_s9  ;;  %2282 = vmatmul.mubr.msk.f32.gmra.mrb[8].mxu0 %vm3811_vm10, %v1199_v49 }
  0xe8   : > { %732 = vrot.lane.b32.xlu0 %v2779_v2, %s2486_s9  ;;  %2284 = vmatprep.mubr.msk.f32.mxu0 %vm3809_vm1, %v2489_v28 }
  0xe9   : > { %v503_v54 = vpop.permute.xlu1 %502 }
  0xea   : > { %v493_v57 = vpop.permute.xlu0 %492 }
  0xeb   : > { %1004 = vrot.lane.b32.xlu1 %v2980_v1, %s2493_s29  ;;  %v1047_v40 = vsel %vm342_vm0, %v2620_v29, %v493_v57 }
  0xec   : > { %994 = vrot.lane.b32.xlu0 %v2785_v3, %s2493_s29  ;;  %v1046_v3 = vsel %vm342_vm0, %v2661_v46, %v491_v24 }
  0xed   : > { %v577_v60 = vpop.permute.xlu1 %576 }
  0xee   : > { %v791_v61 = vpop.permute.xlu0 %790  ;;  %v1069_v32 = vsel %vm1062_vm3, %v1047_v40, %v577_v60 }
  0xef   : > { %510 = vrot.lane.b32.xlu1 %v2825_v30, %s2485_s8 }
  0xf0   : > { %500 = vrot.lane.b32.xlu0 %v2723_v58, %s2485_s8  ;;  %v1068_v58 = vsel %vm1062_vm3, %v1046_v3, %v575_v25  ;;  %v3036_v25 = vld [vmem:[#allocation2 + $0xa2] sm:$0xff] }
  0xf1   : > { %v857_v2 = vpop.permute.xlu1 %856  ;;  %v1090_v10 = vsel %vm1084_vm4, %v1068_v58, %v659_v36  ;;  %v3058_v36 = vld [vmem:[#allocation2 + $0xa8] sm:$0xff] }
  0xf2   : > { %v587_v4 = vpop.permute.xlu0 %586 }
  0xf3   : > { %808 = vrot.lane.b32.xlu1 %v2835_v37, %s2490_s11 }
  0xf4   : > { %798 = vrot.lane.b32.xlu0 %v2791_v6, %s2490_s11  ;;  %v1112_v6 = vsel %vm1106_vm5, %v1090_v10, %v725_v45 }
  0xf5   : > { %v671_v7 = vpop.permute.xlu1 %670  ;;  %v1134_v55 = vsel %vm1128_vm6, %v1112_v6, %v791_v61 }
  0xf6   : > { %v661_v8 = vpop.permute.xlu0 %660  ;;  %v1156_v46 = vsel %vm1150_vm7, %v1134_v55, %v857_v2  ;;  %v3082_v2 = vld [vmem:[#allocation2 + $0xa9] sm:$0xff] }
  0xf7   : > { %594 = vrot.lane.b32.xlu1 %v2852_v48, %s2487_s10  ;;  %v1091_v44 = vsel %vm1084_vm4, %v1069_v32, %v661_v8  ;;  %v3112_v55 = vld [vmem:[#allocation2 + $0xb0] sm:$0xff]  ;;  %v3172_v32 = vld [vmem:[#allocation2 + $0xb9] sm:$0xff] }
  0xf8   : > { %584 = vrot.lane.b32.xlu0 %v2729_v59, %s2487_s10 }
  0xf9   : > { %v727_v13 = vpop.permute.xlu1 %726 }
  0xfa   : > { %v923_v22 = vpop.permute.xlu0 %922 }
  0xfb   : > { %874 = vrot.lane.b32.xlu1 %v3003_v9, %s2491_s12  ;;  %v1178_v59 = vsel %vm1172_vm8, %v1156_v46, %v923_v22 }
  0xfc   : > { %864 = vrot.lane.b32.xlu0 %v2809_v17, %s2491_s12 }
  0xfd   : > { %v989_v16 = vpop.permute.xlu1 %988 }
  0xfe   : > { %v737_v18 = vpop.permute.xlu0 %736  ;;  %v1200_v52 = vsel %vm3812_vm9, %v1178_v59, %v989_v16 }
  0xff   : > { %678 = vrot.lane.b32.xlu1 %v2872_v14, %s2484_s7  ;;  %2285 = vmatmul.mubr.msk.f32.gmra.mrb[10].mxu0 %vm3811_vm10, %v1200_v52 }
 0x100   : > { %668 = vrot.lane.b32.xlu0 %v2874_v15, %s2484_s7  ;;  %2287 = vmatprep.mubr.msk.f32.mxu0 %vm3809_vm1, %v2489_v28 }
 0x101   : > { %v3022_v63 = vpop.permute.xlu1 %504 }
 0x102   : > { %v3024_v24 = vpop.permute.xlu0 %494 }
 0x103   : > { %940 = vrot.lane.b32.xlu1 %v3020_v20, %s2492_s25 }
 0x104   : > { %930 = vrot.lane.b32.xlu0 %v2825_v30, %s2492_s25 }
 0x105   : > { %v803_v14 = vpop.permute.xlu1 %802 }
 0x106   : > { %v793_v56 = vpop.permute.xlu0 %792 }
 0x107   : > { %744 = vrot.lane.b32.xlu1 %v2891_v26, %s2486_s9 }
 0x108   : > { %734 = vrot.lane.b32.xlu0 %v2844_v41, %s2486_s9 }
 0x109   : > { %v3038_v27 = vpop.permute.xlu1 %588 }
 0x10a   : > { %v3040_v31 = vpop.permute.xlu0 %578 }
 0x10b   : > { %1006 = vrot.lane.b32.xlu1 %v3036_v25, %s2493_s29 }
 0x10c   : > { %996 = vrot.lane.b32.xlu0 %v2852_v48, %s2493_s29 }
 0x10d   : > { %v869_v30 = vpop.permute.xlu1 %868 }
 0x10e   : > { %v859_v34 = vpop.permute.xlu0 %858 }
 0x10f   : > { %800 = vrot.lane.b32.xlu1 %v2862_v5, %s2490_s11  ;;  %v1052_v5 = vsel %vm342_vm0, %v2754_v62, %v503_v54  ;;  %v1113_v62 = vsel %vm1106_vm5, %v1091_v44, %v727_v13 }
 0x110   : > { %512 = vrot.lane.b32.xlu0 %v2901_v38, %s2485_s8  ;;  %v1074_v11 = vsel %vm1062_vm3, %v1052_v5, %v587_v4  ;;  %v1135_v57 = vsel %vm1128_vm6, %v1113_v62, %v793_v56  ;;  %v3152_v5 = vld [vmem:[#allocation2 + $0xb8] sm:$0xff] }
 0x111   : > { %v3050_v41 = vpop.permute.xlu1 %672  ;;  %v1096_v43 = vsel %vm1084_vm4, %v1074_v11, %v671_v7  ;;  %v1157_v61 = vsel %vm1150_vm7, %v1135_v57, %v859_v34  ;;  %v1048_v34 = vsel %vm342_vm0, %v2653_v42, %v3024_v24 }
 0x112   : > { %v3052_v35 = vpop.permute.xlu0 %662  ;;  %v1118_v29 = vsel %vm1106_vm5, %v1096_v43, %v737_v18 }
 0x113   : > { %596 = vrot.lane.b32.xlu1 %v2927_v51, %s2487_s10  ;;  %v1140_v54 = vsel %vm1128_vm6, %v1118_v29, %v803_v14 }
 0x114   : > { %810 = vrot.lane.b32.xlu0 %v2911_v47, %s2490_s11  ;;  %v1162_v60 = vsel %vm1150_vm7, %v1140_v54, %v869_v30  ;;  %v1053_v30 = vsel %vm342_vm0, %v2800_v12, %v3022_v63 }
 0x115   : > { %v935_v48 = vpop.permute.xlu1 %934 }
 0x116   : > { %v925_v39 = vpop.permute.xlu0 %924  ;;  %v1184_v4 = vsel %vm1172_vm8, %v1162_v60, %v935_v48  ;;  %v1075_v48 = vsel %vm1062_vm3, %v1053_v30, %v3038_v27  ;;  %v450_v60 = vld [vmem:[#allocation2 + $0xc0] sm:$0xff] }
 0x117   : > { %876 = vrot.lane.b32.xlu1 %v3058_v36, %s2491_s12  ;;  %v1179_v7 = vsel %vm1172_vm8, %v1157_v61, %v925_v39  ;;  %v1070_v39 = vsel %vm1062_vm3, %v1048_v34, %v3040_v31  ;;  %v1097_v12 = vsel %vm1084_vm4, %v1075_v48, %v3050_v41  ;;  %v451_v48 = vld [vmem:[#allocation2 + $0xc8] sm:$0xff] }
 0x118   : > { %866 = vrot.lane.b32.xlu0 %v2883_v19, %s2491_s12  ;;  %v1092_v42 = vsel %vm1084_vm4, %v1070_v39, %v3052_v35 }
 0x119   : > { %v739_v45 = vpop.permute.xlu1 %738 }
 0x11a   : > { %v729_v49 = vpop.permute.xlu0 %728 }
 0x11b   : > { %932 = vrot.lane.b32.xlu1 %v2901_v38, %s2492_s25  ;;  %v3094_v38 = vld [vmem:[#allocation2 + $0xaa] sm:$0xff]  ;;  %v1114_v40 = vsel %vm1106_vm5, %v1092_v42, %v729_v49 }
 0x11c   : > { %680 = vrot.lane.b32.xlu0 %v2945_v21, %s2484_s7  ;;  %v454_v42 = vld [vmem:[#allocation2 + $0xc9] sm:$0xff] }
 0x11d   : > { %v1001_v8 = vpop.permute.xlu1 %1000 }
 0x11e   : > { %v991_v3 = vpop.permute.xlu0 %990  ;;  %v1206_v58 = vsel %vm3812_vm9, %v1184_v4, %v1001_v8 }
 0x11f   : > { %v1201_v10 = vsel %vm3812_vm9, %v1179_v7, %v991_v3  ;;  %746 = vrot.lane.b32.xlu1 %v2961_v33, %s2486_s9  ;;  %2303 = vmatmul.mubr.msk.f32.vlgmr.msra.gmra.mrb[0].mxu1 %vm3811_vm10, %v1206_v58  ;;  %v1460_v7 = vlaneseq }
 0x120   : > { %942 = vrot.lane.b32.xlu0 %v3082_v2, %s2492_s25  ;;  %2288 = vmatmul.mubr.msk.f32.gmra.mrb[12].mxu0 %vm3811_vm10, %v1201_v10  ;;  %v3215_v10 = vstv %s1459_s23 }
 0x121   : > { %v3096_v21 = vpop.permute.xlu1 %506  ;;  %2290 = vmatprep.mubr.msk.f32.mxu0 %vm3809_vm1, %v2489_v28  ;;  %2305 = vmatprep.mubr.msk.f32.mxu1 %vm3809_vm1, %v2489_v28  ;;  %v3210_v58 = vshrl.u32 %v1460_v7, 7 }
 0x122   : > { %v3098_v13 = vpop.permute.xlu0 %496 }
 0x123   : > { %1008 = vrot.lane.b32.xlu1 %v3094_v38, %s2493_s29 }
 0x124   : > { %998 = vrot.lane.b32.xlu0 %v2927_v51, %s2493_s29  ;;  %v3122_v51 = vld [vmem:[#allocation2 + $0xb1] sm:$0xff] }
 0x125   : > { %v805_v22 = vpop.permute.xlu1 %804 }
 0x126   : > { %v795_v6 = vpop.permute.xlu0 %794 }
 0x127   : > { %812 = vrot.lane.b32.xlu1 %v2980_v1, %s2490_s11  ;;  %v1136_v31 = vsel %vm1128_vm6, %v1114_v40, %v795_v6 }
 0x128   : > { %514 = vrot.lane.b32.xlu0 %v2817_v23, %s2485_s8  ;;  %v3128_v23 = vld [vmem:[#allocation2 + $0xb2] sm:$0xff] }
 0x129   : > { %v3114_v46 = vpop.permute.xlu1 %590 }
 0x12a   : > { %v3116_v59 = vpop.permute.xlu0 %580 }
 0x12b   : > { %878 = vrot.lane.b32.xlu1 %v3112_v55, %s2491_s12 }
 0x12c   : > { %598 = vrot.lane.b32.xlu0 %v2835_v37, %s2487_s10 }
 0x12d   : > { %v871_v16 = vpop.permute.xlu1 %870 }
 0x12e   : > { %v861_v18 = vpop.permute.xlu0 %860 }
 0x12f   : > { %944 = vrot.lane.b32.xlu1 %v3122_v51, %s2492_s25  ;;  %v1158_v35 = vsel %vm1150_vm7, %v1136_v31, %v861_v18 }
 0x130   : > { %682 = vrot.lane.b32.xlu0 %v3003_v9, %s2484_s7 }
 0x131   : > { %v3130_v52 = vpop.permute.xlu1 %674 }
 0x132   : > { %v3132_v14 = vpop.permute.xlu0 %664 }
 0x133   : > { %1010 = vrot.lane.b32.xlu1 %v3128_v23, %s2493_s29 }
 0x134   : > { %748 = vrot.lane.b32.xlu0 %v3020_v20, %s2486_s9 }
 0x135   : > { %v937_v37 = vpop.permute.xlu1 %936 }
 0x136   : > { %v927_v56 = vpop.permute.xlu0 %926 }
 0x137   : > { %814 = vrot.lane.b32.xlu1 %v3036_v25, %s2490_s11  ;;  %v1180_v43 = vsel %vm1172_vm8, %v1158_v35, %v927_v56  ;;  %v1049_v56 = vsel %vm342_vm0, %v2676_v50, %v3098_v13 }
 0x138   : > { %516 = vrot.lane.b32.xlu0 %v2891_v26, %s2485_s8  ;;  %v1119_v26 = vsel %vm1106_vm5, %v1097_v12, %v739_v45  ;;  %v1071_v34 = vsel %vm1062_vm3, %v1049_v56, %v3116_v59 }
 0x139   : > { %v3158_v63 = vpop.permute.xlu1 %740  ;;  %v1141_v27 = vsel %vm1128_vm6, %v1119_v26, %v805_v22 }
 0x13a   : > { %v3160_v24 = vpop.permute.xlu0 %730  ;;  %v1163_v41 = vsel %vm1150_vm7, %v1141_v27, %v871_v16 }
 0x13b   : > { %880 = vrot.lane.b32.xlu1 %v3152_v5, %s2491_s12  ;;  %v1185_v11 = vsel %vm1172_vm8, %v1163_v41, %v937_v37  ;;  %v1054_v37 = vsel %vm342_vm0, %v2874_v15, %v3096_v21  ;;  %v1093_v21 = vsel %vm1084_vm4, %v1071_v34, %v3132_v14 }
 0x13c   : > { %600 = vrot.lane.b32.xlu0 %v2911_v47, %s2487_s10  ;;  %v3184_v47 = vld [vmem:[#allocation2 + $0xba] sm:$0xff]  ;;  %v1076_v30 = vsel %vm1062_vm3, %v1054_v37, %v3114_v46  ;;  %v1115_v46 = vsel %vm1106_vm5, %v1093_v21, %v3160_v24  ;;  %v1464_v21 = vadd.s32 24, %v3210_v58 }
 0x13d   : > { %v1003_v44 = vpop.permute.xlu1 %1002  ;;  %v1098_v50 = vsel %vm1084_vm4, %v1076_v30, %v3130_v52 }
 0x13e   : > { %v993_v45 = vpop.permute.xlu0 %992  ;;  %v1207_v49 = vsel %vm3812_vm9, %v1185_v11, %v1003_v44  ;;  %v457_v11 = vld [vmem:[#allocation2 + $0xca] sm:$0xff] }
 0x13f   : > { %v1202_v62 = vsel %vm3812_vm9, %v1180_v43, %v993_v45  ;;  %946 = vrot.lane.b32.xlu1 %v3172_v32, %s2492_s25  ;;  %2306 = vmatmul.mubr.msk.f32.gmra.mrb[2].mxu1 %vm3811_vm10, %v1207_v49 }
 0x140   : > { %684 = vrot.lane.b32.xlu0 %v3058_v36, %s2484_s7  ;;  %2291 = vmatmul.mubr.msk.f32.gmra.mrb[14].mxu0 %vm3811_vm10, %v1202_v62  ;;  %v1463_v62 = vadd.s32 16, %v3210_v58 }
 0x141   : > { %v3186_v29 = vpop.permute.xlu1 %508  ;;  %2293 = vmatprep.mubr.msk.f32.mxu0 %vm3809_vm1, %v2489_v28  ;;  %2308 = vmatprep.mubr.msk.f32.mxu1 %vm3809_vm1, %v2489_v28 }
 0x142   : > { %v3188_v54 = vpop.permute.xlu0 %498 }
 0x143   : > { %1012 = vrot.lane.b32.xlu1 %v3184_v47, %s2493_s29 }
 0x144   : > { %750 = vrot.lane.b32.xlu0 %v3082_v2, %s2486_s9  ;;  %v453_v2 = vld [vmem:[#allocation2 + $0xc1] sm:$0xff] }
 0x145   : > { %v807_v36 = vpop.permute.xlu1 %806 }
 0x146   : > { %v797_v57 = vpop.permute.xlu0 %796 }
 0x147   : > { %816 = vrot.lane.b32.xlu1 %v3094_v38, %s2490_s11  ;;  %v1462_v38 = vadd.s32 8, %v3210_v58  ;;  %v1137_v39 = vsel %vm1128_vm6, %v1115_v46, %v797_v57 }
 0x148   : > { %518 = vrot.lane.b32.xlu0 %v2961_v33, %s2485_s8  ;;  %v456_v33 = vld [vmem:[#allocation2 + $0xc2] sm:$0xff] }
 0x149   : > { %v3202_v61 = vpop.permute.xlu1 %592 }
 0x14a   : > { %v3204_v4 = vpop.permute.xlu0 %582 }
 0x14b   : > { %882 = vrot.lane.b32.xlu1 %v450_v60, %s2491_s12  ;;  %v3297_v60 = vadd.s32 %v3215_v10, %v1463_v62 }
 0x14c   : > { %602 = vrot.lane.b32.xlu0 %v2980_v1, %s2487_s10  ;;  %v3227_v1 = vadd.s32 %v3215_v10, %v3210_v58 }
 0x14d   : > { %v873_v8 = vpop.permute.xlu1 %872 }
 0x14e   : > { %v863_v3 = vpop.permute.xlu0 %862  ;;  %vm1504_vm11 = vcmp.lt.s32.totalorder %v3227_v1, 0 }
 0x14f   : > { %948 = vrot.lane.b32.xlu1 %v453_v2, %s2492_s25  ;;  %v1159_v12 = vsel %vm1150_vm7, %v1137_v39, %v863_v3  ;;  %v458_v2 = vld [vmem:[#allocation2 + $0xd2] sm:$0xff] }
 0x150   : > { %686 = vrot.lane.b32.xlu0 %v3112_v55, %s2484_s7  ;;  %v3230_v55 = vadd.s32 %v3215_v10, %v1462_v38  ;;  %v1527_v38 = vsub.s32 0, %v3297_v60 }
 0x151   : > { %v3218_v22 = vpop.permute.xlu1 %676 }
 0x152   : > { %v3220_v6 = vpop.permute.xlu0 %666  ;;  %v1516_v15 = vsub.s32 0, %v3230_v55  ;;  %vm1515_vm12 = vcmp.lt.s32.totalorder %v3230_v55, 0 }
 0x153   : > { %1014 = vrot.lane.b32.xlu1 %v456_v33, %s2493_s29 }
 0x154   : > { %752 = vrot.lane.b32.xlu0 %v3122_v51, %s2486_s9  ;;  %v1505_v51 = vsub.s32 0, %v3227_v1 }
 0x155   : > { %v939_v16 = vpop.permute.xlu1 %938 }
 0x156   : > { %v929_v18 = vpop.permute.xlu0 %928  ;;  %v2210_v52 = vmin.u32 %v1505_v51, %v3227_v1 }
 0x157   : > { %818 = vrot.lane.b32.xlu1 %v3128_v23, %s2490_s11  ;;  %v1120_v23 = vsel %vm1106_vm5, %v1098_v50, %v3158_v63  ;;  %v2211_v63 = vmin.u32 %v1516_v15, %v3230_v55  ;;  %v1181_v26 = vsel %vm1172_vm8, %v1159_v12, %v929_v18  ;;  %v1050_v12 = vsel %vm342_vm0, %v2696_v53, %v3188_v54 }
 0x158   : > { %520 = vrot.lane.b32.xlu0 %v3020_v20, %s2485_s8  ;;  %v1142_v59 = vsel %vm1128_vm6, %v1120_v23, %v807_v36 }
 0x159   : > { %v3252_v13 = vpop.permute.xlu1 %742  ;;  %v1164_v14 = vsel %vm1150_vm7, %v1142_v59, %v873_v8  ;;  %v3281_v43 = vmul.u32.u64.low 2863311531, %v2211_v63  ;;  %v3282_v44 = vmul.u32.u64.high 2863311531, %v2211_v63, %v3281_v43 }
 0x15a   : > { %v3254_v20 = vpop.permute.xlu0 %732  ;;  %v1186_v24 = vsel %vm1172_vm8, %v1164_v14, %v939_v16  ;;  %v1055_v14 = vsel %vm342_vm0, %v2763_v0, %v3186_v29 }
 0x15b   : > { %884 = vrot.lane.b32.xlu1 %v451_v48, %s2491_s12  ;;  %v1521_v8 = vshrl.u32 %v3282_v44, 4 }
 0x15c   : > { %604 = vrot.lane.b32.xlu0 %v3036_v25, %s2487_s10  ;;  %v3275_v25 = vmul.u32.u64.low 2863311531, %v2210_v52  ;;  %v3276_v35 = vmul.u32.u64.high 2863311531, %v2210_v52, %v3275_v25 }
 0x15d   : > { %v1005_v40 = vpop.permute.xlu1 %1004  ;;  %v1522_v18 = vmul.u32 24, %v1521_v8 }
 0x15e   : > { %v995_v27 = vpop.permute.xlu0 %994  ;;  %v1208_v31 = vsel %vm3812_vm9, %v1186_v24, %v1005_v40  ;;  %v1510_v7 = vshrl.u32 %v3276_v35, 4  ;;  %v1072_v24 = vsel %vm1062_vm3, %v1050_v12, %v3204_v4 }
 0x15f   : > { %v1203_v41 = vsel %vm3812_vm9, %v1181_v26, %v995_v27  ;;  %950 = vrot.lane.b32.xlu1 %v454_v42, %s2492_s25  ;;  %2309 = vmatmul.mubr.msk.f32.gmra.mrb[4].mxu1 %vm3811_vm10, %v1208_v31  ;;  %v1523_v30 = vsub.s32 %v2211_v63, %v1522_v18  ;;  %v1077_v63 = vsel %vm1062_vm3, %v1055_v14, %v3202_v61 }
 0x160   : > { %688 = vrot.lane.b32.xlu0 %v3152_v5, %s2484_s7  ;;  %2294 = vmatmul.mubr.msk.f32.gmra.mrb[16].mxu0 %vm3811_vm10, %v1203_v41  ;;  %v452_v5 = vld [vmem:[#allocation2 + $0xd0] sm:$0xff]  ;;  %v1511_v16 = vmul.u32 24, %v1510_v7  ;;  %v1099_v40 = vsel %vm1084_vm4, %v1077_v63, %v3218_v22  ;;  %v1094_v27 = vsel %vm1084_vm4, %v1072_v24, %v3220_v6  ;;  %s2345_s7 = smul.u32 3, %s3863_s16 }
 0x161   : > { %v3284_v45 = vpop.permute.xlu1 %510  ;;  %2296 = vmatprep.mubr.msk.f32.mxu0 %vm3809_vm1, %v2489_v28  ;;  %2311 = vmatprep.mubr.msk.f32.mxu1 %vm3809_vm1, %v2489_v28  ;;  %v1524_v46 = vsub.s32 0, %v1523_v30  ;;  %v1121_v54 = vsel %vm1106_vm5, %v1099_v40, %v3252_v13  ;;  %v1116_v61 = vsel %vm1106_vm5, %v1094_v27, %v3254_v20 }
 0x162   : > { %v3286_v49 = vpop.permute.xlu0 %500  ;;  %v1512_v51 = vsub.s32 %v2210_v52, %v1511_v16  ;;  %v3323_v52 = vadd.s32 %v3215_v10, %v1464_v21  ;;  %s312_s8 = sadd.s32 %s2345_s7, %s3869_s15 }
 0x163   : > { %1016 = vrot.lane.b32.xlu1 %v457_v11, %s2493_s29  ;;  %v1525_v26 = vsel %vm1515_vm12, %v1524_v46, %v1523_v30  ;;  %s320_s16 = scalar_lea.vmem %s3808_s4, %s312_s8 }
 0x164   : > { %754 = vrot.lane.b32.xlu0 %v3172_v32, %s2486_s9  ;;  %v455_v32 = vld [vmem:[#allocation2 + $0xd1] sm:$0xff]  ;;  %v1513_v23 = vsub.s32 0, %v1512_v51  ;;  %v1538_v29 = vsub.s32 0, %v3323_v52  ;;  %vm1736_vm15 = vcmp.ne.s32.totalorder %v1525_v26, 0  ;;  %vm1757_vm2 = vcmp.lt.s32.totalorder %v1525_v26, 0 }
 0x165   : > { %v809_v36 = vpop.permute.xlu1 %808  ;;  %vm3365_vm12 = vmand %vm1757_vm2, %vm1736_vm15  ;;  %vm1862_vm2 = vcmp.lt.s32.totalorder %v3230_v55, 384 }
 0x166   : > { %v799_v57 = vpop.permute.xlu0 %798  ;;  %v1514_v42 = vsel %vm1504_vm11, %v1513_v23, %v1512_v51  ;;  %v1143_v4 = vsel %vm1128_vm6, %v1121_v54, %v809_v36  ;;  %v1465_v51 = vadd.s32 32, %v3210_v58  ;;  %v1056_v54 = vsel %vm342_vm0, %v2809_v17, %v3284_v45 }
 0x167   : > { %886 = vrot.lane.b32.xlu1 %v452_v5, %s2491_s12  ;;  %vm1735_vm13 = vcmp.ne.s32.totalorder %v1514_v42, 0  ;;  %v1138_v22 = vsel %vm1128_vm6, %v1116_v61, %v799_v57  ;;  %vm1756_vm14 = vcmp.lt.s32.totalorder %v1514_v42, 0  ;;  %v1798_v41 = vadd.s32 24, %v1514_v42  ;;  %v2439_v61 = vld [vmem:[#allocation2 + $0x50] sm:$0xff] }
 0x168   : > { %820 = vrot.lane.b32.xlu0 %v3184_v47, %s2490_s11  ;;  %v2212_v47 = vmin.u32 %v1527_v38, %v3297_v60  ;;  %v2213_v5 = vmin.u32 %v1538_v29, %v3323_v52  ;;  %vm3357_vm11 = vmand %vm1756_vm14, %vm1735_vm13  ;;  %vm1861_vm14 = vcmp.lt.s32.totalorder %v3227_v1, 384  ;;  %s313_s11 = scalar_lea.vmem %s3807_s3, %s312_s8 }
 0x169   : > { %v3304_v3 = vpop.permute.xlu1 %594 }
 0x16a   : > { %v3306_v33 = vpop.permute.xlu0 %584  ;;  %v3316_v15 = vmul.u32.u64.low 2863311531, %v2212_v47  ;;  %v3317_v50 = vmul.u32.u64.high 2863311531, %v2212_v47, %v3316_v15 }
 0x16b   : > { %1018 = vrot.lane.b32.xlu1 %v458_v2, %s2493_s29  ;;  %v1799_v2 = vadd.s32 24, %v1525_v26 }
 0x16c   : > { %952 = vrot.lane.b32.xlu0 %v455_v32, %s2492_s25  ;;  %v1532_v53 = vshrl.u32 %v3317_v50, 4  ;;  %v1819_v32 = vsel %vm3357_vm11, %v1798_v41, %v1514_v42  ;;  %vm1526_vm11 = vcmp.lt.s32.totalorder %v3297_v60, 0 }
 0x16d   : > { %v875_v37 = vpop.permute.xlu1 %874  ;;  %v1820_v30 = vsel %vm3365_vm12, %v1799_v2, %v1525_v26  ;;  %vm1840_vm13 = vcmp.lt.s32.totalorder %v1819_v32, 16 }
 0x16e   : > { %v865_v56 = vpop.permute.xlu0 %864  ;;  %v1165_v25 = vsel %vm1150_vm7, %v1143_v4, %v875_v37  ;;  %v1533_v62 = vmul.u32 24, %v1532_v53  ;;  %vm1841_vm15 = vcmp.lt.s32.totalorder %v1820_v30, 16  ;;  %v1051_v4 = vsel %vm342_vm0, %v2439_v61, %v3286_v49 }
 0x16f   : > { %v1160_v35 = vsel %vm1150_vm7, %v1138_v22, %v865_v56  ;;  %v3377_v37 = vmul.u32.u64.low 2863311531, %v2213_v5  ;;  %v3378_v56 = vmul.u32.u64.high 2863311531, %v2213_v5, %v3377_v37 }
 0x170   : > { %v1534_v18 = vsub.s32 %v2212_v47, %v1533_v62  ;;  %v3389_v47 = vadd.s32 %v3215_v10, %v1465_v51  ;;  %v1466_v37 = vadd.s32 40, %v3210_v58 }
 0x171   : > { %v3312_v34 = vpop.permute.xlu1 %678 }
 0x172   : > { %v3314_v48 = vpop.permute.xlu0 %668  ;;  %v1535_v21 = vsub.s32 0, %v1534_v18  ;;  %v1549_v14 = vsub.s32 0, %v3389_v47 }
 0x174   : > { %v3394_v29 = vmin.u32 %v1549_v14, %v3389_v47 }
 0x175   : > { %v941_v59 = vpop.permute.xlu1 %940 }
 0x176   : > { %v931_v39 = vpop.permute.xlu0 %930  ;;  %v1187_v13 = vsel %vm1172_vm8, %v1165_v25, %v941_v59  ;;  %v1536_v59 = vsel %vm1526_vm11, %v1535_v21, %v1534_v18  ;;  %v1073_v25 = vsel %vm1062_vm3, %v1051_v4, %v3306_v33  ;;  %vm1537_vm11 = vcmp.lt.s32.totalorder %v3323_v52, 0 }
 0x177   : > { %v1182_v43 = vsel %vm1172_vm8, %v1160_v35, %v931_v39  ;;  %v1543_v39 = vshrl.u32 %v3378_v56, 4  ;;  %vm1737_vm12 = vcmp.ne.s32.totalorder %v1536_v59, 0  ;;  %v1800_v41 = vadd.s32 24, %v1536_v59 }
 0x178   : > { %v1095_v45 = vsel %vm1084_vm4, %v1073_v25, %v3314_v48 }
 0x179   : > { %v3339_v31 = vpop.permute.xlu1 %744  ;;  %v1544_v53 = vmul.u32 24, %v1543_v39  ;;  %v3442_v39 = vadd.s32 %v3215_v10, %v1466_v37 }
 0x17a   : > { %v3341_v0 = vpop.permute.xlu0 %734  ;;  %v1355_v6 = vpop.f32.mrb[0].mxu0 }
 0x17b   : > { %v2271_v11 = vpop.f32.mrb[1].mxu0  ;;  %v1117_v33 = vsel %vm1106_vm5, %v1095_v45, %v3341_v0 }
 0x17d   : > { %v1007_v20 = vpop.permute.xlu1 %1006 }
 0x17e   : > { %v997_v44 = vpop.permute.xlu0 %996  ;;  %v1209_v57 = vsel %vm3812_vm9, %v1187_v13, %v1007_v20  ;;  %v1545_v13 = vsub.s32 %v2213_v5, %v1544_v53  ;;  %v1560_v53 = vsub.s32 0, %v3442_v39 }
 0x17f   : > { %v1204_v7 = vsel %vm3812_vm9, %v1182_v43, %v997_v44  ;;  %2312 = vmatmul.mubr.msk.f32.gmra.mrb[6].mxu1 %vm3811_vm10, %v1209_v57  ;;  %vm1758_vm9 = vcmp.lt.s32.totalorder %v1536_v59, 0  ;;  %v3420_v43 = vmul.u32.u64.low 2863311531, %v3394_v29  ;;  %v3421_v20 = vmul.u32.u64.high 2863311531, %v3394_v29, %v3420_v43 }
 0x180   : > { %2297 = vmatmul.mubr.msk.f32.gmra.mrb[18].mxu0 %vm3811_vm10, %v1204_v7  ;;  %2314 = vmatprep.mubr.msk.f32.mxu1 %vm3809_vm1, %v2489_v28  ;;  %vm1883_vm10 = vmand %vm1841_vm15, %vm1862_vm2  ;;  %v1546_v8 = vsub.s32 0, %v1545_v13  ;;  %vm3821_vm15 = vcmask 293888   ;;  %v2440_v43 = vld [vmem:[#allocation2 + $0x88] sm:$0xff] }
 0x181   : > { %2299 = vmatprep.mubr.msk.f32.mxu0 %vm3809_vm1, %v2489_v28  ;;  %v801_v38 = vpop.permute.xlu1 %800  ;;  %vm1882_vm1 = vmand %vm1840_vm13, %vm1861_vm14 }
 0x182   : > { %v3375_v16 = vpop.permute.xlu0 %512  ;;  %v1945_v1 = vsel %vm1882_vm1, %v1355_v6, 0.0  ;;  %vm3407_vm1 = vmand %vm1758_vm9, %vm1737_vm12  ;;  %v1139_v44 = vsel %vm1128_vm6, %v1117_v33, %v801_v38  ;;  %vm1863_vm9 = vcmp.lt.s32.totalorder %v3297_v60, 384  ;;  %vm3823_vm12 = vmmov 0  }
 0x183   : > { %v1993_v55 = vmul.f32 %v1945_v1, %v1355_v6  ;;  %v1078_v6 = vsel %vm1062_vm3, %v1056_v54, %v3304_v3  ;;  %v1821_v48 = vsel %vm3407_vm1, %v1800_v41, %v1536_v59  ;;  %vm3822_vm2 = vmmov %vm3821_vm15  ;;  %v1547_v18 = vsel %vm1537_vm11, %v1546_v8, %v1545_v13 }
 0x184   : > { %v1100_v17 = vsel %vm1084_vm4, %v1078_v6, %v3312_v34  ;;  %vm1842_vm14 = vcmp.lt.s32.totalorder %v1821_v48, 16  ;;  %v1554_v60 = vshrl.u32 %v3421_v20, 4  ;;  %v2215_v41 = vmin.u32 %v1560_v53, %v3442_v39 }
 0x185   : > { %v3384_v15 = vpop.permute.xlu1 %596  ;;  %v1122_v3 = vsel %vm1106_vm5, %v1100_v17, %v3339_v31  ;;  %vm1884_vm1 = vmand %vm1842_vm14, %vm1863_vm9  ;;  %vm1864_vm14 = vcmp.lt.s32.totalorder %v3323_v52, 384  ;;  %vm3825_vm11 = vcmask 293888  }
 0x186   : > { %v811_v50 = vpop.permute.xlu0 %810  ;;  %v1555_v59 = vmul.u32 24, %v1554_v60  ;;  %v3463_v35 = vmul.u32.u64.low 2863311531, %v2215_v41  ;;  %v3464_v17 = vmul.u32.u64.high 2863311531, %v2215_v41, %v3463_v35 }
 0x187   : > { %v1144_v34 = vsel %vm1128_vm6, %v1122_v3, %v811_v50 }
 0x189   : > { %v877_v23 = vpop.permute.xlu1 %876 }
 0x18a   : > { %v867_v46 = vpop.permute.xlu0 %866  ;;  %v1360_v12 = vpop.f32.mrb[2].mxu0  ;;  %v1166_v62 = vsel %vm1150_vm7, %v1144_v34, %v877_v23 }
 0x18b   : > { %v1946_v42 = vsel %vm1883_vm10, %v1360_v12, 0.0  ;;  %v2274_v63 = vpop.f32.mrb[3].mxu0  ;;  %v1161_v5 = vsel %vm1150_vm7, %v1139_v44, %v867_v46  ;;  %vm3819_vm10 = vcmask 261120  }
 0x18c   : > { %v1966_v24 = vadd.f32 %v1946_v42, %v1945_v1  ;;  %v1994_v26 = vmul.f32 %v1946_v42, %v1360_v12  ;;  %vm3820_vm13 = vmmov %vm3819_vm10  ;;  %v1057_v1 = vsel %vm342_vm0, %v2883_v19, %v3375_v16  ;;  %v1801_v12 = vadd.s32 24, %v1547_v18 }
 0x18d   : > { %v933_v40 = vpop.permute.xlu1 %932  ;;  %v1079_v42 = vsel %vm1062_vm3, %v1057_v1, %v3384_v15 }
 0x18e   : > { %v681_v27 = vpop.permute.xlu0 %680  ;;  %v2014_v22 = vadd.f32 %v1994_v26, %v1993_v55  ;;  %v1183_v31 = vsel %vm1172_vm8, %v1161_v5, %v933_v40  ;;  %v1556_v40 = vsub.s32 %v3394_v29, %v1555_v59 }
 0x18f   : > { %v1101_v63 = vsel %vm1084_vm4, %v1079_v42, %v681_v27  ;;  %v2441_v42 = vld [vmem:[#allocation2 + $0x90] sm:$0xff] }
 0x191   : > { %v747_v49 = vpop.permute.xlu1 %746 }
 0x192   : > { %v943_v11 = vpop.permute.xlu0 %942  ;;  %v1123_v26 = vsel %vm1106_vm5, %v1101_v63, %v747_v49 }
 0x193   : > { %v1188_v36 = vsel %vm1172_vm8, %v1166_v62, %v943_v11 }
 0x195   : > { %v1009_v0 = vpop.permute.xlu1 %1008 }
 0x196   : > { %v999_v57 = vpop.permute.xlu0 %998  ;;  %v1210_v7 = vsel %vm3819_vm10, %v1188_v36, %v1009_v0  ;;  %vm1738_vm10 = vcmp.ne.s32.totalorder %v1547_v18, 0  ;;  %v1565_v0 = vshrl.u32 %v3464_v17, 4 }
 0x197   : > { %v1205_v2 = vsel %vm3820_vm13, %v1183_v31, %v999_v57  ;;  %2315 = vmatmul.mubr.msk.f32.gmra.mrb[8].mxu1 %vm3822_vm2, %v1210_v7  ;;  %vm1759_vm13 = vcmp.lt.s32.totalorder %v1547_v18, 0 }
 0x198   : > { %2300 = vmatmul.mubr.msk.f32.gmra.mrb[20].mxu0 %vm3821_vm15, %v1205_v2  ;;  %2317 = vmatprep.mubr.msk.f32.mxu1 %vm3823_vm12, %v2489_v28  ;;  %vm1780_vm9 = vmand %vm1759_vm13, %vm1738_vm10  ;;  %vm3824_vm15 = vcmask 261120   ;;  %v1566_v60 = vmul.u32 24, %v1565_v0 }
 0x199   : > { %v813_v32 = vpop.permute.xlu1 %812  ;;  %v1822_v61 = vsel %vm1780_vm9, %v1801_v12, %v1547_v18 }
 0x19a   : > { %v515_v38 = vpop.permute.xlu0 %514  ;;  %v1365_v56 = vpop.f32.mrb[4].mxu0  ;;  %v1145_v54 = vsel %vm1128_vm6, %v1123_v26, %v813_v32  ;;  %vm1843_vm2 = vcmp.lt.s32.totalorder %v1822_v61, 16 }
 0x19b   : > { %v1947_v51 = vsel %vm1884_vm1, %v1365_v56, 0.0  ;;  %v2277_v30 = vpop.f32.mrb[5].mxu0  ;;  %vm1548_vm1 = vcmp.lt.s32.totalorder %v3389_v47, 0  ;;  %vm1885_vm10 = vmand %vm1843_vm2, %vm1864_vm14  ;;  %v1058_v20 = vsel %vm342_vm0, %v2440_v43, %v515_v38 }
 0x19c   : > { %v1967_v50 = vadd.f32 %v1966_v24, %v1947_v51  ;;  %v1995_v21 = vmul.f32 %v1947_v51, %v1365_v56  ;;  %v1567_v51 = vsub.s32 %v2215_v41, %v1566_v60  ;;  %v1467_v30 = vadd.s32 48, %v3210_v58 }
 0x19d   : > { %v879_v23 = vpop.permute.xlu1 %878 }
 0x19e   : > { %v599_v46 = vpop.permute.xlu0 %598  ;;  %v2015_v14 = vadd.f32 %v2014_v22, %v1995_v21  ;;  %v1167_v19 = vsel %vm1150_vm7, %v1145_v54, %v879_v23  ;;  %v1557_v22 = vsub.s32 0, %v1556_v40  ;;  %v3481_v12 = vadd.s32 %v3215_v10, %v1467_v30 }
 0x19f   : > { %v1080_v48 = vsel %vm1062_vm3, %v1058_v20, %v599_v46 }
 0x1a0   : > { %v1558_v25 = vsel %vm1548_vm1, %v1557_v22, %v1556_v40  ;;  %vm3826_vm1 = vcmask 293888  }
 0x1a1   : > { %v945_v55 = vpop.permute.xlu1 %944  ;;  %vm1739_vm13 = vcmp.ne.s32.totalorder %v1558_v25, 0  ;;  %vm1760_vm9 = vcmp.lt.s32.totalorder %v1558_v25, 0  ;;  %v1802_v34 = vadd.s32 24, %v1558_v25 }
 0x1a2   : > { %v683_v24 = vpop.permute.xlu0 %682  ;;  %v1189_v16 = vsel %vm1172_vm8, %v1167_v19, %v945_v55  ;;  %vm1781_vm14 = vmand %vm1760_vm9, %vm1739_vm13  ;;  %vm1559_vm13 = vcmp.lt.s32.totalorder %v3442_v39, 0  ;;  %v1571_v19 = vsub.s32 0, %v3481_v12 }
 0x1a3   : > { %v1102_v62 = vsel %vm1084_vm4, %v1080_v48, %v683_v24  ;;  %v1823_v7 = vsel %vm1781_vm14, %v1802_v34, %v1558_v25 }
 0x1a4   : > { %vm1844_vm2 = vcmp.lt.s32.totalorder %v1823_v7, 16 }
 0x1a5   : > { %v1011_v4 = vpop.permute.xlu1 %1010 }
 0x1a6   : > { %v749_v15 = vpop.permute.xlu0 %748  ;;  %v1211_v27 = vsel %vm3824_vm15, %v1189_v16, %v1011_v4 }
 0x1a7   : > { %2318 = vmatmul.mubr.msk.f32.gmra.mrb[10].mxu1 %vm3825_vm11, %v1211_v27  ;;  %v1124_v36 = vsel %vm1106_vm5, %v1102_v62, %v749_v15  ;;  %vm1865_vm11 = vcmp.lt.s32.totalorder %v3389_v47, 384  ;;  %v1568_v47 = vsub.s32 0, %v1567_v51 }
 0x1a8   : > { %2320 = vmatprep.mubr.msk.f32.mxu1 %vm3823_vm12, %v2489_v28 }
 0x1a9   : > { %v815_v29 = vpop.permute.xlu1 %814  ;;  %v1569_v61 = vsel %vm1559_vm13, %v1568_v47, %v1567_v51 }
 0x1aa   : > { %v517_v6 = vpop.permute.xlu0 %516  ;;  %v1370_v52 = vpop.f32.mrb[6].mxu0  ;;  %v1146_v57 = vsel %vm1128_vm6, %v1124_v36, %v815_v29  ;;  %vm1740_vm9 = vcmp.ne.s32.totalorder %v1569_v61, 0  ;;  %vm1761_vm14 = vcmp.lt.s32.totalorder %v1569_v61, 0  ;;  %v2216_v29 = vmin.u32 %v1571_v19, %v3481_v12 }
 0x1ab   : > { %v1948_v45 = vsel %vm1885_vm10, %v1370_v52, 0.0  ;;  %v2280_v49 = vpop.f32.mrb[7].mxu0  ;;  %vm1886_vm10 = vmand %vm1844_vm2, %vm1865_vm11  ;;  %v1059_v63 = vsel %vm342_vm0, %v2441_v42, %v517_v6  ;;  %v1803_v6 = vadd.s32 24, %v1569_v61 }
 0x1ac   : > { %v1968_v11 = vadd.f32 %v1967_v50, %v1948_v45  ;;  %v1996_v13 = vmul.f32 %v1948_v45, %v1370_v52  ;;  %vm3827_vm2 = vmmov %vm3826_vm1  ;;  %v3497_v17 = vmul.u32.u64.low 2863311531, %v2216_v29  ;;  %v3498_v52 = vmul.u32.u64.high 2863311531, %v2216_v29, %v3497_v17 }
 0x1ad   : > { %v881_v3 = vpop.permute.xlu1 %880  ;;  %vm1782_vm11 = vmand %vm1761_vm14, %vm1740_vm9 }
 0x1ae   : > { %v601_v33 = vpop.permute.xlu0 %600  ;;  %v2016_v44 = vadd.f32 %v2015_v14, %v1996_v13  ;;  %v1168_v2 = vsel %vm1150_vm7, %v1146_v57, %v881_v3  ;;  %v1824_v45 = vsel %vm1782_vm11, %v1803_v6, %v1569_v61  ;;  %v2442_v13 = vld [vmem:[#allocation2 + $0x98] sm:$0xff]  ;;  %v1576_v48 = vshrl.u32 %v3498_v52, 4  ;;  %vm3828_vm9 = vmmov %vm3824_vm15 }
 0x1af   : > { %v1081_v24 = vsel %vm1062_vm3, %v1059_v63, %v601_v33  ;;  %vm3829_vm14 = vmmov %vm3827_vm2 }
 0x1b1   : > { %v947_v5 = vpop.permute.xlu1 %946 }
 0x1b2   : > { %v685_v31 = vpop.permute.xlu0 %684  ;;  %v1190_v8 = vsel %vm1172_vm8, %v1168_v2, %v947_v5 }
 0x1b3   : > { %v1103_v26 = vsel %vm1084_vm4, %v1081_v24, %v685_v31 }
 0x1b5   : > { %v1013_v32 = vpop.permute.xlu1 %1012 }
 0x1b6   : > { %v751_v38 = vpop.permute.xlu0 %750  ;;  %v1212_v18 = vsel %vm3824_vm15, %v1190_v8, %v1013_v32 }
 0x1b7   : > { %2321 = vmatmul.mubr.msk.f32.gmra.mrb[12].mxu1 %vm3826_vm1, %v1212_v18  ;;  %v1125_v54 = vsel %vm1106_vm5, %v1103_v26, %v751_v38  ;;  %vm1845_vm1 = vcmp.lt.s32.totalorder %v1824_v45, 16  ;;  %v1577_v38 = vmul.u32 24, %v1576_v48 }
 0x1b8   : > { %2323 = vmatprep.mubr.msk.f32.mxu1 %vm3823_vm12, %v2489_v28 }
 0x1b9   : > { %v817_v37 = vpop.permute.xlu1 %816 }
 0x1ba   : > { %v519_v56 = vpop.permute.xlu0 %518  ;;  %v1375_v50 = vpop.f32.mrb[8].mxu0  ;;  %v1147_v16 = vsel %vm1128_vm6, %v1125_v54, %v817_v37 }
 0x1bb   : > { %v1949_v21 = vsel %vm1886_vm10, %v1375_v50, 0.0  ;;  %v2283_v23 = vpop.f32.mrb[9].mxu0  ;;  %vm1866_vm10 = vcmp.lt.s32.totalorder %v3442_v39, 384  ;;  %v1060_v3 = vsel %vm342_vm0, %v2442_v13, %v519_v56 }
 0x1bc   : > { %v1969_v46 = vadd.f32 %v1968_v11, %v1949_v21  ;;  %v1997_v59 = vmul.f32 %v1949_v21, %v1375_v50  ;;  %vm1887_vm13 = vmand %vm1845_vm1, %vm1866_vm10  ;;  %v1578_v21 = vsub.s32 %v2216_v29, %v1577_v38  ;;  %v1468_v23 = vadd.s32 56, %v3210_v58 }
 0x1bd   : > { %v883_v1 = vpop.permute.xlu1 %882 }
 0x1be   : > { %v603_v14 = vpop.permute.xlu0 %602  ;;  %v2017_v55 = vadd.f32 %v2016_v44, %v1997_v59  ;;  %v1169_v4 = vsel %vm1150_vm7, %v1147_v16, %v883_v1  ;;  %v1490_v47 = vadd.s32 %v3215_v10, %v1468_v23  ;;  %v1473_v23 = vadd.s32 96, %v3210_v58 }
 0x1bf   : > { %v1082_v33 = vsel %vm1062_vm3, %v1060_v3, %v603_v14  ;;  %v1579_v14 = vsub.s32 0, %v1578_v21 }
 0x1c1   : > { %v949_v40 = vpop.permute.xlu1 %948 }
 0x1c2   : > { %v687_v53 = vpop.permute.xlu0 %686  ;;  %v1191_v15 = vsel %vm1172_vm8, %v1169_v4, %v949_v40 }
 0x1c3   : > { %v1104_v43 = vsel %vm1084_vm4, %v1082_v33, %v687_v53 }
 0x1c5   : > { %v1015_v27 = vpop.permute.xlu1 %1014 }
 0x1c6   : > { %v753_v22 = vpop.permute.xlu0 %752  ;;  %v1213_v41 = vsel %vm3824_vm15, %v1191_v15, %v1015_v27 }
 0x1c7   : > { %2324 = vmatmul.mubr.msk.f32.gmra.mrb[14].mxu1 %vm3827_vm2, %v1213_v41  ;;  %v1126_v44 = vsel %vm1106_vm5, %v1104_v43, %v753_v22 }
 0x1c8   : > { %2326 = vmatprep.mubr.msk.f32.mxu1 %vm3823_vm12, %v2489_v28 }
 0x1c9   : > { %v819_v25 = vpop.permute.xlu1 %818 }
 0x1ca   : > { %v521_v35 = vpop.permute.xlu0 %520  ;;  %v1148_v62 = vsel %vm1128_vm6, %v1126_v44, %v819_v25 }
 0x1cb   : > { %v1061_v18 = vsel %vm342_vm0, %v3003_v9, %v521_v35  ;;  %vm1570_vm0 = vcmp.lt.s32.totalorder %v3481_v12, 0  ;;  %v1469_v35 = vadd.s32 64, %v3210_v58 }
 0x1cc   : > { %v1580_v63 = vsel %vm1570_vm0, %v1579_v14, %v1578_v21  ;;  %v1471_v21 = vadd.s32 80, %v3210_v58 }
 0x1cd   : > { %v885_v49 = vpop.permute.xlu1 %884  ;;  %v1804_v26 = vadd.s32 24, %v1580_v63  ;;  %v1491_v52 = vadd.s32 %v3215_v10, %v1469_v35 }
 0x1ce   : > { %v605_v11 = vpop.permute.xlu0 %604  ;;  %v1170_v31 = vsel %vm1150_vm7, %v1148_v62, %v885_v49 }
 0x1cf   : > { %v1083_v37 = vsel %vm1062_vm3, %v1061_v18, %v605_v11  ;;  %vm3830_vm3 = vmmov %vm3828_vm9  ;;  %v1593_v45 = vsub.s32 0, %v1491_v52  ;;  %vm1592_vm0 = vcmp.lt.s32.totalorder %v1491_v52, 0 }
 0x1d1   : > { %v951_v20 = vpop.permute.xlu1 %950  ;;  %v2218_v49 = vmin.u32 %v1593_v45, %v1491_v52 }
 0x1d2   : > { %v689_v34 = vpop.permute.xlu0 %688  ;;  %v1380_v5 = vpop.f32.mrb[10].mxu0  ;;  %v1192_v0 = vsel %vm1172_vm8, %v1170_v31, %v951_v20 }
 0x1d3   : > { %v1950_v39 = vsel %vm1887_vm13, %v1380_v5, 0.0  ;;  %v2286_v36 = vpop.f32.mrb[11].mxu0  ;;  %v1105_v56 = vsel %vm1084_vm4, %v1083_v37, %v689_v34  ;;  %vm3831_vm4 = vmmov %vm3827_vm2  ;;  %vm1581_vm2 = vcmp.lt.s32.totalorder %v1490_v47, 0 }
 0x1d4   : > { %v1970_v57 = vadd.f32 %v1969_v46, %v1950_v39  ;;  %v1998_v7 = vmul.f32 %v1950_v39, %v1380_v5  ;;  %v3535_v13 = vmul.u32.u64.low 2863311531, %v2218_v49  ;;  %v3536_v3 = vmul.u32.u64.high 2863311531, %v2218_v49, %v3535_v13 }
 0x1d5   : > { %v1017_v2 = vpop.permute.xlu1 %1016 }
 0x1d6   : > { %v1214_v8 = vsel %vm3828_vm9, %v1192_v0, %v1017_v2  ;;  %v755_v32 = vpop.permute.xlu0 %754  ;;  %v2018_v60 = vadd.f32 %v2017_v55, %v1998_v7  ;;  %v1582_v55 = vsub.s32 0, %v1490_v47  ;;  %vm1868_vm9 = vcmp.lt.s32.totalorder %v1490_v47, 384 }
 0x1d7   : > { %2327 = vmatmul.mubr.msk.f32.gmra.mrb[16].mxu1 %vm3829_vm14, %v1214_v8  ;;  %v1127_v30 = vsel %vm1106_vm5, %v1105_v56, %v755_v32  ;;  %vm1741_vm5 = vcmp.ne.s32.totalorder %v1580_v63, 0  ;;  %v1598_v43 = vshrl.u32 %v3536_v3, 4  ;;  %v1470_v0 = vadd.s32 72, %v3210_v58 }
 0x1d8   : > { %2329 = vmatprep.mubr.msk.f32.mxu1 %vm3823_vm12, %v2489_v28  ;;  %vm1762_vm12 = vcmp.lt.s32.totalorder %v1580_v63, 0  ;;  %v2217_v24 = vmin.u32 %v1582_v55, %v1490_v47 }
 0x1d9   : > { %v887_v51 = vpop.permute.xlu1 %886  ;;  %v1599_v39 = vmul.u32 24, %v1598_v43  ;;  %v3543_v7 = vadd.s32 %v3215_v10, %v1470_v0 }
 0x1da   : > { %v821_v50 = vpop.permute.xlu0 %820  ;;  %v3526_v40 = vmul.u32.u64.low 2863311531, %v2217_v24  ;;  %v3527_v53 = vmul.u32.u64.high 2863311531, %v2217_v24, %v3526_v40 }
 0x1db   : > { %v1149_v46 = vsel %vm1128_vm6, %v1127_v30, %v821_v50  ;;  %vm1783_vm6 = vmand %vm1762_vm12, %vm1741_vm5  ;;  %v1604_v8 = vsub.s32 0, %v3543_v7  ;;  %v1475_v40 = vadd.s32 112, %v3210_v58 }
 0x1dc   : > { %v1171_v59 = vsel %vm1150_vm7, %v1149_v46, %v887_v51  ;;  %v1825_v54 = vsel %vm1783_vm6, %v1804_v26, %v1580_v63  ;;  %v1587_v61 = vshrl.u32 %v3527_v53, 4  ;;  %v1472_v51 = vadd.s32 88, %v3210_v58 }
 0x1dd   : > { %v1019_v9 = vpop.permute.xlu1 %1018  ;;  %vm1846_vm7 = vcmp.lt.s32.totalorder %v1825_v54, 16  ;;  %v2219_v38 = vmin.u32 %v1604_v8, %v3543_v7  ;;  %vm1869_vm6 = vcmp.lt.s32.totalorder %v1491_v52, 384  ;;  %v3567_v26 = vadd.s32 %v3215_v10, %v1473_v23 }
 0x1de   : > { %v953_v1 = vpop.permute.xlu0 %952  ;;  %v1588_v29 = vmul.u32 24, %v1587_v61  ;;  %v3552_v30 = vadd.s32 %v3215_v10, %v1472_v51 }
 0x1df   : > { %v1193_v28 = vsel %vm1172_vm8, %v1171_v59, %v953_v1  ;;  %vm1867_vm8 = vcmp.lt.s32.totalorder %v3481_v12, 384  ;;  %v1474_v59 = vadd.s32 104, %v3210_v58 }
 0x1e0   : > { %v1215_v42 = vsel %vm3830_vm3, %v1193_v28, %v1019_v9  ;;  %vm1888_vm15 = vmand %vm1846_vm7, %vm1867_vm8  ;;  %v1589_v25 = vsub.s32 %v2217_v24, %v1588_v29  ;;  %v1626_v14 = vsub.s32 0, %v3552_v30  ;;  %v3564_v24 = vadd.s32 %v3215_v10, %v1471_v21 }
 0x1e1   : > { %2330 = vmatmul.mubr.msk.f32.gmra.mrb[18].mxu1 %vm3831_vm4, %v1215_v42  ;;  %v3573_v54 = vadd.s32 %v3215_v10, %v1474_v59  ;;  %vm1603_vm8 = vcmp.lt.s32.totalorder %v3543_v7, 0 }
 0x1e2   : > { %v1590_v17 = vsub.s32 0, %v1589_v25  ;;  %v2221_v61 = vmin.u32 %v1626_v14, %v3552_v30 }
 0x1e4   : > { %v1591_v12 = vsel %vm1581_vm2, %v1590_v17, %v1589_v25 }
 0x1e5   : > { %vm1742_vm11 = vcmp.ne.s32.totalorder %v1591_v12, 0  ;;  %vm1763_vm1 = vcmp.lt.s32.totalorder %v1591_v12, 0  ;;  %v1805_v11 = vadd.s32 24, %v1591_v12 }
 0x1e6   : > { %vm1784_vm10 = vmand %vm1763_vm1, %vm1742_vm11 }
 0x1e7   : > { %v1826_v33 = vsel %vm1784_vm10, %v1805_v11, %v1591_v12  ;;  %vm1870_vm10 = vcmp.lt.s32.totalorder %v3543_v7, 384 }
 0x1e8   : > { %vm1847_vm13 = vcmp.lt.s32.totalorder %v1826_v33, 16 }
 0x1e9   : > { %vm1889_vm14 = vmand %vm1847_vm13, %vm1868_vm9  ;;  %vm1625_vm9 = vcmp.lt.s32.totalorder %v3552_v30, 0 }
 0x1f2   : > { %v3531_v16 = vpop.f32.mrb[0].mxu1 }
 0x1f3   : > { %v1385_v19 = vpop.f32.mrb[12].mxu0  ;;  %v2304_v27 = vpop.f32.mrb[1].mxu1 }
 0x1f4   : > { %v1951_v4 = vsel %vm1888_vm15, %v1385_v19, 0.0  ;;  %v2289_v15 = vpop.f32.mrb[13].mxu0  ;;  %v1637_v27 = vsub.s32 0, %v3567_v26 }
 0x1f5   : > { %v1971_v22 = vadd.f32 %v1970_v57, %v1951_v4  ;;  %v1999_v41 = vmul.f32 %v1951_v4, %v1385_v19  ;;  %v1600_v57 = vsub.s32 %v2218_v49, %v1599_v39  ;;  %v1615_v4 = vsub.s32 0, %v3564_v24 }
 0x1f6   : > { %v1476_v15 = vadd.s32 120, %v3210_v58  ;;  %v2222_v52 = vmin.u32 %v1637_v27, %v3567_v26  ;;  %v1477_v49 = vadd.s32 128, %v3210_v58 }
 0x1f7   : > { %v2019_v6 = vadd.f32 %v2018_v60, %v1999_v41  ;;  %v1601_v2 = vsub.s32 0, %v1600_v57  ;;  %v3547_v60 = vmul.u32.u64.low 2863311531, %v2219_v38  ;;  %v3548_v37 = vmul.u32.u64.high 2863311531, %v2219_v38, %v3547_v60 }
 0x1f8   : > { %v1648_v41 = vsub.s32 0, %v3573_v54  ;;  %v2220_v35 = vmin.u32 %v1615_v4, %v3564_v24  ;;  %v3588_v17 = vadd.s32 %v3215_v10, %v1476_v15 }
 0x1f9   : > { %v1602_v32 = vsel %vm1592_vm0, %v1601_v2, %v1600_v57  ;;  %v1609_v50 = vshrl.u32 %v3548_v37, 4  ;;  %vm1636_vm0 = vcmp.lt.s32.totalorder %v3567_v26, 0 }
 0x1fa   : > { %vm1743_vm3 = vcmp.ne.s32.totalorder %v1602_v32, 0  ;;  %vm1764_vm4 = vcmp.lt.s32.totalorder %v1602_v32, 0  ;;  %v1806_v18 = vadd.s32 24, %v1602_v32  ;;  %v2223_v45 = vmin.u32 %v1648_v41, %v3573_v54 }
 0x1fb   : > { %vm1785_vm5 = vmand %vm1764_vm4, %vm1743_vm3  ;;  %v1610_v55 = vmul.u32 24, %v1609_v50  ;;  %v3595_v13 = vmul.u32.u64.low 2863311531, %v2220_v35  ;;  %v3596_v3 = vmul.u32.u64.high 2863311531, %v2220_v35, %v3595_v13  ;;  %v1670_v33 = vsub.s32 0, %v3588_v17 }
 0x1fc   : > { %v1827_v56 = vsel %vm1785_vm5, %v1806_v18, %v1602_v32  ;;  %vm1647_vm3 = vcmp.lt.s32.totalorder %v3573_v54, 0 }
 0x1fd   : > { %vm1848_vm12 = vcmp.lt.s32.totalorder %v1827_v56, 16  ;;  %v1611_v19 = vsub.s32 %v2219_v38, %v1610_v55  ;;  %v2225_v39 = vmin.u32 %v1670_v33, %v3588_v17  ;;  %v1620_v32 = vshrl.u32 %v3596_v3, 4 }
 0x1fe   : > { %vm1890_vm7 = vmand %vm1848_vm12, %vm1869_vm6 }
 0x1ff   : > { %v1612_v25 = vsub.s32 0, %v1611_v19  ;;  %v3616_v38 = vmul.u32.u64.low 2863311531, %v2225_v39  ;;  %v3617_v18 = vmul.u32.u64.high 2863311531, %v2225_v39, %v3616_v38  ;;  %v1621_v21 = vmul.u32 24, %v1620_v32 }
 0x201   : > { %v1613_v11 = vsel %vm1603_vm8, %v1612_v25, %v1611_v19  ;;  %v1675_v55 = vshrl.u32 %v3617_v18, 4 }
 0x202   : > { %vm1744_vm15 = vcmp.ne.s32.totalorder %v1613_v11, 0  ;;  %vm1765_vm2 = vcmp.lt.s32.totalorder %v1613_v11, 0 }
 0x203   : > { %vm1786_vm11 = vmand %vm1765_vm2, %vm1744_vm15 }
 0x212   : > { %v3539_v44 = vpop.f32.mrb[2].mxu1 }
 0x213   : > { %v1390_v20 = vpop.f32.mrb[14].mxu0  ;;  %v2307_v62 = vpop.f32.mrb[3].mxu1 }
 0x214   : > { %v1952_v34 = vsel %vm1889_vm14, %v1390_v20, 0.0  ;;  %v2292_v48 = vpop.f32.mrb[15].mxu0  ;;  %vm1614_vm14 = vcmp.lt.s32.totalorder %v3564_v24, 0 }
 0x215   : > { %v1972_v5 = vadd.f32 %v1971_v22, %v1952_v34  ;;  %v2000_v31 = vmul.f32 %v1952_v34, %v1390_v20  ;;  %v3580_v22 = vadd.s32 %v3215_v10, %v1475_v40 }
 0x216   : > { %v3599_v43 = vmul.u32.u64.low 2863311531, %v2222_v52  ;;  %v3600_v20 = vmul.u32.u64.high 2863311531, %v2222_v52, %v3599_v43  ;;  %v3603_v48 = vmul.u32.u64.low 2863311531, %v2223_v45  ;;  %v3604_v62 = vmul.u32.u64.high 2863311531, %v2223_v45, %v3603_v48 }
 0x217   : > { %v2020_v36 = vadd.f32 %v2019_v6, %v2000_v31  ;;  %v3583_v29 = vmul.u32.u64.low 2863311531, %v2221_v61  ;;  %v3584_v6 = vmul.u32.u64.high 2863311531, %v2221_v61, %v3583_v29  ;;  %v1659_v12 = vsub.s32 0, %v3580_v22 }
 0x218   : > { %v1642_v60 = vshrl.u32 %v3600_v20, 4  ;;  %v1653_v56 = vshrl.u32 %v3604_v62, 4  ;;  %vm1658_vm12 = vcmp.lt.s32.totalorder %v3580_v22, 0 }
 0x219   : > { %v2224_v34 = vmin.u32 %v1659_v12, %v3580_v22  ;;  %v1631_v31 = vshrl.u32 %v3584_v6, 4 }
 0x21a   : > { %v1643_v23 = vmul.u32 24, %v1642_v60  ;;  %v1654_v59 = vmul.u32 24, %v1653_v56 }
 0x21b   : > { %v3611_v0 = vmul.u32.u64.low 2863311531, %v2224_v34  ;;  %v3612_v57 = vmul.u32.u64.high 2863311531, %v2224_v34, %v3611_v0  ;;  %v1632_v8 = vmul.u32 24, %v1631_v31 }
 0x21c   : > { %v1644_v40 = vsub.s32 %v2222_v52, %v1643_v23  ;;  %v1655_v4 = vsub.s32 %v2223_v45, %v1654_v59 }
 0x21d   : > { %v1633_v50 = vsub.s32 %v2221_v61, %v1632_v8 }
 0x21e   : > { %v1656_v45 = vsub.s32 0, %v1655_v4 }
 0x220   : > { %v1657_v62 = vsel %vm1647_vm3, %v1656_v45, %v1655_v4 }
 0x232   : > { %v3557_v46 = vpop.f32.mrb[4].mxu1 }
 0x233   : > { %v1395_v9 = vpop.f32.mrb[16].mxu0  ;;  %v2310_v1 = vpop.f32.mrb[5].mxu1 }
 0x234   : > { %v1953_v47 = vsel %vm1890_vm7, %v1395_v9, 0.0  ;;  %v2295_v28 = vpop.f32.mrb[17].mxu0 }
 0x235   : > { %v3561_v42 = vadd.f32 %v1972_v5, %v1953_v47  ;;  %v2001_v63 = vmul.f32 %v1953_v47, %v1395_v9  ;;  %v3607_v5 = vadd.s32 %v3215_v10, %v1477_v49  ;;  %v1664_v9 = vshrl.u32 %v3612_v57, 4 }
 0x236   : > { %v1478_v47 = vadd.s32 136, %v3210_v58  ;;  %v1634_v28 = vsub.s32 0, %v1633_v50  ;;  %v1676_v49 = vmul.u32 24, %v1675_v55 }
 0x237   : > { %v3570_v53 = vadd.f32 %v2020_v36, %v2001_v63  ;;  %v1807_v36 = vadd.s32 24, %v1613_v11  ;;  %v1681_v2 = vsub.s32 0, %v3607_v5  ;;  %v1622_v63 = vsub.s32 %v2220_v35, %v1621_v21 }
 0x238   : > { %v1665_v19 = vmul.u32 24, %v1664_v9  ;;  %v3639_v25 = vadd.s32 %v3215_v10, %v1478_v47  ;;  %v1635_v35 = vsel %vm1625_vm9, %v1634_v28, %v1633_v50  ;;  %v1677_v43 = vsub.s32 %v2225_v39, %v1676_v49 }
 0x239   : > { %v1828_v37 = vsel %vm1786_vm11, %v1807_v36, %v1613_v11  ;;  %v3622_v51 = vmin.u32 %v1681_v2, %v3607_v5  ;;  %v1623_v12 = vsub.s32 0, %v1622_v63  ;;  %v1645_v11 = vsub.s32 0, %v1644_v40 }
 0x23a   : > { %vm1849_vm1 = vcmp.lt.s32.totalorder %v1828_v37, 16  ;;  %v1666_v13 = vsub.s32 %v2224_v34, %v1665_v19  ;;  %v1692_v3 = vsub.s32 0, %v3639_v25  ;;  %vm1746_vm4 = vcmp.ne.s32.totalorder %v1635_v35, 0 }
 0x23b   : > { %vm1891_vm13 = vmand %vm1849_vm1, %vm1870_vm10  ;;  %v3627_v1 = vmul.u32.u64.low 2863311531, %v3622_v51  ;;  %v3628_v14 = vmul.u32.u64.high 2863311531, %v3622_v51, %v3627_v1  ;;  %vm1767_vm5 = vcmp.lt.s32.totalorder %v1635_v35, 0  ;;  %v1624_v33 = vsel %vm1614_vm14, %v1623_v12, %v1622_v63 }
 0x23c   : > { %v1646_v20 = vsel %vm1636_vm0, %v1645_v11, %v1644_v40  ;;  %v1667_v48 = vsub.s32 0, %v1666_v13  ;;  %vm3650_vm6 = vmand %vm1767_vm5, %vm1746_vm4  ;;  %vm1745_vm7 = vcmp.ne.s32.totalorder %v1624_v33, 0  ;;  %vm1766_vm8 = vcmp.lt.s32.totalorder %v1624_v33, 0 }
 0x23d   : > { %v3655_v36 = vmin.u32 %v1692_v3, %v3639_v25  ;;  %vm1747_vm15 = vcmp.ne.s32.totalorder %v1646_v20, 0  ;;  %v1678_v0 = vsub.s32 0, %v1677_v43  ;;  %vm1768_vm2 = vcmp.lt.s32.totalorder %v1646_v20, 0  ;;  %vm3660_vm10 = vmand %vm1766_vm8, %vm1745_vm7 }
 0x23e   : > { %v1668_v39 = vsel %vm1658_vm12, %v1667_v48, %v1666_v13  ;;  %v1808_v57 = vadd.s32 24, %v1624_v33  ;;  %vm1669_vm11 = vcmp.lt.s32.totalorder %v3588_v17, 0  ;;  %v1810_v8 = vadd.s32 24, %v1646_v20  ;;  %vm3669_vm9 = vmand %vm1768_vm2, %vm1747_vm15 }
 0x23f   : > { %vm1748_vm1 = vcmp.ne.s32.totalorder %v1657_v62, 0  ;;  %v3666_v18 = vmul.u32.u64.low 2863311531, %v3655_v36  ;;  %v3667_v60 = vmul.u32.u64.high 2863311531, %v3655_v36, %v3666_v18  ;;  %vm1749_vm14 = vcmp.ne.s32.totalorder %v1668_v39, 0 }
 0x240   : > { %vm1770_vm0 = vcmp.lt.s32.totalorder %v1668_v39, 0  ;;  %v1679_v56 = vsel %vm1669_vm11, %v1678_v0, %v1677_v43  ;;  %v1479_v50 = vadd.s32 144, %v3210_v58  ;;  %v1811_v21 = vadd.s32 24, %v1657_v62 }
 0x241   : > { %v1829_v23 = vsel %vm3660_vm10, %v1808_v57, %v1624_v33  ;;  %vm1872_vm4 = vcmp.lt.s32.totalorder %v3552_v30, 384  ;;  %v1812_v9 = vadd.s32 24, %v1668_v39  ;;  %v1831_v59 = vsel %vm3669_vm9, %v1810_v8, %v1646_v20  ;;  %vm3683_vm12 = vmand %vm1770_vm0, %vm1749_vm14 }
 0x242   : > { %vm1771_vm7 = vcmp.lt.s32.totalorder %v1679_v56, 0  ;;  %vm1850_vm8 = vcmp.lt.s32.totalorder %v1829_v23, 16  ;;  %vm1871_vm15 = vcmp.lt.s32.totalorder %v3564_v24, 384  ;;  %vm1680_vm2 = vcmp.lt.s32.totalorder %v3607_v5, 0 }
 0x243   : > { %v3690_v30 = vadd.s32 %v3215_v10, %v1479_v50  ;;  %v1813_v63 = vadd.s32 24, %v1679_v56  ;;  %vm1873_vm10 = vcmp.lt.s32.totalorder %v3567_v26, 384  ;;  %v1833_v55 = vsel %vm3683_vm12, %v1812_v9, %v1668_v39  ;;  %vm1892_vm9 = vmand %vm1850_vm8, %vm1871_vm15 }
 0x244   : > { %vm1874_vm0 = vcmp.lt.s32.totalorder %v3573_v54, 384  ;;  %vm1876_vm15 = vcmp.lt.s32.totalorder %v3588_v17, 384 }
 0x245   : > { %v1703_v19 = vsub.s32 0, %v3690_v30 }
 0x252   : > { %v3633_v61 = vpop.f32.mrb[6].mxu1 }
 0x253   : > { %v1400_v7 = vpop.f32.mrb[18].mxu0  ;;  %v2313_v41 = vpop.f32.mrb[7].mxu1 }
 0x254   : > { %v1954_v15 = vsel %vm1891_vm13, %v1400_v7, 0.0  ;;  %v2298_v27 = vpop.f32.mrb[19].mxu0  ;;  %vm1769_vm13 = vcmp.lt.s32.totalorder %v1657_v62, 0 }
 0x255   : > { %v3636_v29 = vadd.f32 %v3561_v42, %v1954_v15  ;;  %v2002_v6 = vmul.f32 %v1954_v15, %v1400_v7  ;;  %v1686_v42 = vshrl.u32 %v3628_v14, 4  ;;  %vm3677_vm5 = vmand %vm1769_vm13, %vm1748_vm1  ;;  %vm1852_vm1 = vcmp.lt.s32.totalorder %v1831_v59, 16 }
 0x256   : > { %v1832_v28 = vsel %vm3677_vm5, %v1811_v21, %v1657_v62  ;;  %v1697_v7 = vshrl.u32 %v3667_v60, 4  ;;  %vm1875_vm5 = vcmp.lt.s32.totalorder %v3580_v22, 384 }
 0x257   : > { %v3642_v52 = vadd.f32 %v3570_v53, %v2002_v6  ;;  %v1809_v53 = vadd.s32 24, %v1635_v35  ;;  %v1687_v31 = vmul.u32 24, %v1686_v42  ;;  %vm1853_vm14 = vcmp.lt.s32.totalorder %v1832_v28, 16 }
 0x258   : > { %v1698_v13 = vmul.u32 24, %v1697_v7  ;;  %v2228_v42 = vmin.u32 %v1703_v19, %v3690_v30 }
 0x259   : > { %v1830_v2 = vsel %vm3650_vm6, %v1809_v53, %v1635_v35  ;;  %v1688_v38 = vsub.s32 %v3622_v51, %v1687_v31  ;;  %vm1750_vm6 = vcmp.ne.s32.totalorder %v1679_v56, 0 }
 0x25a   : > { %vm1851_vm3 = vcmp.lt.s32.totalorder %v1830_v2, 16  ;;  %vm3701_vm13 = vmand %vm1771_vm7, %vm1750_vm6  ;;  %v1699_v22 = vsub.s32 %v3655_v36, %v1698_v13  ;;  %v3743_v34 = vmul.u32.u64.low 2863311531, %v2228_v42  ;;  %v3744_v31 = vmul.u32.u64.high 2863311531, %v2228_v42, %v3743_v34 }
 0x25b   : > { %v1689_v14 = vsub.s32 0, %v1688_v38  ;;  %vm3692_vm11 = vmand %vm1851_vm3, %vm1872_vm4  ;;  %vm3712_vm4 = vcmp.lt.s32.totalorder %v1833_v55, 16  ;;  %v1834_v41 = vsel %vm3701_vm13, %v1813_v63, %v1679_v56  ;;  %vm1877_vm13 = vcmp.lt.s32.totalorder %v3607_v5, 384 }
 0x25c   : > { %vm3708_vm3 = vmand %vm1852_vm1, %vm1873_vm10  ;;  %v1956_v6 = vsel %vm3692_vm11, %v3531_v16, 0.0  ;;  %vm1855_vm8 = vcmp.lt.s32.totalorder %v1834_v41, 16  ;;  %v1700_v36 = vsub.s32 0, %v1699_v22  ;;  %v1708_v21 = vshrl.u32 %v3744_v31, 4 }
 0x25d   : > { %v1690_v40 = vsel %vm1680_vm2, %v1689_v14, %v1688_v38  ;;  %vm1895_vm6 = vmand %vm1853_vm14, %vm1874_vm0  ;;  %v1957_v45 = vsel %vm3708_vm3, %v3539_v44, 0.0  ;;  %v2004_v3 = vmul.f32 %v1956_v6, %v3531_v16  ;;  %v1481_v5 = vadd.s32 160, %v3210_v58 }
 0x25e   : > { %vm1751_vm12 = vcmp.ne.s32.totalorder %v1690_v40, 0  ;;  %vm1772_vm7 = vcmp.lt.s32.totalorder %v1690_v40, 0  ;;  %vm1896_vm2 = vmand %vm3712_vm4, %vm1875_vm5  ;;  %v1814_v43 = vadd.s32 24, %v1690_v40  ;;  %v1958_v20 = vsel %vm1895_vm6, %v3557_v46, 0.0 }
 0x25f   : > { %vm3736_vm11 = vmand %vm1772_vm7, %vm1751_vm12  ;;  %v2005_v17 = vmul.f32 %v1957_v45, %v3539_v44  ;;  %v1959_v62 = vsel %vm1896_vm2, %v3633_v61, 0.0  ;;  %v2006_v0 = vmul.f32 %v1958_v20, %v3557_v46  ;;  %v1709_v14 = vmul.u32 24, %v1708_v21 }
 0x260   : > { %vm1897_vm1 = vmand %vm1855_vm8, %vm1876_vm15  ;;  %v1835_v2 = vsel %vm3736_vm11, %v1814_v43, %v1690_v40  ;;  %v2007_v8 = vmul.f32 %v1959_v62, %v3633_v61  ;;  %v3761_v55 = vadd.s32 %v3215_v10, %v1481_v5  ;;  %vm1878_vm12 = vcmp.lt.s32.totalorder %v3639_v25, 384 }
 0x261   : > { %vm1856_vm10 = vcmp.lt.s32.totalorder %v1835_v2, 16  ;;  %v1710_v24 = vsub.s32 %v2228_v42, %v1709_v14  ;;  %vm1702_vm6 = vcmp.lt.s32.totalorder %v3690_v30, 0 }
 0x262   : > { %vm1898_vm14 = vmand %vm1856_vm10, %vm1877_vm13 }
 0x263   : > { %v1711_v4 = vsub.s32 0, %v1710_v24 }
 0x26a   : > { %v1430_v27 = vpop.f32.mrb[8].mxu1 }
 0x26b   : > { %v1405_v15 = vpop.f32.mrb[20].mxu0  ;;  %v2316_v12 = vpop.f32.mrb[9].mxu1  ;;  %v1960_v44 = vsel %vm1897_vm1, %v1430_v27, 0.0  ;;  %vm1879_vm1 = vcmp.lt.s32.totalorder %v3690_v30, 384 }
 0x26c   : > { %v1955_v54 = vsel %vm1892_vm9, %v1405_v15, 0.0  ;;  %v2301_v35 = vpop.f32.mrb[21].mxu0  ;;  %v2008_v37 = vmul.f32 %v1960_v44, %v1430_v27  ;;  %vm1691_vm9 = vcmp.lt.s32.totalorder %v3639_v25, 0 }
 0x26d   : > { %v1975_v49 = vadd.f32 %v3636_v29, %v1955_v54  ;;  %v2003_v11 = vmul.f32 %v1955_v54, %v1405_v15  ;;  %v1701_v50 = vsel %vm1691_vm9, %v1700_v36, %v1699_v22  ;;  %v1712_v15 = vsel %vm1702_vm6, %v1711_v4, %v1710_v24 }
 0x26e   : > { %vm1752_vm0 = vcmp.ne.s32.totalorder %v1701_v50, 0  ;;  %vm1773_vm3 = vcmp.lt.s32.totalorder %v1701_v50, 0  ;;  %v1815_v63 = vadd.s32 24, %v1701_v50  ;;  %vm1753_vm8 = vcmp.ne.s32.totalorder %v1712_v15, 0 }
 0x26f   : > { %v1976_v29 = vadd.f32 %v1975_v49, %v1956_v6  ;;  %v2023_v33 = vadd.f32 %v3642_v52, %v2003_v11  ;;  %v1480_v52 = vadd.s32 152, %v3210_v58  ;;  %vm1794_vm4 = vmand %vm1773_vm3, %vm1752_vm0  ;;  %v1725_v58 = vsub.s32 0, %v3761_v55 }
 0x270   : > { %v1836_v19 = vsel %vm1794_vm4, %v1815_v63, %v1701_v50  ;;  %vm1774_vm15 = vcmp.lt.s32.totalorder %v1712_v15, 0  ;;  %v1816_v13 = vadd.s32 24, %v1712_v15  ;;  %vm1724_vm3 = vcmp.lt.s32.totalorder %v3761_v55, 0 }
 0x271   : > { %v1977_v53 = vadd.f32 %v1976_v29, %v1957_v45  ;;  %v2024_v16 = vadd.f32 %v2023_v33, %v2004_v3  ;;  %v3753_v18 = vadd.s32 %v3215_v10, %v1480_v52  ;;  %vm1857_vm5 = vcmp.lt.s32.totalorder %v1836_v19, 16  ;;  %vm1795_vm2 = vmand %vm1774_vm15, %vm1753_vm8 }
 0x272   : > { %v2230_v26 = vmin.u32 %v1725_v58, %v3761_v55  ;;  %vm1899_vm7 = vmand %vm1857_vm5, %vm1878_vm12  ;;  %v1837_v42 = vsel %vm1795_vm2, %v1816_v13, %v1712_v15  ;;  %vm1881_vm2 = vcmp.lt.s32.totalorder %v3761_v55, 384 }
 0x273   : > { %v2025_v39 = vadd.f32 %v2024_v16, %v2005_v17  ;;  %v1978_v57 = vadd.f32 %v1977_v53, %v1958_v20  ;;  %v1714_v61 = vsub.s32 0, %v3753_v18  ;;  %vm1858_vm11 = vcmp.lt.s32.totalorder %v1837_v42, 16 }
 0x274   : > { %v3771_v54 = vmul.u32.u64.low 2863311531, %v2230_v26  ;;  %v3772_v35 = vmul.u32.u64.high 2863311531, %v2230_v26, %v3771_v54  ;;  %vm1713_vm10 = vcmp.lt.s32.totalorder %v3753_v18, 0  ;;  %vm1900_vm13 = vmand %vm1858_vm11, %vm1879_vm1  ;;  %vm1880_vm5 = vcmp.lt.s32.totalorder %v3753_v18, 384 }
 0x275   : > { %v1979_v32 = vadd.f32 %v1978_v57, %v1959_v62  ;;  %v2026_v38 = vadd.f32 %v2025_v39, %v2006_v0  ;;  %v2229_v47 = vmin.u32 %v1714_v61, %v3753_v18 }
 0x276   : > { %v1730_v3 = vshrl.u32 %v3772_v35, 4 }
 0x277   : > { %v1980_v60 = vadd.f32 %v1979_v32, %v1960_v44  ;;  %v2027_v46 = vadd.f32 %v2026_v38, %v2007_v8  ;;  %v3763_v40 = vmul.u32.u64.low 2863311531, %v2229_v47  ;;  %v3764_v7 = vmul.u32.u64.high 2863311531, %v2229_v47, %v3763_v40 }
 0x278   : > { %v1731_v33 = vmul.u32 24, %v1730_v3 }
 0x279   : > { %v2028_v56 = vadd.f32 %v2027_v46, %v2008_v37  ;;  %v1719_v10 = vshrl.u32 %v3764_v7, 4 }
 0x27a   : > { %v1435_v23 = vpop.f32.mrb[10].mxu1  ;;  %v1732_v53 = vsub.s32 %v2230_v26, %v1731_v33 }
 0x27b   : > { %v1961_v51 = vsel %vm1898_vm14, %v1435_v23, 0.0  ;;  %v2319_v9 = vpop.f32.mrb[11].mxu1  ;;  %v1720_v25 = vmul.u32 24, %v1719_v10 }
 0x27c   : > { %v1981_v59 = vadd.f32 %v1980_v60, %v1961_v51  ;;  %v2009_v1 = vmul.f32 %v1961_v51, %v1435_v23  ;;  %v1733_v31 = vsub.s32 0, %v1732_v53 }
 0x27d   : > { %v1721_v45 = vsub.s32 %v2229_v47, %v1720_v25 }
 0x27e   : > { %v2029_v28 = vadd.f32 %v2028_v56, %v2009_v1  ;;  %v1734_v52 = vsel %vm1724_vm3, %v1733_v31, %v1732_v53 }
 0x27f   : > { %v1722_v29 = vsub.s32 0, %v1721_v45  ;;  %vm1755_vm12 = vcmp.ne.s32.totalorder %v1734_v52, 0  ;;  %vm1776_vm6 = vcmp.lt.s32.totalorder %v1734_v52, 0  ;;  %v1818_v0 = vadd.s32 24, %v1734_v52 }
 0x280   : > { %vm1797_vm8 = vmand %vm1776_vm6, %vm1755_vm12 }
 0x281   : > { %v1723_v43 = vsel %vm1713_vm10, %v1722_v29, %v1721_v45  ;;  %v1839_v32 = vsel %vm1797_vm8, %v1818_v0, %v1734_v52 }
 0x282   : > { %vm1754_vm9 = vcmp.ne.s32.totalorder %v1723_v43, 0  ;;  %vm1775_vm14 = vcmp.lt.s32.totalorder %v1723_v43, 0  ;;  %v1817_v34 = vadd.s32 24, %v1723_v43  ;;  %vm1860_vm15 = vcmp.lt.s32.totalorder %v1839_v32, 16 }
 0x283   : > { %vm1796_vm0 = vmand %vm1775_vm14, %vm1754_vm9 }
 0x284   : > { %v1838_v30 = vsel %vm1796_vm0, %v1817_v34, %v1723_v43  ;;  %vm1902_vm11 = vmand %vm1860_vm15, %vm1881_vm2 }
 0x285   : > { %vm1859_vm4 = vcmp.lt.s32.totalorder %v1838_v30, 16 }
 0x28a   : > { %v1440_v27 = vpop.f32.mrb[12].mxu1 }
 0x28b   : > { %v1962_v41 = vsel %vm1899_vm7, %v1440_v27, 0.0  ;;  %v2322_v6 = vpop.f32.mrb[13].mxu1  ;;  %vm1901_vm7 = vmand %vm1859_vm4, %vm1880_vm5 }
 0x28c   : > { %v1982_v12 = vadd.f32 %v1981_v59, %v1962_v41  ;;  %v2010_v49 = vmul.f32 %v1962_v41, %v1440_v27 }
 0x28e   : > { %v2030_v11 = vadd.f32 %v2029_v28, %v2010_v49 }
 0x29a   : > { %v1445_v20 = vpop.f32.mrb[14].mxu1 }
 0x29b   : > { %v1963_v48 = vsel %vm1900_vm13, %v1445_v20, 0.0  ;;  %v2325_v17 = vpop.f32.mrb[15].mxu1 }
 0x29c   : > { %v1983_v16 = vadd.f32 %v1982_v12, %v1963_v48  ;;  %v2011_v22 = vmul.f32 %v1963_v48, %v1445_v20 }
 0x29e   : > { %v2031_v62 = vadd.f32 %v2030_v11, %v2011_v22 }
 0x2aa   : > { %v1450_v39 = vpop.f32.mrb[16].mxu1 }
 0x2ab   : > { %v1964_v57 = vsel %vm1901_vm7, %v1450_v39, 0.0  ;;  %v2328_v2 = vpop.f32.mrb[17].mxu1 }
 0x2ac   : > { %v1984_v44 = vadd.f32 %v1983_v16, %v1964_v57  ;;  %v2012_v8 = vmul.f32 %v1964_v57, %v1450_v39 }
 0x2ae   : > { %v2032_v38 = vadd.f32 %v2031_v62, %v2012_v8 }
 0x2b4   : > { %v1455_v36 = vpop.f32.mrb[18].mxu1 }
 0x2b5   : > { %v1965_v18 = vsel %vm1902_vm11, %v1455_v36, 0.0  ;;  %v2331_v60 = vpop.f32.mrb[19].mxu1 }
 0x2b6   : > { %v1985_v37 = vadd.f32 %v1984_v44, %v1965_v18  ;;  %v2013_v46 = vmul.f32 %v1965_v18, %v1455_v36 }
 0x2b8   : > { %v1986_v56 = vrot.slane %v1985_v37, 4  ;;  %v2033_v50 = vadd.f32 %v2032_v38, %v2013_v46 }
 0x2ba   : > { %v1987_v21 = vadd.f32 %v1986_v56, %v1985_v37  ;;  %v2034_v61 = vrot.slane %v2033_v50, 4 }
 0x2bc   : > { %v1988_v23 = vrot.slane %v1987_v21, 2  ;;  %v2035_v51 = vadd.f32 %v2034_v61, %v2033_v50 }
 0x2be   : > { %v1989_v9 = vadd.f32 %v1988_v23, %v1987_v21  ;;  %v2036_v5 = vrot.slane %v2035_v51, 2 }
 0x2c0   : > { %v1990_v59 = vrot.slane %v1989_v9, 1  ;;  %v2037_v1 = vadd.f32 %v2036_v5, %v2035_v51 }
 0x2c2   : > { %v1991_v14 = vadd.f32 %v1990_v59, %v1989_v9  ;;  %v2038_v47 = vrot.slane %v2037_v1, 1 }
 0x2c4   : > { %1992 = vst [vmem:[%s313_s11] sm:$0x1] %v1991_v14  ;;  %v2039_v28 = vadd.f32 %v2038_v47, %v2037_v1 }
 0x2c6   : > { %2040 = vst [vmem:[%s320_s16] sm:$0x1] %v2039_v28 }
 0x2c7 PF: > { %s15_s19 = sadd.s32 1, %s2481_s19   ;;  %s3852_s15 = smov %s2473_s17 }
 0x2c8   : > { %p12_p9 = scmp.ge.s32.totalorder %s15_s19, 8   ;;  %s3853_s16 = smov %s2477_s18 }
 0x2c9   : > { %s3854_s17 = smov %s3857_s20  ;;  %s3855_s18 = smov %s3861_s21 }
 0x2ca   :  { %14 = sbr.rel (!%p12_p9) target bundleno = 3 (0x3), region = 77 }

// kernel: cbr2d.2
= control target key start
LH: loop header
LB: loop body
LE: loop exit
PB: predicated region body
PF: predicated region fallthrough
CT: control target
= control target key end

     0   :  { %s5051_s15 = smov 0   ;;  %s5053_s16 = smov 0   ;;  %s6958_s0 = inlined_call_operand.vmem [shape: f32[2,560,4], index: 0, kind: input, shape index: {}, may-alias: {0,1}]   ;;  %s6959_s1 = inlined_call_operand.vmem [shape: f32[2,560,4], index: 1, kind: input, shape index: {}, may-alias: {0,1}]   ;;  %s6960_s2 = inlined_call_operand.vmem [shape: f32[36,128], index: 2, kind: input, shape index: {}]   ;;  %s6961_s3 = inlined_call_operand.vmem [shape: f32[2,3,1,128], index: 3, kind: output, shape index: {0}]   ;;  %s6962_s4 = inlined_call_operand.vmem [shape: f32[2,3,1,128], index: 4, kind: output, shape index: {1}]  }
   0x1   :  { %s5055_s17 = smov 0   ;;  %s5057_s18 = smov 0  }
   0x2   :  { %s5059_s19 = smov 0  }
   0x3 LB: > { %s24_s20 = sadd.s32 1, %s5014_s17  ;;  %s27_s21 = sadd.s32 1, %s5018_s18  ;;  %s5022_s19 = sphi %s5059_s19, %s15_s19   ;;  %s5018_s18 = sphi %s5057_s18, %s7055_s18   ;;  %s5014_s17 = sphi %s5055_s17, %s7054_s17   ;;  %s5010_s16 = sphi %s5053_s16, %s7053_s16   ;;  %s5006_s15 = sphi %s5051_s15, %s7052_s15  }
   0x4   : > { %p25_p0 = scmp.ge.s32.totalorder %s24_s20, 3  ;;  %p3573_p1 = scmp.ge.s32.totalorder %s5022_s19, 1 }
   0x5   : > { %p221_p2 = scmp.lt.s32.totalorder %s5022_s19, 7 }
   0x6   : > { %s7057_s20 = smov (%p25_p0, %s24_s20), 0  ;;  %s7059_s21 = smov (!%p25_p0, %s27_s21), %s5018_s18 }
   0x7   : > { %p222_p3 = pnand %p3573_p1, %p221_p2  ;;  %p29_p4 = scmp.ge.s32.totalorder %s7059_s21, 2 }
   0x8   : > { %vm485_vm0 = vcmask (!%p222_p3), 1043456   ;;  %v5086_v0 = vld [vmem:[%s6960_s2 + $0x10] sm:$0xf] (!%p222_p3)  ;;  %v421_v1 = vld [vmem:[%s6960_s2 + $0x4] sm:$0xf] (!%p222_p3)  ;;  %v5024_v2 = vmov (!%p222_p3), 0.0  }
   0x9   : > { %s7061_s21 = smov (%p29_p4, %s7059_s21), 0  ;;  %225 = sbr.rel (%p222_p3) target bundleno = 643 (0x283), region = 32 }
   0xa   : > { %4256 = vmatprep.subr.mxu0 (!%p222_p3), %v5024_v2  ;;  %3996 = vmatprep.subr.mxu1 (!%p222_p3), %v5024_v2  ;;  %s275_s26 = smul.u32 (!%p222_p3), 21, %s5006_s15  ;;  %p280_p5 = scmp.lt.s32.totalorder (!%p222_p3), %s5010_s16, 1  ;;  %vm5025_vm1 = vmmov (!%p222_p3), 0   ;;  %vm342_vm2 = vcmask (!%p222_p3), 31744   ;;  %v1753_v28 = vld [vmem:[%s6960_s2 + $0x14] sm:$0xf] (!%p222_p3) }
   0xb   : > { %4257 = vmatpush3.msk.msra.mxu0 (!%p222_p3), %vm485_vm0, %v5086_v0  ;;  %3997 = vmatpush3.msk.msra.mxu1 (!%p222_p3), %vm485_vm0, %v421_v1  ;;  %s293_s27 = sadd.s32 (!%p222_p3), 1, %s5006_s15  ;;  %v399_v30 = vld [vmem:[%s6960_s2] sm:$0xf] (!%p222_p3)  ;;  %v2032_v45 = vld [vmem:[%s6960_s2 + $0x18] sm:$0xf] (!%p222_p3)  ;;  %p309_p8 = scmp.lt.s32.totalorder (!%p222_p3), %s5006_s15, 2 }
   0xc   : > { %3998 = vmatprep.mubr.msk.f32.mxu1 (!%p222_p3), %vm5025_vm1, %v5024_v2  ;;  %4258 = vmatprep.mubr.msk.f32.mxu0 (!%p222_p3), %vm5025_vm1, %v5024_v2  ;;  %p282_p6 = scmp.lt.s32.totalorder (!%p222_p3), %s275_s26, 69  ;;  %s3575_s28 = smul.u32 (!%p222_p3), 21, %s293_s27 }
   0xd   : > { %4321 = vmatprep.subr.mxu0 (!%p222_p3), %v5024_v2  ;;  %4061 = vmatprep.subr.mxu1 (!%p222_p3), %v5024_v2 }
   0xe   : > { %p298_p7 = scmp.lt.s32.totalorder (!%p222_p3), %s3575_s28, 69 }
  0x10   : > { %s7063_s16 = smov (!%p280_p5, %s5010_s16), 1  ;;  %s7065_s26 = smov (!%p282_p6, %s275_s26), 69 }
  0x11   : > { %s4898_s29 = smul.u32 70, %s7063_s16  ;;  %s7067_s28 = smov (!%p298_p7, %s3575_s28), 69 }
  0x13   : > { %s285_s30 = sadd.s32 %s4898_s29, %s7065_s26  ;;  %s301_s9 = sadd.s32 %s4898_s29, %s7067_s28 }
  0x14   : > { %s3574_s5 = sshll.u32 %s285_s30, 3  ;;  %s3576_s10 = sshll.u32 %s301_s9, 3 }
  0x15   : > { %s5110_s8 = scalar_lea.vmem %s6958_s0, %s3574_s5  ;;  %s5142_s13 = scalar_lea.vmem %s6959_s1, %s3576_s10 }
  0x16   : > { %v321_v3 = vld [vmem:[%s5110_s8] sm:$0xff]  ;;  %v322_v4 = vld [vmem:[%s5110_s8 + $0x8] sm:$0xff]  ;;  %v324_v5 = vld [vmem:[%s5110_s8 + $0x18] sm:$0xff]  ;;  %s2848_s9 = smul.u32 168, %s5006_s15  ;;  %s7069_s15 = smov (!%p309_p8, %s5006_s15), 2 }
  0x17   : > { %343 = vst.msk [vmem:[#allocation2] sm:$0xff] %vm342_vm2, %v321_v3  ;;  %344 = vst.msk [vmem:[#allocation2 + $0x8] sm:$0xff] %vm342_vm2, %v322_v4  ;;  %v325_v6 = vld [vmem:[%s5110_s8 + $0x20] sm:$0xff]  ;;  %v323_v7 = vld [vmem:[%s5110_s8 + $0x10] sm:$0xff]  ;;  %s4899_s10 = smul.u32 3, %s7063_s16 }
  0x18   : > { %346 = vst.msk [vmem:[#allocation2 + $0x18] sm:$0xff] %vm342_vm2, %v324_v5  ;;  %v326_v8 = vld [vmem:[%s5110_s8 + $0x28] sm:$0xff]  ;;  %347 = vst.msk [vmem:[#allocation2 + $0x20] sm:$0xff] %vm342_vm2, %v325_v6  ;;  %v327_v9 = vld [vmem:[%s5110_s8 + $0x30] sm:$0xff] }
  0x19   : > { %345 = vst.msk [vmem:[#allocation2 + $0x10] sm:$0xff] %vm342_vm2, %v323_v7  ;;  %348 = vst.msk [vmem:[#allocation2 + $0x28] sm:$0xff] %vm342_vm2, %v326_v8  ;;  %v328_v10 = vld [vmem:[%s5110_s8 + $0x38] sm:$0xff]  ;;  %v329_v11 = vld [vmem:[%s5110_s8 + $0x40] sm:$0xff]  ;;  %s312_s11 = sadd.s32 %s4899_s10, %s7069_s15 }
  0x1a   : > { %349 = vst.msk [vmem:[#allocation2 + $0x30] sm:$0xff] %vm342_vm2, %v327_v9  ;;  %350 = vst.msk [vmem:[#allocation2 + $0x38] sm:$0xff] %vm342_vm2, %v328_v10  ;;  %v330_v12 = vld [vmem:[%s5110_s8 + $0x48] sm:$0xff]  ;;  %v331_v13 = vld [vmem:[%s5110_s8 + $0x50] sm:$0xff]  ;;  %s313_s14 = scalar_lea.vmem %s6961_s3, %s312_s11  ;;  %s320_s16 = scalar_lea.vmem %s6962_s4, %s312_s11 }
  0x1b   : > { %351 = vst.msk [vmem:[#allocation2 + $0x40] sm:$0xff] %vm342_vm2, %v329_v11  ;;  %v332_v14 = vld [vmem:[%s5110_s8 + $0x58] sm:$0xff]  ;;  %352 = vst.msk [vmem:[#allocation2 + $0x48] sm:$0xff] %vm342_vm2, %v330_v12  ;;  %v333_v15 = vld [vmem:[%s5110_s8 + $0x60] sm:$0xff] }
  0x1c   : > { %353 = vst.msk [vmem:[#allocation2 + $0x50] sm:$0xff] %vm342_vm2, %v331_v13  ;;  %354 = vst.msk [vmem:[#allocation2 + $0x58] sm:$0xff] %vm342_vm2, %v332_v14  ;;  %v334_v16 = vld [vmem:[%s5110_s8 + $0x68] sm:$0xff]  ;;  %v335_v17 = vld [vmem:[%s5110_s8 + $0x70] sm:$0xff] }
  0x1d   : > { %355 = vst.msk [vmem:[#allocation2 + $0x60] sm:$0xff] %vm342_vm2, %v333_v15  ;;  %356 = vst.msk [vmem:[#allocation2 + $0x68] sm:$0xff] %vm342_vm2, %v334_v16  ;;  %v336_v18 = vld [vmem:[%s5110_s8 + $0x78] sm:$0xff]  ;;  %v337_v19 = vld [vmem:[%s5110_s8 + $0x80] sm:$0xff] }
  0x1e   : > { %357 = vst.msk [vmem:[#allocation2 + $0x70] sm:$0xff] %vm342_vm2, %v335_v17  ;;  %v338_v20 = vld [vmem:[%s5110_s8 + $0x88] sm:$0xff]  ;;  %358 = vst.msk [vmem:[#allocation2 + $0x78] sm:$0xff] %vm342_vm2, %v336_v18  ;;  %v339_v21 = vld [vmem:[%s5110_s8 + $0x90] sm:$0xff] }
  0x1f   : > { %359 = vst.msk [vmem:[#allocation2 + $0x80] sm:$0xff] %vm342_vm2, %v337_v19  ;;  %360 = vst.msk [vmem:[#allocation2 + $0x88] sm:$0xff] %vm342_vm2, %v338_v20  ;;  %v340_v22 = vld [vmem:[%s5110_s8 + $0x98] sm:$0xff]  ;;  %v341_v23 = vld [vmem:[%s5110_s8 + $0xa0] sm:$0xff] }
  0x20   : > { %361 = vst.msk [vmem:[#allocation2 + $0x90] sm:$0xff] %vm342_vm2, %v339_v21  ;;  %362 = vst.msk [vmem:[#allocation2 + $0x98] sm:$0xff] %vm342_vm2, %v340_v22  ;;  %v364_v24 = vld [vmem:[%s5142_s13] sm:$0xff]  ;;  %v365_v25 = vld [vmem:[%s5142_s13 + $0x8] sm:$0xff] }
  0x21   : > { %363 = vst.msk [vmem:[#allocation2 + $0xa0] sm:$0xff] %vm342_vm2, %v341_v23  ;;  %v366_v26 = vld [vmem:[%s5142_s13 + $0x10] sm:$0xff]  ;;  %v400_v27 = vld [vmem:[#allocation2 + $0x1] sm:$0xff]  ;;  %371 = vst.msk [vmem:[#allocation2 + $0xa8] sm:$0xff] %vm342_vm2, %v364_v24 }
  0x22   : > { %372 = vst.msk [vmem:[#allocation2 + $0xb0] sm:$0xff] %vm342_vm2, %v365_v25  ;;  %373 = vst.msk [vmem:[#allocation2 + $0xb8] sm:$0xff] %vm342_vm2, %v366_v26  ;;  %3999 = vmatmul.mubr.msk.f32.vlgmr.msra.gmra.mrb[0].mxu1 %vm342_vm2, %v400_v27  ;;  %v1453_v29 = vld [vmem:[#allocation2 + $0x19] sm:$0xff]  ;;  %v401_v31 = vld [vmem:[#allocation2 + $0x9] sm:$0xff] }
  0x23   : > { %4259 = vmatmul.mubr.msk.f32.vlgmr.msra.gmra.mrb[0].mxu0 %vm342_vm2, %v1453_v29  ;;  %4001 = vmatprep.mubr.msk.f32.mxu1 %vm5025_vm1, %v5024_v2  ;;  %v1454_v32 = vld [vmem:[#allocation2 + $0x21] sm:$0xff]  ;;  %v402_v33 = vld [vmem:[#allocation2 + $0x11] sm:$0xff]  ;;  %v1455_v34 = vld [vmem:[#allocation2 + $0x29] sm:$0xff] }
  0x24   : > { %4322 = vmatpush3.msk.msra.mxu0 %vm485_vm0, %v1753_v28  ;;  %4261 = vmatprep.mubr.msk.f32.mxu0 %vm5025_vm1, %v5024_v2  ;;  %v5193_v35 = vld [vmem:[#allocation2 + $0x31] sm:$0xff]  ;;  %v5202_v36 = vld [vmem:[#allocation2 + $0x39] sm:$0xff]  ;;  %v5213_v38 = vld [vmem:[#allocation2 + $0x41] sm:$0xff] }
  0x25   : > { %4062 = vmatpush3.msk.msra.mxu1 %vm485_vm0, %v399_v30  ;;  %4386 = vmatprep.subr.mxu0 %v5024_v2  ;;  %v367_v37 = vld [vmem:[%s5142_s13 + $0x18] sm:$0xff]  ;;  %v5222_v39 = vld [vmem:[#allocation2 + $0x49] sm:$0xff]  ;;  %v5252_v42 = vld [vmem:[#allocation2 + $0x61] sm:$0xff] }
  0x26   : > { %4002 = vmatmul.mubr.msk.f32.gmra.mrb[2].mxu1 %vm342_vm2, %v401_v31  ;;  %4126 = vmatprep.subr.mxu1 %v5024_v2  ;;  %374 = vst.msk [vmem:[#allocation2 + $0xc0] sm:$0xff] %vm342_vm2, %v367_v37  ;;  %v5232_v40 = vld [vmem:[#allocation2 + $0x51] sm:$0xff]  ;;  %v5242_v41 = vld [vmem:[#allocation2 + $0x59] sm:$0xff]  ;;  %v5262_v43 = vld [vmem:[#allocation2 + $0x69] sm:$0xff] }
  0x27   : > { %4262 = vmatmul.mubr.msk.f32.gmra.mrb[2].mxu0 %vm342_vm2, %v1454_v32  ;;  %4004 = vmatprep.mubr.msk.f32.mxu1 %vm5025_vm1, %v5024_v2  ;;  %v5272_v44 = vld [vmem:[#allocation2 + $0x1a] sm:$0xff]  ;;  %v5286_v46 = vld [vmem:[#allocation2 + $0x22] sm:$0xff]  ;;  %v5297_v47 = vld [vmem:[#allocation2 + $0x2a] sm:$0xff] }
  0x28   : > { %4264 = vmatprep.mubr.msk.f32.mxu0 %vm5025_vm1, %v5024_v2  ;;  %v5305_v48 = vld [vmem:[#allocation2 + $0x71] sm:$0xff]  ;;  %v5317_v50 = vld [vmem:[#allocation2 + $0x79] sm:$0xff]  ;;  %v5329_v52 = vld [vmem:[#allocation2 + $0x81] sm:$0xff] }
  0x29   : > { %v5309_v49 = vld [vmem:[#allocation2 + $0x32] sm:$0xff]  ;;  %v5321_v51 = vld [vmem:[#allocation2 + $0x3a] sm:$0xff]  ;;  %v5333_v53 = vld [vmem:[#allocation2 + $0x42] sm:$0xff] }
  0x2a   : > { %4005 = vmatmul.mubr.msk.f32.gmra.mrb[4].mxu1 %vm342_vm2, %v402_v33  ;;  %v5341_v54 = vld [vmem:[#allocation2 + $0x89] sm:$0xff]  ;;  %v368_v56 = vld [vmem:[%s5142_s13 + $0x20] sm:$0xff]  ;;  %v5354_v57 = vld [vmem:[#allocation2 + $0x91] sm:$0xff] }
  0x2b   : > { %4265 = vmatmul.mubr.msk.f32.gmra.mrb[4].mxu0 %vm342_vm2, %v1455_v34  ;;  %4007 = vmatprep.mubr.msk.f32.mxu1 %vm5025_vm1, %v5024_v2  ;;  %v5345_v55 = vld [vmem:[#allocation2 + $0x4a] sm:$0xff]  ;;  %375 = vst.msk [vmem:[#allocation2 + $0xc8] sm:$0xff] %vm342_vm2, %v368_v56  ;;  %v5359_v58 = vld [vmem:[#allocation2 + $0x52] sm:$0xff]  ;;  %v5373_v61 = vld [vmem:[#allocation2 + $0x5a] sm:$0xff] }
  0x2c   : > { %4267 = vmatprep.mubr.msk.f32.mxu0 %vm5025_vm1, %v5024_v2  ;;  %v369_v59 = vld [vmem:[%s5142_s13 + $0x28] sm:$0xff]  ;;  %v5368_v60 = vld [vmem:[#allocation2 + $0x99] sm:$0xff]  ;;  %v380_v7 = vld [vmem:[#allocation2 + $0x10] sm:$0xff] }
  0x2d   : > { %376 = vst.msk [vmem:[#allocation2 + $0xd0] sm:$0xff] %vm342_vm2, %v369_v59  ;;  %v5381_v62 = vld [vmem:[#allocation2 + $0xa1] sm:$0xff]  ;;  %v5395_v3 = vld [vmem:[#allocation2 + $0x6a] sm:$0xff]  ;;  %v5408_v6 = vld [vmem:[#allocation2 + $0x72] sm:$0xff] }
  0x2e   : > { %4008 = vmatmul.mubr.msk.f32.gmra.mrb[6].mxu1 %vm342_vm2, %v1453_v29  ;;  %v5385_v63 = vld [vmem:[#allocation2 + $0x62] sm:$0xff]  ;;  %v5418_v8 = vld [vmem:[#allocation2 + $0x7a] sm:$0xff]  ;;  %v5441_v12 = vld [vmem:[#allocation2 + $0x8a] sm:$0xff] }
  0x2f   : > { %4268 = vmatmul.mubr.msk.f32.gmra.mrb[6].mxu0 %vm342_vm2, %v5193_v35  ;;  %4010 = vmatprep.mubr.msk.f32.mxu1 %vm5025_vm1, %v5024_v2  ;;  %v378_v1 = vld [vmem:[#allocation2] sm:$0xff]  ;;  %v916_v4 = vld [vmem:[%s6960_s2 + $0x8] sm:$0xf]  ;;  %v5425_v9 = vld [vmem:[#allocation2 + $0x18] sm:$0xff] }
  0x30   : > { %4270 = vmatprep.mubr.msk.f32.mxu0 %vm5025_vm1, %v5024_v2  ;;  %v379_v5 = vld [vmem:[#allocation2 + $0x8] sm:$0xff]  ;;  %v5437_v11 = vld [vmem:[#allocation2 + $0x20] sm:$0xff]  ;;  %v5453_v14 = vld [vmem:[#allocation2 + $0x92] sm:$0xff] }
  0x31   : > { %v5429_v10 = vld [vmem:[#allocation2 + $0x82] sm:$0xff]  ;;  %v5461_v15 = vld [vmem:[#allocation2 + $0x30] sm:$0xff]  ;;  %v5465_v16 = vld [vmem:[#allocation2 + $0x9a] sm:$0xff] }
  0x32   : > { %4011 = vmatmul.mubr.msk.f32.gmra.mrb[8].mxu1 %vm342_vm2, %v1454_v32  ;;  %v5449_v13 = vld [vmem:[#allocation2 + $0x28] sm:$0xff]  ;;  %v5473_v17 = vld [vmem:[#allocation2 + $0x38] sm:$0xff]  ;;  %v5485_v19 = vld [vmem:[#allocation2 + $0x40] sm:$0xff] }
  0x33   : > { %4271 = vmatmul.mubr.msk.f32.gmra.mrb[8].mxu0 %vm342_vm2, %v5202_v36  ;;  %4013 = vmatprep.mubr.msk.f32.mxu1 %vm5025_vm1, %v5024_v2  ;;  %v5477_v18 = vld [vmem:[#allocation2 + $0xa2] sm:$0xff]  ;;  %v5489_v20 = vld [vmem:[#allocation2 + $0xaa] sm:$0xff]  ;;  %v5501_v22 = vld [vmem:[#allocation2 + $0xb2] sm:$0xff] }
  0x34   : > { %4273 = vmatprep.mubr.msk.f32.mxu0 %vm5025_vm1, %v5024_v2  ;;  %v5497_v21 = vld [vmem:[#allocation2 + $0x48] sm:$0xff]  ;;  %v5509_v23 = vld [vmem:[#allocation2 + $0x50] sm:$0xff]  ;;  %v5513_v24 = vld [vmem:[#allocation2 + $0xba] sm:$0xff] }
  0x35   : > { %v5521_v25 = vld [vmem:[#allocation2 + $0x58] sm:$0xff]  ;;  %v5534_v27 = vld [vmem:[#allocation2 + $0x60] sm:$0xff]  ;;  %v5546_v28 = vld [vmem:[#allocation2 + $0x68] sm:$0xff] }
  0x36   : > { %4014 = vmatmul.mubr.msk.f32.gmra.mrb[10].mxu1 %vm342_vm2, %v1455_v34  ;;  %v2311_v26 = vld [vmem:[%s6960_s2 + $0x1c] sm:$0xf]  ;;  %v5556_v29 = vld [vmem:[#allocation2 + $0x70] sm:$0xff]  ;;  %v5576_v31 = vld [vmem:[#allocation2 + $0x80] sm:$0xff] }
  0x37   : > { %4274 = vmatmul.mubr.msk.f32.gmra.mrb[10].mxu0 %vm342_vm2, %v5213_v38  ;;  %4016 = vmatprep.mubr.msk.f32.mxu1 %vm5025_vm1, %v5024_v2  ;;  %v5566_v30 = vld [vmem:[#allocation2 + $0x78] sm:$0xff]  ;;  %v5586_v32 = vld [vmem:[#allocation2 + $0x88] sm:$0xff]  ;;  %v5596_v33 = vld [vmem:[#allocation2 + $0x90] sm:$0xff] }
  0x38   : > { %4276 = vmatprep.mubr.msk.f32.mxu0 %vm5025_vm1, %v5024_v2  ;;  %v370_v34 = vld [vmem:[%s5142_s13 + $0x30] sm:$0xff]  ;;  %v5607_v37 = vld [vmem:[#allocation2 + $0x98] sm:$0xff]  ;;  %v895_v56 = vld [vmem:[#allocation2 + $0x2] sm:$0xff] }
  0x39   : > { %377 = vst.msk [vmem:[#allocation2 + $0xd8] sm:$0xff] %vm342_vm2, %v370_v34  ;;  %v1195_v59 = vld [vmem:[%s6960_s2 + $0xc] sm:$0xf]  ;;  %v2590_v34 = vld [vmem:[%s6960_s2 + $0x20] sm:$0xf] }
  0x3a   : > { %4017 = vmatmul.mubr.msk.f32.gmra.mrb[12].mxu1 %vm342_vm2, %v5193_v35 }
  0x3b   : > { %4277 = vmatmul.mubr.msk.f32.gmra.mrb[12].mxu0 %vm342_vm2, %v5222_v39  ;;  %4019 = vmatprep.mubr.msk.f32.mxu1 %vm5025_vm1, %v5024_v2 }
  0x3c   : > { %4279 = vmatprep.mubr.msk.f32.mxu0 %vm5025_vm1, %v5024_v2 }
  0x3e   : > { %4020 = vmatmul.mubr.msk.f32.gmra.mrb[14].mxu1 %vm342_vm2, %v5202_v36 }
  0x3f   : > { %4280 = vmatmul.mubr.msk.f32.gmra.mrb[14].mxu0 %vm342_vm2, %v5232_v40  ;;  %4022 = vmatprep.mubr.msk.f32.mxu1 %vm5025_vm1, %v5024_v2 }
  0x40   : > { %4282 = vmatprep.mubr.msk.f32.mxu0 %vm5025_vm1, %v5024_v2 }
  0x42   : > { %4023 = vmatmul.mubr.msk.f32.gmra.mrb[16].mxu1 %vm342_vm2, %v5213_v38 }
  0x43   : > { %4283 = vmatmul.mubr.msk.f32.gmra.mrb[16].mxu0 %vm342_vm2, %v5242_v41  ;;  %4025 = vmatprep.mubr.msk.f32.mxu1 %vm5025_vm1, %v5024_v2 }
  0x44   : > { %4285 = vmatprep.mubr.msk.f32.mxu0 %vm5025_vm1, %v5024_v2 }
  0x46   : > { %4026 = vmatmul.mubr.msk.f32.gmra.mrb[18].mxu1 %vm342_vm2, %v5222_v39 }
  0x47   : > { %4286 = vmatmul.mubr.msk.f32.gmra.mrb[18].mxu0 %vm342_vm2, %v5252_v42  ;;  %4028 = vmatprep.mubr.msk.f32.mxu1 %vm5025_vm1, %v5024_v2 }
  0x48   : > { %4288 = vmatprep.mubr.msk.f32.mxu0 %vm5025_vm1, %v5024_v2 }
  0x4a   : > { %4029 = vmatmul.mubr.msk.f32.gmra.mrb[20].mxu1 %vm342_vm2, %v5232_v40 }
  0x4b   : > { %4289 = vmatmul.mubr.msk.f32.gmra.mrb[20].mxu0 %vm342_vm2, %v5262_v43  ;;  %4031 = vmatprep.mubr.msk.f32.mxu1 %vm5025_vm1, %v5024_v2 }
  0x4c   : > { %4323 = vmatprep.mubr.msk.f32.mxu0 %vm5025_vm1, %v5024_v2 }
  0x4e   : > { %4032 = vmatmul.mubr.msk.f32.gmra.mrb[22].mxu1 %vm342_vm2, %v5242_v41 }
  0x4f   : > { %4324 = vmatmul.mubr.msk.f32.vlgmr.msra.gmra.mrb[0].mxu0 %vm342_vm2, %v5272_v44  ;;  %4034 = vmatprep.mubr.msk.f32.mxu1 %vm5025_vm1, %v5024_v2 }
  0x50   : > { %4387 = vmatpush3.msk.msra.mxu0 %vm485_vm0, %v2032_v45  ;;  %4326 = vmatprep.mubr.msk.f32.mxu0 %vm5025_vm1, %v5024_v2  ;;  %v5618_v45 = vld [vmem:[#allocation2 + $0xa0] sm:$0xff] }
  0x51   : > { %4451 = vmatprep.subr.mxu0 %v5024_v2 }
  0x52   : > { %4035 = vmatmul.mubr.msk.f32.gmra.mrb[24].mxu1 %vm342_vm2, %v5252_v42 }
  0x53   : > { %4327 = vmatmul.mubr.msk.f32.gmra.mrb[2].mxu0 %vm342_vm2, %v5286_v46  ;;  %4037 = vmatprep.mubr.msk.f32.mxu1 %vm5025_vm1, %v5024_v2 }
  0x54   : > { %4329 = vmatprep.mubr.msk.f32.mxu0 %vm5025_vm1, %v5024_v2 }
  0x56   : > { %4038 = vmatmul.mubr.msk.f32.gmra.mrb[26].mxu1 %vm342_vm2, %v5262_v43 }
  0x57   : > { %4330 = vmatmul.mubr.msk.f32.gmra.mrb[4].mxu0 %vm342_vm2, %v5297_v47  ;;  %4040 = vmatprep.mubr.msk.f32.mxu1 %vm5025_vm1, %v5024_v2 }
  0x58   : > { %4332 = vmatprep.mubr.msk.f32.mxu0 %vm5025_vm1, %v5024_v2 }
  0x5a   : > { %4041 = vmatmul.mubr.msk.f32.gmra.mrb[28].mxu1 %vm342_vm2, %v5305_v48 }
  0x5b   : > { %4333 = vmatmul.mubr.msk.f32.gmra.mrb[6].mxu0 %vm342_vm2, %v5309_v49  ;;  %4043 = vmatprep.mubr.msk.f32.mxu1 %vm5025_vm1, %v5024_v2 }
  0x5c   : > { %4335 = vmatprep.mubr.msk.f32.mxu0 %vm5025_vm1, %v5024_v2 }
  0x5e   : > { %4044 = vmatmul.mubr.msk.f32.gmra.mrb[30].mxu1 %vm342_vm2, %v5317_v50 }
  0x5f   : > { %4336 = vmatmul.mubr.msk.f32.gmra.mrb[8].mxu0 %vm342_vm2, %v5321_v51  ;;  %4046 = vmatprep.mubr.msk.f32.mxu1 %vm5025_vm1, %v5024_v2 }
  0x60   : > { %4338 = vmatprep.mubr.msk.f32.mxu0 %vm5025_vm1, %v5024_v2 }
  0x62   : > { %4047 = vmatmul.mubr.msk.f32.gmra.mrb[32].mxu1 %vm342_vm2, %v5329_v52 }
  0x63   : > { %4339 = vmatmul.mubr.msk.f32.gmra.mrb[10].mxu0 %vm342_vm2, %v5333_v53  ;;  %4049 = vmatprep.mubr.msk.f32.mxu1 %vm5025_vm1, %v5024_v2 }
  0x64   : > { %4341 = vmatprep.mubr.msk.f32.mxu0 %vm5025_vm1, %v5024_v2 }
  0x66   : > { %4050 = vmatmul.mubr.msk.f32.gmra.mrb[34].mxu1 %vm342_vm2, %v5341_v54 }
  0x67   : > { %4342 = vmatmul.mubr.msk.f32.gmra.mrb[12].mxu0 %vm342_vm2, %v5345_v55  ;;  %4052 = vmatprep.mubr.msk.f32.mxu1 %vm5025_vm1, %v5024_v2 }
  0x68   : > { %4344 = vmatprep.mubr.msk.f32.mxu0 %vm5025_vm1, %v5024_v2 }
  0x6a   : > { %4053 = vmatmul.mubr.msk.f32.gmra.mrb[36].mxu1 %vm342_vm2, %v5354_v57 }
  0x6b   : > { %4345 = vmatmul.mubr.msk.f32.gmra.mrb[14].mxu0 %vm342_vm2, %v5359_v58  ;;  %4055 = vmatprep.mubr.msk.f32.mxu1 %vm5025_vm1, %v5024_v2 }
  0x6c   : > { %4347 = vmatprep.mubr.msk.f32.mxu0 %vm5025_vm1, %v5024_v2 }
  0x6e   : > { %4056 = vmatmul.mubr.msk.f32.gmra.mrb[38].mxu1 %vm342_vm2, %v5368_v60 }
  0x6f   : > { %4348 = vmatmul.mubr.msk.f32.gmra.mrb[16].mxu0 %vm342_vm2, %v5373_v61  ;;  %4058 = vmatprep.mubr.msk.f32.mxu1 %vm5025_vm1, %v5024_v2 }
  0x70   : > { %4350 = vmatprep.mubr.msk.f32.mxu0 %vm5025_vm1, %v5024_v2 }
  0x72   : > { %4059 = vmatmul.mubr.msk.f32.gmra.mrb[40].mxu1 %vm342_vm2, %v5381_v62 }
  0x73   : > { %4351 = vmatmul.mubr.msk.f32.gmra.mrb[18].mxu0 %vm342_vm2, %v5385_v63  ;;  %4063 = vmatprep.mubr.msk.f32.mxu1 %vm5025_vm1, %v5024_v2 }
  0x74   : > { %4353 = vmatprep.mubr.msk.f32.mxu0 %vm5025_vm1, %v5024_v2 }
  0x76   : > { %4064 = vmatmul.mubr.msk.f32.vlgmr.msra.gmra.mrb[0].mxu1 %vm342_vm2, %v378_v1  ;;  %v896_v1 = vld [vmem:[#allocation2 + $0xa] sm:$0xff] }
  0x77   : > { %4354 = vmatmul.mubr.msk.f32.gmra.mrb[20].mxu0 %vm342_vm2, %v5395_v3  ;;  %4066 = vmatprep.mubr.msk.f32.mxu1 %vm5025_vm1, %v5024_v2 }
  0x78   : > { %4356 = vmatprep.mubr.msk.f32.mxu0 %vm5025_vm1, %v5024_v2  ;;  %4127 = vmatpush3.msk.msra.mxu1 %vm485_vm0, %v916_v4  ;;  %v897_v4 = vld [vmem:[#allocation2 + $0x12] sm:$0xff] }
  0x79   : > { %4191 = vmatprep.subr.mxu1 %v5024_v2 }
  0x7a   : > { %4067 = vmatmul.mubr.msk.f32.gmra.mrb[2].mxu1 %vm342_vm2, %v379_v5  ;;  %v2029_v5 = vld [vmem:[#allocation2 + $0xc0] sm:$0xff] }
  0x7b   : > { %4357 = vmatmul.mubr.msk.f32.gmra.mrb[22].mxu0 %vm342_vm2, %v5408_v6  ;;  %4069 = vmatprep.mubr.msk.f32.mxu1 %vm5025_vm1, %v5024_v2 }
  0x7c   : > { %4359 = vmatprep.mubr.msk.f32.mxu0 %vm5025_vm1, %v5024_v2 }
  0x7e   : > { %4070 = vmatmul.mubr.msk.f32.gmra.mrb[4].mxu1 %vm342_vm2, %v380_v7  ;;  %v2030_v7 = vld [vmem:[#allocation2 + $0xc8] sm:$0xff] }
  0x7f   : > { %4360 = vmatmul.mubr.msk.f32.gmra.mrb[24].mxu0 %vm342_vm2, %v5418_v8  ;;  %4072 = vmatprep.mubr.msk.f32.mxu1 %vm5025_vm1, %v5024_v2 }
  0x80   : > { %4362 = vmatprep.mubr.msk.f32.mxu0 %vm5025_vm1, %v5024_v2 }
  0x82   : > { %4073 = vmatmul.mubr.msk.f32.gmra.mrb[6].mxu1 %vm342_vm2, %v5425_v9 }
  0x83   : > { %4363 = vmatmul.mubr.msk.f32.gmra.mrb[26].mxu0 %vm342_vm2, %v5429_v10  ;;  %4075 = vmatprep.mubr.msk.f32.mxu1 %vm5025_vm1, %v5024_v2 }
  0x84   : > { %4365 = vmatprep.mubr.msk.f32.mxu0 %vm5025_vm1, %v5024_v2 }
  0x86   : > { %4076 = vmatmul.mubr.msk.f32.gmra.mrb[8].mxu1 %vm342_vm2, %v5437_v11 }
  0x87   : > { %4366 = vmatmul.mubr.msk.f32.gmra.mrb[28].mxu0 %vm342_vm2, %v5441_v12  ;;  %4078 = vmatprep.mubr.msk.f32.mxu1 %vm5025_vm1, %v5024_v2 }
  0x88   : > { %4368 = vmatprep.mubr.msk.f32.mxu0 %vm5025_vm1, %v5024_v2 }
  0x8a   : > { %4079 = vmatmul.mubr.msk.f32.gmra.mrb[10].mxu1 %vm342_vm2, %v5449_v13 }
  0x8b   : > { %4369 = vmatmul.mubr.msk.f32.gmra.mrb[30].mxu0 %vm342_vm2, %v5453_v14  ;;  %4081 = vmatprep.mubr.msk.f32.mxu1 %vm5025_vm1, %v5024_v2 }
  0x8c   : > { %4371 = vmatprep.mubr.msk.f32.mxu0 %vm5025_vm1, %v5024_v2 }
  0x8e   : > { %4082 = vmatmul.mubr.msk.f32.gmra.mrb[12].mxu1 %vm342_vm2, %v5461_v15 }
  0x8f   : > { %4372 = vmatmul.mubr.msk.f32.gmra.mrb[32].mxu0 %vm342_vm2, %v5465_v16  ;;  %4084 = vmatprep.mubr.msk.f32.mxu1 %vm5025_vm1, %v5024_v2 }
  0x90   : > { %4374 = vmatprep.mubr.msk.f32.mxu0 %vm5025_vm1, %v5024_v2 }
  0x92   : > { %4085 = vmatmul.mubr.msk.f32.gmra.mrb[14].mxu1 %vm342_vm2, %v5473_v17 }
  0x93   : > { %4375 = vmatmul.mubr.msk.f32.gmra.mrb[34].mxu0 %vm342_vm2, %v5477_v18  ;;  %4087 = vmatprep.mubr.msk.f32.mxu1 %vm5025_vm1, %v5024_v2 }
  0x94   : > { %4377 = vmatprep.mubr.msk.f32.mxu0 %vm5025_vm1, %v5024_v2 }
  0x96   : > { %4088 = vmatmul.mubr.msk.f32.gmra.mrb[16].mxu1 %vm342_vm2, %v5485_v19 }
  0x97   : > { %4378 = vmatmul.mubr.msk.f32.gmra.mrb[36].mxu0 %vm342_vm2, %v5489_v20  ;;  %4090 = vmatprep.mubr.msk.f32.mxu1 %vm5025_vm1, %v5024_v2 }
  0x98   : > { %4380 = vmatprep.mubr.msk.f32.mxu0 %vm5025_vm1, %v5024_v2 }
  0x9a   : > { %4091 = vmatmul.mubr.msk.f32.gmra.mrb[18].mxu1 %vm342_vm2, %v5497_v21 }
  0x9b   : > { %4381 = vmatmul.mubr.msk.f32.gmra.mrb[38].mxu0 %vm342_vm2, %v5501_v22  ;;  %4093 = vmatprep.mubr.msk.f32.mxu1 %vm5025_vm1, %v5024_v2 }
  0x9c   : > { %4383 = vmatprep.mubr.msk.f32.mxu0 %vm5025_vm1, %v5024_v2 }
  0x9e   : > { %4094 = vmatmul.mubr.msk.f32.gmra.mrb[20].mxu1 %vm342_vm2, %v5509_v23 }
  0x9f   : > { %4384 = vmatmul.mubr.msk.f32.gmra.mrb[40].mxu0 %vm342_vm2, %v5513_v24  ;;  %4096 = vmatprep.mubr.msk.f32.mxu1 %vm5025_vm1, %v5024_v2 }
  0xa0   : > { %4388 = vmatprep.mubr.msk.f32.mxu0 %vm5025_vm1, %v5024_v2 }
  0xa2   : > { %4097 = vmatmul.mubr.msk.f32.gmra.mrb[22].mxu1 %vm342_vm2, %v5521_v25 }
  0xa3   : > { %4389 = vmatmul.mubr.msk.f32.vlgmr.msra.gmra.mrb[0].mxu0 %vm342_vm2, %v5461_v15  ;;  %4099 = vmatprep.mubr.msk.f32.mxu1 %vm5025_vm1, %v5024_v2 }
  0xa4   : > { %4452 = vmatpush3.msk.msra.mxu0 %vm485_vm0, %v2311_v26  ;;  %4391 = vmatprep.mubr.msk.f32.mxu0 %vm5025_vm1, %v5024_v2  ;;  %v2031_v26 = vld [vmem:[#allocation2 + $0xd0] sm:$0xff] }
  0xa5   : > { %4516 = vmatprep.subr.mxu0 %v5024_v2 }
  0xa6   : > { %4100 = vmatmul.mubr.msk.f32.gmra.mrb[24].mxu1 %vm342_vm2, %v5534_v27 }
  0xa7   : > { %4392 = vmatmul.mubr.msk.f32.gmra.mrb[2].mxu0 %vm342_vm2, %v5473_v17  ;;  %4102 = vmatprep.mubr.msk.f32.mxu1 %vm5025_vm1, %v5024_v2 }
  0xa8   : > { %4394 = vmatprep.mubr.msk.f32.mxu0 %vm5025_vm1, %v5024_v2 }
  0xaa   : > { %4103 = vmatmul.mubr.msk.f32.gmra.mrb[26].mxu1 %vm342_vm2, %v5546_v28 }
  0xab   : > { %4395 = vmatmul.mubr.msk.f32.gmra.mrb[4].mxu0 %vm342_vm2, %v5485_v19  ;;  %4105 = vmatprep.mubr.msk.f32.mxu1 %vm5025_vm1, %v5024_v2 }
  0xac   : > { %4397 = vmatprep.mubr.msk.f32.mxu0 %vm5025_vm1, %v5024_v2 }
  0xae   : > { %4106 = vmatmul.mubr.msk.f32.gmra.mrb[28].mxu1 %vm342_vm2, %v5556_v29 }
  0xaf   : > { %4398 = vmatmul.mubr.msk.f32.gmra.mrb[6].mxu0 %vm342_vm2, %v5497_v21  ;;  %4108 = vmatprep.mubr.msk.f32.mxu1 %vm5025_vm1, %v5024_v2 }
  0xb0   : > { %4400 = vmatprep.mubr.msk.f32.mxu0 %vm5025_vm1, %v5024_v2 }
  0xb2   : > { %4109 = vmatmul.mubr.msk.f32.gmra.mrb[30].mxu1 %vm342_vm2, %v5566_v30 }
  0xb3   : > { %4401 = vmatmul.mubr.msk.f32.gmra.mrb[8].mxu0 %vm342_vm2, %v5509_v23  ;;  %4111 = vmatprep.mubr.msk.f32.mxu1 %vm5025_vm1, %v5024_v2 }
  0xb4   : > { %4403 = vmatprep.mubr.msk.f32.mxu0 %vm5025_vm1, %v5024_v2 }
  0xb6   : > { %4112 = vmatmul.mubr.msk.f32.gmra.mrb[32].mxu1 %vm342_vm2, %v5576_v31 }
  0xb7   : > { %4404 = vmatmul.mubr.msk.f32.gmra.mrb[10].mxu0 %vm342_vm2, %v5521_v25  ;;  %4114 = vmatprep.mubr.msk.f32.mxu1 %vm5025_vm1, %v5024_v2 }
  0xb8   : > { %4406 = vmatprep.mubr.msk.f32.mxu0 %vm5025_vm1, %v5024_v2 }
  0xba   : > { %4115 = vmatmul.mubr.msk.f32.gmra.mrb[34].mxu1 %vm342_vm2, %v5586_v32 }
  0xbb   : > { %4407 = vmatmul.mubr.msk.f32.gmra.mrb[12].mxu0 %vm342_vm2, %v5534_v27  ;;  %4117 = vmatprep.mubr.msk.f32.mxu1 %vm5025_vm1, %v5024_v2 }
  0xbc   : > { %4409 = vmatprep.mubr.msk.f32.mxu0 %vm5025_vm1, %v5024_v2 }
  0xbe   : > { %4118 = vmatmul.mubr.msk.f32.gmra.mrb[36].mxu1 %vm342_vm2, %v5596_v33 }
  0xbf   : > { %4410 = vmatmul.mubr.msk.f32.gmra.mrb[14].mxu0 %vm342_vm2, %v5546_v28  ;;  %4120 = vmatprep.mubr.msk.f32.mxu1 %vm5025_vm1, %v5024_v2 }
  0xc0   : > { %4412 = vmatprep.mubr.msk.f32.mxu0 %vm5025_vm1, %v5024_v2 }
  0xc2   : > { %4121 = vmatmul.mubr.msk.f32.gmra.mrb[38].mxu1 %vm342_vm2, %v5607_v37 }
  0xc3   : > { %4413 = vmatmul.mubr.msk.f32.gmra.mrb[16].mxu0 %vm342_vm2, %v5556_v29  ;;  %4123 = vmatprep.mubr.msk.f32.mxu1 %vm5025_vm1, %v5024_v2 }
  0xc4   : > { %4415 = vmatprep.mubr.msk.f32.mxu0 %vm5025_vm1, %v5024_v2 }
  0xc6   : > { %4124 = vmatmul.mubr.msk.f32.gmra.mrb[40].mxu1 %vm342_vm2, %v5618_v45 }
  0xc7   : > { %4416 = vmatmul.mubr.msk.f32.gmra.mrb[18].mxu0 %vm342_vm2, %v5566_v30  ;;  %4128 = vmatprep.mubr.msk.f32.mxu1 %vm5025_vm1, %v5024_v2 }
  0xc8   : > { %4418 = vmatprep.mubr.msk.f32.mxu0 %vm5025_vm1, %v5024_v2 }
  0xca   : > { %4129 = vmatmul.mubr.msk.f32.vlgmr.msra.gmra.mrb[0].mxu1 %vm342_vm2, %v895_v56 }
  0xcb   : > { %4419 = vmatmul.mubr.msk.f32.gmra.mrb[20].mxu0 %vm342_vm2, %v5576_v31  ;;  %4131 = vmatprep.mubr.msk.f32.mxu1 %vm5025_vm1, %v5024_v2 }
  0xcc   : > { %4421 = vmatprep.mubr.msk.f32.mxu0 %vm5025_vm1, %v5024_v2  ;;  %4192 = vmatpush3.msk.msra.mxu1 %vm485_vm0, %v1195_v59 }
  0xcd   : > { %4581 = vmatprep.subr.mxu1 %v5024_v2 }
  0xce   : > { %4132 = vmatmul.mubr.msk.f32.gmra.mrb[2].mxu1 %vm342_vm2, %v896_v1 }
  0xcf   : > { %4422 = vmatmul.mubr.msk.f32.gmra.mrb[22].mxu0 %vm342_vm2, %v5586_v32  ;;  %4134 = vmatprep.mubr.msk.f32.mxu1 %vm5025_vm1, %v5024_v2 }
  0xd0   : > { %4424 = vmatprep.mubr.msk.f32.mxu0 %vm5025_vm1, %v5024_v2 }
  0xd2   : > { %4135 = vmatmul.mubr.msk.f32.gmra.mrb[4].mxu1 %vm342_vm2, %v897_v4 }
  0xd3   : > { %4425 = vmatmul.mubr.msk.f32.gmra.mrb[24].mxu0 %vm342_vm2, %v5596_v33  ;;  %4137 = vmatprep.mubr.msk.f32.mxu1 %vm5025_vm1, %v5024_v2 }
  0xd4   : > { %4427 = vmatprep.mubr.msk.f32.mxu0 %vm5025_vm1, %v5024_v2 }
  0xd6   : > { %4138 = vmatmul.mubr.msk.f32.gmra.mrb[6].mxu1 %vm342_vm2, %v5272_v44  ;;  %v5672_v44 = vld [vmem:[#allocation2 + $0xa8] sm:$0xff] }
  0xd7   : > { %4428 = vmatmul.mubr.msk.f32.gmra.mrb[26].mxu0 %vm342_vm2, %v5607_v37  ;;  %4140 = vmatprep.mubr.msk.f32.mxu1 %vm5025_vm1, %v5024_v2 }
  0xd8   : > { %4430 = vmatprep.mubr.msk.f32.mxu0 %vm5025_vm1, %v5024_v2 }
  0xda   : > { %4141 = vmatmul.mubr.msk.f32.gmra.mrb[8].mxu1 %vm342_vm2, %v5286_v46  ;;  %v5682_v46 = vld [vmem:[#allocation2 + $0xb0] sm:$0xff] }
  0xdb   : > { %4431 = vmatmul.mubr.msk.f32.gmra.mrb[28].mxu0 %vm342_vm2, %v5618_v45  ;;  %4143 = vmatprep.mubr.msk.f32.mxu1 %vm5025_vm1, %v5024_v2 }
  0xdc   : > { %4433 = vmatprep.mubr.msk.f32.mxu0 %vm5025_vm1, %v5024_v2 }
  0xde   : > { %4144 = vmatmul.mubr.msk.f32.gmra.mrb[10].mxu1 %vm342_vm2, %v5297_v47  ;;  %v5692_v47 = vld [vmem:[#allocation2 + $0xb8] sm:$0xff] }
  0xdf   : > { %4434 = vmatmul.mubr.msk.f32.gmra.mrb[30].mxu0 %vm342_vm2, %v5672_v44  ;;  %4146 = vmatprep.mubr.msk.f32.mxu1 %vm5025_vm1, %v5024_v2 }
  0xe0   : > { %4436 = vmatprep.mubr.msk.f32.mxu0 %vm5025_vm1, %v5024_v2 }
  0xe2   : > { %4147 = vmatmul.mubr.msk.f32.gmra.mrb[12].mxu1 %vm342_vm2, %v5309_v49 }
  0xe3   : > { %4437 = vmatmul.mubr.msk.f32.gmra.mrb[32].mxu0 %vm342_vm2, %v5682_v46  ;;  %4149 = vmatprep.mubr.msk.f32.mxu1 %vm5025_vm1, %v5024_v2 }
  0xe4   : > { %4439 = vmatprep.mubr.msk.f32.mxu0 %vm5025_vm1, %v5024_v2 }
  0xe6   : > { %4150 = vmatmul.mubr.msk.f32.gmra.mrb[14].mxu1 %vm342_vm2, %v5321_v51 }
  0xe7   : > { %4440 = vmatmul.mubr.msk.f32.gmra.mrb[34].mxu0 %vm342_vm2, %v5692_v47  ;;  %4152 = vmatprep.mubr.msk.f32.mxu1 %vm5025_vm1, %v5024_v2 }
  0xe8   : > { %4442 = vmatprep.mubr.msk.f32.mxu0 %vm5025_vm1, %v5024_v2 }
  0xea   : > { %4153 = vmatmul.mubr.msk.f32.gmra.mrb[16].mxu1 %vm342_vm2, %v5333_v53 }
  0xeb   : > { %4443 = vmatmul.mubr.msk.f32.gmra.mrb[36].mxu0 %vm342_vm2, %v2029_v5  ;;  %4155 = vmatprep.mubr.msk.f32.mxu1 %vm5025_vm1, %v5024_v2 }
  0xec   : > { %4445 = vmatprep.mubr.msk.f32.mxu0 %vm5025_vm1, %v5024_v2 }
  0xee   : > { %4156 = vmatmul.mubr.msk.f32.gmra.mrb[18].mxu1 %vm342_vm2, %v5345_v55 }
  0xef   : > { %4446 = vmatmul.mubr.msk.f32.gmra.mrb[38].mxu0 %vm342_vm2, %v2030_v7  ;;  %4158 = vmatprep.mubr.msk.f32.mxu1 %vm5025_vm1, %v5024_v2 }
  0xf0   : > { %4448 = vmatprep.mubr.msk.f32.mxu0 %vm5025_vm1, %v5024_v2 }
  0xf2   : > { %4159 = vmatmul.mubr.msk.f32.gmra.mrb[20].mxu1 %vm342_vm2, %v5359_v58 }
  0xf3   : > { %4449 = vmatmul.mubr.msk.f32.gmra.mrb[40].mxu0 %vm342_vm2, %v2031_v26  ;;  %4161 = vmatprep.mubr.msk.f32.mxu1 %vm5025_vm1, %v5024_v2 }
  0xf4   : > { %4453 = vmatprep.mubr.msk.f32.mxu0 %vm5025_vm1, %v5024_v2 }
  0xf6   : > { %4162 = vmatmul.mubr.msk.f32.gmra.mrb[22].mxu1 %vm342_vm2, %v5373_v61 }
  0xf7   : > { %4454 = vmatmul.mubr.msk.f32.vlgmr.msra.gmra.mrb[0].mxu0 %vm342_vm2, %v5193_v35  ;;  %4164 = vmatprep.mubr.msk.f32.mxu1 %vm5025_vm1, %v5024_v2  ;;  %v5859_v35 = vld [vmem:[#allocation2 + $0xb1] sm:$0xff] }
  0xf8   : > { %4517 = vmatpush3.msk.msra.mxu0 %vm485_vm0, %v2590_v34  ;;  %4456 = vmatprep.mubr.msk.f32.mxu0 %vm5025_vm1, %v5024_v2 }
  0xfa   : > { %4165 = vmatmul.mubr.msk.f32.gmra.mrb[24].mxu1 %vm342_vm2, %v5385_v63 }
  0xfb   : > { %4457 = vmatmul.mubr.msk.f32.gmra.mrb[2].mxu0 %vm342_vm2, %v5202_v36  ;;  %4167 = vmatprep.mubr.msk.f32.mxu1 %vm5025_vm1, %v5024_v2  ;;  %v5869_v36 = vld [vmem:[#allocation2 + $0xb9] sm:$0xff] }
  0xfc   : > { %4459 = vmatprep.mubr.msk.f32.mxu0 %vm5025_vm1, %v5024_v2 }
  0xfe   : > { %4168 = vmatmul.mubr.msk.f32.gmra.mrb[26].mxu1 %vm342_vm2, %v5395_v3 }
  0xff   : > { %4460 = vmatmul.mubr.msk.f32.gmra.mrb[4].mxu0 %vm342_vm2, %v5213_v38  ;;  %4170 = vmatprep.mubr.msk.f32.mxu1 %vm5025_vm1, %v5024_v2  ;;  %v2308_v38 = vld [vmem:[#allocation2 + $0xc1] sm:$0xff] }
 0x100   : > { %4462 = vmatprep.mubr.msk.f32.mxu0 %vm5025_vm1, %v5024_v2 }
 0x102   : > { %4171 = vmatmul.mubr.msk.f32.gmra.mrb[28].mxu1 %vm342_vm2, %v5408_v6 }
 0x103   : > { %4463 = vmatmul.mubr.msk.f32.gmra.mrb[6].mxu0 %vm342_vm2, %v5222_v39  ;;  %4173 = vmatprep.mubr.msk.f32.mxu1 %vm5025_vm1, %v5024_v2  ;;  %v2309_v39 = vld [vmem:[#allocation2 + $0xc9] sm:$0xff] }
 0x104   : > { %4465 = vmatprep.mubr.msk.f32.mxu0 %vm5025_vm1, %v5024_v2 }
 0x106   : > { %4174 = vmatmul.mubr.msk.f32.gmra.mrb[30].mxu1 %vm342_vm2, %v5418_v8 }
 0x107   : > { %4466 = vmatmul.mubr.msk.f32.gmra.mrb[8].mxu0 %vm342_vm2, %v5232_v40  ;;  %4176 = vmatprep.mubr.msk.f32.mxu1 %vm5025_vm1, %v5024_v2  ;;  %v2310_v40 = vld [vmem:[#allocation2 + $0xd1] sm:$0xff] }
 0x108   : > { %4468 = vmatprep.mubr.msk.f32.mxu0 %vm5025_vm1, %v5024_v2 }
 0x10a   : > { %4177 = vmatmul.mubr.msk.f32.gmra.mrb[32].mxu1 %vm342_vm2, %v5429_v10 }
 0x10b   : > { %4469 = vmatmul.mubr.msk.f32.gmra.mrb[10].mxu0 %vm342_vm2, %v5242_v41  ;;  %4179 = vmatprep.mubr.msk.f32.mxu1 %vm5025_vm1, %v5024_v2  ;;  %v2587_v41 = vld [vmem:[#allocation2 + $0xc2] sm:$0xff] }
 0x10c   : > { %4471 = vmatprep.mubr.msk.f32.mxu0 %vm5025_vm1, %v5024_v2 }
 0x10e   : > { %4180 = vmatmul.mubr.msk.f32.gmra.mrb[34].mxu1 %vm342_vm2, %v5441_v12 }
 0x10f   : > { %4472 = vmatmul.mubr.msk.f32.gmra.mrb[12].mxu0 %vm342_vm2, %v5252_v42  ;;  %4182 = vmatprep.mubr.msk.f32.mxu1 %vm5025_vm1, %v5024_v2  ;;  %v2588_v42 = vld [vmem:[#allocation2 + $0xca] sm:$0xff] }
 0x110   : > { %4474 = vmatprep.mubr.msk.f32.mxu0 %vm5025_vm1, %v5024_v2 }
 0x112   : > { %4183 = vmatmul.mubr.msk.f32.gmra.mrb[36].mxu1 %vm342_vm2, %v5453_v14 }
 0x113   : > { %4475 = vmatmul.mubr.msk.f32.gmra.mrb[14].mxu0 %vm342_vm2, %v5262_v43  ;;  %4185 = vmatprep.mubr.msk.f32.mxu1 %vm5025_vm1, %v5024_v2  ;;  %v2589_v43 = vld [vmem:[#allocation2 + $0xd2] sm:$0xff] }
 0x114   : > { %4477 = vmatprep.mubr.msk.f32.mxu0 %vm5025_vm1, %v5024_v2 }
 0x116   : > { %4186 = vmatmul.mubr.msk.f32.gmra.mrb[38].mxu1 %vm342_vm2, %v5465_v16 }
 0x117   : > { %4478 = vmatmul.mubr.msk.f32.gmra.mrb[16].mxu0 %vm342_vm2, %v5305_v48  ;;  %4188 = vmatprep.mubr.msk.f32.mxu1 %vm5025_vm1, %v5024_v2 }
 0x118   : > { %4480 = vmatprep.mubr.msk.f32.mxu0 %vm5025_vm1, %v5024_v2 }
 0x11a   : > { %4189 = vmatmul.mubr.msk.f32.gmra.mrb[40].mxu1 %vm342_vm2, %v5477_v18 }
 0x11b   : > { %4481 = vmatmul.mubr.msk.f32.gmra.mrb[18].mxu0 %vm342_vm2, %v5317_v50  ;;  %4193 = vmatprep.mubr.msk.f32.mxu1 %vm5025_vm1, %v5024_v2 }
 0x11c   : > { %4483 = vmatprep.mubr.msk.f32.mxu0 %vm5025_vm1, %v5024_v2 }
 0x11e   : > { %4194 = vmatmul.mubr.msk.f32.vlgmr.msra.gmra.mrb[0].mxu1 %vm342_vm2, %v5425_v9 }
 0x11f   : > { %4484 = vmatmul.mubr.msk.f32.gmra.mrb[20].mxu0 %vm342_vm2, %v5329_v52  ;;  %4196 = vmatprep.mubr.msk.f32.mxu1 %vm5025_vm1, %v5024_v2 }
 0x120   : > { %4486 = vmatprep.mubr.msk.f32.mxu0 %vm5025_vm1, %v5024_v2  ;;  %4582 = vmatpush3.msk.msra.mxu1 %vm485_vm0, %v5086_v0  ;;  %v5849_v0 = vld [vmem:[#allocation2 + $0xa9] sm:$0xff] }
 0x122   : > { %4197 = vmatmul.mubr.msk.f32.gmra.mrb[2].mxu1 %vm342_vm2, %v5437_v11 }
 0x123   : > { %4487 = vmatmul.mubr.msk.f32.gmra.mrb[22].mxu0 %vm342_vm2, %v5341_v54  ;;  %4199 = vmatprep.mubr.msk.f32.mxu1 %vm5025_vm1, %v5024_v2 }
 0x124   : > { %4489 = vmatprep.mubr.msk.f32.mxu0 %vm5025_vm1, %v5024_v2 }
 0x126   : > { %4200 = vmatmul.mubr.msk.f32.gmra.mrb[4].mxu1 %vm342_vm2, %v5449_v13 }
 0x127   : > { %4490 = vmatmul.mubr.msk.f32.gmra.mrb[24].mxu0 %vm342_vm2, %v5354_v57  ;;  %4202 = vmatprep.mubr.msk.f32.mxu1 %vm5025_vm1, %v5024_v2 }
 0x128   : > { %4492 = vmatprep.mubr.msk.f32.mxu0 %vm5025_vm1, %v5024_v2 }
 0x12a   : > { %4203 = vmatmul.mubr.msk.f32.gmra.mrb[6].mxu1 %vm342_vm2, %v5461_v15 }
 0x12b   : > { %4493 = vmatmul.mubr.msk.f32.gmra.mrb[26].mxu0 %vm342_vm2, %v5368_v60  ;;  %4205 = vmatprep.mubr.msk.f32.mxu1 %vm5025_vm1, %v5024_v2 }
 0x12c   : > { %4495 = vmatprep.mubr.msk.f32.mxu0 %vm5025_vm1, %v5024_v2 }
 0x12e   : > { %4206 = vmatmul.mubr.msk.f32.gmra.mrb[8].mxu1 %vm342_vm2, %v5473_v17 }
 0x12f   : > { %4496 = vmatmul.mubr.msk.f32.gmra.mrb[28].mxu0 %vm342_vm2, %v5381_v62  ;;  %4208 = vmatprep.mubr.msk.f32.mxu1 %vm5025_vm1, %v5024_v2 }
 0x130   : > { %4498 = vmatprep.mubr.msk.f32.mxu0 %vm5025_vm1, %v5024_v2 }
 0x132   : > { %4209 = vmatmul.mubr.msk.f32.gmra.mrb[10].mxu1 %vm342_vm2, %v5485_v19 }
 0x133   : > { %4499 = vmatmul.mubr.msk.f32.gmra.mrb[30].mxu0 %vm342_vm2, %v5849_v0  ;;  %4211 = vmatprep.mubr.msk.f32.mxu1 %vm5025_vm1, %v5024_v2 }
 0x134   : > { %4501 = vmatprep.mubr.msk.f32.mxu0 %vm5025_vm1, %v5024_v2 }
 0x136   : > { %4212 = vmatmul.mubr.msk.f32.gmra.mrb[12].mxu1 %vm342_vm2, %v5497_v21 }
 0x137   : > { %4502 = vmatmul.mubr.msk.f32.gmra.mrb[32].mxu0 %vm342_vm2, %v5859_v35  ;;  %4214 = vmatprep.mubr.msk.f32.mxu1 %vm5025_vm1, %v5024_v2 }
 0x138   : > { %4504 = vmatprep.mubr.msk.f32.mxu0 %vm5025_vm1, %v5024_v2 }
 0x13a   : > { %4215 = vmatmul.mubr.msk.f32.gmra.mrb[14].mxu1 %vm342_vm2, %v5509_v23 }
 0x13b   : > { %4505 = vmatmul.mubr.msk.f32.gmra.mrb[34].mxu0 %vm342_vm2, %v5869_v36  ;;  %4217 = vmatprep.mubr.msk.f32.mxu1 %vm5025_vm1, %v5024_v2 }
 0x13c   : > { %4507 = vmatprep.mubr.msk.f32.mxu0 %vm5025_vm1, %v5024_v2 }
 0x13e   : > { %4218 = vmatmul.mubr.msk.f32.gmra.mrb[16].mxu1 %vm342_vm2, %v5521_v25 }
 0x13f   : > { %4508 = vmatmul.mubr.msk.f32.gmra.mrb[36].mxu0 %vm342_vm2, %v2308_v38  ;;  %4220 = vmatprep.mubr.msk.f32.mxu1 %vm5025_vm1, %v5024_v2 }
 0x140   : > { %4510 = vmatprep.mubr.msk.f32.mxu0 %vm5025_vm1, %v5024_v2 }
 0x142   : > { %4221 = vmatmul.mubr.msk.f32.gmra.mrb[18].mxu1 %vm342_vm2, %v5534_v27 }
 0x143   : > { %4511 = vmatmul.mubr.msk.f32.gmra.mrb[38].mxu0 %vm342_vm2, %v2309_v39  ;;  %4223 = vmatprep.mubr.msk.f32.mxu1 %vm5025_vm1, %v5024_v2 }
 0x144   : > { %4513 = vmatprep.mubr.msk.f32.mxu0 %vm5025_vm1, %v5024_v2 }
 0x146   : > { %4224 = vmatmul.mubr.msk.f32.gmra.mrb[20].mxu1 %vm342_vm2, %v5546_v28 }
 0x147   : > { %4514 = vmatmul.mubr.msk.f32.gmra.mrb[40].mxu0 %vm342_vm2, %v2310_v40  ;;  %4226 = vmatprep.mubr.msk.f32.mxu1 %vm5025_vm1, %v5024_v2 }
 0x148   : > { %4518 = vmatprep.mubr.msk.f32.mxu0 %vm5025_vm1, %v5024_v2 }
 0x14a   : > { %4227 = vmatmul.mubr.msk.f32.gmra.mrb[22].mxu1 %vm342_vm2, %v5556_v29 }
 0x14b   : > { %4519 = vmatmul.mubr.msk.f32.vlgmr.msra.gmra.mrb[0].mxu0 %vm342_vm2, %v5309_v49  ;;  %4229 = vmatprep.mubr.msk.f32.mxu1 %vm5025_vm1, %v5024_v2 }
 0x14c   : > { %4521 = vmatprep.mubr.msk.f32.mxu0 %vm5025_vm1, %v5024_v2 }
 0x14e   : > { %4230 = vmatmul.mubr.msk.f32.gmra.mrb[24].mxu1 %vm342_vm2, %v5566_v30 }
 0x14f   : > { %4522 = vmatmul.mubr.msk.f32.gmra.mrb[2].mxu0 %vm342_vm2, %v5321_v51  ;;  %4232 = vmatprep.mubr.msk.f32.mxu1 %vm5025_vm1, %v5024_v2 }
 0x150   : > { %4524 = vmatprep.mubr.msk.f32.mxu0 %vm5025_vm1, %v5024_v2 }
 0x152   : > { %4233 = vmatmul.mubr.msk.f32.gmra.mrb[26].mxu1 %vm342_vm2, %v5576_v31 }
 0x153   : > { %4525 = vmatmul.mubr.msk.f32.gmra.mrb[4].mxu0 %vm342_vm2, %v5333_v53  ;;  %4235 = vmatprep.mubr.msk.f32.mxu1 %vm5025_vm1, %v5024_v2 }
 0x154   : > { %4527 = vmatprep.mubr.msk.f32.mxu0 %vm5025_vm1, %v5024_v2 }
 0x156   : > { %4236 = vmatmul.mubr.msk.f32.gmra.mrb[28].mxu1 %vm342_vm2, %v5586_v32 }
 0x157   : > { %4528 = vmatmul.mubr.msk.f32.gmra.mrb[6].mxu0 %vm342_vm2, %v5345_v55  ;;  %4238 = vmatprep.mubr.msk.f32.mxu1 %vm5025_vm1, %v5024_v2 }
 0x158   : > { %4530 = vmatprep.mubr.msk.f32.mxu0 %vm5025_vm1, %v5024_v2 }
 0x15a   : > { %4239 = vmatmul.mubr.msk.f32.gmra.mrb[30].mxu1 %vm342_vm2, %v5596_v33 }
 0x15b   : > { %4531 = vmatmul.mubr.msk.f32.gmra.mrb[8].mxu0 %vm342_vm2, %v5359_v58  ;;  %4241 = vmatprep.mubr.msk.f32.mxu1 %vm5025_vm1, %v5024_v2 }
 0x15c   : > { %4533 = vmatprep.mubr.msk.f32.mxu0 %vm5025_vm1, %v5024_v2 }
 0x15e   : > { %4242 = vmatmul.mubr.msk.f32.gmra.mrb[32].mxu1 %vm342_vm2, %v5607_v37 }
 0x15f   : > { %4534 = vmatmul.mubr.msk.f32.gmra.mrb[10].mxu0 %vm342_vm2, %v5373_v61  ;;  %4244 = vmatprep.mubr.msk.f32.mxu1 %vm5025_vm1, %v5024_v2 }
 0x160   : > { %4536 = vmatprep.mubr.msk.f32.mxu0 %vm5025_vm1, %v5024_v2 }
 0x162   : > { %4245 = vmatmul.mubr.msk.f32.gmra.mrb[34].mxu1 %vm342_vm2, %v5618_v45 }
 0x163   : > { %4537 = vmatmul.mubr.msk.f32.gmra.mrb[12].mxu0 %vm342_vm2, %v5385_v63  ;;  %4247 = vmatprep.mubr.msk.f32.mxu1 %vm5025_vm1, %v5024_v2 }
 0x164   : > { %4539 = vmatprep.mubr.msk.f32.mxu0 %vm5025_vm1, %v5024_v2 }
 0x166   : > { %4248 = vmatmul.mubr.msk.f32.gmra.mrb[36].mxu1 %vm342_vm2, %v5672_v44 }
 0x167   : > { %4540 = vmatmul.mubr.msk.f32.gmra.mrb[14].mxu0 %vm342_vm2, %v5395_v3  ;;  %4250 = vmatprep.mubr.msk.f32.mxu1 %vm5025_vm1, %v5024_v2 }
 0x168   : > { %4542 = vmatprep.mubr.msk.f32.mxu0 %vm5025_vm1, %v5024_v2 }
 0x16a   : > { %4251 = vmatmul.mubr.msk.f32.gmra.mrb[38].mxu1 %vm342_vm2, %v5682_v46 }
 0x16b   : > { %4543 = vmatmul.mubr.msk.f32.gmra.mrb[16].mxu0 %vm342_vm2, %v5408_v6  ;;  %4253 = vmatprep.mubr.msk.f32.mxu1 %vm5025_vm1, %v5024_v2 }
 0x16c   : > { %4545 = vmatprep.mubr.msk.f32.mxu0 %vm5025_vm1, %v5024_v2 }
 0x16e   : > { %4254 = vmatmul.mubr.msk.f32.gmra.mrb[40].mxu1 %vm342_vm2, %v5692_v47 }
 0x16f   : > { %4546 = vmatmul.mubr.msk.f32.gmra.mrb[18].mxu0 %vm342_vm2, %v5418_v8  ;;  %4291 = vmatprep.mubr.msk.f32.mxu1 %vm5025_vm1, %v5024_v2 }
 0x170   : > { %4548 = vmatprep.mubr.msk.f32.mxu0 %vm5025_vm1, %v5024_v2 }
 0x172   : > { %4292 = vmatmul.mubr.msk.f32.vlgmr.msra.gmra.mrb[22].mxu1 %vm342_vm2, %v5305_v48  ;;  %v2849_v48 = vlaneseq }
 0x173   : > { %4549 = vmatmul.mubr.msk.f32.gmra.mrb[20].mxu0 %vm342_vm2, %v5429_v10  ;;  %4294 = vmatprep.mubr.msk.f32.mxu1 %vm5025_vm1, %v5024_v2 }
 0x174   : > { %4551 = vmatprep.mubr.msk.f32.mxu0 %vm5025_vm1, %v5024_v2  ;;  %v6058_v49 = vshrl.u32 %v2849_v48, 7 }
 0x176   : > { %4295 = vmatmul.mubr.msk.f32.gmra.mrb[24].mxu1 %vm342_vm2, %v5317_v50  ;;  %v6060_v50 = vstv %s2848_s9  ;;  %v2851_v51 = vadd.s32 8, %v6058_v49  ;;  %v2852_v53 = vadd.s32 16, %v6058_v49  ;;  %v2853_v61 = vadd.s32 24, %v6058_v49 }
 0x177   : > { %4552 = vmatmul.mubr.msk.f32.gmra.mrb[22].mxu0 %vm342_vm2, %v5441_v12  ;;  %4297 = vmatprep.mubr.msk.f32.mxu1 %vm5025_vm1, %v5024_v2  ;;  %v2854_v6 = vadd.s32 32, %v6058_v49  ;;  %v2855_v10 = vadd.s32 40, %v6058_v49  ;;  %v2856_v13 = vadd.s32 48, %v6058_v49  ;;  %v2857_v15 = vadd.s32 56, %v6058_v49 }
 0x178   : > { %4554 = vmatprep.mubr.msk.f32.mxu0 %vm5025_vm1, %v5024_v2  ;;  %v6073_v55 = vadd.s32 %v6060_v50, %v2852_v53  ;;  %v6086_v9 = vadd.s32 %v6060_v50, %v2853_v61  ;;  %v2858_v31 = vadd.s32 64, %v6058_v49  ;;  %v2859_v34 = vadd.s32 72, %v6058_v49 }
 0x179   : > { %v6104_v21 = vadd.s32 %v6060_v50, %v2855_v10  ;;  %v6112_v25 = vadd.s32 %v6060_v50, %v2857_v15 }
 0x17a   : > { %4298 = vmatmul.mubr.msk.f32.gmra.mrb[26].mxu1 %vm342_vm2, %v5329_v52  ;;  %v6065_v52 = vadd.s32 %v6060_v50, %v6058_v49  ;;  %v2927_v19 = vsub.s32 0, %v6086_v9  ;;  %v6138_v5 = vadd.s32 %v6060_v50, %v2858_v31  ;;  %vm2915_vm5 = vcmp.lt.s32.totalorder %v6073_v55, 0 }
 0x17b   : > { %4555 = vmatmul.mubr.msk.f32.gmra.mrb[24].mxu0 %vm342_vm2, %v5453_v14  ;;  %4300 = vmatprep.mubr.msk.f32.mxu1 %vm5025_vm1, %v5024_v2  ;;  %v6094_v14 = vadd.s32 %v6060_v50, %v2854_v6  ;;  %v2949_v30 = vsub.s32 0, %v6104_v21  ;;  %v2971_v56 = vsub.s32 0, %v6112_v25  ;;  %vm2926_vm15 = vcmp.lt.s32.totalorder %v6086_v9, 0 }
 0x17c   : > { %4557 = vmatprep.mubr.msk.f32.mxu0 %vm5025_vm1, %v5024_v2  ;;  %v6117_v28 = vmin.u32 %v2927_v19, %v6086_v9  ;;  %v2982_v48 = vsub.s32 0, %v6138_v5  ;;  %vm2893_vm3 = vcmp.lt.s32.totalorder %v6065_v52, 0 }
 0x17d   : > { %v6135_v47 = vmin.u32 %v2949_v30, %v6104_v21  ;;  %v6149_v38 = vmin.u32 %v2971_v56, %v6112_v25  ;;  %vm2937_vm0 = vcmp.lt.s32.totalorder %v6094_v14, 0 }
 0x17e   : > { %4301 = vmatmul.mubr.msk.f32.gmra.mrb[28].mxu1 %vm342_vm2, %v5341_v54  ;;  %v6069_v54 = vadd.s32 %v6060_v50, %v2851_v51  ;;  %v6131_v4 = vmul.u32.u64.low 2863311531, %v6117_v28  ;;  %v6132_v44 = vmul.u32.u64.high 2863311531, %v6117_v28, %v6131_v4  ;;  %v2860_v51 = vadd.s32 80, %v6058_v49 }
 0x17f   : > { %4558 = vmatmul.mubr.msk.f32.gmra.mrb[26].mxu0 %vm342_vm2, %v5465_v16  ;;  %4303 = vmatprep.mubr.msk.f32.mxu1 %vm5025_vm1, %v5024_v2 }
 0x180   : > { %4560 = vmatprep.mubr.msk.f32.mxu0 %vm5025_vm1, %v5024_v2  ;;  %v2932_v10 = vshrl.u32 %v6132_v44, 4  ;;  %vm2904_vm4 = vcmp.lt.s32.totalorder %v6069_v54, 0 }
 0x182   : > { %4304 = vmatmul.mubr.msk.f32.gmra.mrb[30].mxu1 %vm342_vm2, %v5354_v57  ;;  %v2905_v57 = vsub.s32 0, %v6069_v54 }
 0x183   : > { %4561 = vmatmul.mubr.msk.f32.gmra.mrb[28].mxu0 %vm342_vm2, %v5477_v18  ;;  %4306 = vmatprep.mubr.msk.f32.mxu1 %vm5025_vm1, %v5024_v2 }
 0x184   : > { %4563 = vmatprep.mubr.msk.f32.mxu0 %vm5025_vm1, %v5024_v2 }
 0x186   : > { %4307 = vmatmul.mubr.msk.f32.gmra.mrb[32].mxu1 %vm342_vm2, %v5368_v60  ;;  %v2916_v60 = vsub.s32 0, %v6073_v55 }
 0x187   : > { %4564 = vmatmul.mubr.msk.f32.gmra.mrb[30].mxu0 %vm342_vm2, %v5489_v20  ;;  %4309 = vmatprep.mubr.msk.f32.mxu1 %vm5025_vm1, %v5024_v2 }
 0x188   : > { %4566 = vmatprep.mubr.msk.f32.mxu0 %vm5025_vm1, %v5024_v2  ;;  %v3777_v8 = vmin.u32 %v2916_v60, %v6073_v55 }
 0x18a   : > { %4310 = vmatmul.mubr.msk.f32.gmra.mrb[34].mxu1 %vm342_vm2, %v5381_v62  ;;  %v3776_v62 = vmin.u32 %v2905_v57, %v6069_v54  ;;  %v6099_v17 = vmul.u32.u64.low 2863311531, %v3777_v8  ;;  %v6100_v18 = vmul.u32.u64.high 2863311531, %v3777_v8, %v6099_v17 }
 0x18b   : > { %4567 = vmatmul.mubr.msk.f32.gmra.mrb[32].mxu0 %vm342_vm2, %v5501_v22  ;;  %4312 = vmatprep.mubr.msk.f32.mxu1 %vm5025_vm1, %v5024_v2  ;;  %v6107_v22 = vadd.s32 %v6060_v50, %v2856_v13 }
 0x18c   : > { %4569 = vmatprep.mubr.msk.f32.mxu0 %vm5025_vm1, %v5024_v2  ;;  %v6089_v11 = vmul.u32.u64.low 2863311531, %v3776_v62  ;;  %v6090_v12 = vmul.u32.u64.high 2863311531, %v3776_v62, %v6089_v11  ;;  %v2921_v1 = vshrl.u32 %v6100_v18, 4 }
 0x18d   : > { %v2960_v33 = vsub.s32 0, %v6107_v22  ;;  %v6175_v11 = vmin.u32 %v2982_v48, %v6138_v5 }
 0x18e   : > { %4313 = vmatmul.mubr.msk.f32.gmra.mrb[36].mxu1 %vm342_vm2, %v5849_v0  ;;  %v2910_v32 = vshrl.u32 %v6090_v12, 4  ;;  %v2922_v40 = vmul.u32 24, %v2921_v1  ;;  %v6178_v12 = vadd.s32 %v6060_v50, %v2860_v51 }
 0x18f   : > { %4570 = vmatmul.mubr.msk.f32.gmra.mrb[34].mxu0 %vm342_vm2, %v5513_v24  ;;  %4315 = vmatprep.mubr.msk.f32.mxu1 %vm5025_vm1, %v5024_v2  ;;  %v2938_v24 = vsub.s32 0, %v6094_v14  ;;  %v6141_v26 = vmin.u32 %v2960_v33, %v6107_v22  ;;  %v6191_v30 = vmul.u32.u64.low 2863311531, %v6175_v11  ;;  %v6192_v31 = vmul.u32.u64.high 2863311531, %v6175_v11, %v6191_v30 }
 0x190   : > { %4572 = vmatprep.mubr.msk.f32.mxu0 %vm5025_vm1, %v5024_v2  ;;  %v2911_v7 = vmul.u32 24, %v2910_v32  ;;  %v2923_v6 = vsub.s32 %v3777_v8, %v2922_v40  ;;  %v3004_v32 = vsub.s32 0, %v6178_v12 }
 0x191   : > { %v6124_v45 = vmin.u32 %v2938_v24, %v6094_v14 }
 0x192   : > { %4316 = vmatmul.mubr.msk.f32.gmra.mrb[38].mxu1 %vm342_vm2, %v5859_v35  ;;  %v2912_v53 = vsub.s32 %v3776_v62, %v2911_v7  ;;  %v2924_v8 = vsub.s32 0, %v2923_v6  ;;  %v6217_v40 = vmin.u32 %v3004_v32, %v6178_v12 }
 0x193   : > { %4573 = vmatmul.mubr.msk.f32.gmra.mrb[36].mxu0 %vm342_vm2, %v2587_v41  ;;  %4318 = vmatprep.mubr.msk.f32.mxu1 %vm5025_vm1, %v5024_v2 }
 0x194   : > { %4575 = vmatprep.mubr.msk.f32.mxu0 %vm5025_vm1, %v5024_v2  ;;  %v2913_v13 = vsub.s32 0, %v2912_v53 }
 0x196   : > { %4319 = vmatmul.mubr.msk.f32.gmra.mrb[40].mxu1 %vm342_vm2, %v5869_v36  ;;  %v6145_v35 = vmul.u32.u64.low 2863311531, %v6124_v45  ;;  %v6146_v36 = vmul.u32.u64.high 2863311531, %v6124_v45, %v6145_v35  ;;  %v6195_v33 = vsel %vm2904_vm4, %v2913_v13, %v2912_v53  ;;  %vm3250_vm4 = vcmp.lt.s32.totalorder %v6065_v52, 384 }
 0x197   : > { %4576 = vmatmul.mubr.msk.f32.gmra.mrb[38].mxu0 %vm342_vm2, %v2588_v42  ;;  %vm3125_vm8 = vcmp.ne.s32.totalorder %v6195_v33, 0  ;;  %vm3146_vm9 = vcmp.lt.s32.totalorder %v6195_v33, 0 }
 0x198   : > { %4578 = vmatprep.mubr.msk.f32.mxu0 %vm5025_vm1, %v5024_v2  ;;  %v2894_v2 = vsub.s32 0, %v6065_v52  ;;  %v2943_v18 = vshrl.u32 %v6146_v36, 4  ;;  %vm6244_vm13 = vmand %vm3146_vm9, %vm3125_vm8  ;;  %vm2948_vm1 = vcmp.lt.s32.totalorder %v6104_v21, 0 }
 0x19a   : > { %v3775_v58 = vmin.u32 %v2894_v2, %v6065_v52  ;;  %v6160_v2 = vmul.u32.u64.low 2863311531, %v6141_v26  ;;  %v6161_v57 = vmul.u32.u64.high 2863311531, %v6141_v26, %v6160_v2  ;;  %v2944_v1 = vmul.u32 24, %v2943_v18 }
 0x19b   : > { %4579 = vmatmul.mubr.msk.f32.gmra.mrb[40].mxu0 %vm342_vm2, %v2589_v43  ;;  %v6154_v42 = vmul.u32.u64.low 2863311531, %v6135_v47  ;;  %v6155_v43 = vmul.u32.u64.high 2863311531, %v6135_v47, %v6154_v42  ;;  %v3188_v2 = vadd.s32 24, %v6195_v33  ;;  %vm2959_vm2 = vcmp.lt.s32.totalorder %v6107_v22, 0 }
 0x19c   : > { %v6080_v63 = vmul.u32.u64.low 2863311531, %v3775_v58  ;;  %v6081_v3 = vmul.u32.u64.high 2863311531, %v3775_v58, %v6080_v63 }
 0x19d   : > { %v6167_v61 = vmul.u32.u64.low 2863311531, %v6149_v38  ;;  %v6168_v63 = vmul.u32.u64.high 2863311531, %v6149_v38, %v6167_v61 }
 0x19e   : > { %v2899_v23 = vshrl.u32 %v6081_v3, 4 }
 0x19f   : > { %v2976_v4 = vshrl.u32 %v6168_v63, 4 }
 0x1a0   : > { %v2900_v37 = vmul.u32 24, %v2899_v23  ;;  %v2861_v23 = vadd.s32 88, %v6058_v49 }
 0x1a1   : > { %v2977_v48 = vmul.u32 24, %v2976_v4 }
 0x1a2   : > { %v2901_v0 = vsub.s32 %v3775_v58, %v2900_v37  ;;  %v6164_v58 = vadd.s32 %v6060_v50, %v2859_v34  ;;  %v2965_v37 = vshrl.u32 %v6161_v57, 4  ;;  %v6212_v34 = vadd.s32 %v6060_v50, %v2861_v23 }
 0x1a4   : > { %v2902_v60 = vsub.s32 0, %v2901_v0  ;;  %v2993_v15 = vsub.s32 0, %v6164_v58  ;;  %v3015_v61 = vsub.s32 0, %v6212_v34 }
 0x1a6   : > { %v6181_v17 = vsel %vm2893_vm3, %v2902_v60, %v2901_v0  ;;  %v6199_v56 = vmin.u32 %v2993_v15, %v6164_v58  ;;  %v6274_v30 = vmin.u32 %v3015_v61, %v6212_v34 }
 0x1a7   : > { %vm3124_vm6 = vcmp.ne.s32.totalorder %v6181_v17, 0  ;;  %vm3145_vm7 = vcmp.lt.s32.totalorder %v6181_v17, 0  ;;  %v3187_v35 = vadd.s32 24, %v6181_v17 }
 0x1a8   : > { %vm6233_vm12 = vmand %vm3145_vm7, %vm3124_vm6  ;;  %vm2970_vm6 = vcmp.lt.s32.totalorder %v6112_v25, 0 }
 0x1f1   : > { %v6097_v16 = vpop.f32.mrb[0].mxu1 }
 0x1f2   : > { %v4195_v20 = vpop.f32.mrb[1].mxu1 }
 0x1f3   : > { %v2933_v20 = vmul.u32 24, %v2932_v10  ;;  %v2987_v10 = vshrl.u32 %v6192_v31, 4 }
 0x1f5   : > { %v6114_v27 = vpop.f32.mrb[2].mxu1  ;;  %v2934_v7 = vsub.s32 %v6117_v28, %v2933_v20  ;;  %v2945_v28 = vsub.s32 %v6124_v45, %v2944_v1 }
 0x1f6   : > { %v4198_v29 = vpop.f32.mrb[3].mxu1 }
 0x1f7   : > { %v2954_v29 = vshrl.u32 %v6155_v43, 4  ;;  %v6221_v42 = vmul.u32.u64.low 2863311531, %v6199_v56  ;;  %v6222_v43 = vmul.u32.u64.high 2863311531, %v6199_v56, %v6221_v42  ;;  %v2935_v60 = vsub.s32 0, %v2934_v7 }
 0x1f8   : > { %v2946_v20 = vsub.s32 0, %v2945_v28 }
 0x1f9   : > { %v6127_v59 = vpop.f32.mrb[4].mxu1  ;;  %v2955_v36 = vmul.u32 24, %v2954_v29  ;;  %v3209_v29 = vsel %vm6244_vm13, %v3188_v2, %v6195_v33  ;;  %v6280_v31 = vsel %vm2926_vm15, %v2935_v60, %v2934_v7  ;;  %v2998_v33 = vshrl.u32 %v6222_v43, 4 }
 0x1fa   : > { %v4201_v46 = vpop.f32.mrb[5].mxu1  ;;  %v6287_v4 = vsel %vm2937_vm0, %v2946_v20, %v2945_v28  ;;  %vm3148_vm7 = vcmp.lt.s32.totalorder %v6280_v31, 0  ;;  %vm6311_vm8 = vcmp.lt.s32.totalorder %v3209_v29, 16 }
 0x1fb   : > { %v6208_v46 = vsel %vm2915_vm5, %v2924_v8, %v2923_v6  ;;  %v2956_v6 = vsub.s32 %v6135_v47, %v2955_v36  ;;  %v2862_v8 = vadd.s32 96, %v6058_v49  ;;  %v2978_v47 = vsub.s32 %v6149_v38, %v2977_v48 }
 0x1fc   : > { %vm3126_vm10 = vcmp.ne.s32.totalorder %v6208_v46, 0  ;;  %vm3147_vm11 = vcmp.lt.s32.totalorder %v6208_v46, 0  ;;  %v6239_v57 = vadd.s32 24, %v6208_v46  ;;  %vm3127_vm5 = vcmp.ne.s32.totalorder %v6280_v31, 0 }
 0x1fd   : > { %v6151_v39 = vpop.f32.mrb[6].mxu1  ;;  %vm6256_vm14 = vmand %vm3147_vm11, %vm3126_vm10  ;;  %v2957_v32 = vsub.s32 0, %v2956_v6  ;;  %v6285_v1 = vadd.s32 %v6060_v50, %v2862_v8  ;;  %vm3128_vm10 = vcmp.ne.s32.totalorder %v6287_v4, 0  ;;  %vm3149_vm11 = vcmp.lt.s32.totalorder %v6287_v4, 0 }
 0x1fe   : > { %v4204_v41 = vpop.f32.mrb[7].mxu1  ;;  %v3210_v38 = vsel %vm6256_vm14, %v6239_v57, %v6208_v46  ;;  %v2999_v57 = vmul.u32 24, %v2998_v33  ;;  %vm6339_vm14 = vmand %vm3148_vm7, %vm3127_vm5  ;;  %vm2981_vm7 = vcmp.lt.s32.totalorder %v6138_v5, 0 }
 0x1ff   : > { %v2966_v41 = vmul.u32 24, %v2965_v37  ;;  %v2988_v37 = vmul.u32 24, %v2987_v10  ;;  %v6307_v43 = vsel %vm2948_vm1, %v2957_v32, %v2956_v6  ;;  %v3026_v60 = vsub.s32 0, %v6285_v1  ;;  %vm6354_vm5 = vmand %vm3149_vm11, %vm3128_vm10 }
 0x200   : > { %v3190_v6 = vadd.s32 24, %v6280_v31  ;;  %v3191_v10 = vadd.s32 24, %v6287_v4  ;;  %vm3150_vm13 = vcmp.lt.s32.totalorder %v6307_v43, 0  ;;  %vm6345_vm1 = vcmp.lt.s32.totalorder %v3210_v38, 16 }
 0x201   : > { %v6170_v3 = vpop.f32.mrb[8].mxu1  ;;  %v2967_v18 = vsub.s32 %v6141_v26, %v2966_v41  ;;  %v6301_v36 = vmul.u32.u64.low 2863311531, %v6274_v30  ;;  %v6302_v41 = vmul.u32.u64.high 2863311531, %v6274_v30, %v6301_v36  ;;  %v2989_v28 = vsub.s32 %v6175_v11, %v2988_v37 }
 0x202   : > { %v4207_v62 = vpop.f32.mrb[9].mxu1  ;;  %v2865_v38 = vadd.s32 120, %v6058_v49  ;;  %v3211_v32 = vsel %vm6339_vm14, %v3190_v6, %v6280_v31  ;;  %v3192_v37 = vadd.s32 24, %v6307_v43  ;;  %vm3253_vm11 = vcmp.lt.s32.totalorder %v6086_v9, 384 }
 0x203   : > { %v6251_v62 = vmul.u32.u64.low 2863311531, %v6217_v40  ;;  %v6252_v13 = vmul.u32.u64.high 2863311531, %v6217_v40, %v6251_v62  ;;  %v2990_v15 = vsub.s32 0, %v2989_v28  ;;  %v3020_v33 = vshrl.u32 %v6302_v41, 4 }
 0x204   : > { %v3212_v31 = vsel %vm6354_vm5, %v3191_v10, %v6287_v4  ;;  %v6433_v10 = vadd.s32 %v6060_v50, %v2865_v38  ;;  %vm3254_vm5 = vcmp.lt.s32.totalorder %v6094_v14, 384 }
 0x205   : > { %v6185_v19 = vpop.f32.mrb[10].mxu1  ;;  %v3009_v48 = vshrl.u32 %v6252_v13, 4  ;;  %v6403_v41 = vsel %vm2981_vm7, %v2990_v15, %v2989_v28  ;;  %v3021_v13 = vmul.u32 24, %v3020_v33 }
 0x206   : > { %v4210_v24 = vpop.f32.mrb[11].mxu1  ;;  %vm3153_vm7 = vcmp.lt.s32.totalorder %v6403_v41, 0 }
 0x207   : > { %v3208_v24 = vsel %vm6233_vm12, %v3187_v35, %v6181_v17  ;;  %v2968_v17 = vsub.s32 0, %v2967_v18  ;;  %v2863_v35 = vadd.s32 104, %v6058_v49  ;;  %vm3129_vm12 = vcmp.ne.s32.totalorder %v6307_v43, 0 }
 0x208   : > { %vm6293_vm3 = vcmp.lt.s32.totalorder %v3208_v24, 16  ;;  %v6362_v24 = vmin.u32 %v3026_v60, %v6285_v1  ;;  %vm6377_vm10 = vmand %vm3150_vm13, %vm3129_vm12 }
 0x209   : > { %v6203_v44 = vpop.f32.mrb[12].mxu1  ;;  %v6319_v2 = vsel %vm2959_vm2, %v2968_v17, %v2967_v18  ;;  %v6326_v61 = vadd.s32 %v6060_v50, %v2863_v35  ;;  %v3010_v18 = vmul.u32 24, %v3009_v48  ;;  %vm3252_vm2 = vcmp.lt.s32.totalorder %v6073_v55, 384  ;;  %vm6423_vm14 = vmand %vm6293_vm3, %vm3250_vm4 }
 0x20a   : > { %v4213_v0 = vpop.f32.mrb[13].mxu1  ;;  %vm3130_vm15 = vcmp.ne.s32.totalorder %v6319_v2, 0  ;;  %vm3151_vm0 = vcmp.lt.s32.totalorder %v6319_v2, 0  ;;  %v6383_v17 = vadd.s32 24, %v6319_v2  ;;  %v3213_v52 = vsel %vm6377_vm10, %v3192_v37, %v6307_v43  ;;  %vm3273_vm10 = vmand %vm6345_vm1, %vm3252_vm2 }
 0x20b   : > { %v2979_v0 = vsub.s32 0, %v2978_v47  ;;  %v3037_v29 = vsub.s32 0, %v6326_v61  ;;  %vm6394_vm12 = vmand %vm3151_vm0, %vm3130_vm15  ;;  %vm2992_vm15 = vcmp.lt.s32.totalorder %v6164_v58, 0  ;;  %vm6989_vm3 = vcmp.lt.s32.totalorder %v6069_v54, 384 }
 0x20c   : > { %v3214_v7 = vsel %vm6394_vm12, %v6383_v17, %v6319_v2  ;;  %vm6450_vm4 = vmand %vm6311_vm8, %vm6989_vm3  ;;  %vm6454_vm0 = vcmp.lt.s32.totalorder %v3212_v31, 16  ;;  %vm3003_vm8 = vcmp.lt.s32.totalorder %v6178_v12, 0  ;;  %v3059_v17 = vsub.s32 0, %v6433_v10 }
 0x20d   : > { %v6227_v51 = vpop.f32.mrb[14].mxu1  ;;  %v6323_v11 = vsel %vm2970_vm6, %v2979_v0, %v2978_v47  ;;  %v3000_v47 = vsub.s32 %v6199_v56, %v2999_v57  ;;  %vm3014_vm2 = vcmp.lt.s32.totalorder %v6212_v34, 0 }
 0x20e   : > { %v4216_v45 = vpop.f32.mrb[15].mxu1  ;;  %vm3131_vm6 = vcmp.ne.s32.totalorder %v6323_v11, 0  ;;  %vm3152_vm9 = vcmp.lt.s32.totalorder %v6323_v11, 0  ;;  %v6399_v36 = vadd.s32 24, %v6323_v11 }
 0x20f   : > { %v2864_v45 = vadd.s32 112, %v6058_v49  ;;  %vm6411_vm13 = vmand %vm3152_vm9, %vm3131_vm6  ;;  %v3001_v60 = vsub.s32 0, %v3000_v47  ;;  %vm6435_vm9 = vcmp.lt.s32.totalorder %v3211_v32, 16  ;;  %vm3132_vm6 = vcmp.ne.s32.totalorder %v6403_v41, 0 }
 0x210   : > { %v3215_v43 = vsel %vm6411_vm13, %v6399_v36, %v6323_v11  ;;  %vm6516_vm1 = vmand %vm6435_vm9, %vm3253_vm11 }
 0x211   : > { %v6264_v23 = vpop.f32.mrb[16].mxu1 }
 0x212   : > { %v4219_v26 = vpop.f32.mrb[17].mxu1 }
 0x213   : > { %v6367_v26 = vadd.s32 %v6060_v50, %v2864_v45  ;;  %v6416_v45 = vmul.u32.u64.low 2863311531, %v6362_v24  ;;  %v6417_v6 = vmul.u32.u64.high 2863311531, %v6362_v24, %v6416_v45 }
 0x215   : > { %v6291_v46 = vpop.f32.mrb[18].mxu1  ;;  %v3048_v28 = vsub.s32 0, %v6367_v26  ;;  %v3031_v55 = vshrl.u32 %v6417_v6, 4 }
 0x216   : > { %v4222_v42 = vpop.f32.mrb[19].mxu1 }
 0x217   : > { %v3011_v42 = vsub.s32 %v6217_v40, %v3010_v18  ;;  %v6429_v40 = vmin.u32 %v3037_v29, %v6326_v61  ;;  %v6471_v29 = vsel %vm2992_vm15, %v3001_v60, %v3000_v47  ;;  %v6478_v37 = vmin.u32 %v3048_v28, %v6367_v26 }
 0x218   : > { %v2866_v47 = vadd.s32 128, %v6058_v49  ;;  %vm3133_vm12 = vcmp.ne.s32.totalorder %v6471_v29, 0  ;;  %vm3255_vm15 = vcmp.lt.s32.totalorder %v6104_v21, 384  ;;  %vm3154_vm3 = vcmp.lt.s32.totalorder %v6471_v29, 0 }
 0x219   : > { %v6329_v63 = vpop.f32.mrb[20].mxu1  ;;  %v3012_v38 = vsub.s32 0, %v3011_v42  ;;  %v6474_v32 = vmul.u32.u64.low 2863311531, %v6429_v40  ;;  %v6475_v56 = vmul.u32.u64.high 2863311531, %v6429_v40, %v6474_v32 }
 0x21a   : > { %v4225_v62 = vpop.f32.mrb[21].mxu1  ;;  %v6525_v6 = vadd.s32 %v6060_v50, %v2866_v47  ;;  %v2867_v47 = vadd.s32 136, %v6058_v49 }
 0x21e   : > { %v2723_v0 = vpop.f32.mrb[0].mxu0 }
 0x21f   : > { %v4583_v48 = vadd.f32 %v2723_v0, %v6097_v16  ;;  %v4520_v4 = vpop.f32.mrb[1].mxu0  ;;  %v3022_v0 = vsub.s32 %v6274_v30, %v3021_v13  ;;  %v6502_v30 = vsel %vm3003_vm8, %v3012_v38, %v3011_v42  ;;  %v6521_v42 = vadd.s32 24, %v6471_v29 }
 0x220   : > { %vm3134_vm11 = vcmp.ne.s32.totalorder %v6502_v30, 0  ;;  %vm3155_vm9 = vcmp.lt.s32.totalorder %v6502_v30, 0  ;;  %vm6538_vm8 = vcmp.lt.s32.totalorder %v3214_v7, 16  ;;  %v3042_v7 = vshrl.u32 %v6475_v56, 4 }
 0x221   : > { %v3334_v54 = vsel %vm6423_vm14, %v4583_v48, 0.0  ;;  %vm6494_vm14 = vcmp.lt.s32.totalorder %v3213_v52, 16  ;;  %v3070_v56 = vsub.s32 0, %v6525_v6 }
 0x222   : > { %v2728_v15 = vpop.f32.mrb[2].mxu0  ;;  %v3382_v31 = vmul.f32 %v4583_v48, %v3334_v54  ;;  %v6506_v48 = vmul.u32.u64.low 2863311531, %v6478_v37  ;;  %v6507_v13 = vmul.u32.u64.high 2863311531, %v6478_v37, %v6506_v48  ;;  %v3043_v57 = vmul.u32 24, %v3042_v7  ;;  %vm3276_vm13 = vmand %vm6494_vm14, %vm3255_vm15 }
 0x223   : > { %v4584_v53 = vadd.f32 %v2728_v15, %v6114_v27  ;;  %v4523_v2 = vpop.f32.mrb[3].mxu0  ;;  %v6484_v27 = vadd.s32 24, %v6403_v41 }
 0x224   : > { %v3053_v11 = vshrl.u32 %v6507_v13, 4  ;;  %v2869_v13 = vadd.s32 152, %v6058_v49 }
 0x225   : > { %v3335_v33 = vsel %vm6450_vm4, %v4584_v53, 0.0  ;;  %vm6531_vm4 = vmand %vm3153_vm7, %vm3132_vm6 }
 0x226   : > { %v3355_v35 = vadd.f32 %v3335_v33, %v3334_v54  ;;  %v3383_v4 = vmul.f32 %v4584_v53, %v3335_v33  ;;  %v2733_v60 = vpop.f32.mrb[4].mxu0  ;;  %vm6547_vm6 = vmand %vm3154_vm3, %vm3133_vm12  ;;  %v3032_v33 = vmul.u32 24, %v3031_v55  ;;  %v3216_v14 = vsel %vm6531_vm4, %v6484_v27, %v6403_v41 }
 0x227   : > { %v4585_v45 = vadd.f32 %v2733_v60, %v6127_v59  ;;  %v4526_v16 = vpop.f32.mrb[5].mxu0  ;;  %v6510_v59 = vmin.u32 %v3059_v17, %v6433_v10  ;;  %v3023_v17 = vsub.s32 0, %v3022_v0  ;;  %vm6563_vm7 = vmand %vm6454_vm0, %vm3254_vm5  ;;  %v3217_v20 = vsel %vm6547_vm6, %v6521_v42, %v6471_v29 }
 0x228   : > { %v3403_v8 = vadd.f32 %v3383_v4, %v3382_v31  ;;  %v2868_v16 = vadd.s32 144, %v6058_v49  ;;  %vm6584_vm0 = vmand %vm3155_vm9, %vm3134_vm11  ;;  %vm6594_vm5 = vcmp.lt.s32.totalorder %v3215_v43, 16  ;;  %vm3257_vm12 = vcmp.lt.s32.totalorder %v6112_v25, 384 }
 0x229   : > { %v3336_v52 = vsel %vm3273_vm10, %v4585_v45, 0.0  ;;  %vm3256_vm10 = vcmp.lt.s32.totalorder %v6107_v22, 384  ;;  %v6601_v29 = vsel %vm3014_vm2, %v3023_v17, %v3022_v0  ;;  %v3033_v27 = vsub.s32 %v6362_v24, %v3032_v33  ;;  %vm3278_vm6 = vmand %vm6594_vm5, %vm3257_vm12 }
 0x22a   : > { %v3356_v18 = vadd.f32 %v3355_v35, %v3336_v52  ;;  %v3384_v54 = vmul.f32 %v4585_v45, %v3336_v52  ;;  %v2738_v53 = vpop.f32.mrb[6].mxu0  ;;  %v6554_v31 = vmul.u32.u64.low 2863311531, %v6510_v59  ;;  %v6555_v35 = vmul.u32.u64.high 2863311531, %v6510_v59, %v6554_v31  ;;  %vm3277_vm14 = vmand %vm6538_vm8, %vm3256_vm10 }
 0x22b   : > { %v4586_v62 = vadd.f32 %v2738_v53, %v6151_v39  ;;  %v4529_v2 = vpop.f32.mrb[7].mxu0  ;;  %v6568_v45 = vadd.s32 24, %v6502_v30  ;;  %vm3025_vm3 = vcmp.lt.s32.totalorder %v6285_v1, 0  ;;  %v6616_v0 = vmin.u32 %v3070_v56, %v6525_v6 }
 0x22c   : > { %v3404_v39 = vadd.f32 %v3403_v8, %v3384_v54  ;;  %v6619_v24 = vadd.s32 %v6060_v50, %v2868_v16  ;;  %vm6628_vm2 = vcmp.lt.s32.totalorder %v3216_v14, 16  ;;  %vm3258_vm4 = vcmp.lt.s32.totalorder %v6138_v5, 384 }
 0x22d   : > { %v3337_v4 = vsel %vm6516_vm1, %v4586_v62, 0.0  ;;  %v3218_v43 = vsel %vm6584_vm0, %v6568_v45, %v6502_v30  ;;  %vm3135_vm1 = vcmp.ne.s32.totalorder %v6601_v29, 0  ;;  %vm3156_vm11 = vcmp.lt.s32.totalorder %v6601_v29, 0  ;;  %vm3279_vm12 = vmand %vm6628_vm2, %vm3258_vm4 }
 0x22e   : > { %v3357_v55 = vadd.f32 %v3356_v18, %v3337_v4  ;;  %v3385_v8 = vmul.f32 %v4586_v62, %v3337_v4  ;;  %v2743_v48 = vpop.f32.mrb[8].mxu0  ;;  %v3034_v17 = vsub.s32 0, %v3033_v27  ;;  %v3044_v33 = vsub.s32 %v6429_v40, %v3043_v57  ;;  %vm6691_vm5 = vmand %vm3156_vm11, %vm3135_vm1 }
 0x22f   : > { %v4587_v15 = vadd.f32 %v2743_v48, %v6170_v3  ;;  %v4532_v18 = vpop.f32.mrb[9].mxu0  ;;  %v6605_v3 = vadd.s32 %v6060_v50, %v2867_v47  ;;  %v3054_v47 = vmul.u32 24, %v3053_v11  ;;  %v3092_v4 = vsub.s32 0, %v6619_v24 }
 0x230   : > { %v3405_v42 = vadd.f32 %v3404_v39, %v3385_v8  ;;  %v3064_v39 = vshrl.u32 %v6555_v35, 4  ;;  %v6647_v40 = vadd.s32 24, %v6601_v29  ;;  %v6650_v35 = vadd.s32 %v6060_v50, %v2869_v13 }
 0x231   : > { %v3338_v36 = vsel %vm6563_vm7, %v4587_v15, 0.0  ;;  %v3081_v21 = vsub.s32 0, %v6605_v3  ;;  %vm6653_vm15 = vcmp.lt.s32.totalorder %v3217_v20, 16  ;;  %vm3259_vm9 = vcmp.lt.s32.totalorder %v6164_v58, 384 }
 0x232   : > { %v3358_v54 = vadd.f32 %v3357_v55, %v3338_v36  ;;  %v3386_v53 = vmul.f32 %v4587_v15, %v3338_v36  ;;  %v2748_v9 = vpop.f32.mrb[10].mxu0  ;;  %v6660_v22 = vsel %vm3025_vm3, %v3034_v17, %v3033_v27  ;;  %v2870_v14 = vadd.s32 160, %v6058_v49 }
 0x233   : > { %v4588_v62 = vadd.f32 %v2748_v9, %v6185_v19  ;;  %v4535_v2 = vpop.f32.mrb[11].mxu0  ;;  %v6638_v19 = vmul.u32.u64.low 2863311531, %v6616_v0  ;;  %v6639_v31 = vmul.u32.u64.high 2863311531, %v6616_v0, %v6638_v19  ;;  %v6663_v38 = vmin.u32 %v3081_v21, %v6605_v3 }
 0x234   : > { %v3406_v28 = vadd.f32 %v3405_v42, %v3386_v53  ;;  %v3045_v18 = vsub.s32 0, %v3044_v33  ;;  %v3065_v42 = vmul.u32 24, %v3064_v39  ;;  %vm3036_vm8 = vcmp.lt.s32.totalorder %v6326_v61, 0 }
 0x235   : > { %v3339_v7 = vsel %vm3276_vm13, %v4588_v62, 0.0  ;;  %vm3047_vm10 = vcmp.lt.s32.totalorder %v6367_v26, 0  ;;  %v6670_v57 = vmin.u32 %v3092_v4, %v6619_v24  ;;  %vm3260_vm7 = vcmp.lt.s32.totalorder %v6178_v12, 384 }
 0x236   : > { %v3359_v60 = vadd.f32 %v3358_v54, %v3339_v7  ;;  %v3387_v56 = vmul.f32 %v4588_v62, %v3339_v7  ;;  %v2753_v16 = vpop.f32.mrb[12].mxu0  ;;  %vm3136_vm3 = vcmp.ne.s32.totalorder %v6660_v22, 0  ;;  %v3103_v49 = vsub.s32 0, %v6650_v35 }
 0x237   : > { %v4589_v55 = vadd.f32 %v2753_v16, %v6203_v44  ;;  %v4538_v8 = vpop.f32.mrb[13].mxu0  ;;  %v3055_v44 = vsub.s32 %v6478_v37, %v3054_v47  ;;  %v6681_v53 = vmul.u32.u64.low 2863311531, %v6663_v38  ;;  %v6682_v9 = vmul.u32.u64.high 2863311531, %v6663_v38, %v6681_v53 }
 0x238   : > { %v3407_v15 = vadd.f32 %v3406_v28, %v3387_v56  ;;  %v6685_v13 = vadd.s32 %v6060_v50, %v2870_v14  ;;  %v3066_v2 = vsub.s32 %v6510_v59, %v3065_v42  ;;  %v3075_v50 = vshrl.u32 %v6639_v31, 4 }
 0x239   : > { %v3340_v20 = vsel %vm3277_vm14, %v4589_v55, 0.0  ;;  %v3056_v62 = vsub.s32 0, %v3055_v44  ;;  %v6702_v21 = vmul.u32.u64.low 2863311531, %v6670_v57  ;;  %v6703_v28 = vmul.u32.u64.high 2863311531, %v6670_v57, %v6702_v21  ;;  %vm3280_vm14 = vmand %vm6653_vm15, %vm3259_vm9 }
 0x23a   : > { %v3360_v27 = vadd.f32 %v3359_v60, %v3340_v20  ;;  %v3388_v11 = vmul.f32 %v4589_v55, %v3340_v20  ;;  %v2758_v36 = vpop.f32.mrb[14].mxu0  ;;  %vm3261_vm13 = vcmp.lt.s32.totalorder %v6212_v34, 384  ;;  %vm3157_vm1 = vcmp.lt.s32.totalorder %v6660_v22, 0 }
 0x23b   : > { %v4590_v37 = vadd.f32 %v2758_v36, %v6227_v51  ;;  %v4541_v54 = vpop.f32.mrb[15].mxu0  ;;  %v6697_v51 = vsel %vm3036_vm8, %v3045_v18, %v3044_v33  ;;  %v6712_v59 = vmin.u32 %v3103_v49, %v6650_v35  ;;  %vm6720_vm11 = vcmp.lt.s32.totalorder %v3218_v43, 16  ;;  %vm6734_vm0 = vmand %vm3157_vm1, %vm3136_vm3 }
 0x23c   : > { %v3408_v25 = vadd.f32 %v3407_v15, %v3388_v11  ;;  %v3219_v32 = vsel %vm6691_vm5, %v6647_v40, %v6601_v29  ;;  %v3114_v31 = vsub.s32 0, %v6685_v13  ;;  %vm3137_vm2 = vcmp.ne.s32.totalorder %v6697_v51, 0  ;;  %vm6768_vm15 = vmand %vm6720_vm11, %vm3260_vm7 }
 0x23d   : > { %v3341_v17 = vsel %vm3278_vm6, %v4590_v37, 0.0  ;;  %vm3058_vm4 = vcmp.lt.s32.totalorder %v6433_v10, 0  ;;  %v6740_v45 = vsel %vm3047_vm10, %v3056_v62, %v3055_v44  ;;  %v3067_v29 = vsub.s32 0, %v3066_v2 }
 0x23e   : > { %v3361_v47 = vadd.f32 %v3360_v27, %v3341_v17  ;;  %v3389_v39 = vmul.f32 %v4590_v37, %v3341_v17  ;;  %v2763_v7 = vpop.f32.mrb[16].mxu0  ;;  %v3076_v43 = vmul.u32 24, %v3075_v50  ;;  %vm3158_vm8 = vcmp.lt.s32.totalorder %v6697_v51, 0 }
 0x23f   : > { %v4591_v33 = vadd.f32 %v2763_v7, %v6264_v23  ;;  %v4544_v19 = vpop.f32.mrb[17].mxu0  ;;  %v3199_v23 = vadd.s32 24, %v6660_v22  ;;  %v6747_v40 = vmul.u32.u64.low 2863311531, %v6712_v59  ;;  %v6748_v55 = vmul.u32.u64.high 2863311531, %v6712_v59, %v6747_v40  ;;  %vm6782_vm7 = vmand %vm3158_vm8, %vm3137_vm2 }
 0x240   : > { %v3409_v4 = vadd.f32 %v3408_v25, %v3389_v39  ;;  %v3086_v15 = vshrl.u32 %v6682_v9, 4  ;;  %v6754_v18 = vmin.u32 %v3114_v31, %v6685_v13  ;;  %vm6756_vm10 = vcmp.lt.s32.totalorder %v3219_v32, 16 }
 0x241   : > { %v3342_v52 = vsel %vm3279_vm12, %v4591_v33, 0.0  ;;  %v3220_v48 = vsel %vm6734_vm0, %v3199_v23, %v6660_v22  ;;  %v3200_v42 = vadd.s32 24, %v6697_v51  ;;  %vm3138_vm9 = vcmp.ne.s32.totalorder %v6740_v45, 0  ;;  %vm6805_vm1 = vmand %vm6756_vm10, %vm3261_vm13 }
 0x242   : > { %v3362_v60 = vadd.f32 %v3361_v47, %v3342_v52  ;;  %v3390_v56 = vmul.f32 %v4591_v33, %v3342_v52  ;;  %v2768_v16 = vpop.f32.mrb[18].mxu0  ;;  %vm3159_vm6 = vcmp.lt.s32.totalorder %v6740_v45, 0  ;;  %v6776_v11 = vsel %vm3058_vm4, %v3067_v29, %v3066_v2 }
 0x243   : > { %v4592_v8 = vadd.f32 %v2768_v16, %v6291_v46  ;;  %v4547_v14 = vpop.f32.mrb[19].mxu0  ;;  %v3077_v54 = vsub.s32 %v6616_v0, %v3076_v43  ;;  %v3097_v53 = vshrl.u32 %v6703_v28, 4  ;;  %v3087_v41 = vmul.u32 24, %v3086_v15  ;;  %vm6818_vm13 = vmand %vm3159_vm6, %vm3138_vm9 }
 0x244   : > { %v3410_v44 = vadd.f32 %v3409_v4, %v3390_v56  ;;  %v6790_v62 = vmul.u32.u64.low 2863311531, %v6754_v18  ;;  %v6791_v2 = vmul.u32.u64.high 2863311531, %v6754_v18, %v6790_v62  ;;  %vm6793_vm3 = vcmp.lt.s32.totalorder %v3220_v48, 16 }
 0x245   : > { %v3343_v46 = vsel %vm3280_vm14, %v4592_v8, 0.0  ;;  %v1662_v20 = vpop.f32.mrb[22].mxu1  ;;  %vm3262_vm5 = vcmp.lt.s32.totalorder %v6285_v1, 384  ;;  %vm3069_vm12 = vcmp.lt.s32.totalorder %v6525_v6, 0  ;;  %v3221_v28 = vsel %vm6782_vm7, %v3200_v42, %v6697_v51 }
 0x246   : > { %v3363_v22 = vadd.f32 %v3362_v60, %v3343_v46  ;;  %v3391_v36 = vmul.f32 %v4592_v8, %v3343_v46  ;;  %v2773_v49 = vpop.f32.mrb[20].mxu0  ;;  %v4293_v37 = vpop.f32.mrb[23].mxu1  ;;  %v3201_v47 = vadd.s32 24, %v6740_v45  ;;  %vm3139_vm11 = vcmp.ne.s32.totalorder %v6776_v11, 0  ;;  %vm6832_vm0 = vmand %vm6793_vm3, %vm3262_vm5 }
 0x247   : > { %v4593_v9 = vadd.f32 %v2773_v49, %v6329_v63  ;;  %v4550_v25 = vpop.f32.mrb[21].mxu0  ;;  %v3078_v5 = vsub.s32 0, %v3077_v54  ;;  %v3098_v32 = vmul.u32 24, %v3097_v53  ;;  %vm3160_vm2 = vcmp.lt.s32.totalorder %v6776_v11, 0 }
 0x248   : > { %v3411_v17 = vadd.f32 %v3410_v44, %v3391_v36  ;;  %v3088_v4 = vsub.s32 %v6663_v38, %v3087_v41  ;;  %v3108_v23 = vshrl.u32 %v6748_v55, 4  ;;  %vm3263_vm4 = vcmp.lt.s32.totalorder %v6326_v61, 384  ;;  %vm6848_vm8 = vmand %vm3160_vm2, %vm3139_vm11 }
 0x249   : > { %v3344_v0 = vsel %vm6768_vm15, %v4593_v9, 0.0  ;;  %v1667_v21 = vpop.f32.mrb[24].mxu1  ;;  %vm6836_vm14 = vcmp.lt.s32.totalorder %v3221_v28, 16  ;;  %v3222_v38 = vsel %vm6818_vm13, %v3201_v47, %v6740_v45  ;;  %v3202_v56 = vadd.s32 24, %v6776_v11 }
 0x24a   : > { %v3364_v39 = vadd.f32 %v3363_v22, %v3344_v0  ;;  %v3392_v7 = vmul.f32 %v4593_v9, %v3344_v0  ;;  %v2778_v33 = vpop.f32.mrb[22].mxu0  ;;  %v4296_v19 = vpop.f32.mrb[25].mxu1  ;;  %v6854_v14 = vsel %vm3069_vm12, %v3078_v5, %v3077_v54  ;;  %v3099_v45 = vsub.s32 %v6670_v57, %v3098_v32  ;;  %vm3284_vm7 = vmand %vm6836_vm14, %vm3263_vm4 }
 0x24b   : > { %v4594_v31 = vadd.f32 %v2778_v33, %v1662_v20  ;;  %v4553_v51 = vpop.f32.mrb[23].mxu0  ;;  %v3089_v58 = vsub.s32 0, %v3088_v4  ;;  %v3109_v48 = vmul.u32 24, %v3108_v23  ;;  %v3119_v42 = vshrl.u32 %v6791_v2, 4 }
 0x24c   : > { %v3412_v52 = vadd.f32 %v3411_v17, %v3392_v7  ;;  %vm3264_vm10 = vcmp.lt.s32.totalorder %v6367_v26, 384  ;;  %vm3080_vm15 = vcmp.lt.s32.totalorder %v6605_v3, 0  ;;  %vm6862_vm9 = vcmp.lt.s32.totalorder %v3222_v38, 16 }
 0x24d   : > { %v3345_v30 = vsel %vm6805_vm1, %v4594_v31, 0.0  ;;  %v1672_v29 = vpop.f32.mrb[26].mxu1  ;;  %v3223_v57 = vsel %vm6848_vm8, %v3202_v56, %v6776_v11  ;;  %vm3140_vm6 = vcmp.ne.s32.totalorder %v6854_v14, 0  ;;  %vm3161_vm3 = vcmp.lt.s32.totalorder %v6854_v14, 0  ;;  %vm3285_vm13 = vmand %vm6862_vm9, %vm3264_vm10 }
 0x24e   : > { %v3365_v16 = vadd.f32 %v3364_v39, %v3345_v30  ;;  %v3393_v40 = vmul.f32 %v4594_v31, %v3345_v30  ;;  %v2783_v55 = vpop.f32.mrb[24].mxu0  ;;  %v4299_v1 = vpop.f32.mrb[27].mxu1  ;;  %v3100_v54 = vsub.s32 0, %v3099_v45  ;;  %v3090_v25 = vsel %vm3080_vm15, %v3089_v58, %v3088_v4  ;;  %vm6885_vm11 = vmand %vm3161_vm3, %vm3140_vm6 }
 0x24f   : > { %v4595_v15 = vadd.f32 %v2783_v55, %v1667_v21  ;;  %v4556_v44 = vpop.f32.mrb[25].mxu0  ;;  %v3110_v41 = vsub.s32 %v6712_v59, %v3109_v48  ;;  %v3120_v11 = vmul.u32 24, %v3119_v42  ;;  %v3203_v2 = vadd.s32 24, %v6854_v14 }
 0x250   : > { %v3413_v46 = vadd.f32 %v3412_v52, %v3393_v40  ;;  %vm3091_vm5 = vcmp.lt.s32.totalorder %v6619_v24, 0  ;;  %vm6878_vm12 = vcmp.lt.s32.totalorder %v3223_v57, 16  ;;  %vm3265_vm1 = vcmp.lt.s32.totalorder %v6433_v10, 384 }
 0x251   : > { %v3346_v20 = vsel %vm6832_vm0, %v4595_v15, 0.0  ;;  %v1677_v27 = vpop.f32.mrb[28].mxu1  ;;  %vm3141_vm2 = vcmp.ne.s32.totalorder %v3090_v25, 0  ;;  %vm3162_vm4 = vcmp.lt.s32.totalorder %v3090_v25, 0  ;;  %v3101_v7 = vsel %vm3091_vm5, %v3100_v54, %v3099_v45  ;;  %vm3286_vm10 = vmand %vm6878_vm12, %vm3265_vm1 }
 0x252   : > { %v3366_v36 = vadd.f32 %v3365_v16, %v3346_v20  ;;  %v3394_v49 = vmul.f32 %v4595_v15, %v3346_v20  ;;  %v2788_v37 = vpop.f32.mrb[26].mxu0  ;;  %v4302_v12 = vpop.f32.mrb[29].mxu1  ;;  %v3111_v33 = vsub.s32 0, %v3110_v41  ;;  %v3121_v19 = vsub.s32 %v6754_v18, %v3120_v11  ;;  %vm6899_vm8 = vmand %vm3162_vm4, %vm3141_vm2 }
 0x253   : > { %v4596_v53 = vadd.f32 %v2788_v37, %v1672_v29  ;;  %v4559_v9 = vpop.f32.mrb[27].mxu0  ;;  %v3224_v5 = vsel %vm6885_vm11, %v3203_v2, %v6854_v14  ;;  %v3204_v32 = vadd.s32 24, %v3090_v25  ;;  %vm3102_vm0 = vcmp.lt.s32.totalorder %v6650_v35, 0 }
 0x254   : > { %v3414_v62 = vadd.f32 %v3413_v46, %v3394_v49  ;;  %vm3266_vm14 = vcmp.lt.s32.totalorder %v6525_v6, 384  ;;  %vm3142_vm15 = vcmp.ne.s32.totalorder %v3101_v7, 0  ;;  %vm3163_vm9 = vcmp.lt.s32.totalorder %v3101_v7, 0 }
 0x255   : > { %v3347_v17 = vsel %vm3284_vm7, %v4596_v53, 0.0  ;;  %v1682_v61 = vpop.f32.mrb[30].mxu1  ;;  %vm3245_vm6 = vcmp.lt.s32.totalorder %v3224_v5, 16  ;;  %v3112_v43 = vsel %vm3102_vm0, %v3111_v33, %v3110_v41  ;;  %v3122_v60 = vsub.s32 0, %v3121_v19  ;;  %vm6910_vm3 = vmand %vm3163_vm9, %vm3142_vm15 }
 0x256   : > { %v3367_v59 = vadd.f32 %v3366_v36, %v3347_v17  ;;  %v3395_v21 = vmul.f32 %v4596_v53, %v3347_v17  ;;  %v2793_v63 = vpop.f32.mrb[28].mxu0  ;;  %v4305_v28 = vpop.f32.mrb[31].mxu1  ;;  %v3225_v56 = vsel %vm6899_vm8, %v3204_v32, %v3090_v25  ;;  %v3205_v16 = vadd.s32 24, %v3101_v7  ;;  %vm3287_vm5 = vmand %vm3245_vm6, %vm3266_vm14 }
 0x257   : > { %v4597_v47 = vadd.f32 %v2793_v63, %v1677_v27  ;;  %v4562_v39 = vpop.f32.mrb[29].mxu0  ;;  %vm3113_vm7 = vcmp.lt.s32.totalorder %v6685_v13, 0  ;;  %vm3143_vm12 = vcmp.ne.s32.totalorder %v3112_v43, 0  ;;  %vm3164_vm1 = vcmp.lt.s32.totalorder %v3112_v43, 0 }
 0x258   : > { %v3415_v34 = vadd.f32 %v3414_v62, %v3395_v21  ;;  %vm3246_vm11 = vcmp.lt.s32.totalorder %v3225_v56, 16  ;;  %v3123_v58 = vsel %vm3113_vm7, %v3122_v60, %v3121_v19  ;;  %v3226_v42 = vsel %vm6910_vm3, %v3205_v16, %v3101_v7  ;;  %vm6919_vm2 = vmand %vm3164_vm1, %vm3143_vm12 }
 0x259   : > { %v3348_v26 = vsel %vm3285_vm13, %v4597_v47, 0.0  ;;  %v1687_v31 = vpop.f32.mrb[32].mxu1  ;;  %vm3267_vm13 = vcmp.lt.s32.totalorder %v6605_v3, 384  ;;  %v3206_v46 = vadd.s32 24, %v3112_v43  ;;  %vm3144_vm0 = vcmp.ne.s32.totalorder %v3123_v58, 0 }
 0x25a   : > { %v3368_v4 = vadd.f32 %v3367_v59, %v3348_v26  ;;  %v3396_v23 = vmul.f32 %v4597_v47, %v3348_v26  ;;  %v2798_v52 = vpop.f32.mrb[30].mxu0  ;;  %v4308_v18 = vpop.f32.mrb[33].mxu1  ;;  %vm3288_vm4 = vmand %vm3246_vm11, %vm3267_vm13  ;;  %vm3165_vm14 = vcmp.lt.s32.totalorder %v3123_v58, 0  ;;  %vm3247_vm8 = vcmp.lt.s32.totalorder %v3226_v42, 16 }
 0x25b   : > { %v4598_v30 = vadd.f32 %v2798_v52, %v1682_v61  ;;  %v4565_v29 = vpop.f32.mrb[31].mxu0  ;;  %v3227_v54 = vsel %vm6919_vm2, %v3206_v46, %v3112_v43  ;;  %v3207_v53 = vadd.s32 24, %v3123_v58  ;;  %vm6926_vm15 = vmand %vm3165_vm14, %vm3144_vm0  ;;  %vm3269_vm7 = vcmp.lt.s32.totalorder %v6650_v35, 384 }
 0x25c   : > { %v3416_v38 = vadd.f32 %v3415_v34, %v3396_v23  ;;  %vm3248_vm6 = vcmp.lt.s32.totalorder %v3227_v54, 16  ;;  %vm3270_vm12 = vcmp.lt.s32.totalorder %v6685_v13, 384 }
 0x25d   : > { %v3349_v40 = vsel %vm3286_vm10, %v4598_v30, 0.0  ;;  %v1692_v10 = vpop.f32.mrb[34].mxu1  ;;  %vm3268_vm10 = vcmp.lt.s32.totalorder %v6619_v24, 384  ;;  %v3228_v0 = vsel %vm6926_vm15, %v3207_v53, %v3123_v58  ;;  %vm3290_vm3 = vmand %vm3248_vm6, %vm3269_vm7 }
 0x25e   : > { %v3369_v1 = vadd.f32 %v3368_v4, %v3349_v40  ;;  %v3397_v8 = vmul.f32 %v4598_v30, %v3349_v40  ;;  %v2803_v14 = vpop.f32.mrb[32].mxu0  ;;  %v4311_v45 = vpop.f32.mrb[35].mxu1  ;;  %vm3289_vm9 = vmand %vm3247_vm8, %vm3268_vm10 }
 0x25f   : > { %v4599_v15 = vadd.f32 %v2803_v14, %v1687_v31  ;;  %v4568_v44 = vpop.f32.mrb[33].mxu0 }
 0x260   : > { %v3417_v48 = vadd.f32 %v3416_v38, %v3397_v8 }
 0x261   : > { %v3350_v20 = vsel %vm3287_vm5, %v4599_v15, 0.0  ;;  %v1697_v27 = vpop.f32.mrb[36].mxu1  ;;  %vm3249_vm5 = vcmp.lt.s32.totalorder %v3228_v0, 16 }
 0x262   : > { %v3370_v6 = vadd.f32 %v3369_v1, %v3350_v20  ;;  %v3398_v57 = vmul.f32 %v4599_v15, %v3350_v20  ;;  %v2808_v36 = vpop.f32.mrb[34].mxu0  ;;  %v4314_v49 = vpop.f32.mrb[37].mxu1  ;;  %vm3291_vm1 = vmand %vm3249_vm5, %vm3270_vm12 }
 0x263   : > { %v4600_v3 = vadd.f32 %v2808_v36, %v1692_v10  ;;  %v4571_v37 = vpop.f32.mrb[35].mxu0 }
 0x264   : > { %v3418_v12 = vadd.f32 %v3417_v48, %v3398_v57 }
 0x265   : > { %v3351_v9 = vsel %vm3288_vm4, %v4600_v3, 0.0  ;;  %v1702_v25 = vpop.f32.mrb[38].mxu1 }
 0x266   : > { %v3371_v11 = vadd.f32 %v3370_v6, %v3351_v9  ;;  %v3399_v62 = vmul.f32 %v4600_v3, %v3351_v9  ;;  %v2813_v2 = vpop.f32.mrb[36].mxu0  ;;  %v4317_v17 = vpop.f32.mrb[39].mxu1 }
 0x267   : > { %v4601_v61 = vadd.f32 %v2813_v2, %v1697_v27  ;;  %v4574_v50 = vpop.f32.mrb[37].mxu0 }
 0x268   : > { %v3419_v24 = vadd.f32 %v3418_v12, %v3399_v62 }
 0x269   : > { %v3352_v59 = vsel %vm3289_vm9, %v4601_v61, 0.0  ;;  %v1707_v21 = vpop.f32.mrb[40].mxu1 }
 0x26a   : > { %v3372_v63 = vadd.f32 %v3371_v11, %v3352_v59  ;;  %v3400_v28 = vmul.f32 %v4601_v61, %v3352_v59  ;;  %v2818_v47 = vpop.f32.mrb[38].mxu0  ;;  %v4320_v39 = vpop.f32.mrb[41].mxu1 }
 0x26b   : > { %v4602_v7 = vadd.f32 %v2818_v47, %v1702_v25  ;;  %v4577_v33 = vpop.f32.mrb[39].mxu0 }
 0x26c   : > { %v3420_v19 = vadd.f32 %v3419_v24, %v3400_v28 }
 0x26d   : > { %v3353_v35 = vsel %vm3290_vm3, %v4602_v7, 0.0 }
 0x26e   : > { %v3373_v34 = vadd.f32 %v3372_v63, %v3353_v35  ;;  %v3401_v5 = vmul.f32 %v4602_v7, %v3353_v35  ;;  %v2823_v32 = vpop.f32.mrb[40].mxu0 }
 0x26f   : > { %v4603_v26 = vadd.f32 %v2823_v32, %v1707_v21  ;;  %v4580_v31 = vpop.f32.mrb[41].mxu0 }
 0x270   : > { %v3421_v51 = vadd.f32 %v3420_v19, %v3401_v5 }
 0x271   : > { %v3354_v4 = vsel %vm3291_vm1, %v4603_v26, 0.0 }
 0x272   : > { %v3374_v23 = vadd.f32 %v3373_v34, %v3354_v4  ;;  %v3402_v52 = vmul.f32 %v4603_v26, %v3354_v4 }
 0x274   : > { %v3375_v18 = vrot.slane %v3374_v23, 4  ;;  %v3422_v30 = vadd.f32 %v3421_v51, %v3402_v52 }
 0x276   : > { %v3376_v13 = vadd.f32 %v3375_v18, %v3374_v23  ;;  %v3423_v29 = vrot.slane %v3422_v30, 4 }
 0x278   : > { %v3377_v43 = vrot.slane %v3376_v13, 2  ;;  %v3424_v60 = vadd.f32 %v3423_v29, %v3422_v30 }
 0x27a   : > { %v3378_v38 = vadd.f32 %v3377_v43, %v3376_v13  ;;  %v3425_v56 = vrot.slane %v3424_v60, 2 }
 0x27c   : > { %v3379_v16 = vrot.slane %v3378_v38, 1  ;;  %v3426_v40 = vadd.f32 %v3425_v56, %v3424_v60 }
 0x27e   : > { %v3380_v10 = vadd.f32 %v3379_v16, %v3378_v38  ;;  %v3427_v55 = vrot.slane %v3426_v40, 1 }
 0x280   : > { %3381 = vst [vmem:[%s313_s14] sm:$0x1] %v3380_v10  ;;  %v3428_v1 = vadd.f32 %v3427_v55, %v3426_v40 }
 0x282   : > { %3429 = vst [vmem:[%s320_s16] sm:$0x1] %v3428_v1 }
 0x283 PF: > { %s15_s19 = sadd.s32 1, %s5022_s19   ;;  %s7052_s15 = smov %s5014_s17 }
 0x284   : > { %p12_p9 = scmp.ge.s32.totalorder %s15_s19, 8   ;;  %s7053_s16 = smov %s5018_s18 }
 0x285   : > { %s7054_s17 = smov %s7057_s20  ;;  %s7055_s18 = smov %s7061_s21 }
 0x286   :  { %14 = sbr.rel (!%p12_p9) target bundleno = 3 (0x3), region = 77 }

// kernel: cbr2d.3
= control target key start
LH: loop header
LB: loop body
LE: loop exit
PB: predicated region body
PF: predicated region fallthrough
CT: control target
= control target key end

     0   :  { %s4120_s15 = smov 0   ;;  %s4122_s16 = smov 0   ;;  %s5433_s0 = inlined_call_operand.vmem [shape: f32[2,560,4], index: 0, kind: input, shape index: {}, may-alias: {0,1}]   ;;  %s5434_s1 = inlined_call_operand.vmem [shape: f32[2,560,4], index: 1, kind: input, shape index: {}, may-alias: {0,1}]   ;;  %s5435_s2 = inlined_call_operand.vmem [shape: f32[36,128], index: 2, kind: input, shape index: {}]   ;;  %s5436_s3 = inlined_call_operand.vmem [shape: f32[1,128], index: 3, kind: input, shape index: {}]   ;;  %s5437_s4 = inlined_call_operand.vmem [shape: f32[2,3,168,128], index: 4, kind: output, shape index: {}]  }
   0x1   :  { %s4124_s17 = smov 0   ;;  %s4126_s18 = smov 0  }
   0x2   :  { %s4128_s19 = smov 0  }
   0x3 LB: > { %s23_s20 = sadd.s32 1, %s4083_s17  ;;  %s26_s21 = sadd.s32 1, %s4087_s18  ;;  %s4091_s19 = sphi %s4128_s19, %s14_s19   ;;  %s4087_s18 = sphi %s4126_s18, %s5441_s18   ;;  %s4083_s17 = sphi %s4124_s17, %s5440_s17   ;;  %s4079_s16 = sphi %s4122_s16, %s5439_s16   ;;  %s4075_s15 = sphi %s4120_s15, %s5438_s15  }
   0x4   : > { %p24_p0 = scmp.ge.s32.totalorder %s23_s20, 3  ;;  %p3017_p1 = scmp.ge.s32.totalorder %s4091_s19, 1 }
   0x5   : > { %p216_p2 = scmp.lt.s32.totalorder %s4091_s19, 7 }
   0x6   : > { %s5443_s20 = smov (%p24_p0, %s23_s20), 0  ;;  %s5445_s21 = smov (!%p24_p0, %s26_s21), %s4087_s18 }
   0x7   : > { %p217_p3 = pnand %p3017_p1, %p216_p2  ;;  %p28_p4 = scmp.ge.s32.totalorder %s5445_s21, 2 }
   0x8   : > { %v406_v0 = vld [vmem:[%s5435_s2 + $0x4] sm:$0xf] (!%p217_p3)  ;;  %vm470_vm0 = vcmask (!%p217_p3), 1043456   ;;  %s265_s24 = smul.u32 (!%p217_p3), 21, %s4075_s15  ;;  %v4093_v1 = vmov (!%p217_p3), 0.0   ;;  %p270_p5 = scmp.lt.s32.totalorder (!%p217_p3), %s4079_s16, 1 }
   0x9   : > { %s5447_s21 = smov (%p28_p4, %s5445_s21), 0  ;;  %220 = sbr.rel (%p217_p3) target bundleno = 629 (0x275), region = 36 }
   0xa   : > { %3421 = vmatprep.subr.mxu0 (!%p217_p3), %v4093_v1  ;;  %4006 = vmatprep.subr.mxu1 (!%p217_p3), %v4093_v1  ;;  %p272_p6 = scmp.lt.s32.totalorder (!%p217_p3), %s265_s24, 69  ;;  %s283_s25 = sadd.s32 (!%p217_p3), 1, %s4075_s15  ;;  %vm4094_vm1 = vmmov (!%p217_p3), 0   ;;  %vm327_vm2 = vcmask (!%p217_p3), 31744   ;;  %v901_v23 = vld [vmem:[%s5435_s2 + $0x8] sm:$0xf] (!%p217_p3) }
   0xb   : > { %3422 = vmatpush3.msk.msra.mxu0 (!%p217_p3), %vm470_vm0, %v406_v0  ;;  %4007 = vmatpush3.msk.msra.mxu1 (!%p217_p3), %vm470_vm0, %v406_v0  ;;  %s3019_s27 = smul.u32 (!%p217_p3), 21, %s283_s25  ;;  %v384_v26 = vld [vmem:[%s5435_s2] sm:$0xf] (!%p217_p3)  ;;  %v1180_v48 = vld [vmem:[%s5435_s2 + $0xc] sm:$0xf] (!%p217_p3)  ;;  %p299_p8 = scmp.lt.s32.totalorder (!%p217_p3), %s4075_s15, 2 }
   0xc   : > { %3423 = vmatprep.mubr.msk.f32.mxu0 (!%p217_p3), %vm4094_vm1, %v4093_v1  ;;  %3456 = vmatprep.mubr.msk.f32.mxu1 (!%p217_p3), %vm4094_vm1, %v4093_v1  ;;  %v1459_v51 = vld [vmem:[%s5435_s2 + $0x10] sm:$0xf] (!%p217_p3) }
   0xd   : > { %3551 = vmatprep.subr.mxu0 (!%p217_p3), %v4093_v1  ;;  %3486 = vmatprep.subr.mxu1 (!%p217_p3), %v4093_v1  ;;  %p288_p7 = scmp.lt.s32.totalorder (!%p217_p3), %s3019_s27, 69 }
  0x10   : > { %s5449_s16 = smov (!%p270_p5, %s4079_s16), 1  ;;  %s5451_s24 = smov (!%p272_p6, %s265_s24), 69 }
  0x11   : > { %s4008_s26 = smul.u32 70, %s5449_s16  ;;  %s5453_s27 = smov (!%p288_p7, %s3019_s27), 69 }
  0x12   : > { %s5455_s15 = smov (!%p299_p8, %s4075_s15), 2  ;;  %s4010_s9 = smul.u32 63, %s5449_s16 }
  0x13   : > { %s275_s28 = sadd.s32 %s4008_s26, %s5451_s24  ;;  %s291_s7 = sadd.s32 %s4008_s26, %s5453_s27 }
  0x14   : > { %s3018_s29 = sshll.u32 %s275_s28, 3  ;;  %s3020_s8 = sshll.u32 %s291_s7, 3 }
  0x15   : > { %s4173_s6 = scalar_lea.vmem %s5433_s0, %s3018_s29  ;;  %s4205_s11 = scalar_lea.vmem %s5434_s1, %s3020_s8 }
  0x16   : > { %v306_v2 = vld [vmem:[%s4173_s6] sm:$0xff]  ;;  %v307_v3 = vld [vmem:[%s4173_s6 + $0x8] sm:$0xff]  ;;  %v317_v4 = vld [vmem:[%s4173_s6 + $0x58] sm:$0xff]  ;;  %s4009_s10 = smul.u32 21, %s5455_s15 }
  0x17   : > { %328 = vst.msk [vmem:[#allocation2] sm:$0xff] %vm327_vm2, %v306_v2  ;;  %329 = vst.msk [vmem:[#allocation2 + $0x8] sm:$0xff] %vm327_vm2, %v307_v3  ;;  %v318_v5 = vld [vmem:[%s4173_s6 + $0x60] sm:$0xff]  ;;  %v308_v6 = vld [vmem:[%s4173_s6 + $0x10] sm:$0xff] }
  0x18   : > { %339 = vst.msk [vmem:[#allocation2 + $0x58] sm:$0xff] %vm327_vm2, %v317_v4  ;;  %v319_v7 = vld [vmem:[%s4173_s6 + $0x68] sm:$0xff]  ;;  %340 = vst.msk [vmem:[#allocation2 + $0x60] sm:$0xff] %vm327_vm2, %v318_v5  ;;  %v309_v8 = vld [vmem:[%s4173_s6 + $0x18] sm:$0xff] }
  0x19   : > { %330 = vst.msk [vmem:[#allocation2 + $0x10] sm:$0xff] %vm327_vm2, %v308_v6  ;;  %341 = vst.msk [vmem:[#allocation2 + $0x68] sm:$0xff] %vm327_vm2, %v319_v7  ;;  %v320_v9 = vld [vmem:[%s4173_s6 + $0x70] sm:$0xff]  ;;  %v310_v10 = vld [vmem:[%s4173_s6 + $0x20] sm:$0xff] }
  0x1a   : > { %331 = vst.msk [vmem:[#allocation2 + $0x18] sm:$0xff] %vm327_vm2, %v309_v8  ;;  %342 = vst.msk [vmem:[#allocation2 + $0x70] sm:$0xff] %vm327_vm2, %v320_v9  ;;  %v321_v11 = vld [vmem:[%s4173_s6 + $0x78] sm:$0xff]  ;;  %v311_v12 = vld [vmem:[%s4173_s6 + $0x28] sm:$0xff] }
  0x1b   : > { %332 = vst.msk [vmem:[#allocation2 + $0x20] sm:$0xff] %vm327_vm2, %v310_v10  ;;  %v322_v13 = vld [vmem:[%s4173_s6 + $0x80] sm:$0xff]  ;;  %343 = vst.msk [vmem:[#allocation2 + $0x78] sm:$0xff] %vm327_vm2, %v321_v11  ;;  %v312_v14 = vld [vmem:[%s4173_s6 + $0x30] sm:$0xff] }
  0x1c   : > { %333 = vst.msk [vmem:[#allocation2 + $0x28] sm:$0xff] %vm327_vm2, %v311_v12  ;;  %344 = vst.msk [vmem:[#allocation2 + $0x80] sm:$0xff] %vm327_vm2, %v322_v13  ;;  %v323_v15 = vld [vmem:[%s4173_s6 + $0x88] sm:$0xff]  ;;  %v313_v16 = vld [vmem:[%s4173_s6 + $0x38] sm:$0xff] }
  0x1d   : > { %334 = vst.msk [vmem:[#allocation2 + $0x30] sm:$0xff] %vm327_vm2, %v312_v14  ;;  %345 = vst.msk [vmem:[#allocation2 + $0x88] sm:$0xff] %vm327_vm2, %v323_v15  ;;  %v324_v17 = vld [vmem:[%s4173_s6 + $0x90] sm:$0xff]  ;;  %v314_v18 = vld [vmem:[%s4173_s6 + $0x40] sm:$0xff] }
  0x1e   : > { %335 = vst.msk [vmem:[#allocation2 + $0x38] sm:$0xff] %vm327_vm2, %v313_v16  ;;  %v325_v19 = vld [vmem:[%s4173_s6 + $0x98] sm:$0xff]  ;;  %346 = vst.msk [vmem:[#allocation2 + $0x90] sm:$0xff] %vm327_vm2, %v324_v17  ;;  %v315_v20 = vld [vmem:[%s4173_s6 + $0x48] sm:$0xff] }
  0x1f   : > { %336 = vst.msk [vmem:[#allocation2 + $0x40] sm:$0xff] %vm327_vm2, %v314_v18  ;;  %347 = vst.msk [vmem:[#allocation2 + $0x98] sm:$0xff] %vm327_vm2, %v325_v19  ;;  %v326_v21 = vld [vmem:[%s4173_s6 + $0xa0] sm:$0xff]  ;;  %v316_v22 = vld [vmem:[%s4173_s6 + $0x50] sm:$0xff] }
  0x20   : > { %337 = vst.msk [vmem:[#allocation2 + $0x48] sm:$0xff] %vm327_vm2, %v315_v20  ;;  %348 = vst.msk [vmem:[#allocation2 + $0xa0] sm:$0xff] %vm327_vm2, %v326_v21  ;;  %v349_v24 = vld [vmem:[%s4205_s11] sm:$0xff]  ;;  %v386_v28 = vld [vmem:[#allocation2 + $0x9] sm:$0xff] }
  0x21   : > { %338 = vst.msk [vmem:[#allocation2 + $0x50] sm:$0xff] %vm327_vm2, %v316_v22  ;;  %v385_v25 = vld [vmem:[#allocation2 + $0x1] sm:$0xff]  ;;  %356 = vst.msk [vmem:[#allocation2 + $0xa8] sm:$0xff] %vm327_vm2, %v349_v24  ;;  %v4231_v27 = vld [vmem:[#allocation2 + $0x59] sm:$0xff] }
  0x22   : > { %3424 = vmatmul.mubr.msk.f32.vlgmr.msra.gmra.mrb[0].mxu0 %vm327_vm2, %v385_v25  ;;  %3457 = vmatmul.mubr.msk.f32.vlgmr.msra.gmra.mrb[0].mxu1 %vm327_vm2, %v4231_v27  ;;  %v4239_v29 = vld [vmem:[#allocation2 + $0x61] sm:$0xff]  ;;  %v387_v30 = vld [vmem:[#allocation2 + $0x11] sm:$0xff]  ;;  %v4252_v31 = vld [vmem:[#allocation2 + $0x69] sm:$0xff] }
  0x23   : > { %3552 = vmatpush3.msk.msra.mxu0 %vm470_vm0, %v901_v23  ;;  %3487 = vmatpush3.msk.msra.mxu1 %vm470_vm0, %v384_v26  ;;  %v4259_v32 = vld [vmem:[#allocation2 + $0x19] sm:$0xff]  ;;  %v4263_v33 = vld [vmem:[#allocation2 + $0x71] sm:$0xff]  ;;  %v4271_v34 = vld [vmem:[#allocation2 + $0x21] sm:$0xff] }
  0x24   : > { %3426 = vmatprep.mubr.msk.f32.mxu0 %vm4094_vm1, %v4093_v1  ;;  %3459 = vmatprep.mubr.msk.f32.mxu1 %vm4094_vm1, %v4093_v1  ;;  %v4275_v35 = vld [vmem:[#allocation2 + $0x79] sm:$0xff]  ;;  %v4283_v36 = vld [vmem:[#allocation2 + $0x29] sm:$0xff]  ;;  %v4287_v37 = vld [vmem:[#allocation2 + $0x81] sm:$0xff] }
  0x25   : > { %3616 = vmatprep.subr.mxu1 %v4093_v1  ;;  %3681 = vmatprep.subr.mxu0 %v4093_v1  ;;  %v4295_v38 = vld [vmem:[#allocation2 + $0x31] sm:$0xff]  ;;  %v4299_v39 = vld [vmem:[#allocation2 + $0x89] sm:$0xff]  ;;  %v363_v47 = vld [vmem:[#allocation2] sm:$0xff] }
  0x26   : > { %3427 = vmatmul.mubr.msk.f32.gmra.mrb[2].mxu0 %vm327_vm2, %v386_v28  ;;  %3460 = vmatmul.mubr.msk.f32.gmra.mrb[2].mxu1 %vm327_vm2, %v4239_v29  ;;  %v4307_v40 = vld [vmem:[#allocation2 + $0x39] sm:$0xff]  ;;  %v4311_v41 = vld [vmem:[#allocation2 + $0x91] sm:$0xff]  ;;  %v880_v49 = vld [vmem:[#allocation2 + $0x2] sm:$0xff] }
  0x27   : > { %3429 = vmatprep.mubr.msk.f32.mxu0 %vm4094_vm1, %v4093_v1  ;;  %3462 = vmatprep.mubr.msk.f32.mxu1 %vm4094_vm1, %v4093_v1  ;;  %v4319_v42 = vld [vmem:[#allocation2 + $0x41] sm:$0xff]  ;;  %v4323_v43 = vld [vmem:[#allocation2 + $0x99] sm:$0xff]  ;;  %v881_v52 = vld [vmem:[#allocation2 + $0xa] sm:$0xff] }
  0x28   : > { %v4331_v44 = vld [vmem:[#allocation2 + $0x49] sm:$0xff]  ;;  %v4335_v45 = vld [vmem:[#allocation2 + $0xa1] sm:$0xff]  ;;  %v4343_v46 = vld [vmem:[#allocation2 + $0x51] sm:$0xff] }
  0x29   : > { %v364_v50 = vld [vmem:[#allocation2 + $0x8] sm:$0xff]  ;;  %v365_v53 = vld [vmem:[#allocation2 + $0x10] sm:$0xff]  ;;  %v4376_v55 = vld [vmem:[#allocation2 + $0x18] sm:$0xff] }
  0x2a   : > { %3430 = vmatmul.mubr.msk.f32.gmra.mrb[4].mxu0 %vm327_vm2, %v387_v30  ;;  %3463 = vmatmul.mubr.msk.f32.gmra.mrb[4].mxu1 %vm327_vm2, %v4252_v31  ;;  %v882_v54 = vld [vmem:[#allocation2 + $0x12] sm:$0xff]  ;;  %v4383_v56 = vld [vmem:[#allocation2 + $0x1a] sm:$0xff]  ;;  %v4395_v58 = vld [vmem:[#allocation2 + $0x22] sm:$0xff] }
  0x2b   : > { %3432 = vmatprep.mubr.msk.f32.mxu0 %vm4094_vm1, %v4093_v1  ;;  %3465 = vmatprep.mubr.msk.f32.mxu1 %vm4094_vm1, %v4093_v1  ;;  %v4387_v57 = vld [vmem:[#allocation2 + $0x20] sm:$0xff]  ;;  %v4399_v59 = vld [vmem:[#allocation2 + $0x28] sm:$0xff]  ;;  %v4411_v61 = vld [vmem:[#allocation2 + $0x30] sm:$0xff] }
  0x2c   : > { %v4407_v60 = vld [vmem:[#allocation2 + $0x2a] sm:$0xff]  ;;  %v4420_v63 = vld [vmem:[#allocation2 + $0x32] sm:$0xff]  ;;  %v4434_v3 = vld [vmem:[#allocation2 + $0x3a] sm:$0xff] }
  0x2d   : > { %v350_v62 = vld [vmem:[%s4205_s11 + $0x8] sm:$0xff]  ;;  %v4425_v0 = vld [vmem:[#allocation2 + $0x38] sm:$0xff]  ;;  %v351_v2 = vld [vmem:[%s4205_s11 + $0x10] sm:$0xff] }
  0x2e   : > { %3433 = vmatmul.mubr.msk.f32.gmra.mrb[6].mxu0 %vm327_vm2, %v4259_v32  ;;  %3466 = vmatmul.mubr.msk.f32.gmra.mrb[6].mxu1 %vm327_vm2, %v4263_v33  ;;  %357 = vst.msk [vmem:[#allocation2 + $0xb0] sm:$0xff] %vm327_vm2, %v350_v62  ;;  %358 = vst.msk [vmem:[#allocation2 + $0xb8] sm:$0xff] %vm327_vm2, %v351_v2  ;;  %v4439_v4 = vld [vmem:[#allocation2 + $0x40] sm:$0xff]  ;;  %v352_v5 = vld [vmem:[%s4205_s11 + $0x18] sm:$0xff] }
  0x2f   : > { %3435 = vmatprep.mubr.msk.f32.mxu0 %vm4094_vm1, %v4093_v1  ;;  %3468 = vmatprep.mubr.msk.f32.mxu1 %vm4094_vm1, %v4093_v1  ;;  %v4448_v6 = vld [vmem:[#allocation2 + $0x42] sm:$0xff]  ;;  %359 = vst.msk [vmem:[#allocation2 + $0xc0] sm:$0xff] %vm327_vm2, %v352_v5  ;;  %v4461_v8 = vld [vmem:[#allocation2 + $0x4a] sm:$0xff]  ;;  %v4473_v10 = vld [vmem:[#allocation2 + $0x52] sm:$0xff] }
  0x30   : > { %v4453_v7 = vld [vmem:[#allocation2 + $0x48] sm:$0xff]  ;;  %v4465_v9 = vld [vmem:[#allocation2 + $0x50] sm:$0xff]  ;;  %v4477_v11 = vld [vmem:[#allocation2 + $0x58] sm:$0xff] }
  0x31   : > { %v4485_v12 = vld [vmem:[#allocation2 + $0x5a] sm:$0xff]  ;;  %v4497_v14 = vld [vmem:[#allocation2 + $0x62] sm:$0xff]  ;;  %v4509_v16 = vld [vmem:[#allocation2 + $0x6a] sm:$0xff] }
  0x32   : > { %3436 = vmatmul.mubr.msk.f32.gmra.mrb[8].mxu0 %vm327_vm2, %v4271_v34  ;;  %3469 = vmatmul.mubr.msk.f32.gmra.mrb[8].mxu1 %vm327_vm2, %v4275_v35  ;;  %v4489_v13 = vld [vmem:[#allocation2 + $0x60] sm:$0xff]  ;;  %v4501_v15 = vld [vmem:[#allocation2 + $0x68] sm:$0xff]  ;;  %v4513_v17 = vld [vmem:[#allocation2 + $0x70] sm:$0xff] }
  0x33   : > { %3438 = vmatprep.mubr.msk.f32.mxu0 %vm4094_vm1, %v4093_v1  ;;  %3471 = vmatprep.mubr.msk.f32.mxu1 %vm4094_vm1, %v4093_v1  ;;  %v4521_v18 = vld [vmem:[#allocation2 + $0x72] sm:$0xff]  ;;  %v4533_v20 = vld [vmem:[#allocation2 + $0x7a] sm:$0xff]  ;;  %v4545_v22 = vld [vmem:[#allocation2 + $0x82] sm:$0xff] }
  0x34   : > { %v4525_v19 = vld [vmem:[#allocation2 + $0x78] sm:$0xff]  ;;  %v4537_v21 = vld [vmem:[#allocation2 + $0x80] sm:$0xff]  ;;  %v4549_v23 = vld [vmem:[#allocation2 + $0x88] sm:$0xff] }
  0x35   : > { %v4557_v24 = vld [vmem:[#allocation2 + $0x8a] sm:$0xff]  ;;  %v4569_v26 = vld [vmem:[#allocation2 + $0x92] sm:$0xff]  ;;  %v4581_v30 = vld [vmem:[#allocation2 + $0x9a] sm:$0xff] }
  0x36   : > { %3439 = vmatmul.mubr.msk.f32.gmra.mrb[10].mxu0 %vm327_vm2, %v4283_v36  ;;  %3472 = vmatmul.mubr.msk.f32.gmra.mrb[10].mxu1 %vm327_vm2, %v4287_v37  ;;  %v4561_v25 = vld [vmem:[#allocation2 + $0x90] sm:$0xff]  ;;  %v4573_v28 = vld [vmem:[#allocation2 + $0x98] sm:$0xff] }
  0x37   : > { %3441 = vmatprep.mubr.msk.f32.mxu0 %vm4094_vm1, %v4093_v1  ;;  %3474 = vmatprep.mubr.msk.f32.mxu1 %vm4094_vm1, %v4093_v1 }
  0x3a   : > { %3442 = vmatmul.mubr.msk.f32.gmra.mrb[12].mxu0 %vm327_vm2, %v4295_v38  ;;  %3475 = vmatmul.mubr.msk.f32.gmra.mrb[12].mxu1 %vm327_vm2, %v4299_v39 }
  0x3b   : > { %3444 = vmatprep.mubr.msk.f32.mxu0 %vm4094_vm1, %v4093_v1  ;;  %3477 = vmatprep.mubr.msk.f32.mxu1 %vm4094_vm1, %v4093_v1 }
  0x3e   : > { %3445 = vmatmul.mubr.msk.f32.gmra.mrb[14].mxu0 %vm327_vm2, %v4307_v40  ;;  %3478 = vmatmul.mubr.msk.f32.gmra.mrb[14].mxu1 %vm327_vm2, %v4311_v41 }
  0x3f   : > { %3447 = vmatprep.mubr.msk.f32.mxu0 %vm4094_vm1, %v4093_v1  ;;  %3480 = vmatprep.mubr.msk.f32.mxu1 %vm4094_vm1, %v4093_v1 }
  0x42   : > { %3448 = vmatmul.mubr.msk.f32.gmra.mrb[16].mxu0 %vm327_vm2, %v4319_v42  ;;  %3481 = vmatmul.mubr.msk.f32.gmra.mrb[16].mxu1 %vm327_vm2, %v4323_v43 }
  0x43   : > { %3450 = vmatprep.mubr.msk.f32.mxu0 %vm4094_vm1, %v4093_v1  ;;  %3483 = vmatprep.mubr.msk.f32.mxu1 %vm4094_vm1, %v4093_v1 }
  0x46   : > { %3451 = vmatmul.mubr.msk.f32.gmra.mrb[18].mxu0 %vm327_vm2, %v4331_v44  ;;  %3484 = vmatmul.mubr.msk.f32.gmra.mrb[18].mxu1 %vm327_vm2, %v4335_v45 }
  0x47   : > { %3453 = vmatprep.mubr.msk.f32.mxu0 %vm4094_vm1, %v4093_v1  ;;  %3488 = vmatprep.mubr.msk.f32.mxu1 %vm4094_vm1, %v4093_v1 }
  0x4a   : > { %3454 = vmatmul.mubr.msk.f32.gmra.mrb[20].mxu0 %vm327_vm2, %v4343_v46  ;;  %3489 = vmatmul.mubr.msk.f32.vlgmr.msra.gmra.mrb[20].mxu1 %vm327_vm2, %v363_v47  ;;  %v4585_v47 = vld [vmem:[#allocation2 + $0xa0] sm:$0xff] }
  0x4b   : > { %3553 = vmatprep.mubr.msk.f32.mxu0 %vm4094_vm1, %v4093_v1  ;;  %3617 = vmatpush3.msk.msra.mxu1 %vm470_vm0, %v1180_v48  ;;  %v4593_v48 = vld [vmem:[#allocation2 + $0xa2] sm:$0xff] }
  0x4c   : > { %3491 = vmatprep.mubr.msk.f32.mxu1 %vm4094_vm1, %v4093_v1  ;;  %3746 = vmatprep.subr.mxu1 %v4093_v1 }
  0x4e   : > { %3554 = vmatmul.mubr.msk.f32.vlgmr.msra.gmra.mrb[22].mxu0 %vm327_vm2, %v880_v49  ;;  %3492 = vmatmul.mubr.msk.f32.gmra.mrb[22].mxu1 %vm327_vm2, %v364_v50  ;;  %v1738_v49 = vld [vmem:[%s5435_s2 + $0x14] sm:$0xf]  ;;  %v2017_v50 = vld [vmem:[%s5435_s2 + $0x18] sm:$0xf] }
  0x4f   : > { %3682 = vmatpush3.msk.msra.mxu0 %vm470_vm0, %v1459_v51  ;;  %3494 = vmatprep.mubr.msk.f32.mxu1 %vm4094_vm1, %v4093_v1 }
  0x50   : > { %3556 = vmatprep.mubr.msk.f32.mxu0 %vm4094_vm1, %v4093_v1  ;;  %3811 = vmatprep.subr.mxu0 %v4093_v1 }
  0x52   : > { %3557 = vmatmul.mubr.msk.f32.gmra.mrb[24].mxu0 %vm327_vm2, %v881_v52  ;;  %3495 = vmatmul.mubr.msk.f32.gmra.mrb[24].mxu1 %vm327_vm2, %v365_v53 }
  0x53   : > { %3559 = vmatprep.mubr.msk.f32.mxu0 %vm4094_vm1, %v4093_v1  ;;  %3497 = vmatprep.mubr.msk.f32.mxu1 %vm4094_vm1, %v4093_v1 }
  0x56   : > { %3560 = vmatmul.mubr.msk.f32.gmra.mrb[26].mxu0 %vm327_vm2, %v882_v54  ;;  %3498 = vmatmul.mubr.msk.f32.gmra.mrb[26].mxu1 %vm327_vm2, %v4376_v55 }
  0x57   : > { %3562 = vmatprep.mubr.msk.f32.mxu0 %vm4094_vm1, %v4093_v1  ;;  %3500 = vmatprep.mubr.msk.f32.mxu1 %vm4094_vm1, %v4093_v1 }
  0x5a   : > { %3563 = vmatmul.mubr.msk.f32.gmra.mrb[28].mxu0 %vm327_vm2, %v4383_v56  ;;  %3501 = vmatmul.mubr.msk.f32.gmra.mrb[28].mxu1 %vm327_vm2, %v4387_v57 }
  0x5b   : > { %3565 = vmatprep.mubr.msk.f32.mxu0 %vm4094_vm1, %v4093_v1  ;;  %3503 = vmatprep.mubr.msk.f32.mxu1 %vm4094_vm1, %v4093_v1 }
  0x5e   : > { %3566 = vmatmul.mubr.msk.f32.gmra.mrb[30].mxu0 %vm327_vm2, %v4395_v58  ;;  %3504 = vmatmul.mubr.msk.f32.gmra.mrb[30].mxu1 %vm327_vm2, %v4399_v59 }
  0x5f   : > { %3568 = vmatprep.mubr.msk.f32.mxu0 %vm4094_vm1, %v4093_v1  ;;  %3506 = vmatprep.mubr.msk.f32.mxu1 %vm4094_vm1, %v4093_v1 }
  0x62   : > { %3569 = vmatmul.mubr.msk.f32.gmra.mrb[32].mxu0 %vm327_vm2, %v4407_v60  ;;  %3507 = vmatmul.mubr.msk.f32.gmra.mrb[32].mxu1 %vm327_vm2, %v4411_v61 }
  0x63   : > { %3571 = vmatprep.mubr.msk.f32.mxu0 %vm4094_vm1, %v4093_v1  ;;  %3509 = vmatprep.mubr.msk.f32.mxu1 %vm4094_vm1, %v4093_v1 }
  0x66   : > { %3572 = vmatmul.mubr.msk.f32.gmra.mrb[34].mxu0 %vm327_vm2, %v4420_v63  ;;  %3510 = vmatmul.mubr.msk.f32.gmra.mrb[34].mxu1 %vm327_vm2, %v4425_v0 }
  0x67   : > { %3574 = vmatprep.mubr.msk.f32.mxu0 %vm4094_vm1, %v4093_v1  ;;  %3512 = vmatprep.mubr.msk.f32.mxu1 %vm4094_vm1, %v4093_v1 }
  0x6a   : > { %3575 = vmatmul.mubr.msk.f32.gmra.mrb[36].mxu0 %vm327_vm2, %v4434_v3  ;;  %3513 = vmatmul.mubr.msk.f32.gmra.mrb[36].mxu1 %vm327_vm2, %v4439_v4 }
  0x6b   : > { %3577 = vmatprep.mubr.msk.f32.mxu0 %vm4094_vm1, %v4093_v1  ;;  %3515 = vmatprep.mubr.msk.f32.mxu1 %vm4094_vm1, %v4093_v1 }
  0x6e   : > { %3578 = vmatmul.mubr.msk.f32.gmra.mrb[38].mxu0 %vm327_vm2, %v4448_v6  ;;  %3516 = vmatmul.mubr.msk.f32.gmra.mrb[38].mxu1 %vm327_vm2, %v4453_v7 }
  0x6f   : > { %3580 = vmatprep.mubr.msk.f32.mxu0 %vm4094_vm1, %v4093_v1  ;;  %3518 = vmatprep.mubr.msk.f32.mxu1 %vm4094_vm1, %v4093_v1 }
  0x72   : > { %3581 = vmatmul.mubr.msk.f32.gmra.mrb[40].mxu0 %vm327_vm2, %v4461_v8  ;;  %3519 = vmatmul.mubr.msk.f32.gmra.mrb[40].mxu1 %vm327_vm2, %v4465_v9 }
  0x73   : > { %3583 = vmatprep.mubr.msk.f32.mxu0 %vm4094_vm1, %v4093_v1  ;;  %3521 = vmatprep.mubr.msk.f32.mxu1 %vm4094_vm1, %v4093_v1 }
  0x76   : > { %3584 = vmatmul.mubr.msk.f32.gmra.mrb[42].mxu0 %vm327_vm2, %v4473_v10  ;;  %3522 = vmatmul.mubr.msk.f32.gmra.mrb[42].mxu1 %vm327_vm2, %v4477_v11 }
  0x77   : > { %3586 = vmatprep.mubr.msk.f32.mxu0 %vm4094_vm1, %v4093_v1  ;;  %3524 = vmatprep.mubr.msk.f32.mxu1 %vm4094_vm1, %v4093_v1 }
  0x7a   : > { %3587 = vmatmul.mubr.msk.f32.gmra.mrb[44].mxu0 %vm327_vm2, %v4485_v12  ;;  %3525 = vmatmul.mubr.msk.f32.gmra.mrb[44].mxu1 %vm327_vm2, %v4489_v13 }
  0x7b   : > { %3589 = vmatprep.mubr.msk.f32.mxu0 %vm4094_vm1, %v4093_v1  ;;  %3527 = vmatprep.mubr.msk.f32.mxu1 %vm4094_vm1, %v4093_v1 }
  0x7e   : > { %3590 = vmatmul.mubr.msk.f32.gmra.mrb[46].mxu0 %vm327_vm2, %v4497_v14  ;;  %3528 = vmatmul.mubr.msk.f32.gmra.mrb[46].mxu1 %vm327_vm2, %v4501_v15 }
  0x7f   : > { %3592 = vmatprep.mubr.msk.f32.mxu0 %vm4094_vm1, %v4093_v1  ;;  %3530 = vmatprep.mubr.msk.f32.mxu1 %vm4094_vm1, %v4093_v1 }
  0x82   : > { %3593 = vmatmul.mubr.msk.f32.gmra.mrb[48].mxu0 %vm327_vm2, %v4509_v16  ;;  %3531 = vmatmul.mubr.msk.f32.gmra.mrb[48].mxu1 %vm327_vm2, %v4513_v17 }
  0x83   : > { %3595 = vmatprep.mubr.msk.f32.mxu0 %vm4094_vm1, %v4093_v1  ;;  %3533 = vmatprep.mubr.msk.f32.mxu1 %vm4094_vm1, %v4093_v1 }
  0x86   : > { %3596 = vmatmul.mubr.msk.f32.gmra.mrb[50].mxu0 %vm327_vm2, %v4521_v18  ;;  %3534 = vmatmul.mubr.msk.f32.gmra.mrb[50].mxu1 %vm327_vm2, %v4525_v19 }
  0x87   : > { %3598 = vmatprep.mubr.msk.f32.mxu0 %vm4094_vm1, %v4093_v1  ;;  %3536 = vmatprep.mubr.msk.f32.mxu1 %vm4094_vm1, %v4093_v1 }
  0x8a   : > { %3599 = vmatmul.mubr.msk.f32.gmra.mrb[52].mxu0 %vm327_vm2, %v4533_v20  ;;  %3537 = vmatmul.mubr.msk.f32.gmra.mrb[52].mxu1 %vm327_vm2, %v4537_v21 }
  0x8b   : > { %3601 = vmatprep.mubr.msk.f32.mxu0 %vm4094_vm1, %v4093_v1  ;;  %3539 = vmatprep.mubr.msk.f32.mxu1 %vm4094_vm1, %v4093_v1 }
  0x8e   : > { %3602 = vmatmul.mubr.msk.f32.gmra.mrb[54].mxu0 %vm327_vm2, %v4545_v22  ;;  %3540 = vmatmul.mubr.msk.f32.gmra.mrb[54].mxu1 %vm327_vm2, %v4549_v23 }
  0x8f   : > { %3604 = vmatprep.mubr.msk.f32.mxu0 %vm4094_vm1, %v4093_v1  ;;  %3542 = vmatprep.mubr.msk.f32.mxu1 %vm4094_vm1, %v4093_v1 }
  0x92   : > { %3605 = vmatmul.mubr.msk.f32.gmra.mrb[56].mxu0 %vm327_vm2, %v4557_v24  ;;  %3543 = vmatmul.mubr.msk.f32.gmra.mrb[56].mxu1 %vm327_vm2, %v4561_v25 }
  0x93   : > { %3607 = vmatprep.mubr.msk.f32.mxu0 %vm4094_vm1, %v4093_v1  ;;  %3545 = vmatprep.mubr.msk.f32.mxu1 %vm4094_vm1, %v4093_v1 }
  0x96   : > { %3608 = vmatmul.mubr.msk.f32.gmra.mrb[58].mxu0 %vm327_vm2, %v4569_v26  ;;  %3546 = vmatmul.mubr.msk.f32.gmra.mrb[58].mxu1 %vm327_vm2, %v4573_v28 }
  0x97   : > { %3610 = vmatprep.mubr.msk.f32.mxu0 %vm4094_vm1, %v4093_v1  ;;  %3548 = vmatprep.mubr.msk.f32.mxu1 %vm4094_vm1, %v4093_v1 }
  0x9a   : > { %3611 = vmatmul.mubr.msk.f32.gmra.mrb[60].mxu0 %vm327_vm2, %v4581_v30  ;;  %3549 = vmatmul.mubr.msk.f32.gmra.mrb[60].mxu1 %vm327_vm2, %v4585_v47 }
  0x9b   : > { %3613 = vmatprep.mubr.msk.f32.mxu0 %vm4094_vm1, %v4093_v1  ;;  %3618 = vmatprep.mubr.msk.f32.mxu1 %vm4094_vm1, %v4093_v1 }
  0x9e   : > { %3614 = vmatmul.mubr.msk.f32.gmra.mrb[62].mxu0 %vm327_vm2, %v4593_v48  ;;  %3619 = vmatmul.mubr.msk.f32.vlgmr.msra.gmra.mrb[62].mxu1 %vm327_vm2, %v4376_v55 }
  0x9f   : > { %3683 = vmatprep.mubr.msk.f32.mxu0 %vm4094_vm1, %v4093_v1  ;;  %3747 = vmatpush3.msk.msra.mxu1 %vm470_vm0, %v1738_v49 }
  0xa0   : > { %3621 = vmatprep.mubr.msk.f32.mxu1 %vm4094_vm1, %v4093_v1  ;;  %3876 = vmatprep.subr.mxu1 %v4093_v1 }
  0xa2   : > { %3684 = vmatmul.mubr.msk.f32.vlgmr.msra.gmra.mrb[64].mxu0 %vm327_vm2, %v4259_v32  ;;  %3622 = vmatmul.mubr.msk.f32.gmra.mrb[64].mxu1 %vm327_vm2, %v4387_v57  ;;  %v353_v32 = vld [vmem:[%s4205_s11 + $0x20] sm:$0xff] }
  0xa3   : > { %3812 = vmatpush3.msk.msra.mxu0 %vm470_vm0, %v2017_v50  ;;  %3624 = vmatprep.mubr.msk.f32.mxu1 %vm4094_vm1, %v4093_v1  ;;  %360 = vst.msk [vmem:[#allocation2 + $0xc8] sm:$0xff] %vm327_vm2, %v353_v32  ;;  %v355_v50 = vld [vmem:[%s4205_s11 + $0x30] sm:$0xff] }
  0xa4   : > { %3686 = vmatprep.mubr.msk.f32.mxu0 %vm4094_vm1, %v4093_v1  ;;  %3941 = vmatprep.subr.mxu0 %v4093_v1  ;;  %362 = vst.msk [vmem:[#allocation2 + $0xd8] sm:$0xff] %vm327_vm2, %v355_v50 }
  0xa6   : > { %3687 = vmatmul.mubr.msk.f32.gmra.mrb[66].mxu0 %vm327_vm2, %v4271_v34  ;;  %3625 = vmatmul.mubr.msk.f32.gmra.mrb[66].mxu1 %vm327_vm2, %v4399_v59  ;;  %v354_v34 = vld [vmem:[%s4205_s11 + $0x28] sm:$0xff]  ;;  %s303_s11 = sadd.s32 %s4010_s9, %s4009_s10 }
  0xa7   : > { %3689 = vmatprep.mubr.msk.f32.mxu0 %vm4094_vm1, %v4093_v1  ;;  %3627 = vmatprep.mubr.msk.f32.mxu1 %vm4094_vm1, %v4093_v1  ;;  %361 = vst.msk [vmem:[#allocation2 + $0xd0] sm:$0xff] %vm327_vm2, %v354_v34  ;;  %s3021_s16 = sshll.u32 %s303_s11, 3 }
  0xa8   : > { %s5356_s22 = scalar_lea.vmem %s5437_s4, %s3021_s16 }
  0xaa   : > { %3690 = vmatmul.mubr.msk.f32.gmra.mrb[68].mxu0 %vm327_vm2, %v4283_v36  ;;  %3628 = vmatmul.mubr.msk.f32.gmra.mrb[68].mxu1 %vm327_vm2, %v4411_v61  ;;  %v4787_v36 = vld [vmem:[#allocation2 + $0xb9] sm:$0xff] }
  0xab   : > { %3692 = vmatprep.mubr.msk.f32.mxu0 %vm4094_vm1, %v4093_v1  ;;  %3630 = vmatprep.mubr.msk.f32.mxu1 %vm4094_vm1, %v4093_v1 }
  0xae   : > { %3693 = vmatmul.mubr.msk.f32.gmra.mrb[70].mxu0 %vm327_vm2, %v4295_v38  ;;  %3631 = vmatmul.mubr.msk.f32.gmra.mrb[70].mxu1 %vm327_vm2, %v4425_v0  ;;  %v2575_v38 = vld [vmem:[%s5435_s2 + $0x20] sm:$0xf] }
  0xaf   : > { %3695 = vmatprep.mubr.msk.f32.mxu0 %vm4094_vm1, %v4093_v1  ;;  %3633 = vmatprep.mubr.msk.f32.mxu1 %vm4094_vm1, %v4093_v1 }
  0xb2   : > { %3696 = vmatmul.mubr.msk.f32.gmra.mrb[72].mxu0 %vm327_vm2, %v4307_v40  ;;  %3634 = vmatmul.mubr.msk.f32.gmra.mrb[72].mxu1 %vm327_vm2, %v4439_v4 }
  0xb3   : > { %3698 = vmatprep.mubr.msk.f32.mxu0 %vm4094_vm1, %v4093_v1  ;;  %3636 = vmatprep.mubr.msk.f32.mxu1 %vm4094_vm1, %v4093_v1 }
  0xb6   : > { %3699 = vmatmul.mubr.msk.f32.gmra.mrb[74].mxu0 %vm327_vm2, %v4319_v42  ;;  %3637 = vmatmul.mubr.msk.f32.gmra.mrb[74].mxu1 %vm327_vm2, %v4453_v7 }
  0xb7   : > { %3701 = vmatprep.mubr.msk.f32.mxu0 %vm4094_vm1, %v4093_v1  ;;  %3639 = vmatprep.mubr.msk.f32.mxu1 %vm4094_vm1, %v4093_v1 }
  0xba   : > { %3702 = vmatmul.mubr.msk.f32.gmra.mrb[76].mxu0 %vm327_vm2, %v4331_v44  ;;  %3640 = vmatmul.mubr.msk.f32.gmra.mrb[76].mxu1 %vm327_vm2, %v4465_v9 }
  0xbb   : > { %3704 = vmatprep.mubr.msk.f32.mxu0 %vm4094_vm1, %v4093_v1  ;;  %3642 = vmatprep.mubr.msk.f32.mxu1 %vm4094_vm1, %v4093_v1 }
  0xbe   : > { %3705 = vmatmul.mubr.msk.f32.gmra.mrb[78].mxu0 %vm327_vm2, %v4343_v46  ;;  %3643 = vmatmul.mubr.msk.f32.gmra.mrb[78].mxu1 %vm327_vm2, %v4477_v11 }
  0xbf   : > { %3707 = vmatprep.mubr.msk.f32.mxu0 %vm4094_vm1, %v4093_v1  ;;  %3645 = vmatprep.mubr.msk.f32.mxu1 %vm4094_vm1, %v4093_v1 }
  0xc2   : > { %3708 = vmatmul.mubr.msk.f32.gmra.mrb[80].mxu0 %vm327_vm2, %v4231_v27  ;;  %3646 = vmatmul.mubr.msk.f32.gmra.mrb[80].mxu1 %vm327_vm2, %v4489_v13  ;;  %v4755_v27 = vld [vmem:[#allocation2 + $0xa8] sm:$0xff] }
  0xc3   : > { %3710 = vmatprep.mubr.msk.f32.mxu0 %vm4094_vm1, %v4093_v1  ;;  %3648 = vmatprep.mubr.msk.f32.mxu1 %vm4094_vm1, %v4093_v1 }
  0xc6   : > { %3711 = vmatmul.mubr.msk.f32.gmra.mrb[82].mxu0 %vm327_vm2, %v4239_v29  ;;  %3649 = vmatmul.mubr.msk.f32.gmra.mrb[82].mxu1 %vm327_vm2, %v4501_v15  ;;  %v4763_v29 = vld [vmem:[#allocation2 + $0xa9] sm:$0xff] }
  0xc7   : > { %3713 = vmatprep.mubr.msk.f32.mxu0 %vm4094_vm1, %v4093_v1  ;;  %3651 = vmatprep.mubr.msk.f32.mxu1 %vm4094_vm1, %v4093_v1 }
  0xca   : > { %3714 = vmatmul.mubr.msk.f32.gmra.mrb[84].mxu0 %vm327_vm2, %v4252_v31  ;;  %3652 = vmatmul.mubr.msk.f32.gmra.mrb[84].mxu1 %vm327_vm2, %v4513_v17  ;;  %v4767_v31 = vld [vmem:[#allocation2 + $0xb0] sm:$0xff] }
  0xcb   : > { %3716 = vmatprep.mubr.msk.f32.mxu0 %vm4094_vm1, %v4093_v1  ;;  %3654 = vmatprep.mubr.msk.f32.mxu1 %vm4094_vm1, %v4093_v1 }
  0xce   : > { %3717 = vmatmul.mubr.msk.f32.gmra.mrb[86].mxu0 %vm327_vm2, %v4263_v33  ;;  %3655 = vmatmul.mubr.msk.f32.gmra.mrb[86].mxu1 %vm327_vm2, %v4525_v19  ;;  %v4775_v33 = vld [vmem:[#allocation2 + $0xb1] sm:$0xff] }
  0xcf   : > { %3719 = vmatprep.mubr.msk.f32.mxu0 %vm4094_vm1, %v4093_v1  ;;  %3657 = vmatprep.mubr.msk.f32.mxu1 %vm4094_vm1, %v4093_v1 }
  0xd2   : > { %3720 = vmatmul.mubr.msk.f32.gmra.mrb[88].mxu0 %vm327_vm2, %v4275_v35  ;;  %3658 = vmatmul.mubr.msk.f32.gmra.mrb[88].mxu1 %vm327_vm2, %v4537_v21  ;;  %v4779_v35 = vld [vmem:[#allocation2 + $0xb8] sm:$0xff] }
  0xd3   : > { %3722 = vmatprep.mubr.msk.f32.mxu0 %vm4094_vm1, %v4093_v1  ;;  %3660 = vmatprep.mubr.msk.f32.mxu1 %vm4094_vm1, %v4093_v1 }
  0xd6   : > { %3723 = vmatmul.mubr.msk.f32.gmra.mrb[90].mxu0 %vm327_vm2, %v4287_v37  ;;  %3661 = vmatmul.mubr.msk.f32.gmra.mrb[90].mxu1 %vm327_vm2, %v4549_v23  ;;  %v2296_v37 = vld [vmem:[%s5435_s2 + $0x1c] sm:$0xf] }
  0xd7   : > { %3725 = vmatprep.mubr.msk.f32.mxu0 %vm4094_vm1, %v4093_v1  ;;  %3663 = vmatprep.mubr.msk.f32.mxu1 %vm4094_vm1, %v4093_v1 }
  0xda   : > { %3726 = vmatmul.mubr.msk.f32.gmra.mrb[92].mxu0 %vm327_vm2, %v4299_v39  ;;  %3664 = vmatmul.mubr.msk.f32.gmra.mrb[92].mxu1 %vm327_vm2, %v4561_v25 }
  0xdb   : > { %3728 = vmatprep.mubr.msk.f32.mxu0 %vm4094_vm1, %v4093_v1  ;;  %3666 = vmatprep.mubr.msk.f32.mxu1 %vm4094_vm1, %v4093_v1 }
  0xde   : > { %3729 = vmatmul.mubr.msk.f32.gmra.mrb[94].mxu0 %vm327_vm2, %v4311_v41  ;;  %3667 = vmatmul.mubr.msk.f32.gmra.mrb[94].mxu1 %vm327_vm2, %v4573_v28 }
  0xdf   : > { %3731 = vmatprep.mubr.msk.f32.mxu0 %vm4094_vm1, %v4093_v1  ;;  %3669 = vmatprep.mubr.msk.f32.mxu1 %vm4094_vm1, %v4093_v1 }
  0xe2   : > { %3732 = vmatmul.mubr.msk.f32.gmra.mrb[96].mxu0 %vm327_vm2, %v4323_v43  ;;  %3670 = vmatmul.mubr.msk.f32.gmra.mrb[96].mxu1 %vm327_vm2, %v4585_v47 }
  0xe3   : > { %3734 = vmatprep.mubr.msk.f32.mxu0 %vm4094_vm1, %v4093_v1  ;;  %3672 = vmatprep.mubr.msk.f32.mxu1 %vm4094_vm1, %v4093_v1 }
  0xe6   : > { %3735 = vmatmul.mubr.msk.f32.gmra.mrb[98].mxu0 %vm327_vm2, %v4335_v45  ;;  %3673 = vmatmul.mubr.msk.f32.gmra.mrb[98].mxu1 %vm327_vm2, %v4755_v27 }
  0xe7   : > { %3737 = vmatprep.mubr.msk.f32.mxu0 %vm4094_vm1, %v4093_v1  ;;  %3675 = vmatprep.mubr.msk.f32.mxu1 %vm4094_vm1, %v4093_v1 }
  0xea   : > { %3738 = vmatmul.mubr.msk.f32.gmra.mrb[100].mxu0 %vm327_vm2, %v4763_v29  ;;  %3676 = vmatmul.mubr.msk.f32.gmra.mrb[100].mxu1 %vm327_vm2, %v4767_v31 }
  0xeb   : > { %3740 = vmatprep.mubr.msk.f32.mxu0 %vm4094_vm1, %v4093_v1  ;;  %3678 = vmatprep.mubr.msk.f32.mxu1 %vm4094_vm1, %v4093_v1 }
  0xee   : > { %3741 = vmatmul.mubr.msk.f32.gmra.mrb[102].mxu0 %vm327_vm2, %v4775_v33  ;;  %3679 = vmatmul.mubr.msk.f32.gmra.mrb[102].mxu1 %vm327_vm2, %v4779_v35 }
  0xef   : > { %3743 = vmatprep.mubr.msk.f32.mxu0 %vm4094_vm1, %v4093_v1  ;;  %3748 = vmatprep.mubr.msk.f32.mxu1 %vm4094_vm1, %v4093_v1 }
  0xf2   : > { %3744 = vmatmul.mubr.msk.f32.gmra.mrb[104].mxu0 %vm327_vm2, %v4787_v36  ;;  %3749 = vmatmul.mubr.msk.f32.vlgmr.msra.gmra.mrb[104].mxu1 %vm327_vm2, %v4383_v56 }
  0xf3   : > { %3813 = vmatprep.mubr.msk.f32.mxu0 %vm4094_vm1, %v4093_v1  ;;  %3877 = vmatpush3.msk.msra.mxu1 %vm470_vm0, %v2296_v37 }
  0xf4   : > { %3751 = vmatprep.mubr.msk.f32.mxu1 %vm4094_vm1, %v4093_v1 }
  0xf5   : > { %v4806_v39 = vpop.f32.mrb[0].mxu0  ;;  %v4808_v41 = vpop.f32.mrb[0].mxu1 }
  0xf6   : > { %v3425_v40 = vpop.f32.mrb[1].mxu0  ;;  %3814 = vmatmul.mubr.msk.f32.vlgmr.msra.gmra.mrb[106].mxu0 %vm327_vm2, %v4411_v61  ;;  %3752 = vmatmul.mubr.msk.f32.gmra.mrb[106].mxu1 %vm327_vm2, %v4395_v58  ;;  %v3458_v42 = vpop.f32.mrb[1].mxu1 }
  0xf7   : > { %3942 = vmatpush3.msk.msra.mxu0 %vm470_vm0, %v2575_v38  ;;  %3754 = vmatprep.mubr.msk.f32.mxu1 %vm4094_vm1, %v4093_v1 }
  0xf8   : > { %3816 = vmatprep.mubr.msk.f32.mxu0 %vm4094_vm1, %v4093_v1 }
  0xf9   : > { %v4819_v43 = vpop.f32.mrb[2].mxu0  ;;  %v4821_v45 = vpop.f32.mrb[2].mxu1 }
  0xfa   : > { %v3428_v44 = vpop.f32.mrb[3].mxu0  ;;  %3817 = vmatmul.mubr.msk.f32.gmra.mrb[108].mxu0 %vm327_vm2, %v4425_v0  ;;  %3755 = vmatmul.mubr.msk.f32.gmra.mrb[108].mxu1 %vm327_vm2, %v4407_v60  ;;  %v3461_v46 = vpop.f32.mrb[3].mxu1 }
  0xfb   : > { %3819 = vmatprep.mubr.msk.f32.mxu0 %vm4094_vm1, %v4093_v1  ;;  %3757 = vmatprep.mubr.msk.f32.mxu1 %vm4094_vm1, %v4093_v1 }
  0xfd   : > { %v4831_v51 = vpop.f32.mrb[4].mxu0  ;;  %v4833_v53 = vpop.f32.mrb[4].mxu1 }
  0xfe   : > { %v3431_v52 = vpop.f32.mrb[5].mxu0  ;;  %3820 = vmatmul.mubr.msk.f32.gmra.mrb[110].mxu0 %vm327_vm2, %v4439_v4  ;;  %3758 = vmatmul.mubr.msk.f32.gmra.mrb[110].mxu1 %vm327_vm2, %v4420_v63  ;;  %v3464_v54 = vpop.f32.mrb[5].mxu1 }
  0xff   : > { %3822 = vmatprep.mubr.msk.f32.mxu0 %vm4094_vm1, %v4093_v1  ;;  %3760 = vmatprep.mubr.msk.f32.mxu1 %vm4094_vm1, %v4093_v1 }
 0x101   : > { %v4843_v55 = vpop.f32.mrb[6].mxu0  ;;  %v4845_v57 = vpop.f32.mrb[6].mxu1 }
 0x102   : > { %v3434_v56 = vpop.f32.mrb[7].mxu0  ;;  %3823 = vmatmul.mubr.msk.f32.gmra.mrb[112].mxu0 %vm327_vm2, %v4453_v7  ;;  %3761 = vmatmul.mubr.msk.f32.gmra.mrb[112].mxu1 %vm327_vm2, %v4434_v3  ;;  %v3467_v58 = vpop.f32.mrb[7].mxu1 }
 0x103   : > { %3825 = vmatprep.mubr.msk.f32.mxu0 %vm4094_vm1, %v4093_v1  ;;  %3763 = vmatprep.mubr.msk.f32.mxu1 %vm4094_vm1, %v4093_v1 }
 0x105   : > { %v4855_v59 = vpop.f32.mrb[8].mxu0  ;;  %v4857_v61 = vpop.f32.mrb[8].mxu1 }
 0x106   : > { %v3437_v60 = vpop.f32.mrb[9].mxu0  ;;  %3826 = vmatmul.mubr.msk.f32.gmra.mrb[114].mxu0 %vm327_vm2, %v4465_v9  ;;  %3764 = vmatmul.mubr.msk.f32.gmra.mrb[114].mxu1 %vm327_vm2, %v4448_v6  ;;  %v3470_v62 = vpop.f32.mrb[9].mxu1 }
 0x107   : > { %3828 = vmatprep.mubr.msk.f32.mxu0 %vm4094_vm1, %v4093_v1  ;;  %3766 = vmatprep.mubr.msk.f32.mxu1 %vm4094_vm1, %v4093_v1 }
 0x109   : > { %v4867_v0 = vpop.f32.mrb[10].mxu0  ;;  %v4869_v4 = vpop.f32.mrb[10].mxu1 }
 0x10a   : > { %v3440_v2 = vpop.f32.mrb[11].mxu0  ;;  %3829 = vmatmul.mubr.msk.f32.gmra.mrb[116].mxu0 %vm327_vm2, %v4477_v11  ;;  %3767 = vmatmul.mubr.msk.f32.gmra.mrb[116].mxu1 %vm327_vm2, %v4461_v8  ;;  %v3473_v5 = vpop.f32.mrb[11].mxu1 }
 0x10b   : > { %3831 = vmatprep.mubr.msk.f32.mxu0 %vm4094_vm1, %v4093_v1  ;;  %3769 = vmatprep.mubr.msk.f32.mxu1 %vm4094_vm1, %v4093_v1 }
 0x10d   : > { %v4879_v7 = vpop.f32.mrb[12].mxu0  ;;  %v4881_v49 = vpop.f32.mrb[12].mxu1 }
 0x10e   : > { %v3443_v9 = vpop.f32.mrb[13].mxu0  ;;  %3832 = vmatmul.mubr.msk.f32.gmra.mrb[118].mxu0 %vm327_vm2, %v4489_v13  ;;  %3770 = vmatmul.mubr.msk.f32.gmra.mrb[118].mxu1 %vm327_vm2, %v4473_v10  ;;  %v3476_v11 = vpop.f32.mrb[13].mxu1 }
 0x10f   : > { %3834 = vmatprep.mubr.msk.f32.mxu0 %vm4094_vm1, %v4093_v1  ;;  %3772 = vmatprep.mubr.msk.f32.mxu1 %vm4094_vm1, %v4093_v1 }
 0x111   : > { %v4893_v32 = vpop.f32.mrb[14].mxu0  ;;  %v4895_v37 = vpop.f32.mrb[14].mxu1 }
 0x112   : > { %v3446_v34 = vpop.f32.mrb[15].mxu0  ;;  %3835 = vmatmul.mubr.msk.f32.gmra.mrb[120].mxu0 %vm327_vm2, %v4501_v15  ;;  %3773 = vmatmul.mubr.msk.f32.gmra.mrb[120].mxu1 %vm327_vm2, %v4485_v12  ;;  %v3479_v13 = vpop.f32.mrb[15].mxu1 }
 0x113   : > { %3837 = vmatprep.mubr.msk.f32.mxu0 %vm4094_vm1, %v4093_v1  ;;  %3775 = vmatprep.mubr.msk.f32.mxu1 %vm4094_vm1, %v4093_v1 }
 0x115   : > { %v4905_v38 = vpop.f32.mrb[16].mxu0  ;;  %v4907_v42 = vpop.f32.mrb[16].mxu1 }
 0x116   : > { %v3449_v40 = vpop.f32.mrb[17].mxu0  ;;  %3838 = vmatmul.mubr.msk.f32.gmra.mrb[122].mxu0 %vm327_vm2, %v4513_v17  ;;  %3776 = vmatmul.mubr.msk.f32.gmra.mrb[122].mxu1 %vm327_vm2, %v4497_v14  ;;  %v3482_v15 = vpop.f32.mrb[17].mxu1 }
 0x117   : > { %3840 = vmatprep.mubr.msk.f32.mxu0 %vm4094_vm1, %v4093_v1  ;;  %3778 = vmatprep.mubr.msk.f32.mxu1 %vm4094_vm1, %v4093_v1 }
 0x119   : > { %v4917_v44 = vpop.f32.mrb[18].mxu0  ;;  %v4919_v52 = vpop.f32.mrb[18].mxu1 }
 0x11a   : > { %v3452_v46 = vpop.f32.mrb[19].mxu0  ;;  %3841 = vmatmul.mubr.msk.f32.gmra.mrb[124].mxu0 %vm327_vm2, %v4525_v19  ;;  %3779 = vmatmul.mubr.msk.f32.gmra.mrb[124].mxu1 %vm327_vm2, %v4509_v16  ;;  %v3485_v17 = vpop.f32.mrb[19].mxu1 }
 0x11b   : > { %3843 = vmatprep.mubr.msk.f32.mxu0 %vm4094_vm1, %v4093_v1  ;;  %3781 = vmatprep.mubr.msk.f32.mxu1 %vm4094_vm1, %v4093_v1 }
 0x11d   : > { %v4929_v54 = vpop.f32.mrb[20].mxu0  ;;  %v776_v56 = vpop.f32.mrb[20].mxu1 }
 0x11e   : > { %v3455_v58 = vpop.f32.mrb[21].mxu0  ;;  %3844 = vmatmul.mubr.msk.f32.gmra.mrb[126].mxu0 %vm327_vm2, %v4537_v21  ;;  %v777_v60 = vadd.f32 %v776_v56, %v4806_v39  ;;  %3782 = vmatmul.mubr.msk.f32.gmra.mrb[126].mxu1 %vm327_vm2, %v4521_v18  ;;  %v3490_v16 = vpop.f32.mrb[21].mxu1 }
 0x11f   : > { %3846 = vmatprep.mubr.msk.f32.mxu0 %vm4094_vm1, %v4093_v1  ;;  %3784 = vmatprep.mubr.msk.f32.mxu1 %vm4094_vm1, %v4093_v1 }
 0x121   : > { %v1034_v19 = vpop.f32.mrb[22].mxu0  ;;  %v781_v62 = vpop.f32.mrb[22].mxu1 }
 0x122   : > { %v4940_v2 = vadd.f32 %v1034_v19, %v777_v60  ;;  %v3555_v5 = vpop.f32.mrb[23].mxu0  ;;  %3847 = vmatmul.mubr.msk.f32.gmra.mrb[128].mxu0 %vm327_vm2, %v4549_v23  ;;  %v782_v21 = vadd.f32 %v781_v62, %v4819_v43  ;;  %3785 = vmatmul.mubr.msk.f32.gmra.mrb[128].mxu1 %vm327_vm2, %v4533_v20  ;;  %v3493_v18 = vpop.f32.mrb[23].mxu1 }
 0x123   : > { %3849 = vmatprep.mubr.msk.f32.mxu0 %vm4094_vm1, %v4093_v1  ;;  %3787 = vmatprep.mubr.msk.f32.mxu1 %vm4094_vm1, %v4093_v1 }
 0x125   : > { %v1039_v39 = vpop.f32.mrb[24].mxu0  ;;  %v786_v9 = vpop.f32.mrb[24].mxu1 }
 0x126   : > { %v4951_v50 = vadd.f32 %v1039_v39, %v782_v21  ;;  %v3558_v11 = vpop.f32.mrb[25].mxu0  ;;  %3850 = vmatmul.mubr.msk.f32.gmra.mrb[130].mxu0 %vm327_vm2, %v4561_v25  ;;  %v787_v23 = vadd.f32 %v786_v9, %v4831_v51  ;;  %3788 = vmatmul.mubr.msk.f32.gmra.mrb[130].mxu1 %vm327_vm2, %v4545_v22  ;;  %v3496_v20 = vpop.f32.mrb[25].mxu1  ;;  %v5019_v9 = vld [vmem:[#allocation2 + $0xb2] sm:$0xff] }
 0x127   : > { %3852 = vmatprep.mubr.msk.f32.mxu0 %vm4094_vm1, %v4093_v1  ;;  %3790 = vmatprep.mubr.msk.f32.mxu1 %vm4094_vm1, %v4093_v1 }
 0x129   : > { %v1044_v43 = vpop.f32.mrb[26].mxu0  ;;  %v791_v34 = vpop.f32.mrb[26].mxu1 }
 0x12a   : > { %v4962_v13 = vadd.f32 %v1044_v43, %v787_v23  ;;  %v3561_v40 = vpop.f32.mrb[27].mxu0  ;;  %3853 = vmatmul.mubr.msk.f32.gmra.mrb[132].mxu0 %vm327_vm2, %v4573_v28  ;;  %v792_v25 = vadd.f32 %v791_v34, %v4843_v55  ;;  %3791 = vmatmul.mubr.msk.f32.gmra.mrb[132].mxu1 %vm327_vm2, %v4557_v24  ;;  %v3499_v22 = vpop.f32.mrb[27].mxu1  ;;  %v2015_v34 = vld [vmem:[#allocation2 + $0xc8] sm:$0xff] }
 0x12b   : > { %3855 = vmatprep.mubr.msk.f32.mxu0 %vm4094_vm1, %v4093_v1  ;;  %3793 = vmatprep.mubr.msk.f32.mxu1 %vm4094_vm1, %v4093_v1  ;;  %v5031_v40 = vld [vmem:[#allocation2 + $0xba] sm:$0xff] }
 0x12d   : > { %v1049_v51 = vpop.f32.mrb[28].mxu0  ;;  %v796_v15 = vpop.f32.mrb[28].mxu1 }
 0x12e   : > { %v4973_v46 = vadd.f32 %v1049_v51, %v792_v25  ;;  %v3564_v17 = vpop.f32.mrb[29].mxu0  ;;  %3856 = vmatmul.mubr.msk.f32.gmra.mrb[134].mxu0 %vm327_vm2, %v4585_v47  ;;  %v797_v28 = vadd.f32 %v796_v15, %v4855_v59  ;;  %3794 = vmatmul.mubr.msk.f32.gmra.mrb[134].mxu1 %vm327_vm2, %v4569_v26  ;;  %v3502_v24 = vpop.f32.mrb[29].mxu1 }
 0x12f   : > { %3858 = vmatprep.mubr.msk.f32.mxu0 %vm4094_vm1, %v4093_v1  ;;  %3796 = vmatprep.mubr.msk.f32.mxu1 %vm4094_vm1, %v4093_v1  ;;  %v2275_v24 = vld [vmem:[#allocation2 + $0x31] sm:$0xff] }
 0x131   : > { %v1054_v55 = vpop.f32.mrb[30].mxu0  ;;  %v801_v56 = vpop.f32.mrb[30].mxu1 }
 0x132   : > { %v4984_v58 = vadd.f32 %v1054_v55, %v797_v28  ;;  %v3567_v60 = vpop.f32.mrb[31].mxu0  ;;  %3859 = vmatmul.mubr.msk.f32.gmra.mrb[136].mxu0 %vm327_vm2, %v4755_v27  ;;  %v802_v47 = vadd.f32 %v801_v56, %v4867_v0  ;;  %3797 = vmatmul.mubr.msk.f32.gmra.mrb[136].mxu1 %vm327_vm2, %v4581_v30  ;;  %v3505_v26 = vpop.f32.mrb[31].mxu1  ;;  %v5006_v0 = vld [vmem:[#allocation2 + $0xaa] sm:$0xff] }
 0x133   : > { %3861 = vmatprep.mubr.msk.f32.mxu0 %vm4094_vm1, %v4093_v1  ;;  %3799 = vmatprep.mubr.msk.f32.mxu1 %vm4094_vm1, %v4093_v1  ;;  %v2016_v28 = vld [vmem:[#allocation2 + $0xd0] sm:$0xff] }
 0x135   : > { %v1059_v59 = vpop.f32.mrb[32].mxu0  ;;  %v806_v16 = vpop.f32.mrb[32].mxu1 }
 0x136   : > { %v4995_v19 = vadd.f32 %v1059_v59, %v802_v47  ;;  %v3570_v62 = vpop.f32.mrb[33].mxu0  ;;  %3862 = vmatmul.mubr.msk.f32.gmra.mrb[138].mxu0 %vm327_vm2, %v4767_v31  ;;  %v807_v27 = vadd.f32 %v806_v16, %v4879_v7  ;;  %3800 = vmatmul.mubr.msk.f32.gmra.mrb[138].mxu1 %vm327_vm2, %v4593_v48  ;;  %v3508_v30 = vpop.f32.mrb[33].mxu1  ;;  %v2014_v7 = vld [vmem:[#allocation2 + $0xc0] sm:$0xff] }
 0x137   : > { %3864 = vmatprep.mubr.msk.f32.mxu0 %vm4094_vm1, %v4093_v1  ;;  %3802 = vmatprep.mubr.msk.f32.mxu1 %vm4094_vm1, %v4093_v1  ;;  %v2276_v59 = vld [vmem:[#allocation2 + $0x39] sm:$0xff] }
 0x139   : > { %v1064_v5 = vpop.f32.mrb[34].mxu0  ;;  %v811_v21 = vpop.f32.mrb[34].mxu1 }
 0x13a   : > { %v5008_v18 = vadd.f32 %v1064_v5, %v807_v27  ;;  %v3573_v39 = vpop.f32.mrb[35].mxu0  ;;  %3865 = vmatmul.mubr.msk.f32.gmra.mrb[140].mxu0 %vm327_vm2, %v4779_v35  ;;  %v812_v31 = vadd.f32 %v811_v21, %v4893_v32  ;;  %3803 = vmatmul.mubr.msk.f32.gmra.mrb[140].mxu1 %vm327_vm2, %v5006_v0  ;;  %v3511_v48 = vpop.f32.mrb[35].mxu1  ;;  %v2277_v21 = vld [vmem:[#allocation2 + $0x41] sm:$0xff] }
 0x13b   : > { %3867 = vmatprep.mubr.msk.f32.mxu0 %vm4094_vm1, %v4093_v1  ;;  %3805 = vmatprep.mubr.msk.f32.mxu1 %vm4094_vm1, %v4093_v1 }
 0x13d   : > { %v1069_v11 = vpop.f32.mrb[36].mxu0  ;;  %v816_v23 = vpop.f32.mrb[36].mxu1 }
 0x13e   : > { %v5021_v20 = vadd.f32 %v1069_v11, %v812_v31  ;;  %v3576_v35 = vpop.f32.mrb[37].mxu0  ;;  %3868 = vmatmul.mubr.msk.f32.gmra.mrb[142].mxu0 %vm327_vm2, %v2014_v7  ;;  %v817_v32 = vadd.f32 %v816_v23, %v4905_v38  ;;  %3806 = vmatmul.mubr.msk.f32.gmra.mrb[142].mxu1 %vm327_vm2, %v5019_v9  ;;  %v3514_v43 = vpop.f32.mrb[37].mxu1  ;;  %v2278_v11 = vld [vmem:[#allocation2 + $0x49] sm:$0xff] }
 0x13f   : > { %3870 = vmatprep.mubr.msk.f32.mxu0 %vm4094_vm1, %v4093_v1  ;;  %3808 = vmatprep.mubr.msk.f32.mxu1 %vm4094_vm1, %v4093_v1 }
 0x141   : > { %v1074_v25 = vpop.f32.mrb[38].mxu0  ;;  %v821_v22 = vpop.f32.mrb[38].mxu1 }
 0x142   : > { %v5033_v51 = vadd.f32 %v1074_v25, %v817_v32  ;;  %v3579_v15 = vpop.f32.mrb[39].mxu0  ;;  %3871 = vmatmul.mubr.msk.f32.gmra.mrb[144].mxu0 %vm327_vm2, %v2015_v34  ;;  %v822_v38 = vadd.f32 %v821_v22, %v4917_v44  ;;  %3809 = vmatmul.mubr.msk.f32.gmra.mrb[144].mxu1 %vm327_vm2, %v5031_v40  ;;  %v3517_v17 = vpop.f32.mrb[39].mxu1  ;;  %v2279_v34 = vld [vmem:[#allocation2 + $0x51] sm:$0xff] }
 0x143   : > { %3873 = vmatprep.mubr.msk.f32.mxu0 %vm4094_vm1, %v4093_v1  ;;  %3878 = vmatprep.mubr.msk.f32.mxu1 %vm4094_vm1, %v4093_v1  ;;  %v2280_v17 = vld [vmem:[#allocation2 + $0x59] sm:$0xff] }
 0x145   : > { %v1079_v55 = vpop.f32.mrb[40].mxu0  ;;  %v826_v56 = vpop.f32.mrb[40].mxu1 }
 0x146   : > { %v5043_v60 = vadd.f32 %v1079_v55, %v822_v38  ;;  %v3582_v47 = vpop.f32.mrb[41].mxu0  ;;  %3874 = vmatmul.mubr.msk.f32.gmra.mrb[146].mxu0 %vm327_vm2, %v2016_v28  ;;  %v827_v44 = vadd.f32 %v826_v56, %v4929_v54  ;;  %3879 = vmatmul.mubr.msk.f32.vlgmr.msra.gmra.mrb[146].mxu1 %vm327_vm2, %v2275_v24  ;;  %v3520_v26 = vpop.f32.mrb[41].mxu1 }
 0x147   : > { %3943 = vmatprep.mubr.msk.f32.mxu0 %vm4094_vm1, %v4093_v1  ;;  %3881 = vmatprep.mubr.msk.f32.mxu1 %vm4094_vm1, %v4093_v1  ;;  %v2281_v47 = vld [vmem:[#allocation2 + $0x61] sm:$0xff] }
 0x149   : > { %v1084_v16 = vpop.f32.mrb[42].mxu0  ;;  %v831_v62 = vpop.f32.mrb[42].mxu1 }
 0x14a   : > { %v5052_v27 = vadd.f32 %v1084_v16, %v827_v44  ;;  %v3585_v30 = vpop.f32.mrb[43].mxu0  ;;  %3944 = vmatmul.mubr.msk.f32.vlgmr.msra.gmra.mrb[148].mxu0 %vm327_vm2, %v4420_v63  ;;  %v832_v54 = vadd.f32 %v831_v62, %v4808_v41  ;;  %3882 = vmatmul.mubr.msk.f32.gmra.mrb[148].mxu1 %vm327_vm2, %v2276_v59  ;;  %v3523_v5 = vpop.f32.mrb[43].mxu1  ;;  %v2282_v62 = vld [vmem:[#allocation2 + $0x69] sm:$0xff] }
 0x14b   : > { %3946 = vmatprep.mubr.msk.f32.mxu0 %vm4094_vm1, %v4093_v1  ;;  %3884 = vmatprep.mubr.msk.f32.mxu1 %vm4094_vm1, %v4093_v1 }
 0x14d   : > { %v1089_v39 = vpop.f32.mrb[44].mxu0  ;;  %v836_v31 = vpop.f32.mrb[44].mxu1 }
 0x14e   : > { %v5062_v48 = vadd.f32 %v1089_v39, %v832_v54  ;;  %v3588_v7 = vpop.f32.mrb[45].mxu0  ;;  %3947 = vmatmul.mubr.msk.f32.gmra.mrb[150].mxu0 %vm327_vm2, %v4434_v3  ;;  %v837_v63 = vadd.f32 %v836_v31, %v4821_v45  ;;  %3885 = vmatmul.mubr.msk.f32.gmra.mrb[150].mxu1 %vm327_vm2, %v2277_v21  ;;  %v3526_v41 = vpop.f32.mrb[45].mxu1  ;;  %v2561_v39 = vld [vmem:[#allocation2 + $0x6a] sm:$0xff] }
 0x14f   : > { %3949 = vmatprep.mubr.msk.f32.mxu0 %vm4094_vm1, %v4093_v1  ;;  %3887 = vmatprep.mubr.msk.f32.mxu1 %vm4094_vm1, %v4093_v1  ;;  %v2283_v31 = vld [vmem:[#allocation2 + $0x71] sm:$0xff] }
 0x151   : > { %v1094_v23 = vpop.f32.mrb[46].mxu0  ;;  %v841_v35 = vpop.f32.mrb[46].mxu1 }
 0x152   : > { %v5072_v32 = vadd.f32 %v1094_v23, %v837_v63  ;;  %v3591_v43 = vpop.f32.mrb[47].mxu0  ;;  %3950 = vmatmul.mubr.msk.f32.gmra.mrb[152].mxu0 %vm327_vm2, %v4448_v6  ;;  %v842_v3 = vadd.f32 %v841_v35, %v4833_v53  ;;  %3888 = vmatmul.mubr.msk.f32.gmra.mrb[152].mxu1 %vm327_vm2, %v2278_v11  ;;  %v3529_v45 = vpop.f32.mrb[47].mxu1  ;;  %v2562_v23 = vld [vmem:[#allocation2 + $0x72] sm:$0xff] }
 0x153   : > { %3952 = vmatprep.mubr.msk.f32.mxu0 %vm4094_vm1, %v4093_v1  ;;  %3890 = vmatprep.mubr.msk.f32.mxu1 %vm4094_vm1, %v4093_v1  ;;  %v2284_v35 = vld [vmem:[#allocation2 + $0x79] sm:$0xff] }
 0x155   : > { %v1099_v25 = vpop.f32.mrb[48].mxu0  ;;  %v846_v22 = vpop.f32.mrb[48].mxu1 }
 0x156   : > { %v5082_v15 = vadd.f32 %v1099_v25, %v842_v3  ;;  %v3594_v38 = vpop.f32.mrb[49].mxu0  ;;  %3953 = vmatmul.mubr.msk.f32.gmra.mrb[154].mxu0 %vm327_vm2, %v4461_v8  ;;  %v847_v6 = vadd.f32 %v846_v22, %v4845_v57  ;;  %3891 = vmatmul.mubr.msk.f32.gmra.mrb[154].mxu1 %vm327_vm2, %v2279_v34  ;;  %v3532_v53 = vpop.f32.mrb[49].mxu1  ;;  %v2563_v22 = vld [vmem:[#allocation2 + $0x7a] sm:$0xff] }
 0x157   : > { %3955 = vmatprep.mubr.msk.f32.mxu0 %vm4094_vm1, %v4093_v1  ;;  %3893 = vmatprep.mubr.msk.f32.mxu1 %vm4094_vm1, %v4093_v1  ;;  %v2285_v38 = vld [vmem:[#allocation2 + $0x81] sm:$0xff] }
 0x159   : > { %v1104_v28 = vpop.f32.mrb[50].mxu0  ;;  %v851_v24 = vpop.f32.mrb[50].mxu1 }
 0x15a   : > { %v5092_v55 = vadd.f32 %v1104_v28, %v847_v6  ;;  %v3597_v56 = vpop.f32.mrb[51].mxu0  ;;  %3956 = vmatmul.mubr.msk.f32.gmra.mrb[156].mxu0 %vm327_vm2, %v4473_v10  ;;  %v852_v8 = vadd.f32 %v851_v24, %v4857_v61  ;;  %3894 = vmatmul.mubr.msk.f32.gmra.mrb[156].mxu1 %vm327_vm2, %v2280_v17  ;;  %v3535_v57 = vpop.f32.mrb[51].mxu1 }
 0x15b   : > { %3958 = vmatprep.mubr.msk.f32.mxu0 %vm4094_vm1, %v4093_v1  ;;  %3896 = vmatprep.mubr.msk.f32.mxu1 %vm4094_vm1, %v4093_v1  ;;  %v2564_v56 = vld [vmem:[#allocation2 + $0x82] sm:$0xff] }
 0x15d   : > { %v1109_v44 = vpop.f32.mrb[52].mxu0  ;;  %v856_v26 = vpop.f32.mrb[52].mxu1 }
 0x15e   : > { %v5102_v59 = vadd.f32 %v1109_v44, %v852_v8  ;;  %v3600_v16 = vpop.f32.mrb[53].mxu0  ;;  %3959 = vmatmul.mubr.msk.f32.gmra.mrb[158].mxu0 %vm327_vm2, %v4485_v12  ;;  %v857_v10 = vadd.f32 %v856_v26, %v4869_v4  ;;  %3897 = vmatmul.mubr.msk.f32.gmra.mrb[158].mxu1 %vm327_vm2, %v2281_v47  ;;  %v3538_v61 = vpop.f32.mrb[53].mxu1  ;;  %v2286_v8 = vld [vmem:[#allocation2 + $0x89] sm:$0xff] }
 0x15f   : > { %3961 = vmatprep.mubr.msk.f32.mxu0 %vm4094_vm1, %v4093_v1  ;;  %3899 = vmatprep.mubr.msk.f32.mxu1 %vm4094_vm1, %v4093_v1  ;;  %v2287_v61 = vld [vmem:[#allocation2 + $0x91] sm:$0xff] }
 0x161   : > { %v1114_v30 = vpop.f32.mrb[54].mxu0  ;;  %v861_v54 = vpop.f32.mrb[54].mxu1 }
 0x162   : > { %v5112_v5 = vadd.f32 %v1114_v30, %v857_v10  ;;  %v3603_v21 = vpop.f32.mrb[55].mxu0  ;;  %3962 = vmatmul.mubr.msk.f32.gmra.mrb[160].mxu0 %vm327_vm2, %v4497_v14  ;;  %v862_v12 = vadd.f32 %v861_v54, %v4881_v49  ;;  %3900 = vmatmul.mubr.msk.f32.gmra.mrb[160].mxu1 %vm327_vm2, %v2282_v62  ;;  %v3541_v4 = vpop.f32.mrb[55].mxu1  ;;  %v2565_v10 = vld [vmem:[#allocation2 + $0x8a] sm:$0xff] }
 0x163   : > { %3964 = vmatprep.mubr.msk.f32.mxu0 %vm4094_vm1, %v4093_v1  ;;  %3902 = vmatprep.mubr.msk.f32.mxu1 %vm4094_vm1, %v4093_v1  ;;  %v2566_v4 = vld [vmem:[#allocation2 + $0x92] sm:$0xff] }
 0x165   : > { %v1119_v7 = vpop.f32.mrb[56].mxu0  ;;  %v866_v63 = vpop.f32.mrb[56].mxu1 }
 0x166   : > { %v5122_v41 = vadd.f32 %v1119_v7, %v862_v12  ;;  %v3606_v11 = vpop.f32.mrb[57].mxu0  ;;  %3965 = vmatmul.mubr.msk.f32.gmra.mrb[162].mxu0 %vm327_vm2, %v2561_v39  ;;  %v867_v14 = vadd.f32 %v866_v63, %v4895_v37  ;;  %3903 = vmatmul.mubr.msk.f32.gmra.mrb[162].mxu1 %vm327_vm2, %v2283_v31  ;;  %v3544_v49 = vpop.f32.mrb[57].mxu1  ;;  %v2288_v39 = vld [vmem:[#allocation2 + $0x99] sm:$0xff] }
 0x167   : > { %3967 = vmatprep.mubr.msk.f32.mxu0 %vm4094_vm1, %v4093_v1  ;;  %3905 = vmatprep.mubr.msk.f32.mxu1 %vm4094_vm1, %v4093_v1  ;;  %v2567_v49 = vld [vmem:[#allocation2 + $0x9a] sm:$0xff] }
 0x169   : > { %v1124_v43 = vpop.f32.mrb[58].mxu0  ;;  %v871_v3 = vpop.f32.mrb[58].mxu1 }
 0x16a   : > { %v5131_v45 = vadd.f32 %v1124_v43, %v867_v14  ;;  %v3609_v34 = vpop.f32.mrb[59].mxu0  ;;  %3968 = vmatmul.mubr.msk.f32.gmra.mrb[164].mxu0 %vm327_vm2, %v2562_v23  ;;  %v872_v37 = vadd.f32 %v871_v3, %v4907_v42  ;;  %3906 = vmatmul.mubr.msk.f32.gmra.mrb[164].mxu1 %vm327_vm2, %v2284_v35  ;;  %v3547_v25 = vpop.f32.mrb[59].mxu1  ;;  %v2289_v23 = vld [vmem:[#allocation2 + $0xa1] sm:$0xff] }
 0x16b   : > { %3970 = vmatprep.mubr.msk.f32.mxu0 %vm4094_vm1, %v4093_v1  ;;  %3908 = vmatprep.mubr.msk.f32.mxu1 %vm4094_vm1, %v4093_v1  ;;  %v2568_v25 = vld [vmem:[#allocation2 + $0xa2] sm:$0xff] }
 0x16d   : > { %v1129_v6 = vpop.f32.mrb[60].mxu0  ;;  %v876_v53 = vpop.f32.mrb[60].mxu1 }
 0x16e   : > { %v5140_v17 = vadd.f32 %v1129_v6, %v872_v37  ;;  %v3612_v28 = vpop.f32.mrb[61].mxu0  ;;  %3971 = vmatmul.mubr.msk.f32.gmra.mrb[166].mxu0 %vm327_vm2, %v2563_v22  ;;  %v877_v42 = vadd.f32 %v876_v53, %v4919_v52  ;;  %3909 = vmatmul.mubr.msk.f32.gmra.mrb[166].mxu1 %vm327_vm2, %v2285_v38  ;;  %v3550_v24 = vpop.f32.mrb[61].mxu1 }
 0x16f   : > { %3973 = vmatprep.mubr.msk.f32.mxu0 %vm4094_vm1, %v4093_v1  ;;  %3911 = vmatprep.mubr.msk.f32.mxu1 %vm4094_vm1, %v4093_v1 }
 0x171   : > { %v1134_v57 = vpop.f32.mrb[62].mxu0  ;;  %v1313_v44 = vpop.f32.mrb[62].mxu1 }
 0x172   : > { %v5149_v47 = vadd.f32 %v1134_v57, %v877_v42  ;;  %v3615_v26 = vpop.f32.mrb[63].mxu0  ;;  %3974 = vmatmul.mubr.msk.f32.gmra.mrb[168].mxu0 %vm327_vm2, %v2564_v56  ;;  %v1417_v52 = vadd.f32 %v1313_v44, %v4940_v2  ;;  %3912 = vmatmul.mubr.msk.f32.gmra.mrb[168].mxu1 %vm327_vm2, %v2286_v8  ;;  %v3620_v16 = vpop.f32.mrb[63].mxu1 }
 0x173   : > { %3976 = vmatprep.mubr.msk.f32.mxu0 %vm4094_vm1, %v4093_v1  ;;  %3914 = vmatprep.mubr.msk.f32.mxu1 %vm4094_vm1, %v4093_v1 }
 0x175   : > { %v1592_v62 = vpop.f32.mrb[64].mxu0  ;;  %v1318_v30 = vpop.f32.mrb[64].mxu1 }
 0x176   : > { %v5158_v54 = vadd.f32 %v1592_v62, %v1417_v52  ;;  %v3685_v21 = vpop.f32.mrb[65].mxu0  ;;  %3977 = vmatmul.mubr.msk.f32.gmra.mrb[170].mxu0 %vm327_vm2, %v2565_v10  ;;  %v1418_v2 = vadd.f32 %v1318_v30, %v4951_v50  ;;  %3915 = vmatmul.mubr.msk.f32.gmra.mrb[170].mxu1 %vm327_vm2, %v2287_v61  ;;  %v3623_v12 = vpop.f32.mrb[65].mxu1  ;;  %v2294_v30 = vld [vmem:[#allocation2 + $0xc9] sm:$0xff] }
 0x177   : > { %3979 = vmatprep.mubr.msk.f32.mxu0 %vm4094_vm1, %v4093_v1  ;;  %3917 = vmatprep.mubr.msk.f32.mxu1 %vm4094_vm1, %v4093_v1 }
 0x179   : > { %v1597_v31 = vpop.f32.mrb[66].mxu0  ;;  %v1323_v7 = vpop.f32.mrb[66].mxu1 }
 0x17a   : > { %v5167_v63 = vadd.f32 %v1597_v31, %v1418_v2  ;;  %v3688_v11 = vpop.f32.mrb[67].mxu0  ;;  %3980 = vmatmul.mubr.msk.f32.gmra.mrb[172].mxu0 %vm327_vm2, %v2566_v4  ;;  %v1419_v50 = vadd.f32 %v1323_v7, %v4962_v13  ;;  %3918 = vmatmul.mubr.msk.f32.gmra.mrb[172].mxu1 %vm327_vm2, %v2288_v39  ;;  %v3626_v14 = vpop.f32.mrb[67].mxu1  ;;  %v2573_v39 = vld [vmem:[#allocation2 + $0xca] sm:$0xff] }
 0x17b   : > { %3982 = vmatprep.mubr.msk.f32.mxu0 %vm4094_vm1, %v4093_v1  ;;  %3920 = vmatprep.mubr.msk.f32.mxu1 %vm4094_vm1, %v4093_v1  ;;  %v2295_v31 = vld [vmem:[#allocation2 + $0xd1] sm:$0xff] }
 0x17d   : > { %v1602_v35 = vpop.f32.mrb[68].mxu0  ;;  %v1328_v43 = vpop.f32.mrb[68].mxu1 }
 0x17e   : > { %v5176_v3 = vadd.f32 %v1602_v35, %v1419_v50  ;;  %v3691_v34 = vpop.f32.mrb[69].mxu0  ;;  %3983 = vmatmul.mubr.msk.f32.gmra.mrb[174].mxu0 %vm327_vm2, %v2567_v49  ;;  %v1420_v13 = vadd.f32 %v1328_v43, %v4973_v46  ;;  %3921 = vmatmul.mubr.msk.f32.gmra.mrb[174].mxu1 %vm327_vm2, %v2289_v23  ;;  %v3629_v37 = vpop.f32.mrb[69].mxu1  ;;  %v2574_v23 = vld [vmem:[#allocation2 + $0xd2] sm:$0xff] }
 0x17f   : > { %3985 = vmatprep.mubr.msk.f32.mxu0 %vm4094_vm1, %v4093_v1  ;;  %3923 = vmatprep.mubr.msk.f32.mxu1 %vm4094_vm1, %v4093_v1 }
 0x181   : > { %v1607_v22 = vpop.f32.mrb[70].mxu0  ;;  %v1333_v38 = vpop.f32.mrb[70].mxu1 }
 0x182   : > { %v5185_v6 = vadd.f32 %v1607_v22, %v1420_v13  ;;  %v3694_v53 = vpop.f32.mrb[71].mxu0  ;;  %3986 = vmatmul.mubr.msk.f32.gmra.mrb[176].mxu0 %vm327_vm2, %v2568_v25  ;;  %v1421_v28 = vadd.f32 %v1333_v38, %v4984_v58  ;;  %3924 = vmatmul.mubr.msk.f32.gmra.mrb[176].mxu1 %vm327_vm2, %v4763_v29  ;;  %v3632_v46 = vpop.f32.mrb[71].mxu1 }
 0x183   : > { %3988 = vmatprep.mubr.msk.f32.mxu0 %vm4094_vm1, %v4093_v1  ;;  %3926 = vmatprep.mubr.msk.f32.mxu1 %vm4094_vm1, %v4093_v1 }
 0x185   : > { %v1612_v42 = vpop.f32.mrb[72].mxu0  ;;  %v1338_v24 = vpop.f32.mrb[72].mxu1 }
 0x186   : > { %v5195_v56 = vadd.f32 %v1612_v42, %v1421_v28  ;;  %v3697_v8 = vpop.f32.mrb[73].mxu0  ;;  %3989 = vmatmul.mubr.msk.f32.gmra.mrb[178].mxu0 %vm327_vm2, %v5006_v0  ;;  %v1422_v58 = vadd.f32 %v1338_v24, %v4995_v19  ;;  %3927 = vmatmul.mubr.msk.f32.gmra.mrb[178].mxu1 %vm327_vm2, %v4775_v33  ;;  %v3635_v29 = vpop.f32.mrb[73].mxu1  ;;  %v2293_v0 = vld [vmem:[#allocation2 + $0xc1] sm:$0xff] }
 0x187   : > { %3991 = vmatprep.mubr.msk.f32.mxu0 %vm4094_vm1, %v4093_v1  ;;  %3929 = vmatprep.mubr.msk.f32.mxu1 %vm4094_vm1, %v4093_v1 }
 0x189   : > { %v1617_v57 = vpop.f32.mrb[74].mxu0  ;;  %v1343_v44 = vpop.f32.mrb[74].mxu1 }
 0x18a   : > { %v5206_v26 = vadd.f32 %v1617_v57, %v1422_v58  ;;  %v3700_v52 = vpop.f32.mrb[75].mxu0  ;;  %3992 = vmatmul.mubr.msk.f32.gmra.mrb[180].mxu0 %vm327_vm2, %v5019_v9  ;;  %v1423_v19 = vadd.f32 %v1343_v44, %v5008_v18  ;;  %3930 = vmatmul.mubr.msk.f32.gmra.mrb[180].mxu1 %vm327_vm2, %v4787_v36  ;;  %v3638_v33 = vpop.f32.mrb[75].mxu1  ;;  %v2572_v9 = vld [vmem:[#allocation2 + $0xc2] sm:$0xff] }
 0x18b   : > { %3994 = vmatprep.mubr.msk.f32.mxu0 %vm4094_vm1, %v4093_v1  ;;  %3932 = vmatprep.mubr.msk.f32.mxu1 %vm4094_vm1, %v4093_v1 }
 0x18d   : > { %v1622_v16 = vpop.f32.mrb[76].mxu0  ;;  %v1348_v10 = vpop.f32.mrb[76].mxu1 }
 0x18e   : > { %v5217_v61 = vadd.f32 %v1622_v16, %v1423_v19  ;;  %v3703_v62 = vpop.f32.mrb[77].mxu0  ;;  %3995 = vmatmul.mubr.msk.f32.gmra.mrb[182].mxu0 %vm327_vm2, %v5031_v40  ;;  %v1424_v18 = vadd.f32 %v1348_v10, %v5021_v20  ;;  %3933 = vmatmul.mubr.msk.f32.gmra.mrb[182].mxu1 %vm327_vm2, %v2293_v0  ;;  %v3641_v36 = vpop.f32.mrb[77].mxu1 }
 0x18f   : > { %3997 = vmatprep.mubr.msk.f32.mxu0 %vm4094_vm1, %v4093_v1  ;;  %3935 = vmatprep.mubr.msk.f32.mxu1 %vm4094_vm1, %v4093_v1 }
 0x191   : > { %v1627_v21 = vpop.f32.mrb[78].mxu0  ;;  %v1353_v2 = vpop.f32.mrb[78].mxu1 }
 0x192   : > { %v5227_v12 = vadd.f32 %v1627_v21, %v1424_v18  ;;  %v3706_v4 = vpop.f32.mrb[79].mxu0  ;;  %3998 = vmatmul.mubr.msk.f32.gmra.mrb[184].mxu0 %vm327_vm2, %v2572_v9  ;;  %v1425_v20 = vadd.f32 %v1353_v2, %v5033_v51  ;;  %3936 = vmatmul.mubr.msk.f32.gmra.mrb[184].mxu1 %vm327_vm2, %v2294_v30  ;;  %v3644_v40 = vpop.f32.mrb[79].mxu1 }
 0x193   : > { %4000 = vmatprep.mubr.msk.f32.mxu0 %vm4094_vm1, %v4093_v1  ;;  %3938 = vmatprep.mubr.msk.f32.mxu1 %vm4094_vm1, %v4093_v1 }
 0x195   : > { %v1632_v7 = vpop.f32.mrb[80].mxu0  ;;  %v1358_v11 = vpop.f32.mrb[80].mxu1 }
 0x196   : > { %v5236_v50 = vadd.f32 %v1632_v7, %v1425_v20  ;;  %v3709_v14 = vpop.f32.mrb[81].mxu0  ;;  %4001 = vmatmul.mubr.msk.f32.gmra.mrb[186].mxu0 %vm327_vm2, %v2573_v39  ;;  %v1426_v51 = vadd.f32 %v1358_v11, %v5043_v60  ;;  %3939 = vmatmul.mubr.msk.f32.gmra.mrb[186].mxu1 %vm327_vm2, %v2295_v31  ;;  %v3647_v49 = vpop.f32.mrb[81].mxu1 }
 0x197   : > { %4003 = vmatprep.mubr.msk.f32.mxu0 %vm4094_vm1, %v4093_v1 }
 0x199   : > { %v1637_v35 = vpop.f32.mrb[82].mxu0  ;;  %v1363_v43 = vpop.f32.mrb[82].mxu1 }
 0x19a   : > { %v5243_v34 = vadd.f32 %v1637_v35, %v1426_v51  ;;  %v3712_v13 = vpop.f32.mrb[83].mxu0  ;;  %4004 = vmatmul.mubr.msk.f32.gmra.mrb[188].mxu0 %vm327_vm2, %v2574_v23  ;;  %v1427_v37 = vadd.f32 %v1363_v43, %v5052_v27  ;;  %v3650_v25 = vpop.f32.mrb[83].mxu1 }
 0x19d   : > { %v1642_v22 = vpop.f32.mrb[84].mxu0  ;;  %v1368_v38 = vpop.f32.mrb[84].mxu1 }
 0x19e   : > { %v5247_v60 = vadd.f32 %v1642_v22, %v1427_v37  ;;  %v3715_v53 = vpop.f32.mrb[85].mxu0  ;;  %v1428_v28 = vadd.f32 %v1368_v38, %v5062_v48  ;;  %v3653_v46 = vpop.f32.mrb[85].mxu1 }
 0x1a1   : > { %v1647_v1 = vpop.f32.mrb[86].mxu0  ;;  %v1373_v42 = vpop.f32.mrb[86].mxu1 }
 0x1a2   : > { %v5250_v24 = vadd.f32 %v1647_v1, %v1428_v28  ;;  %v3718_v8 = vpop.f32.mrb[87].mxu0  ;;  %v1429_v58 = vadd.f32 %v1373_v42, %v5072_v32  ;;  %v3656_v29 = vpop.f32.mrb[87].mxu1 }
 0x1a5   : > { %v1652_v57 = vpop.f32.mrb[88].mxu0  ;;  %v1378_v44 = vpop.f32.mrb[88].mxu1 }
 0x1a6   : > { %v5253_v27 = vadd.f32 %v1652_v57, %v1429_v58  ;;  %v3721_v52 = vpop.f32.mrb[89].mxu0  ;;  %v1430_v19 = vadd.f32 %v1378_v44, %v5082_v15  ;;  %v3659_v33 = vpop.f32.mrb[89].mxu1 }
 0x1a9   : > { %v1657_v0 = vpop.f32.mrb[90].mxu0  ;;  %v1383_v16 = vpop.f32.mrb[90].mxu1 }
 0x1aa   : > { %v5256_v48 = vadd.f32 %v1657_v0, %v1430_v19  ;;  %v3724_v10 = vpop.f32.mrb[91].mxu0  ;;  %v1431_v62 = vadd.f32 %v1383_v16, %v5092_v55  ;;  %v3662_v18 = vpop.f32.mrb[91].mxu1 }
 0x1ad   : > { %v1662_v36 = vpop.f32.mrb[92].mxu0  ;;  %v1388_v9 = vpop.f32.mrb[92].mxu1 }
 0x1ae   : > { %v5259_v32 = vadd.f32 %v1662_v36, %v1431_v62  ;;  %v3727_v30 = vpop.f32.mrb[93].mxu0  ;;  %v1432_v21 = vadd.f32 %v1388_v9, %v5102_v59  ;;  %v3665_v2 = vpop.f32.mrb[93].mxu1 }
 0x1b1   : > { %v1667_v4 = vpop.f32.mrb[94].mxu0  ;;  %v1393_v20 = vpop.f32.mrb[94].mxu1 }
 0x1b2   : > { %v5262_v15 = vadd.f32 %v1667_v4, %v1432_v21  ;;  %v3730_v40 = vpop.f32.mrb[95].mxu0  ;;  %v1433_v39 = vadd.f32 %v1393_v20, %v5112_v5  ;;  %v3668_v31 = vpop.f32.mrb[95].mxu1 }
 0x1b5   : > { %v1672_v7 = vpop.f32.mrb[96].mxu0  ;;  %v1398_v11 = vpop.f32.mrb[96].mxu1 }
 0x1b6   : > { %v5265_v55 = vadd.f32 %v1672_v7, %v1433_v39  ;;  %v3733_v14 = vpop.f32.mrb[97].mxu0  ;;  %v1434_v51 = vadd.f32 %v1398_v11, %v5122_v41  ;;  %v3671_v49 = vpop.f32.mrb[97].mxu1 }
 0x1b9   : > { %v1677_v23 = vpop.f32.mrb[98].mxu0  ;;  %v1403_v35 = vpop.f32.mrb[98].mxu1 }
 0x1ba   : > { %v5268_v59 = vadd.f32 %v1677_v23, %v1434_v51  ;;  %v3736_v43 = vpop.f32.mrb[99].mxu0  ;;  %v1435_v13 = vadd.f32 %v1403_v35, %v5131_v45  ;;  %v3674_v37 = vpop.f32.mrb[99].mxu1 }
 0x1bd   : > { %v1682_v25 = vpop.f32.mrb[100].mxu0  ;;  %v1408_v22 = vpop.f32.mrb[100].mxu1 }
 0x1be   : > { %v5271_v5 = vadd.f32 %v1682_v25, %v1435_v13  ;;  %v3739_v38 = vpop.f32.mrb[101].mxu0  ;;  %v1436_v53 = vadd.f32 %v1408_v22, %v5140_v17  ;;  %v3677_v28 = vpop.f32.mrb[101].mxu1 }
 0x1c1   : > { %v1687_v46 = vpop.f32.mrb[102].mxu0  ;;  %v1413_v1 = vpop.f32.mrb[102].mxu1 }
 0x1c2   : > { %v5274_v41 = vadd.f32 %v1687_v46, %v1436_v53  ;;  %v3742_v42 = vpop.f32.mrb[103].mxu0  ;;  %v1437_v8 = vadd.f32 %v1413_v1, %v5149_v47  ;;  %v3680_v58 = vpop.f32.mrb[103].mxu1 }
 0x1c5   : > { %v1692_v29 = vpop.f32.mrb[104].mxu0  ;;  %v1871_v45 = vpop.f32.mrb[104].mxu1 }
 0x1c6   : > { %v5277_v57 = vadd.f32 %v1692_v29, %v1437_v8  ;;  %v3745_v44 = vpop.f32.mrb[105].mxu0  ;;  %v1975_v52 = vadd.f32 %v1871_v45, %v5158_v54  ;;  %v3750_v19 = vpop.f32.mrb[105].mxu1 }
 0x1c9   : > { %v2150_v33 = vpop.f32.mrb[106].mxu0  ;;  %v1876_v0 = vpop.f32.mrb[106].mxu1 }
 0x1ca   : > { %v5280_v17 = vadd.f32 %v2150_v33, %v1975_v52  ;;  %v3815_v16 = vpop.f32.mrb[107].mxu0  ;;  %v1976_v10 = vadd.f32 %v1876_v0, %v5167_v63  ;;  %v3753_v62 = vpop.f32.mrb[107].mxu1 }
 0x1cd   : > { %v2155_v18 = vpop.f32.mrb[108].mxu0  ;;  %v1881_v36 = vpop.f32.mrb[108].mxu1 }
 0x1ce   : > { %v5283_v47 = vadd.f32 %v2155_v18, %v1976_v10  ;;  %v3818_v9 = vpop.f32.mrb[109].mxu0  ;;  %v1977_v30 = vadd.f32 %v1881_v36, %v5176_v3  ;;  %v3756_v21 = vpop.f32.mrb[109].mxu1 }
 0x1d1   : > { %v2160_v2 = vpop.f32.mrb[110].mxu0  ;;  %v1886_v4 = vpop.f32.mrb[110].mxu1 }
 0x1d2   : > { %v5286_v54 = vadd.f32 %v2160_v2, %v1977_v30  ;;  %v3821_v20 = vpop.f32.mrb[111].mxu0  ;;  %v1978_v40 = vadd.f32 %v1886_v4, %v5185_v6  ;;  %v3759_v39 = vpop.f32.mrb[111].mxu1 }
 0x1d5   : > { %v2165_v31 = vpop.f32.mrb[112].mxu0  ;;  %v1891_v7 = vpop.f32.mrb[112].mxu1 }
 0x1d6   : > { %v5289_v63 = vadd.f32 %v2165_v31, %v1978_v40  ;;  %v3824_v11 = vpop.f32.mrb[113].mxu0  ;;  %v1979_v14 = vadd.f32 %v1891_v7, %v5195_v56  ;;  %v3762_v51 = vpop.f32.mrb[113].mxu1 }
 0x1d9   : > { %v2170_v49 = vpop.f32.mrb[114].mxu0  ;;  %v1896_v23 = vpop.f32.mrb[114].mxu1 }
 0x1da   : > { %v5292_v3 = vadd.f32 %v2170_v49, %v1979_v14  ;;  %v3827_v35 = vpop.f32.mrb[115].mxu0  ;;  %v1980_v43 = vadd.f32 %v1896_v23, %v5206_v26  ;;  %v3765_v13 = vpop.f32.mrb[115].mxu1 }
 0x1dd   : > { %v2175_v37 = vpop.f32.mrb[116].mxu0  ;;  %v1901_v25 = vpop.f32.mrb[116].mxu1 }
 0x1de   : > { %v5295_v6 = vadd.f32 %v2175_v37, %v1980_v43  ;;  %v3830_v22 = vpop.f32.mrb[117].mxu0  ;;  %v1981_v38 = vadd.f32 %v1901_v25, %v5217_v61  ;;  %v3768_v53 = vpop.f32.mrb[117].mxu1 }
 0x1e1   : > { %v2180_v28 = vpop.f32.mrb[118].mxu0  ;;  %v1906_v46 = vpop.f32.mrb[118].mxu1 }
 0x1e2   : > { %v5298_v56 = vadd.f32 %v2180_v28, %v1981_v38  ;;  %v3833_v1 = vpop.f32.mrb[119].mxu0  ;;  %v1982_v42 = vadd.f32 %v1906_v46, %v5227_v12  ;;  %v3771_v8 = vpop.f32.mrb[119].mxu1 }
 0x1e5   : > { %v2185_v58 = vpop.f32.mrb[120].mxu0  ;;  %v1911_v29 = vpop.f32.mrb[120].mxu1 }
 0x1e6   : > { %v5301_v26 = vadd.f32 %v2185_v58, %v1982_v42  ;;  %v3836_v45 = vpop.f32.mrb[121].mxu0  ;;  %v1983_v44 = vadd.f32 %v1911_v29, %v5236_v50  ;;  %v3774_v52 = vpop.f32.mrb[121].mxu1 }
 0x1e9   : > { %v2190_v19 = vpop.f32.mrb[122].mxu0  ;;  %v1916_v33 = vpop.f32.mrb[122].mxu1 }
 0x1ea   : > { %v5304_v61 = vadd.f32 %v2190_v19, %v1983_v44  ;;  %v3839_v0 = vpop.f32.mrb[123].mxu0  ;;  %v1984_v16 = vadd.f32 %v1916_v33, %v5243_v34  ;;  %v3777_v10 = vpop.f32.mrb[123].mxu1 }
 0x1ed   : > { %v2195_v62 = vpop.f32.mrb[124].mxu0  ;;  %v1921_v18 = vpop.f32.mrb[124].mxu1 }
 0x1ee   : > { %v5307_v12 = vadd.f32 %v2195_v62, %v1984_v16  ;;  %v3842_v36 = vpop.f32.mrb[125].mxu0  ;;  %v1985_v9 = vadd.f32 %v1921_v18, %v5247_v60  ;;  %v3780_v30 = vpop.f32.mrb[125].mxu1 }
 0x1f1   : > { %v2200_v21 = vpop.f32.mrb[126].mxu0  ;;  %v1926_v2 = vpop.f32.mrb[126].mxu1 }
 0x1f2   : > { %v5310_v50 = vadd.f32 %v2200_v21, %v1985_v9  ;;  %v3845_v4 = vpop.f32.mrb[127].mxu0  ;;  %v1986_v20 = vadd.f32 %v1926_v2, %v5250_v24  ;;  %v3783_v40 = vpop.f32.mrb[127].mxu1 }
 0x1f5   : > { %v2205_v39 = vpop.f32.mrb[128].mxu0  ;;  %v1931_v31 = vpop.f32.mrb[128].mxu1 }
 0x1f6   : > { %v5313_v34 = vadd.f32 %v2205_v39, %v1986_v20  ;;  %v3848_v7 = vpop.f32.mrb[129].mxu0  ;;  %v1987_v11 = vadd.f32 %v1931_v31, %v5253_v27  ;;  %v3786_v14 = vpop.f32.mrb[129].mxu1 }
 0x1f9   : > { %v2210_v51 = vpop.f32.mrb[130].mxu0  ;;  %v1936_v49 = vpop.f32.mrb[130].mxu1 }
 0x1fa   : > { %v5316_v60 = vadd.f32 %v2210_v51, %v1987_v11  ;;  %v3851_v23 = vpop.f32.mrb[131].mxu0  ;;  %v1988_v35 = vadd.f32 %v1936_v49, %v5256_v48  ;;  %v3789_v43 = vpop.f32.mrb[131].mxu1 }
 0x1fb   : > { %v5349_v43 = vld [vmem:[%s5436_s3] ss:$0 sm:$0xff] }
 0x1fd   : > { %v2215_v13 = vpop.f32.mrb[132].mxu0  ;;  %v1941_v37 = vpop.f32.mrb[132].mxu1 }
 0x1fe   : > { %v5319_v24 = vadd.f32 %v2215_v13, %v1988_v35  ;;  %v3854_v25 = vpop.f32.mrb[133].mxu0  ;;  %v1989_v22 = vadd.f32 %v1941_v37, %v5259_v32  ;;  %v3792_v38 = vpop.f32.mrb[133].mxu1 }
 0x201   : > { %v2220_v53 = vpop.f32.mrb[134].mxu0  ;;  %v1946_v28 = vpop.f32.mrb[134].mxu1 }
 0x202   : > { %v5322_v27 = vadd.f32 %v2220_v53, %v1989_v22  ;;  %v3857_v46 = vpop.f32.mrb[135].mxu0  ;;  %v1990_v1 = vadd.f32 %v1946_v28, %v5262_v15  ;;  %v3795_v42 = vpop.f32.mrb[135].mxu1 }
 0x205   : > { %v2225_v8 = vpop.f32.mrb[136].mxu0  ;;  %v1951_v58 = vpop.f32.mrb[136].mxu1 }
 0x206   : > { %v5325_v48 = vadd.f32 %v2225_v8, %v1990_v1  ;;  %v3860_v29 = vpop.f32.mrb[137].mxu0  ;;  %v1991_v45 = vadd.f32 %v1951_v58, %v5265_v55  ;;  %v3798_v44 = vpop.f32.mrb[137].mxu1 }
 0x209   : > { %v2230_v52 = vpop.f32.mrb[138].mxu0  ;;  %v1956_v32 = vpop.f32.mrb[138].mxu1 }
 0x20a   : > { %v5328_v19 = vadd.f32 %v2230_v52, %v1991_v45  ;;  %v3863_v33 = vpop.f32.mrb[139].mxu0  ;;  %v1992_v0 = vadd.f32 %v1956_v32, %v5268_v59  ;;  %v3801_v16 = vpop.f32.mrb[139].mxu1 }
 0x20d   : > { %v2235_v15 = vpop.f32.mrb[140].mxu0  ;;  %v1961_v10 = vpop.f32.mrb[140].mxu1 }
 0x20e   : > { %v5331_v62 = vadd.f32 %v2235_v15, %v1992_v0  ;;  %v3866_v18 = vpop.f32.mrb[141].mxu0  ;;  %v1993_v36 = vadd.f32 %v1961_v10, %v5271_v5  ;;  %v3804_v9 = vpop.f32.mrb[141].mxu1 }
 0x211   : > { %v2240_v55 = vpop.f32.mrb[142].mxu0  ;;  %v1966_v30 = vpop.f32.mrb[142].mxu1 }
 0x212   : > { %v5335_v21 = vadd.f32 %v2240_v55, %v1993_v36  ;;  %v3869_v2 = vpop.f32.mrb[143].mxu0  ;;  %v1994_v4 = vadd.f32 %v1966_v30, %v5274_v41  ;;  %v3807_v20 = vpop.f32.mrb[143].mxu1 }
 0x215   : > { %v2245_v59 = vpop.f32.mrb[144].mxu0  ;;  %v1971_v40 = vpop.f32.mrb[144].mxu1 }
 0x216   : > { %v5339_v39 = vadd.f32 %v2245_v59, %v1994_v4  ;;  %v3872_v31 = vpop.f32.mrb[145].mxu0  ;;  %v1995_v7 = vadd.f32 %v1971_v40, %v5277_v57  ;;  %v3810_v5 = vpop.f32.mrb[145].mxu1 }
 0x219   : > { %v2250_v11 = vpop.f32.mrb[146].mxu0  ;;  %v2429_v51 = vpop.f32.mrb[146].mxu1 }
 0x21a   : > { %v5343_v14 = vadd.f32 %v2250_v11, %v1995_v7  ;;  %v3875_v49 = vpop.f32.mrb[147].mxu0  ;;  %v2533_v23 = vadd.f32 %v2429_v51, %v5280_v17  ;;  %v3880_v41 = vpop.f32.mrb[147].mxu1 }
 0x21d   : > { %v2708_v35 = vpop.f32.mrb[148].mxu0  ;;  %v2434_v13 = vpop.f32.mrb[148].mxu1 }
 0x21e   : > { %v2812_v57 = vadd.f32 %v2708_v35, %v2533_v23  ;;  %v3945_v37 = vpop.f32.mrb[149].mxu0  ;;  %v2534_v25 = vadd.f32 %v2434_v13, %v5283_v47  ;;  %v3883_v22 = vpop.f32.mrb[149].mxu1 }
 0x220   : > { %v2840_v38 = vadd.f32 %v5349_v43, %v2812_v57 }
 0x221   : > { %v2713_v17 = vpop.f32.mrb[150].mxu0  ;;  %v2439_v28 = vpop.f32.mrb[150].mxu1 }
 0x222   : > { %v2861_v53 = vmax.f32 %v2840_v38, 0.0  ;;  %v2813_v46 = vadd.f32 %v2713_v17, %v2534_v25  ;;  %v3948_v1 = vpop.f32.mrb[151].mxu0  ;;  %v2535_v42 = vadd.f32 %v2439_v28, %v5286_v54  ;;  %v3886_v8 = vpop.f32.mrb[151].mxu1 }
 0x224   : > { %2882 = vst [vmem:[%s5356_s22] sm:$0xff] %v2861_v53  ;;  %v2841_v47 = vadd.f32 %v5349_v43, %v2813_v46 }
 0x225   : > { %v2718_v58 = vpop.f32.mrb[152].mxu0  ;;  %v2444_v45 = vpop.f32.mrb[152].mxu1 }
 0x226   : > { %v2862_v29 = vmax.f32 %v2841_v47, 0.0  ;;  %v2814_v44 = vadd.f32 %v2718_v58, %v2535_v42  ;;  %v3951_v52 = vpop.f32.mrb[153].mxu0  ;;  %v2536_v32 = vadd.f32 %v2444_v45, %v5289_v63  ;;  %v3889_v33 = vpop.f32.mrb[153].mxu1 }
 0x228   : > { %2883 = vst [vmem:[%s5356_s22 + $0x8] sm:$0xff] %v2862_v29  ;;  %v2842_v0 = vadd.f32 %v5349_v43, %v2814_v44 }
 0x229   : > { %v2723_v16 = vpop.f32.mrb[154].mxu0  ;;  %v2449_v54 = vpop.f32.mrb[154].mxu1 }
 0x22a   : > { %v2863_v15 = vmax.f32 %v2842_v0, 0.0  ;;  %v2815_v10 = vadd.f32 %v2723_v16, %v2536_v32  ;;  %v3954_v18 = vpop.f32.mrb[155].mxu0  ;;  %v2537_v36 = vadd.f32 %v2449_v54, %v5292_v3  ;;  %v3892_v9 = vpop.f32.mrb[155].mxu1 }
 0x22c   : > { %2884 = vst [vmem:[%s5356_s22 + $0x10] sm:$0xff] %v2863_v15  ;;  %v2843_v55 = vadd.f32 %v5349_v43, %v2815_v10 }
 0x22d   : > { %v2728_v30 = vpop.f32.mrb[156].mxu0  ;;  %v2454_v63 = vpop.f32.mrb[156].mxu1 }
 0x22e   : > { %v2864_v2 = vmax.f32 %v2843_v55, 0.0  ;;  %v2816_v4 = vadd.f32 %v2728_v30, %v2537_v36  ;;  %v3957_v20 = vpop.f32.mrb[157].mxu0  ;;  %v2538_v59 = vadd.f32 %v2454_v63, %v5295_v6  ;;  %v3895_v40 = vpop.f32.mrb[157].mxu1 }
 0x230   : > { %2885 = vst [vmem:[%s5356_s22 + $0x18] sm:$0xff] %v2864_v2  ;;  %v2844_v31 = vadd.f32 %v5349_v43, %v2816_v4 }
 0x231   : > { %v2733_v7 = vpop.f32.mrb[158].mxu0  ;;  %v2459_v3 = vpop.f32.mrb[158].mxu1 }
 0x232   : > { %v2865_v5 = vmax.f32 %v2844_v31, 0.0  ;;  %v2817_v11 = vadd.f32 %v2733_v7, %v2538_v59  ;;  %v3960_v51 = vpop.f32.mrb[159].mxu0  ;;  %v2539_v49 = vadd.f32 %v2459_v3, %v5298_v56  ;;  %v3898_v23 = vpop.f32.mrb[159].mxu1 }
 0x234   : > { %2886 = vst [vmem:[%s5356_s22 + $0x20] sm:$0xff] %v2865_v5  ;;  %v2845_v41 = vadd.f32 %v5349_v43, %v2817_v11 }
 0x235   : > { %v2738_v35 = vpop.f32.mrb[160].mxu0  ;;  %v2464_v6 = vpop.f32.mrb[160].mxu1 }
 0x236   : > { %v2866_v13 = vmax.f32 %v2845_v41, 0.0  ;;  %v2818_v57 = vadd.f32 %v2738_v35, %v2539_v49  ;;  %v3963_v37 = vpop.f32.mrb[161].mxu0  ;;  %v2540_v25 = vadd.f32 %v2464_v6, %v5301_v26  ;;  %v3901_v22 = vpop.f32.mrb[161].mxu1 }
 0x238   : > { %2887 = vst [vmem:[%s5356_s22 + $0x28] sm:$0xff] %v2866_v13  ;;  %v2846_v38 = vadd.f32 %v5349_v43, %v2818_v57 }
 0x239   : > { %v2743_v17 = vpop.f32.mrb[162].mxu0  ;;  %v2469_v56 = vpop.f32.mrb[162].mxu1 }
 0x23a   : > { %v2867_v53 = vmax.f32 %v2846_v38, 0.0  ;;  %v2819_v28 = vadd.f32 %v2743_v17, %v2540_v25  ;;  %v3966_v46 = vpop.f32.mrb[163].mxu0  ;;  %v2541_v1 = vadd.f32 %v2469_v56, %v5304_v61  ;;  %v3904_v42 = vpop.f32.mrb[163].mxu1 }
 0x23c   : > { %2888 = vst [vmem:[%s5356_s22 + $0x30] sm:$0xff] %v2867_v53  ;;  %v2847_v8 = vadd.f32 %v5349_v43, %v2819_v28 }
 0x23d   : > { %v2748_v47 = vpop.f32.mrb[164].mxu0  ;;  %v2474_v26 = vpop.f32.mrb[164].mxu1 }
 0x23e   : > { %v2868_v58 = vmax.f32 %v2847_v8, 0.0  ;;  %v2820_v29 = vadd.f32 %v2748_v47, %v2541_v1  ;;  %v3969_v45 = vpop.f32.mrb[165].mxu0  ;;  %v2542_v44 = vadd.f32 %v2474_v26, %v5307_v12  ;;  %v3907_v52 = vpop.f32.mrb[165].mxu1 }
 0x240   : > { %2889 = vst [vmem:[%s5356_s22 + $0x38] sm:$0xff] %v2868_v58  ;;  %v2848_v32 = vadd.f32 %v5349_v43, %v2820_v29 }
 0x241   : > { %v2753_v33 = vpop.f32.mrb[166].mxu0  ;;  %v2479_v61 = vpop.f32.mrb[166].mxu1 }
 0x242   : > { %v2869_v0 = vmax.f32 %v2848_v32, 0.0  ;;  %v2821_v16 = vadd.f32 %v2753_v33, %v2542_v44  ;;  %v3972_v15 = vpop.f32.mrb[167].mxu0  ;;  %v2543_v54 = vadd.f32 %v2479_v61, %v5310_v50  ;;  %v3910_v10 = vpop.f32.mrb[167].mxu1 }
 0x244   : > { %2890 = vst [vmem:[%s5356_s22 + $0x40] sm:$0xff] %v2869_v0  ;;  %v2849_v18 = vadd.f32 %v5349_v43, %v2821_v16 }
 0x245   : > { %v2758_v36 = vpop.f32.mrb[168].mxu0  ;;  %v2484_v12 = vpop.f32.mrb[168].mxu1 }
 0x246   : > { %v2870_v9 = vmax.f32 %v2849_v18, 0.0  ;;  %v2822_v55 = vadd.f32 %v2758_v36, %v2543_v54  ;;  %v3975_v30 = vpop.f32.mrb[169].mxu0  ;;  %v2544_v2 = vadd.f32 %v2484_v12, %v5313_v34  ;;  %v3913_v63 = vpop.f32.mrb[169].mxu1 }
 0x248   : > { %2891 = vst [vmem:[%s5356_s22 + $0x48] sm:$0xff] %v2870_v9  ;;  %v2850_v4 = vadd.f32 %v5349_v43, %v2822_v55 }
 0x249   : > { %v2763_v20 = vpop.f32.mrb[170].mxu0  ;;  %v2489_v50 = vpop.f32.mrb[170].mxu1 }
 0x24a   : > { %v2871_v59 = vmax.f32 %v2850_v4, 0.0  ;;  %v2823_v40 = vadd.f32 %v2763_v20, %v2544_v2  ;;  %v3978_v31 = vpop.f32.mrb[171].mxu0  ;;  %v2545_v7 = vadd.f32 %v2489_v50, %v5316_v60  ;;  %v3916_v5 = vpop.f32.mrb[171].mxu1 }
 0x24c   : > { %2892 = vst [vmem:[%s5356_s22 + $0x50] sm:$0xff] %v2871_v59  ;;  %v2851_v3 = vadd.f32 %v5349_v43, %v2823_v40 }
 0x24d   : > { %v2768_v11 = vpop.f32.mrb[172].mxu0  ;;  %v2494_v34 = vpop.f32.mrb[172].mxu1 }
 0x24e   : > { %v2872_v51 = vmax.f32 %v2851_v3, 0.0  ;;  %v2824_v49 = vadd.f32 %v2768_v11, %v2545_v7  ;;  %v3981_v23 = vpop.f32.mrb[173].mxu0  ;;  %v2546_v41 = vadd.f32 %v2494_v34, %v5319_v24  ;;  %v3919_v35 = vpop.f32.mrb[173].mxu1 }
 0x250   : > { %2893 = vst [vmem:[%s5356_s22 + $0x58] sm:$0xff] %v2872_v51  ;;  %v2852_v13 = vadd.f32 %v5349_v43, %v2824_v49 }
 0x251   : > { %v2773_v6 = vpop.f32.mrb[174].mxu0  ;;  %v2499_v60 = vpop.f32.mrb[174].mxu1 }
 0x252   : > { %v2873_v57 = vmax.f32 %v2852_v13, 0.0  ;;  %v2825_v37 = vadd.f32 %v2773_v6, %v2546_v41  ;;  %v3984_v25 = vpop.f32.mrb[175].mxu0  ;;  %v2547_v22 = vadd.f32 %v2499_v60, %v5322_v27  ;;  %v3922_v38 = vpop.f32.mrb[175].mxu1 }
 0x254   : > { %2894 = vst [vmem:[%s5356_s22 + $0x60] sm:$0xff] %v2873_v57  ;;  %v2853_v17 = vadd.f32 %v5349_v43, %v2825_v37 }
 0x255   : > { %v2778_v53 = vpop.f32.mrb[176].mxu0  ;;  %v2504_v24 = vpop.f32.mrb[176].mxu1 }
 0x256   : > { %v2874_v56 = vmax.f32 %v2853_v17, 0.0  ;;  %v2826_v28 = vadd.f32 %v2778_v53, %v2547_v22  ;;  %v3987_v46 = vpop.f32.mrb[177].mxu0  ;;  %v2548_v1 = vadd.f32 %v2504_v24, %v5325_v48  ;;  %v3925_v42 = vpop.f32.mrb[177].mxu1 }
 0x258   : > { %2895 = vst [vmem:[%s5356_s22 + $0x68] sm:$0xff] %v2874_v56  ;;  %v2854_v8 = vadd.f32 %v5349_v43, %v2826_v28 }
 0x259   : > { %v2783_v47 = vpop.f32.mrb[178].mxu0  ;;  %v2509_v27 = vpop.f32.mrb[178].mxu1 }
 0x25a   : > { %v2875_v58 = vmax.f32 %v2854_v8, 0.0  ;;  %v2827_v26 = vadd.f32 %v2783_v47, %v2548_v1  ;;  %v3990_v29 = vpop.f32.mrb[179].mxu0  ;;  %v2549_v45 = vadd.f32 %v2509_v27, %v5328_v19  ;;  %v3928_v44 = vpop.f32.mrb[179].mxu1 }
 0x25c   : > { %2896 = vst [vmem:[%s5356_s22 + $0x70] sm:$0xff] %v2875_v58  ;;  %v2855_v52 = vadd.f32 %v5349_v43, %v2827_v26 }
 0x25d   : > { %v2788_v32 = vpop.f32.mrb[180].mxu0  ;;  %v2514_v48 = vpop.f32.mrb[180].mxu1 }
 0x25e   : > { %v2876_v33 = vmax.f32 %v2855_v52, 0.0  ;;  %v2828_v0 = vadd.f32 %v2788_v32, %v2549_v45  ;;  %v3993_v61 = vpop.f32.mrb[181].mxu0  ;;  %v2550_v16 = vadd.f32 %v2514_v48, %v5331_v62  ;;  %v3931_v15 = vpop.f32.mrb[181].mxu1 }
 0x260   : > { %2897 = vst [vmem:[%s5356_s22 + $0x78] sm:$0xff] %v2876_v33  ;;  %v2856_v54 = vadd.f32 %v5349_v43, %v2828_v0 }
 0x261   : > { %v2793_v10 = vpop.f32.mrb[182].mxu0  ;;  %v2519_v19 = vpop.f32.mrb[182].mxu1 }
 0x262   : > { %v2877_v18 = vmax.f32 %v2856_v54, 0.0  ;;  %v2829_v36 = vadd.f32 %v2793_v10, %v2550_v16  ;;  %v3996_v9 = vpop.f32.mrb[183].mxu0  ;;  %v2551_v12 = vadd.f32 %v2519_v19, %v5335_v21  ;;  %v3934_v55 = vpop.f32.mrb[183].mxu1 }
 0x264   : > { %2898 = vst [vmem:[%s5356_s22 + $0x80] sm:$0xff] %v2877_v18  ;;  %v2857_v30 = vadd.f32 %v5349_v43, %v2829_v36 }
 0x265   : > { %v2798_v2 = vpop.f32.mrb[184].mxu0  ;;  %v2524_v62 = vpop.f32.mrb[184].mxu1 }
 0x266   : > { %v2878_v63 = vmax.f32 %v2857_v30, 0.0  ;;  %v2830_v4 = vadd.f32 %v2798_v2, %v2551_v12  ;;  %v3999_v20 = vpop.f32.mrb[185].mxu0  ;;  %v2552_v59 = vadd.f32 %v2524_v62, %v5339_v39  ;;  %v3937_v50 = vpop.f32.mrb[185].mxu1 }
 0x268   : > { %2899 = vst [vmem:[%s5356_s22 + $0x88] sm:$0xff] %v2878_v63  ;;  %v2858_v40 = vadd.f32 %v5349_v43, %v2830_v4 }
 0x269   : > { %v2803_v31 = vpop.f32.mrb[186].mxu0  ;;  %v2529_v7 = vpop.f32.mrb[186].mxu1 }
 0x26a   : > { %v2879_v21 = vmax.f32 %v2858_v40, 0.0  ;;  %v2831_v5 = vadd.f32 %v2803_v31, %v2552_v59  ;;  %v4002_v3 = vpop.f32.mrb[187].mxu0  ;;  %v2553_v11 = vadd.f32 %v2529_v7, %v5343_v14  ;;  %v3940_v51 = vpop.f32.mrb[187].mxu1 }
 0x26c   : > { %2900 = vst [vmem:[%s5356_s22 + $0x90] sm:$0xff] %v2879_v21  ;;  %v2859_v34 = vadd.f32 %v5349_v43, %v2831_v5 }
 0x26d   : > { %v2808_v49 = vpop.f32.mrb[188].mxu0 }
 0x26e   : > { %v2880_v23 = vmax.f32 %v2859_v34, 0.0  ;;  %v2832_v39 = vadd.f32 %v2808_v49, %v2553_v11  ;;  %v4005_v41 = vpop.f32.mrb[189].mxu0 }
 0x270   : > { %2901 = vst [vmem:[%s5356_s22 + $0x98] sm:$0xff] %v2880_v23  ;;  %v2860_v35 = vadd.f32 %v5349_v43, %v2832_v39 }
 0x272   : > { %v2881_v13 = vmax.f32 %v2860_v35, 0.0 }
 0x274   : > { %2902 = vst [vmem:[%s5356_s22 + $0xa0] sm:$0xff] %v2881_v13 }
 0x275 PF: > { %s14_s19 = sadd.s32 1, %s4091_s19   ;;  %s5438_s15 = smov %s4083_s17 }
 0x276   : > { %p11_p9 = scmp.ge.s32.totalorder %s14_s19, 8   ;;  %s5439_s16 = smov %s4087_s18 }
 0x277   : > { %s5440_s17 = smov %s5443_s20  ;;  %s5441_s18 = smov %s5447_s21 }
 0x278   :  { %13 = sbr.rel (!%p11_p9) target bundleno = 3 (0x3), region = 69 }

</bundles_post_ra>
